<compile_context>
chip_gen: v6e
topology: v6e:2x2x1
jax: 0.10.0
libtpu: 0.0.40
codegen_flags: <defaults>
</compile_context>

<pallas_src>
import jax
import jax.numpy as jnp
from jax import lax
from jax.experimental import pallas as pl
from jax.experimental.pallas import tpu as pltpu

# Static geometry of the ConvNet (28x28x1 -> pool -> 14x14x16 -> pool -> 7x7x32).
KS = 5                         # conv kernel size (stride 1, padding 2)
C1, C2 = 16, 32                # conv1 / conv2 output channels
H1, W1 = 28, 28                # conv1 output spatial size
H2, W2 = 14, 14                # conv2 output spatial size (= pooled conv1)
HO1, HO2 = H1 // 2, H2 // 2    # pooled rows (= cols, square): 14, 7
WP1 = 32                       # row pitch of flat padded conv1 input (mult. of 8)
WP2 = 24                       # row pitch of flat padded conv2 input (mult. of 8)
FLAT1 = (H1 + KS - 1 + 1) * WP1   # 33 * 32 = 1056  (+1 guard row for tap slices)
FLAT2 = (H2 + KS - 1 + 1) * WP2   # 19 * 24 = 456
NFEAT = HO2 * HO2 * C2            # 7 * 7 * 32 = 1568


# ---------------------------------------------------------------------------
# Fused kernel: conv1 + BN + ReLU + pool -> conv2 + BN + ReLU + pool
# ---------------------------------------------------------------------------
def _convnet_fused_kernel(x1_ref, w1_ref, b1_ref, w2_ref, b2_ref, out_ref,
                          x2_ref, t1_ref, t2_ref):
    """Processes ONE image per grid step.

    x1_ref : (FLAT1, 1)   f32  zero-padded 28x28 image, row pitch WP1.
    w1_ref : (25, 1, C1)  f32  conv1 weight * BN1 scale, tap-major (kh*5+kw).
    b1_ref : (1, C1)      f32  folded conv1 + BN1 bias.
    w2_ref : (25, C1, C2) f32  conv2 weight * BN2 scale, tap-major.
    b2_ref : (1, C2)      f32  folded conv2 + BN2 bias.
    out_ref: (49, C2)     f32  pooled conv2 features, row = ho*7 + wo ((h,w,c) order).
    x2_ref : (FLAT2, C1)  f32  VMEM scratch: zero-padded conv2 input, row pitch WP2.
    t1_ref : (WP1, C1)    f32  VMEM scratch for the layer-1 w-pair pooling.
    t2_ref : (WP2, C2)    f32  VMEM scratch for the layer-2 w-pair pooling.
    """
    # Padding region of layer 2's input must be zero (scratch persists across
    # grid steps).
    x2_ref[...] = jnp.zeros_like(x2_ref)
    b1 = b1_ref[...]
    b2 = b2_ref[...]

    # ----- layer 1: Conv2d(1, 16, 5, pad=2) + BN + ReLU + MaxPool(2) --------
    def layer1_row_pair(ho, carry):
        base = 2 * ho * WP1
        acc = jnp.zeros((2 * WP1, C1), jnp.float32)
        for kh in range(KS):
            for kw in range(KS):
                xs = x1_ref[pl.ds(base + kh * WP1 + kw, 2 * WP1), :]   # (64, 1)
                # Cin == 1: each tap is an outer product (VPU broadcast-mul).
                acc = acc + xs * w1_ref[kh * KS + kw]
        act = jnp.maximum(acc + b1, 0.0)                               # bias + ReLU
        # 2x2 max-pool: h-pair max (aligned value slices) ...
        t1_ref[...] = jnp.maximum(act[:WP1, :], act[WP1:, :])
        # ... then w-pair max via stride-2 reads of the scratch.
        row = jnp.maximum(t1_ref[pl.ds(0, HO1, stride=2), :],
                          t1_ref[pl.ds(1, HO1, stride=2), :])          # (14, C1)
        # Scatter the pooled row into layer 2's zero-padded flat input.
        x2_ref[pl.ds((ho + 2) * WP2 + 2, HO1), :] = row
        return carry

    lax.fori_loop(0, HO1, layer1_row_pair, 0)

    # ----- layer 2: Conv2d(16, 32, 5, pad=2) + BN + ReLU + MaxPool(2) -------
    def layer2_row_pair(ho, carry):
        base = 2 * ho * WP2
        acc = jnp.zeros((2 * WP2, C2), jnp.float32)
        for kh in range(KS):
            for kw in range(KS):
                xs = x2_ref[pl.ds(base + kh * WP2 + kw, 2 * WP2), :]   # (48, C1)
                acc = acc + jnp.dot(xs, w2_ref[kh * KS + kw],
                                    preferred_element_type=jnp.float32,
                                    precision=jax.lax.Precision.HIGHEST)
        act = jnp.maximum(acc + b2, 0.0)
        t2_ref[...] = jnp.maximum(act[:WP2, :], act[WP2:, :])
        row = jnp.maximum(t2_ref[pl.ds(0, HO2, stride=2), :],
                          t2_ref[pl.ds(1, HO2, stride=2), :])          # (7, C2)
        out_ref[pl.ds(ho * HO2, HO2), :] = row
        return carry

    lax.fori_loop(0, HO2, layer2_row_pair, 0)


# ---------------------------------------------------------------------------
# Wrappers
# ---------------------------------------------------------------------------
def fused_features(x1_flat, w1, b1, w2, b2):
    """Runs the fused two-conv-block kernel; returns (N, 49, C2) pooled features."""
    n = x1_flat.shape[0]
    return pl.pallas_call(
        _convnet_fused_kernel,
        out_shape=jax.ShapeDtypeStruct((n, HO2 * HO2, C2), jnp.float32),
        grid=(n,),
        in_specs=[
            # Streaming per-image input (double-buffered by Pallas).
            pl.BlockSpec((None, FLAT1, 1), lambda i: (i, 0, 0)),
            # Weights / biases: constant block index -> stay VMEM-resident.
            pl.BlockSpec((KS * KS, 1, C1), lambda i: (0, 0, 0)),
            pl.BlockSpec((1, C1), lambda i: (0, 0)),
            pl.BlockSpec((KS * KS, C1, C2), lambda i: (0, 0, 0)),
            pl.BlockSpec((1, C2), lambda i: (0, 0)),
        ],
        out_specs=pl.BlockSpec((None, HO2 * HO2, C2), lambda i: (i, 0, 0)),
        scratch_shapes=[
            pltpu.VMEM((FLAT2, C1), jnp.float32),   # padded conv2 input
            pltpu.VMEM((WP1, C1), jnp.float32),     # layer-1 pooling scratch
            pltpu.VMEM((WP2, C2), jnp.float32),     # layer-2 pooling scratch
        ],
        compiler_params=pltpu.CompilerParams(
            # One image per grid step -> grid >= 2 at batch >= 2, so both v7x
            # TensorCores are used.  Per-step VMEM use is ~2 MiB; 48 MiB cap is
            # within v7x's 64 MiB and leaves ample headroom on v5e/v6e.
            dimension_semantics=("parallel",),
            vmem_limit_bytes=48 * 1024 * 1024),
    )(x1_flat, w1, b1, w2, b2)


def fold_params(p, eps=1e-5):
    """BN (inference-form) folding + layout prep.  Call ONCE, outside jit."""
    s1 = p['g1'] / jnp.sqrt(p['v1'] + eps)
    w1 = (p['w1'] * s1).reshape(KS * KS, 1, C1).astype(jnp.float32)
    b1 = ((p['b1'] - p['m1']) * s1 + p['be1']).reshape(1, C1).astype(jnp.float32)
    s2 = p['g2'] / jnp.sqrt(p['v2'] + eps)
    w2 = (p['w2'] * s2).reshape(KS * KS, C1, C2).astype(jnp.float32)
    b2 = ((p['b2'] - p['m2']) * s2 + p['be2']).reshape(1, C2).astype(jnp.float32)
    # fc weight: PyTorch flattens (c, h, w); our features come out (h, w, c).
    wfc = (p['wfc'].reshape(-1, C2, HO2, HO2).transpose(2, 3, 1, 0)
           .reshape(NFEAT, -1)).astype(jnp.float32)
    bfc = p['bfc'].astype(jnp.float32)
    return dict(w1=w1, b1=b1, w2=w2, b2=b2, wfc=wfc, bfc=bfc)


def convnet_forward(x_nchw, fp):
    """x_nchw: (N, 1, 28, 28) f32, fp: folded params -> (N, num_classes) f32."""
    n = x_nchw.shape[0]
    img = x_nchw[:, 0, :, :].astype(jnp.float32)               # Cin = 1
    # Zero-pad to the kernel's flat layout: 2 rows/cols of conv padding, row
    # pitch WP1, plus one guard row so every tap slice stays in bounds.
    xp = jnp.pad(img, ((0, 0),
                       (2, FLAT1 // WP1 - H1 - 2),
                       (2, WP1 - W1 - 2)))                      # (N, 33, 32)
    x1 = xp.reshape(n, FLAT1, 1)
    feats = fused_features(x1, fp['w1'], fp['b1'], fp['w2'], fp['b2'])
    flat = feats.reshape(n, NFEAT)                              # (h, w, c) order
    # The fc is tiny (1568 x 10): a plain XLA dot beats a third kernel launch.
    return jnp.dot(flat, fp['wfc'],
                   precision=jax.lax.Precision.HIGHEST) + fp['bfc']


def convnet_reference(x_nchw, p, eps=1e-5):
    """Pure-JAX f32 reference for correctness checking."""
    hi = jax.lax.Precision.HIGHEST

    def block(x, w, b, g, bt, m, v):
        y = lax.conv_general_dilated(
            x, w, window_strides=(1, 1), padding='SAME',
            dimension_numbers=('NHWC', 'HWIO', 'NHWC'), precision=hi) + b
        y = (y - m) / jnp.sqrt(v + eps) * g + bt
        y = jnp.maximum(y, 0.0)
        n, h, w_, c = y.shape
        return y.reshape(n, h // 2, 2, w_ // 2, 2, c).max(axis=(2, 4))

    x = jnp.transpose(x_nchw, (0, 2, 3, 1))
    h1 = block(x, p['w1'], p['b1'], p['g1'], p['be1'], p['m1'], p['v1'])
    h2 = block(h1, p['w2'], p['b2'], p['g2'], p['be2'], p['m2'], p['v2'])
    flat = jnp.transpose(h2, (0, 3, 1, 2)).reshape(h2.shape[0], -1)
    return jnp.dot(flat, p['wfc'].T, precision=hi) + p['bfc']


if __name__ == "__main__":
    num_classes = 10
    key = jax.random.PRNGKey(0)
    ks = jax.random.split(key, 16)
    f32 = jnp.float32
    params = {
        # conv1: Conv2d(1, 16, k=5, pad=2)  (HWIO layout)
        'w1': 0.1 * jax.random.normal(ks[0], (5, 5, 1, C1), f32),
        'b1': 0.1 * jax.random.normal(ks[1], (C1,), f32),
        'g1': 1.0 + 0.1 * jax.random.normal(ks[2], (C1,), f32),
        'be1': 0.1 * jax.random.normal(ks[3], (C1,), f32),
        'm1': 0.1 * jax.random.normal(ks[4], (C1,), f32),
        'v1': 0.5 + jnp.abs(jax.random.normal(ks[5], (C1,), f32)),
        # conv2: Conv2d(16, 32, k=5, pad=2)
        'w2': 0.05 * jax.random.normal(ks[6], (5, 5, C1, C2), f32),
        'b2': 0.1 * jax.random.normal(ks[7], (C2,), f32),
        'g2': 1.0 + 0.1 * jax.random.normal(ks[8], (C2,), f32),
        'be2': 0.1 * jax.random.normal(ks[9], (C2,), f32),
        'm2': 0.1 * jax.random.normal(ks[10], (C2,), f32),
        'v2': 0.5 + jnp.abs(jax.random.normal(ks[11], (C2,), f32)),
        # fc: Linear(7*7*32, 10), PyTorch weight shape (out, in)
        'wfc': 0.05 * jax.random.normal(ks[12], (num_classes, NFEAT), f32),
        'bfc': 0.1 * jax.random.normal(ks[13], (num_classes,), f32),
    }

    # Input shape implied by the module: NCHW, 1 channel, 28x28 (fc expects 7*7*32).
    x = jax.random.normal(ks[14], (2, 1, 28, 28), f32)

    # Hoisted (one-time) weight preprocessing, outside the jitted forward.
    fparams = fold_params(params)

    fwd = jax.jit(convnet_forward)
    out = jax.block_until_ready(fwd(x, fparams))

    ref = convnet_reference(x, params)
    assert out.shape == (2, num_classes), out.shape
    err = float(jnp.max(jnp.abs(out - ref)))
    assert jnp.allclose(out, ref, rtol=2e-2, atol=2e-2), f"max abs err = {err}"

    print("KERNEL_OK")
</pallas_src>

<mosaic_0001>
module attributes {stable_mosaic.version = 11 : i64} {
  func.func @_convnet_fused_kernel(%arg0: i32, %arg1: memref<1x1056x1xf32, #tpu.memory_space<vmem>>, %arg2: memref<25x1x16xf32, #tpu.memory_space<vmem>>, %arg3: memref<1x16xf32, #tpu.memory_space<vmem>>, %arg4: memref<25x16x32xf32, #tpu.memory_space<vmem>>, %arg5: memref<1x32xf32, #tpu.memory_space<vmem>>, %arg6: memref<1x49x32xf32, #tpu.memory_space<vmem>>, %arg7: memref<456x16xf32, #tpu.memory_space<vmem>>, %arg8: memref<32x16xf32, #tpu.memory_space<vmem>>, %arg9: memref<24x32xf32, #tpu.memory_space<vmem>>) attributes {dimension_semantics = [#tpu.dimension_semantics<parallel>], iteration_bounds = array<i64: 2>, scalar_prefetch = 0 : i64, scratch_operands = 3 : i64, tpu.core_type = #tpu.core_type<tc>, window_params = [{transform_indices = @transform_0, window_bounds = array<i64: 1, 1056, 1>}, {pipeline_mode = #tpu.pipeline_mode<synchronous>, transform_indices = @transform_1, window_bounds = array<i64: 25, 1, 16>}, {pipeline_mode = #tpu.pipeline_mode<synchronous>, transform_indices = @transform_2, window_bounds = array<i64: 1, 16>}, {pipeline_mode = #tpu.pipeline_mode<synchronous>, transform_indices = @transform_3, window_bounds = array<i64: 25, 16, 32>}, {pipeline_mode = #tpu.pipeline_mode<synchronous>, transform_indices = @transform_4, window_bounds = array<i64: 1, 32>}, {transform_indices = @transform_5, window_bounds = array<i64: 1, 49, 32>}]} {
    %cst = arith.constant 0.000000e+00 : f32
    %0 = vector.broadcast %cst : f32 to vector<456x16xf32>
    %c0 = arith.constant 0 : index
    %c0_0 = arith.constant 0 : index
    %1 = vector.load %arg7[%c0, %c0_0] : memref<456x16xf32, #tpu.memory_space<vmem>>, vector<456x16xf32>
    tpu.vector_store %arg7[%c0, %c0_0], %0 {strides = array<i32>} : memref<456x16xf32, #tpu.memory_space<vmem>>, vector<456x16xf32>,
    %c0_1 = arith.constant 0 : index
    %c0_2 = arith.constant 0 : index
    %2 = vector.load %arg3[%c0_1, %c0_2] : memref<1x16xf32, #tpu.memory_space<vmem>>, vector<1x16xf32>
    %c0_3 = arith.constant 0 : index
    %c0_4 = arith.constant 0 : index
    %3 = vector.load %arg5[%c0_3, %c0_4] : memref<1x32xf32, #tpu.memory_space<vmem>>, vector<1x32xf32>
    %c0_i32 = arith.constant 0 : i32
    %c14_i32 = arith.constant 14 : i32
    %4 = arith.addi %c0_i32, %c14_i32 : i32
    %c1_i32 = arith.constant 1 : i32
    scf.for %arg10 = %c0_i32 to %4 step %c1_i32  : i32 {
      %c2_i32 = arith.constant 2 : i32
      %6 = arith.muli %c2_i32, %arg10 : i32
      %c32_i32 = arith.constant 32 : i32
      %7 = arith.muli %6, %c32_i32 : i32
      %cst_9 = arith.constant 0.000000e+00 : f32
      %8 = vector.broadcast %cst_9 : f32 to vector<64x16xf32>
      %c0_i32_10 = arith.constant 0 : i32
      %9 = arith.addi %7, %c0_i32_10 : i32
      %c0_i32_11 = arith.constant 0 : i32
      %10 = arith.addi %9, %c0_i32_11 : i32
      %c0_12 = arith.constant 0 : index
      %11 = arith.index_cast %10 : i32 to index
      %c0_13 = arith.constant 0 : index
      %12 = vector.load %arg1[%c0_12, %11, %c0_13] : memref<1x1056x1xf32, #tpu.memory_space<vmem>>, vector<1x64x1xf32>
      %13 = vector.shape_cast %12 : vector<1x64x1xf32> to vector<64x1xf32>
      %c0_14 = arith.constant 0 : index
      %c0_15 = arith.constant 0 : index
      %c0_16 = arith.constant 0 : index
      %14 = vector.load %arg2[%c0_14, %c0_15, %c0_16] : memref<25x1x16xf32, #tpu.memory_space<vmem>>, vector<1x1x16xf32>
      %15 = vector.shape_cast %14 : vector<1x1x16xf32> to vector<1x16xf32>
      %16 = vector.broadcast %13 : vector<64x1xf32> to vector<64x16xf32>
      %17 = vector.broadcast %15 : vector<1x16xf32> to vector<64x16xf32>
      %18 = arith.mulf %16, %17 : vector<64x16xf32>
      %19 = arith.addf %8, %18 : vector<64x16xf32>
      %c0_i32_17 = arith.constant 0 : i32
      %20 = arith.addi %7, %c0_i32_17 : i32
      %c1_i32_18 = arith.constant 1 : i32
      %21 = arith.addi %20, %c1_i32_18 : i32
      %c0_19 = arith.constant 0 : index
      %22 = arith.index_cast %21 : i32 to index
      %c0_20 = arith.constant 0 : index
      %23 = vector.load %arg1[%c0_19, %22, %c0_20] : memref<1x1056x1xf32, #tpu.memory_space<vmem>>, vector<1x64x1xf32>
      %24 = vector.shape_cast %23 : vector<1x64x1xf32> to vector<64x1xf32>
      %c1 = arith.constant 1 : index
      %c0_21 = arith.constant 0 : index
      %c0_22 = arith.constant 0 : index
      %25 = vector.load %arg2[%c1, %c0_21, %c0_22] : memref<25x1x16xf32, #tpu.memory_space<vmem>>, vector<1x1x16xf32>
      %26 = vector.shape_cast %25 : vector<1x1x16xf32> to vector<1x16xf32>
      %27 = vector.broadcast %24 : vector<64x1xf32> to vector<64x16xf32>
      %28 = vector.broadcast %26 : vector<1x16xf32> to vector<64x16xf32>
      %29 = arith.mulf %27, %28 : vector<64x16xf32>
      %30 = arith.addf %19, %29 : vector<64x16xf32>
      %c0_i32_23 = arith.constant 0 : i32
      %31 = arith.addi %7, %c0_i32_23 : i32
      %c2_i32_24 = arith.constant 2 : i32
      %32 = arith.addi %31, %c2_i32_24 : i32
      %c0_25 = arith.constant 0 : index
      %33 = arith.index_cast %32 : i32 to index
      %c0_26 = arith.constant 0 : index
      %34 = vector.load %arg1[%c0_25, %33, %c0_26] : memref<1x1056x1xf32, #tpu.memory_space<vmem>>, vector<1x64x1xf32>
      %35 = vector.shape_cast %34 : vector<1x64x1xf32> to vector<64x1xf32>
      %c2 = arith.constant 2 : index
      %c0_27 = arith.constant 0 : index
      %c0_28 = arith.constant 0 : index
      %36 = vector.load %arg2[%c2, %c0_27, %c0_28] : memref<25x1x16xf32, #tpu.memory_space<vmem>>, vector<1x1x16xf32>
      %37 = vector.shape_cast %36 : vector<1x1x16xf32> to vector<1x16xf32>
      %38 = vector.broadcast %35 : vector<64x1xf32> to vector<64x16xf32>
      %39 = vector.broadcast %37 : vector<1x16xf32> to vector<64x16xf32>
      %40 = arith.mulf %38, %39 : vector<64x16xf32>
      %41 = arith.addf %30, %40 : vector<64x16xf32>
      %c0_i32_29 = arith.constant 0 : i32
      %42 = arith.addi %7, %c0_i32_29 : i32
      %c3_i32 = arith.constant 3 : i32
      %43 = arith.addi %42, %c3_i32 : i32
      %c0_30 = arith.constant 0 : index
      %44 = arith.index_cast %43 : i32 to index
      %c0_31 = arith.constant 0 : index
      %45 = vector.load %arg1[%c0_30, %44, %c0_31] : memref<1x1056x1xf32, #tpu.memory_space<vmem>>, vector<1x64x1xf32>
      %46 = vector.shape_cast %45 : vector<1x64x1xf32> to vector<64x1xf32>
      %c3 = arith.constant 3 : index
      %c0_32 = arith.constant 0 : index
      %c0_33 = arith.constant 0 : index
      %47 = vector.load %arg2[%c3, %c0_32, %c0_33] : memref<25x1x16xf32, #tpu.memory_space<vmem>>, vector<1x1x16xf32>
      %48 = vector.shape_cast %47 : vector<1x1x16xf32> to vector<1x16xf32>
      %49 = vector.broadcast %46 : vector<64x1xf32> to vector<64x16xf32>
      %50 = vector.broadcast %48 : vector<1x16xf32> to vector<64x16xf32>
      %51 = arith.mulf %49, %50 : vector<64x16xf32>
      %52 = arith.addf %41, %51 : vector<64x16xf32>
      %c0_i32_34 = arith.constant 0 : i32
      %53 = arith.addi %7, %c0_i32_34 : i32
      %c4_i32 = arith.constant 4 : i32
      %54 = arith.addi %53, %c4_i32 : i32
      %c0_35 = arith.constant 0 : index
      %55 = arith.index_cast %54 : i32 to index
      %c0_36 = arith.constant 0 : index
      %56 = vector.load %arg1[%c0_35, %55, %c0_36] : memref<1x1056x1xf32, #tpu.memory_space<vmem>>, vector<1x64x1xf32>
      %57 = vector.shape_cast %56 : vector<1x64x1xf32> to vector<64x1xf32>
      %c4 = arith.constant 4 : index
      %c0_37 = arith.constant 0 : index
      %c0_38 = arith.constant 0 : index
      %58 = vector.load %arg2[%c4, %c0_37, %c0_38] : memref<25x1x16xf32, #tpu.memory_space<vmem>>, vector<1x1x16xf32>
      %59 = vector.shape_cast %58 : vector<1x1x16xf32> to vector<1x16xf32>
      %60 = vector.broadcast %57 : vector<64x1xf32> to vector<64x16xf32>
      %61 = vector.broadcast %59 : vector<1x16xf32> to vector<64x16xf32>
      %62 = arith.mulf %60, %61 : vector<64x16xf32>
      %63 = arith.addf %52, %62 : vector<64x16xf32>
      %c32_i32_39 = arith.constant 32 : i32
      %64 = arith.addi %7, %c32_i32_39 : i32
      %c0_i32_40 = arith.constant 0 : i32
      %65 = arith.addi %64, %c0_i32_40 : i32
      %c0_41 = arith.constant 0 : index
      %66 = arith.index_cast %65 : i32 to index
      %c0_42 = arith.constant 0 : index
      %67 = vector.load %arg1[%c0_41, %66, %c0_42] : memref<1x1056x1xf32, #tpu.memory_space<vmem>>, vector<1x64x1xf32>
      %68 = vector.shape_cast %67 : vector<1x64x1xf32> to vector<64x1xf32>
      %c5 = arith.constant 5 : index
      %c0_43 = arith.constant 0 : index
      %c0_44 = arith.constant 0 : index
      %69 = vector.load %arg2[%c5, %c0_43, %c0_44] : memref<25x1x16xf32, #tpu.memory_space<vmem>>, vector<1x1x16xf32>
      %70 = vector.shape_cast %69 : vector<1x1x16xf32> to vector<1x16xf32>
      %71 = vector.broadcast %68 : vector<64x1xf32> to vector<64x16xf32>
      %72 = vector.broadcast %70 : vector<1x16xf32> to vector<64x16xf32>
      %73 = arith.mulf %71, %72 : vector<64x16xf32>
      %74 = arith.addf %63, %73 : vector<64x16xf32>
      %c32_i32_45 = arith.constant 32 : i32
      %75 = arith.addi %7, %c32_i32_45 : i32
      %c1_i32_46 = arith.constant 1 : i32
      %76 = arith.addi %75, %c1_i32_46 : i32
      %c0_47 = arith.constant 0 : index
      %77 = arith.index_cast %76 : i32 to index
      %c0_48 = arith.constant 0 : index
      %78 = vector.load %arg1[%c0_47, %77, %c0_48] : memref<1x1056x1xf32, #tpu.memory_space<vmem>>, vector<1x64x1xf32>
      %79 = vector.shape_cast %78 : vector<1x64x1xf32> to vector<64x1xf32>
      %c6 = arith.constant 6 : index
      %c0_49 = arith.constant 0 : index
      %c0_50 = arith.constant 0 : index
      %80 = vector.load %arg2[%c6, %c0_49, %c0_50] : memref<25x1x16xf32, #tpu.memory_space<vmem>>, vector<1x1x16xf32>
      %81 = vector.shape_cast %80 : vector<1x1x16xf32> to vector<1x16xf32>
      %82 = vector.broadcast %79 : vector<64x1xf32> to vector<64x16xf32>
      %83 = vector.broadcast %81 : vector<1x16xf32> to vector<64x16xf32>
      %84 = arith.mulf %82, %83 : vector<64x16xf32>
      %85 = arith.addf %74, %84 : vector<64x16xf32>
      %c32_i32_51 = arith.constant 32 : i32
      %86 = arith.addi %7, %c32_i32_51 : i32
      %c2_i32_52 = arith.constant 2 : i32
      %87 = arith.addi %86, %c2_i32_52 : i32
      %c0_53 = arith.constant 0 : index
      %88 = arith.index_cast %87 : i32 to index
      %c0_54 = arith.constant 0 : index
      %89 = vector.load %arg1[%c0_53, %88, %c0_54] : memref<1x1056x1xf32, #tpu.memory_space<vmem>>, vector<1x64x1xf32>
      %90 = vector.shape_cast %89 : vector<1x64x1xf32> to vector<64x1xf32>
      %c7 = arith.constant 7 : index
      %c0_55 = arith.constant 0 : index
      %c0_56 = arith.constant 0 : index
      %91 = vector.load %arg2[%c7, %c0_55, %c0_56] : memref<25x1x16xf32, #tpu.memory_space<vmem>>, vector<1x1x16xf32>
      %92 = vector.shape_cast %91 : vector<1x1x16xf32> to vector<1x16xf32>
      %93 = vector.broadcast %90 : vector<64x1xf32> to vector<64x16xf32>
      %94 = vector.broadcast %92 : vector<1x16xf32> to vector<64x16xf32>
      %95 = arith.mulf %93, %94 : vector<64x16xf32>
      %96 = arith.addf %85, %95 : vector<64x16xf32>
      %c32_i32_57 = arith.constant 32 : i32
      %97 = arith.addi %7, %c32_i32_57 : i32
      %c3_i32_58 = arith.constant 3 : i32
      %98 = arith.addi %97, %c3_i32_58 : i32
      %c0_59 = arith.constant 0 : index
      %99 = arith.index_cast %98 : i32 to index
      %c0_60 = arith.constant 0 : index
      %100 = vector.load %arg1[%c0_59, %99, %c0_60] : memref<1x1056x1xf32, #tpu.memory_space<vmem>>, vector<1x64x1xf32>
      %101 = vector.shape_cast %100 : vector<1x64x1xf32> to vector<64x1xf32>
      %c8 = arith.constant 8 : index
      %c0_61 = arith.constant 0 : index
      %c0_62 = arith.constant 0 : index
      %102 = vector.load %arg2[%c8, %c0_61, %c0_62] : memref<25x1x16xf32, #tpu.memory_space<vmem>>, vector<1x1x16xf32>
      %103 = vector.shape_cast %102 : vector<1x1x16xf32> to vector<1x16xf32>
      %104 = vector.broadcast %101 : vector<64x1xf32> to vector<64x16xf32>
      %105 = vector.broadcast %103 : vector<1x16xf32> to vector<64x16xf32>
      %106 = arith.mulf %104, %105 : vector<64x16xf32>
      %107 = arith.addf %96, %106 : vector<64x16xf32>
      %c32_i32_63 = arith.constant 32 : i32
      %108 = arith.addi %7, %c32_i32_63 : i32
      %c4_i32_64 = arith.constant 4 : i32
      %109 = arith.addi %108, %c4_i32_64 : i32
      %c0_65 = arith.constant 0 : index
      %110 = arith.index_cast %109 : i32 to index
      %c0_66 = arith.constant 0 : index
      %111 = vector.load %arg1[%c0_65, %110, %c0_66] : memref<1x1056x1xf32, #tpu.memory_space<vmem>>, vector<1x64x1xf32>
      %112 = vector.shape_cast %111 : vector<1x64x1xf32> to vector<64x1xf32>
      %c9 = arith.constant 9 : index
      %c0_67 = arith.constant 0 : index
      %c0_68 = arith.constant 0 : index
      %113 = vector.load %arg2[%c9, %c0_67, %c0_68] : memref<25x1x16xf32, #tpu.memory_space<vmem>>, vector<1x1x16xf32>
      %114 = vector.shape_cast %113 : vector<1x1x16xf32> to vector<1x16xf32>
      %115 = vector.broadcast %112 : vector<64x1xf32> to vector<64x16xf32>
      %116 = vector.broadcast %114 : vector<1x16xf32> to vector<64x16xf32>
      %117 = arith.mulf %115, %116 : vector<64x16xf32>
      %118 = arith.addf %107, %117 : vector<64x16xf32>
      %c64_i32 = arith.constant 64 : i32
      %119 = arith.addi %7, %c64_i32 : i32
      %c0_i32_69 = arith.constant 0 : i32
      %120 = arith.addi %119, %c0_i32_69 : i32
      %c0_70 = arith.constant 0 : index
      %121 = arith.index_cast %120 : i32 to index
      %c0_71 = arith.constant 0 : index
      %122 = vector.load %arg1[%c0_70, %121, %c0_71] : memref<1x1056x1xf32, #tpu.memory_space<vmem>>, vector<1x64x1xf32>
      %123 = vector.shape_cast %122 : vector<1x64x1xf32> to vector<64x1xf32>
      %c10 = arith.constant 10 : index
      %c0_72 = arith.constant 0 : index
      %c0_73 = arith.constant 0 : index
      %124 = vector.load %arg2[%c10, %c0_72, %c0_73] : memref<25x1x16xf32, #tpu.memory_space<vmem>>, vector<1x1x16xf32>
      %125 = vector.shape_cast %124 : vector<1x1x16xf32> to vector<1x16xf32>
      %126 = vector.broadcast %123 : vector<64x1xf32> to vector<64x16xf32>
      %127 = vector.broadcast %125 : vector<1x16xf32> to vector<64x16xf32>
      %128 = arith.mulf %126, %127 : vector<64x16xf32>
      %129 = arith.addf %118, %128 : vector<64x16xf32>
      %c64_i32_74 = arith.constant 64 : i32
      %130 = arith.addi %7, %c64_i32_74 : i32
      %c1_i32_75 = arith.constant 1 : i32
      %131 = arith.addi %130, %c1_i32_75 : i32
      %c0_76 = arith.constant 0 : index
      %132 = arith.index_cast %131 : i32 to index
      %c0_77 = arith.constant 0 : index
      %133 = vector.load %arg1[%c0_76, %132, %c0_77] : memref<1x1056x1xf32, #tpu.memory_space<vmem>>, vector<1x64x1xf32>
      %134 = vector.shape_cast %133 : vector<1x64x1xf32> to vector<64x1xf32>
      %c11 = arith.constant 11 : index
      %c0_78 = arith.constant 0 : index
      %c0_79 = arith.constant 0 : index
      %135 = vector.load %arg2[%c11, %c0_78, %c0_79] : memref<25x1x16xf32, #tpu.memory_space<vmem>>, vector<1x1x16xf32>
      %136 = vector.shape_cast %135 : vector<1x1x16xf32> to vector<1x16xf32>
      %137 = vector.broadcast %134 : vector<64x1xf32> to vector<64x16xf32>
      %138 = vector.broadcast %136 : vector<1x16xf32> to vector<64x16xf32>
      %139 = arith.mulf %137, %138 : vector<64x16xf32>
      %140 = arith.addf %129, %139 : vector<64x16xf32>
      %c64_i32_80 = arith.constant 64 : i32
      %141 = arith.addi %7, %c64_i32_80 : i32
      %c2_i32_81 = arith.constant 2 : i32
      %142 = arith.addi %141, %c2_i32_81 : i32
      %c0_82 = arith.constant 0 : index
      %143 = arith.index_cast %142 : i32 to index
      %c0_83 = arith.constant 0 : index
      %144 = vector.load %arg1[%c0_82, %143, %c0_83] : memref<1x1056x1xf32, #tpu.memory_space<vmem>>, vector<1x64x1xf32>
      %145 = vector.shape_cast %144 : vector<1x64x1xf32> to vector<64x1xf32>
      %c12 = arith.constant 12 : index
      %c0_84 = arith.constant 0 : index
      %c0_85 = arith.constant 0 : index
      %146 = vector.load %arg2[%c12, %c0_84, %c0_85] : memref<25x1x16xf32, #tpu.memory_space<vmem>>, vector<1x1x16xf32>
      %147 = vector.shape_cast %146 : vector<1x1x16xf32> to vector<1x16xf32>
      %148 = vector.broadcast %145 : vector<64x1xf32> to vector<64x16xf32>
      %149 = vector.broadcast %147 : vector<1x16xf32> to vector<64x16xf32>
      %150 = arith.mulf %148, %149 : vector<64x16xf32>
      %151 = arith.addf %140, %150 : vector<64x16xf32>
      %c64_i32_86 = arith.constant 64 : i32
      %152 = arith.addi %7, %c64_i32_86 : i32
      %c3_i32_87 = arith.constant 3 : i32
      %153 = arith.addi %152, %c3_i32_87 : i32
      %c0_88 = arith.constant 0 : index
      %154 = arith.index_cast %153 : i32 to index
      %c0_89 = arith.constant 0 : index
      %155 = vector.load %arg1[%c0_88, %154, %c0_89] : memref<1x1056x1xf32, #tpu.memory_space<vmem>>, vector<1x64x1xf32>
      %156 = vector.shape_cast %155 : vector<1x64x1xf32> to vector<64x1xf32>
      %c13 = arith.constant 13 : index
      %c0_90 = arith.constant 0 : index
      %c0_91 = arith.constant 0 : index
      %157 = vector.load %arg2[%c13, %c0_90, %c0_91] : memref<25x1x16xf32, #tpu.memory_space<vmem>>, vector<1x1x16xf32>
      %158 = vector.shape_cast %157 : vector<1x1x16xf32> to vector<1x16xf32>
      %159 = vector.broadcast %156 : vector<64x1xf32> to vector<64x16xf32>
      %160 = vector.broadcast %158 : vector<1x16xf32> to vector<64x16xf32>
      %161 = arith.mulf %159, %160 : vector<64x16xf32>
      %162 = arith.addf %151, %161 : vector<64x16xf32>
      %c64_i32_92 = arith.constant 64 : i32
      %163 = arith.addi %7, %c64_i32_92 : i32
      %c4_i32_93 = arith.constant 4 : i32
      %164 = arith.addi %163, %c4_i32_93 : i32
      %c0_94 = arith.constant 0 : index
      %165 = arith.index_cast %164 : i32 to index
      %c0_95 = arith.constant 0 : index
      %166 = vector.load %arg1[%c0_94, %165, %c0_95] : memref<1x1056x1xf32, #tpu.memory_space<vmem>>, vector<1x64x1xf32>
      %167 = vector.shape_cast %166 : vector<1x64x1xf32> to vector<64x1xf32>
      %c14 = arith.constant 14 : index
      %c0_96 = arith.constant 0 : index
      %c0_97 = arith.constant 0 : index
      %168 = vector.load %arg2[%c14, %c0_96, %c0_97] : memref<25x1x16xf32, #tpu.memory_space<vmem>>, vector<1x1x16xf32>
      %169 = vector.shape_cast %168 : vector<1x1x16xf32> to vector<1x16xf32>
      %170 = vector.broadcast %167 : vector<64x1xf32> to vector<64x16xf32>
      %171 = vector.broadcast %169 : vector<1x16xf32> to vector<64x16xf32>
      %172 = arith.mulf %170, %171 : vector<64x16xf32>
      %173 = arith.addf %162, %172 : vector<64x16xf32>
      %c96_i32 = arith.constant 96 : i32
      %174 = arith.addi %7, %c96_i32 : i32
      %c0_i32_98 = arith.constant 0 : i32
      %175 = arith.addi %174, %c0_i32_98 : i32
      %c0_99 = arith.constant 0 : index
      %176 = arith.index_cast %175 : i32 to index
      %c0_100 = arith.constant 0 : index
      %177 = vector.load %arg1[%c0_99, %176, %c0_100] : memref<1x1056x1xf32, #tpu.memory_space<vmem>>, vector<1x64x1xf32>
      %178 = vector.shape_cast %177 : vector<1x64x1xf32> to vector<64x1xf32>
      %c15 = arith.constant 15 : index
      %c0_101 = arith.constant 0 : index
      %c0_102 = arith.constant 0 : index
      %179 = vector.load %arg2[%c15, %c0_101, %c0_102] : memref<25x1x16xf32, #tpu.memory_space<vmem>>, vector<1x1x16xf32>
      %180 = vector.shape_cast %179 : vector<1x1x16xf32> to vector<1x16xf32>
      %181 = vector.broadcast %178 : vector<64x1xf32> to vector<64x16xf32>
      %182 = vector.broadcast %180 : vector<1x16xf32> to vector<64x16xf32>
      %183 = arith.mulf %181, %182 : vector<64x16xf32>
      %184 = arith.addf %173, %183 : vector<64x16xf32>
      %c96_i32_103 = arith.constant 96 : i32
      %185 = arith.addi %7, %c96_i32_103 : i32
      %c1_i32_104 = arith.constant 1 : i32
      %186 = arith.addi %185, %c1_i32_104 : i32
      %c0_105 = arith.constant 0 : index
      %187 = arith.index_cast %186 : i32 to index
      %c0_106 = arith.constant 0 : index
      %188 = vector.load %arg1[%c0_105, %187, %c0_106] : memref<1x1056x1xf32, #tpu.memory_space<vmem>>, vector<1x64x1xf32>
      %189 = vector.shape_cast %188 : vector<1x64x1xf32> to vector<64x1xf32>
      %c16 = arith.constant 16 : index
      %c0_107 = arith.constant 0 : index
      %c0_108 = arith.constant 0 : index
      %190 = vector.load %arg2[%c16, %c0_107, %c0_108] : memref<25x1x16xf32, #tpu.memory_space<vmem>>, vector<1x1x16xf32>
      %191 = vector.shape_cast %190 : vector<1x1x16xf32> to vector<1x16xf32>
      %192 = vector.broadcast %189 : vector<64x1xf32> to vector<64x16xf32>
      %193 = vector.broadcast %191 : vector<1x16xf32> to vector<64x16xf32>
      %194 = arith.mulf %192, %193 : vector<64x16xf32>
      %195 = arith.addf %184, %194 : vector<64x16xf32>
      %c96_i32_109 = arith.constant 96 : i32
      %196 = arith.addi %7, %c96_i32_109 : i32
      %c2_i32_110 = arith.constant 2 : i32
      %197 = arith.addi %196, %c2_i32_110 : i32
      %c0_111 = arith.constant 0 : index
      %198 = arith.index_cast %197 : i32 to index
      %c0_112 = arith.constant 0 : index
      %199 = vector.load %arg1[%c0_111, %198, %c0_112] : memref<1x1056x1xf32, #tpu.memory_space<vmem>>, vector<1x64x1xf32>
      %200 = vector.shape_cast %199 : vector<1x64x1xf32> to vector<64x1xf32>
      %c17 = arith.constant 17 : index
      %c0_113 = arith.constant 0 : index
      %c0_114 = arith.constant 0 : index
      %201 = vector.load %arg2[%c17, %c0_113, %c0_114] : memref<25x1x16xf32, #tpu.memory_space<vmem>>, vector<1x1x16xf32>
      %202 = vector.shape_cast %201 : vector<1x1x16xf32> to vector<1x16xf32>
      %203 = vector.broadcast %200 : vector<64x1xf32> to vector<64x16xf32>
      %204 = vector.broadcast %202 : vector<1x16xf32> to vector<64x16xf32>
      %205 = arith.mulf %203, %204 : vector<64x16xf32>
      %206 = arith.addf %195, %205 : vector<64x16xf32>
      %c96_i32_115 = arith.constant 96 : i32
      %207 = arith.addi %7, %c96_i32_115 : i32
      %c3_i32_116 = arith.constant 3 : i32
      %208 = arith.addi %207, %c3_i32_116 : i32
      %c0_117 = arith.constant 0 : index
      %209 = arith.index_cast %208 : i32 to index
      %c0_118 = arith.constant 0 : index
      %210 = vector.load %arg1[%c0_117, %209, %c0_118] : memref<1x1056x1xf32, #tpu.memory_space<vmem>>, vector<1x64x1xf32>
      %211 = vector.shape_cast %210 : vector<1x64x1xf32> to vector<64x1xf32>
      %c18 = arith.constant 18 : index
      %c0_119 = arith.constant 0 : index
      %c0_120 = arith.constant 0 : index
      %212 = vector.load %arg2[%c18, %c0_119, %c0_120] : memref<25x1x16xf32, #tpu.memory_space<vmem>>, vector<1x1x16xf32>
      %213 = vector.shape_cast %212 : vector<1x1x16xf32> to vector<1x16xf32>
      %214 = vector.broadcast %211 : vector<64x1xf32> to vector<64x16xf32>
      %215 = vector.broadcast %213 : vector<1x16xf32> to vector<64x16xf32>
      %216 = arith.mulf %214, %215 : vector<64x16xf32>
      %217 = arith.addf %206, %216 : vector<64x16xf32>
      %c96_i32_121 = arith.constant 96 : i32
      %218 = arith.addi %7, %c96_i32_121 : i32
      %c4_i32_122 = arith.constant 4 : i32
      %219 = arith.addi %218, %c4_i32_122 : i32
      %c0_123 = arith.constant 0 : index
      %220 = arith.index_cast %219 : i32 to index
      %c0_124 = arith.constant 0 : index
      %221 = vector.load %arg1[%c0_123, %220, %c0_124] : memref<1x1056x1xf32, #tpu.memory_space<vmem>>, vector<1x64x1xf32>
      %222 = vector.shape_cast %221 : vector<1x64x1xf32> to vector<64x1xf32>
      %c19 = arith.constant 19 : index
      %c0_125 = arith.constant 0 : index
      %c0_126 = arith.constant 0 : index
      %223 = vector.load %arg2[%c19, %c0_125, %c0_126] : memref<25x1x16xf32, #tpu.memory_space<vmem>>, vector<1x1x16xf32>
      %224 = vector.shape_cast %223 : vector<1x1x16xf32> to vector<1x16xf32>
      %225 = vector.broadcast %222 : vector<64x1xf32> to vector<64x16xf32>
      %226 = vector.broadcast %224 : vector<1x16xf32> to vector<64x16xf32>
      %227 = arith.mulf %225, %226 : vector<64x16xf32>
      %228 = arith.addf %217, %227 : vector<64x16xf32>
      %c128_i32 = arith.constant 128 : i32
      %229 = arith.addi %7, %c128_i32 : i32
      %c0_i32_127 = arith.constant 0 : i32
      %230 = arith.addi %229, %c0_i32_127 : i32
      %c0_128 = arith.constant 0 : index
      %231 = arith.index_cast %230 : i32 to index
      %c0_129 = arith.constant 0 : index
      %232 = vector.load %arg1[%c0_128, %231, %c0_129] : memref<1x1056x1xf32, #tpu.memory_space<vmem>>, vector<1x64x1xf32>
      %233 = vector.shape_cast %232 : vector<1x64x1xf32> to vector<64x1xf32>
      %c20 = arith.constant 20 : index
      %c0_130 = arith.constant 0 : index
      %c0_131 = arith.constant 0 : index
      %234 = vector.load %arg2[%c20, %c0_130, %c0_131] : memref<25x1x16xf32, #tpu.memory_space<vmem>>, vector<1x1x16xf32>
      %235 = vector.shape_cast %234 : vector<1x1x16xf32> to vector<1x16xf32>
      %236 = vector.broadcast %233 : vector<64x1xf32> to vector<64x16xf32>
      %237 = vector.broadcast %235 : vector<1x16xf32> to vector<64x16xf32>
      %238 = arith.mulf %236, %237 : vector<64x16xf32>
      %239 = arith.addf %228, %238 : vector<64x16xf32>
      %c128_i32_132 = arith.constant 128 : i32
      %240 = arith.addi %7, %c128_i32_132 : i32
      %c1_i32_133 = arith.constant 1 : i32
      %241 = arith.addi %240, %c1_i32_133 : i32
      %c0_134 = arith.constant 0 : index
      %242 = arith.index_cast %241 : i32 to index
      %c0_135 = arith.constant 0 : index
      %243 = vector.load %arg1[%c0_134, %242, %c0_135] : memref<1x1056x1xf32, #tpu.memory_space<vmem>>, vector<1x64x1xf32>
      %244 = vector.shape_cast %243 : vector<1x64x1xf32> to vector<64x1xf32>
      %c21 = arith.constant 21 : index
      %c0_136 = arith.constant 0 : index
      %c0_137 = arith.constant 0 : index
      %245 = vector.load %arg2[%c21, %c0_136, %c0_137] : memref<25x1x16xf32, #tpu.memory_space<vmem>>, vector<1x1x16xf32>
      %246 = vector.shape_cast %245 : vector<1x1x16xf32> to vector<1x16xf32>
      %247 = vector.broadcast %244 : vector<64x1xf32> to vector<64x16xf32>
      %248 = vector.broadcast %246 : vector<1x16xf32> to vector<64x16xf32>
      %249 = arith.mulf %247, %248 : vector<64x16xf32>
      %250 = arith.addf %239, %249 : vector<64x16xf32>
      %c128_i32_138 = arith.constant 128 : i32
      %251 = arith.addi %7, %c128_i32_138 : i32
      %c2_i32_139 = arith.constant 2 : i32
      %252 = arith.addi %251, %c2_i32_139 : i32
      %c0_140 = arith.constant 0 : index
      %253 = arith.index_cast %252 : i32 to index
      %c0_141 = arith.constant 0 : index
      %254 = vector.load %arg1[%c0_140, %253, %c0_141] : memref<1x1056x1xf32, #tpu.memory_space<vmem>>, vector<1x64x1xf32>
      %255 = vector.shape_cast %254 : vector<1x64x1xf32> to vector<64x1xf32>
      %c22 = arith.constant 22 : index
      %c0_142 = arith.constant 0 : index
      %c0_143 = arith.constant 0 : index
      %256 = vector.load %arg2[%c22, %c0_142, %c0_143] : memref<25x1x16xf32, #tpu.memory_space<vmem>>, vector<1x1x16xf32>
      %257 = vector.shape_cast %256 : vector<1x1x16xf32> to vector<1x16xf32>
      %258 = vector.broadcast %255 : vector<64x1xf32> to vector<64x16xf32>
      %259 = vector.broadcast %257 : vector<1x16xf32> to vector<64x16xf32>
      %260 = arith.mulf %258, %259 : vector<64x16xf32>
      %261 = arith.addf %250, %260 : vector<64x16xf32>
      %c128_i32_144 = arith.constant 128 : i32
      %262 = arith.addi %7, %c128_i32_144 : i32
      %c3_i32_145 = arith.constant 3 : i32
      %263 = arith.addi %262, %c3_i32_145 : i32
      %c0_146 = arith.constant 0 : index
      %264 = arith.index_cast %263 : i32 to index
      %c0_147 = arith.constant 0 : index
      %265 = vector.load %arg1[%c0_146, %264, %c0_147] : memref<1x1056x1xf32, #tpu.memory_space<vmem>>, vector<1x64x1xf32>
      %266 = vector.shape_cast %265 : vector<1x64x1xf32> to vector<64x1xf32>
      %c23 = arith.constant 23 : index
      %c0_148 = arith.constant 0 : index
      %c0_149 = arith.constant 0 : index
      %267 = vector.load %arg2[%c23, %c0_148, %c0_149] : memref<25x1x16xf32, #tpu.memory_space<vmem>>, vector<1x1x16xf32>
      %268 = vector.shape_cast %267 : vector<1x1x16xf32> to vector<1x16xf32>
      %269 = vector.broadcast %266 : vector<64x1xf32> to vector<64x16xf32>
      %270 = vector.broadcast %268 : vector<1x16xf32> to vector<64x16xf32>
      %271 = arith.mulf %269, %270 : vector<64x16xf32>
      %272 = arith.addf %261, %271 : vector<64x16xf32>
      %c128_i32_150 = arith.constant 128 : i32
      %273 = arith.addi %7, %c128_i32_150 : i32
      %c4_i32_151 = arith.constant 4 : i32
      %274 = arith.addi %273, %c4_i32_151 : i32
      %c0_152 = arith.constant 0 : index
      %275 = arith.index_cast %274 : i32 to index
      %c0_153 = arith.constant 0 : index
      %276 = vector.load %arg1[%c0_152, %275, %c0_153] : memref<1x1056x1xf32, #tpu.memory_space<vmem>>, vector<1x64x1xf32>
      %277 = vector.shape_cast %276 : vector<1x64x1xf32> to vector<64x1xf32>
      %c24 = arith.constant 24 : index
      %c0_154 = arith.constant 0 : index
      %c0_155 = arith.constant 0 : index
      %278 = vector.load %arg2[%c24, %c0_154, %c0_155] : memref<25x1x16xf32, #tpu.memory_space<vmem>>, vector<1x1x16xf32>
      %279 = vector.shape_cast %278 : vector<1x1x16xf32> to vector<1x16xf32>
      %280 = vector.broadcast %277 : vector<64x1xf32> to vector<64x16xf32>
      %281 = vector.broadcast %279 : vector<1x16xf32> to vector<64x16xf32>
      %282 = arith.mulf %280, %281 : vector<64x16xf32>
      %283 = arith.addf %272, %282 : vector<64x16xf32>
      %284 = vector.broadcast %2 : vector<1x16xf32> to vector<64x16xf32>
      %285 = arith.addf %283, %284 : vector<64x16xf32>
      %cst_156 = arith.constant 0.000000e+00 : f32
      %286 = vector.broadcast %cst_156 : f32 to vector<64x16xf32>
      %287 = arith.maximumf %285, %286 : vector<64x16xf32>
      %288 = vector.extract_strided_slice %287 {offsets = [0, 0], sizes = [32, 16], strides = [1, 1]} : vector<64x16xf32> to vector<32x16xf32>
      %289 = vector.extract_strided_slice %287 {offsets = [32, 0], sizes = [32, 16], strides = [1, 1]} : vector<64x16xf32> to vector<32x16xf32>
      %290 = arith.maximumf %288, %289 : vector<32x16xf32>
      %c0_157 = arith.constant 0 : index
      %c0_158 = arith.constant 0 : index
      %291 = vector.load %arg8[%c0_157, %c0_158] : memref<32x16xf32, #tpu.memory_space<vmem>>, vector<32x16xf32>
      tpu.vector_store %arg8[%c0_157, %c0_158], %290 {strides = array<i32>} : memref<32x16xf32, #tpu.memory_space<vmem>>, vector<32x16xf32>,
      %c0_159 = arith.constant 0 : index
      %c0_160 = arith.constant 0 : index
      %292 = tpu.strided_load %arg8[%c0_159, %c0_160] {strides = array<i32: 2, 1>} : memref<32x16xf32, #tpu.memory_space<vmem>>, vector<14x16xf32>
      %c1_161 = arith.constant 1 : index
      %c0_162 = arith.constant 0 : index
      %293 = tpu.strided_load %arg8[%c1_161, %c0_162] {strides = array<i32: 2, 1>} : memref<32x16xf32, #tpu.memory_space<vmem>>, vector<14x16xf32>
      %294 = arith.maximumf %292, %293 : vector<14x16xf32>
      %c2_i32_163 = arith.constant 2 : i32
      %295 = arith.addi %arg10, %c2_i32_163 : i32
      %c24_i32 = arith.constant 24 : i32
      %296 = arith.muli %295, %c24_i32 : i32
      %c2_i32_164 = arith.constant 2 : i32
      %297 = arith.addi %296, %c2_i32_164 : i32
      %298 = arith.index_cast %297 : i32 to index
      %c0_165 = arith.constant 0 : index
      %299 = vector.load %arg7[%298, %c0_165] : memref<456x16xf32, #tpu.memory_space<vmem>>, vector<14x16xf32>
      tpu.vector_store %arg7[%298, %c0_165], %294 {strides = array<i32>} : memref<456x16xf32, #tpu.memory_space<vmem>>, vector<14x16xf32>,
    }
    %c14_i32_5 = arith.constant 14 : i32
    %c0_i32_6 = arith.constant 0 : i32
    %c7_i32 = arith.constant 7 : i32
    %5 = arith.addi %c0_i32_6, %c7_i32 : i32
    %c1_i32_7 = arith.constant 1 : i32
    scf.for %arg10 = %c0_i32_6 to %5 step %c1_i32_7  : i32 {
      %c2_i32 = arith.constant 2 : i32
      %6 = arith.muli %c2_i32, %arg10 : i32
      %c24_i32 = arith.constant 24 : i32
      %7 = arith.muli %6, %c24_i32 : i32
      %cst_9 = arith.constant 0.000000e+00 : f32
      %8 = vector.broadcast %cst_9 : f32 to vector<48x32xf32>
      %c0_i32_10 = arith.constant 0 : i32
      %9 = arith.addi %7, %c0_i32_10 : i32
      %c0_i32_11 = arith.constant 0 : i32
      %10 = arith.addi %9, %c0_i32_11 : i32
      %11 = arith.index_cast %10 : i32 to index
      %c0_12 = arith.constant 0 : index
      %12 = vector.load %arg7[%11, %c0_12] : memref<456x16xf32, #tpu.memory_space<vmem>>, vector<48x16xf32>
      %c0_13 = arith.constant 0 : index
      %c0_14 = arith.constant 0 : index
      %c0_15 = arith.constant 0 : index
      %13 = vector.load %arg4[%c0_13, %c0_14, %c0_15] : memref<25x16x32xf32, #tpu.memory_space<vmem>>, vector<1x16x32xf32>
      %14 = vector.shape_cast %13 : vector<1x16x32xf32> to vector<16x32xf32>
      %cst_16 = arith.constant dense<0.000000e+00> : vector<48x32xf32>
      %15 = tpu.matmul %12, %14, %cst_16 {dimension_numbers = #tpu.dot_dimension_numbers<[1], [0], [0], [1], [0, 0, 1, 1], [], []>, precision = #tpu.contract_precision<fp32>} : vector<48x16xf32>, vector<16x32xf32>, vector<48x32xf32> -> vector<48x32xf32>
      %16 = arith.addf %8, %15 : vector<48x32xf32>
      %c0_i32_17 = arith.constant 0 : i32
      %17 = arith.addi %7, %c0_i32_17 : i32
      %c1_i32_18 = arith.constant 1 : i32
      %18 = arith.addi %17, %c1_i32_18 : i32
      %19 = arith.index_cast %18 : i32 to index
      %c0_19 = arith.constant 0 : index
      %20 = vector.load %arg7[%19, %c0_19] : memref<456x16xf32, #tpu.memory_space<vmem>>, vector<48x16xf32>
      %c1 = arith.constant 1 : index
      %c0_20 = arith.constant 0 : index
      %c0_21 = arith.constant 0 : index
      %21 = vector.load %arg4[%c1, %c0_20, %c0_21] : memref<25x16x32xf32, #tpu.memory_space<vmem>>, vector<1x16x32xf32>
      %22 = vector.shape_cast %21 : vector<1x16x32xf32> to vector<16x32xf32>
      %cst_22 = arith.constant dense<0.000000e+00> : vector<48x32xf32>
      %23 = tpu.matmul %20, %22, %cst_22 {dimension_numbers = #tpu.dot_dimension_numbers<[1], [0], [0], [1], [0, 0, 1, 1], [], []>, precision = #tpu.contract_precision<fp32>} : vector<48x16xf32>, vector<16x32xf32>, vector<48x32xf32> -> vector<48x32xf32>
      %24 = arith.addf %16, %23 : vector<48x32xf32>
      %c0_i32_23 = arith.constant 0 : i32
      %25 = arith.addi %7, %c0_i32_23 : i32
      %c2_i32_24 = arith.constant 2 : i32
      %26 = arith.addi %25, %c2_i32_24 : i32
      %27 = arith.index_cast %26 : i32 to index
      %c0_25 = arith.constant 0 : index
      %28 = vector.load %arg7[%27, %c0_25] : memref<456x16xf32, #tpu.memory_space<vmem>>, vector<48x16xf32>
      %c2 = arith.constant 2 : index
      %c0_26 = arith.constant 0 : index
      %c0_27 = arith.constant 0 : index
      %29 = vector.load %arg4[%c2, %c0_26, %c0_27] : memref<25x16x32xf32, #tpu.memory_space<vmem>>, vector<1x16x32xf32>
      %30 = vector.shape_cast %29 : vector<1x16x32xf32> to vector<16x32xf32>
      %cst_28 = arith.constant dense<0.000000e+00> : vector<48x32xf32>
      %31 = tpu.matmul %28, %30, %cst_28 {dimension_numbers = #tpu.dot_dimension_numbers<[1], [0], [0], [1], [0, 0, 1, 1], [], []>, precision = #tpu.contract_precision<fp32>} : vector<48x16xf32>, vector<16x32xf32>, vector<48x32xf32> -> vector<48x32xf32>
      %32 = arith.addf %24, %31 : vector<48x32xf32>
      %c0_i32_29 = arith.constant 0 : i32
      %33 = arith.addi %7, %c0_i32_29 : i32
      %c3_i32 = arith.constant 3 : i32
      %34 = arith.addi %33, %c3_i32 : i32
      %35 = arith.index_cast %34 : i32 to index
      %c0_30 = arith.constant 0 : index
      %36 = vector.load %arg7[%35, %c0_30] : memref<456x16xf32, #tpu.memory_space<vmem>>, vector<48x16xf32>
      %c3 = arith.constant 3 : index
      %c0_31 = arith.constant 0 : index
      %c0_32 = arith.constant 0 : index
      %37 = vector.load %arg4[%c3, %c0_31, %c0_32] : memref<25x16x32xf32, #tpu.memory_space<vmem>>, vector<1x16x32xf32>
      %38 = vector.shape_cast %37 : vector<1x16x32xf32> to vector<16x32xf32>
      %cst_33 = arith.constant dense<0.000000e+00> : vector<48x32xf32>
      %39 = tpu.matmul %36, %38, %cst_33 {dimension_numbers = #tpu.dot_dimension_numbers<[1], [0], [0], [1], [0, 0, 1, 1], [], []>, precision = #tpu.contract_precision<fp32>} : vector<48x16xf32>, vector<16x32xf32>, vector<48x32xf32> -> vector<48x32xf32>
      %40 = arith.addf %32, %39 : vector<48x32xf32>
      %c0_i32_34 = arith.constant 0 : i32
      %41 = arith.addi %7, %c0_i32_34 : i32
      %c4_i32 = arith.constant 4 : i32
      %42 = arith.addi %41, %c4_i32 : i32
      %43 = arith.index_cast %42 : i32 to index
      %c0_35 = arith.constant 0 : index
      %44 = vector.load %arg7[%43, %c0_35] : memref<456x16xf32, #tpu.memory_space<vmem>>, vector<48x16xf32>
      %c4 = arith.constant 4 : index
      %c0_36 = arith.constant 0 : index
      %c0_37 = arith.constant 0 : index
      %45 = vector.load %arg4[%c4, %c0_36, %c0_37] : memref<25x16x32xf32, #tpu.memory_space<vmem>>, vector<1x16x32xf32>
      %46 = vector.shape_cast %45 : vector<1x16x32xf32> to vector<16x32xf32>
      %cst_38 = arith.constant dense<0.000000e+00> : vector<48x32xf32>
      %47 = tpu.matmul %44, %46, %cst_38 {dimension_numbers = #tpu.dot_dimension_numbers<[1], [0], [0], [1], [0, 0, 1, 1], [], []>, precision = #tpu.contract_precision<fp32>} : vector<48x16xf32>, vector<16x32xf32>, vector<48x32xf32> -> vector<48x32xf32>
      %48 = arith.addf %40, %47 : vector<48x32xf32>
      %c24_i32_39 = arith.constant 24 : i32
      %49 = arith.addi %7, %c24_i32_39 : i32
      %c0_i32_40 = arith.constant 0 : i32
      %50 = arith.addi %49, %c0_i32_40 : i32
      %51 = arith.index_cast %50 : i32 to index
      %c0_41 = arith.constant 0 : index
      %52 = vector.load %arg7[%51, %c0_41] : memref<456x16xf32, #tpu.memory_space<vmem>>, vector<48x16xf32>
      %c5 = arith.constant 5 : index
      %c0_42 = arith.constant 0 : index
      %c0_43 = arith.constant 0 : index
      %53 = vector.load %arg4[%c5, %c0_42, %c0_43] : memref<25x16x32xf32, #tpu.memory_space<vmem>>, vector<1x16x32xf32>
      %54 = vector.shape_cast %53 : vector<1x16x32xf32> to vector<16x32xf32>
      %cst_44 = arith.constant dense<0.000000e+00> : vector<48x32xf32>
      %55 = tpu.matmul %52, %54, %cst_44 {dimension_numbers = #tpu.dot_dimension_numbers<[1], [0], [0], [1], [0, 0, 1, 1], [], []>, precision = #tpu.contract_precision<fp32>} : vector<48x16xf32>, vector<16x32xf32>, vector<48x32xf32> -> vector<48x32xf32>
      %56 = arith.addf %48, %55 : vector<48x32xf32>
      %c24_i32_45 = arith.constant 24 : i32
      %57 = arith.addi %7, %c24_i32_45 : i32
      %c1_i32_46 = arith.constant 1 : i32
      %58 = arith.addi %57, %c1_i32_46 : i32
      %59 = arith.index_cast %58 : i32 to index
      %c0_47 = arith.constant 0 : index
      %60 = vector.load %arg7[%59, %c0_47] : memref<456x16xf32, #tpu.memory_space<vmem>>, vector<48x16xf32>
      %c6 = arith.constant 6 : index
      %c0_48 = arith.constant 0 : index
      %c0_49 = arith.constant 0 : index
      %61 = vector.load %arg4[%c6, %c0_48, %c0_49] : memref<25x16x32xf32, #tpu.memory_space<vmem>>, vector<1x16x32xf32>
      %62 = vector.shape_cast %61 : vector<1x16x32xf32> to vector<16x32xf32>
      %cst_50 = arith.constant dense<0.000000e+00> : vector<48x32xf32>
      %63 = tpu.matmul %60, %62, %cst_50 {dimension_numbers = #tpu.dot_dimension_numbers<[1], [0], [0], [1], [0, 0, 1, 1], [], []>, precision = #tpu.contract_precision<fp32>} : vector<48x16xf32>, vector<16x32xf32>, vector<48x32xf32> -> vector<48x32xf32>
      %64 = arith.addf %56, %63 : vector<48x32xf32>
      %c24_i32_51 = arith.constant 24 : i32
      %65 = arith.addi %7, %c24_i32_51 : i32
      %c2_i32_52 = arith.constant 2 : i32
      %66 = arith.addi %65, %c2_i32_52 : i32
      %67 = arith.index_cast %66 : i32 to index
      %c0_53 = arith.constant 0 : index
      %68 = vector.load %arg7[%67, %c0_53] : memref<456x16xf32, #tpu.memory_space<vmem>>, vector<48x16xf32>
      %c7 = arith.constant 7 : index
      %c0_54 = arith.constant 0 : index
      %c0_55 = arith.constant 0 : index
      %69 = vector.load %arg4[%c7, %c0_54, %c0_55] : memref<25x16x32xf32, #tpu.memory_space<vmem>>, vector<1x16x32xf32>
      %70 = vector.shape_cast %69 : vector<1x16x32xf32> to vector<16x32xf32>
      %cst_56 = arith.constant dense<0.000000e+00> : vector<48x32xf32>
      %71 = tpu.matmul %68, %70, %cst_56 {dimension_numbers = #tpu.dot_dimension_numbers<[1], [0], [0], [1], [0, 0, 1, 1], [], []>, precision = #tpu.contract_precision<fp32>} : vector<48x16xf32>, vector<16x32xf32>, vector<48x32xf32> -> vector<48x32xf32>
      %72 = arith.addf %64, %71 : vector<48x32xf32>
      %c24_i32_57 = arith.constant 24 : i32
      %73 = arith.addi %7, %c24_i32_57 : i32
      %c3_i32_58 = arith.constant 3 : i32
      %74 = arith.addi %73, %c3_i32_58 : i32
      %75 = arith.index_cast %74 : i32 to index
      %c0_59 = arith.constant 0 : index
      %76 = vector.load %arg7[%75, %c0_59] : memref<456x16xf32, #tpu.memory_space<vmem>>, vector<48x16xf32>
      %c8 = arith.constant 8 : index
      %c0_60 = arith.constant 0 : index
      %c0_61 = arith.constant 0 : index
      %77 = vector.load %arg4[%c8, %c0_60, %c0_61] : memref<25x16x32xf32, #tpu.memory_space<vmem>>, vector<1x16x32xf32>
      %78 = vector.shape_cast %77 : vector<1x16x32xf32> to vector<16x32xf32>
      %cst_62 = arith.constant dense<0.000000e+00> : vector<48x32xf32>
      %79 = tpu.matmul %76, %78, %cst_62 {dimension_numbers = #tpu.dot_dimension_numbers<[1], [0], [0], [1], [0, 0, 1, 1], [], []>, precision = #tpu.contract_precision<fp32>} : vector<48x16xf32>, vector<16x32xf32>, vector<48x32xf32> -> vector<48x32xf32>
      %80 = arith.addf %72, %79 : vector<48x32xf32>
      %c24_i32_63 = arith.constant 24 : i32
      %81 = arith.addi %7, %c24_i32_63 : i32
      %c4_i32_64 = arith.constant 4 : i32
      %82 = arith.addi %81, %c4_i32_64 : i32
      %83 = arith.index_cast %82 : i32 to index
      %c0_65 = arith.constant 0 : index
      %84 = vector.load %arg7[%83, %c0_65] : memref<456x16xf32, #tpu.memory_space<vmem>>, vector<48x16xf32>
      %c9 = arith.constant 9 : index
      %c0_66 = arith.constant 0 : index
      %c0_67 = arith.constant 0 : index
      %85 = vector.load %arg4[%c9, %c0_66, %c0_67] : memref<25x16x32xf32, #tpu.memory_space<vmem>>, vector<1x16x32xf32>
      %86 = vector.shape_cast %85 : vector<1x16x32xf32> to vector<16x32xf32>
      %cst_68 = arith.constant dense<0.000000e+00> : vector<48x32xf32>
      %87 = tpu.matmul %84, %86, %cst_68 {dimension_numbers = #tpu.dot_dimension_numbers<[1], [0], [0], [1], [0, 0, 1, 1], [], []>, precision = #tpu.contract_precision<fp32>} : vector<48x16xf32>, vector<16x32xf32>, vector<48x32xf32> -> vector<48x32xf32>
      %88 = arith.addf %80, %87 : vector<48x32xf32>
      %c48_i32 = arith.constant 48 : i32
      %89 = arith.addi %7, %c48_i32 : i32
      %c0_i32_69 = arith.constant 0 : i32
      %90 = arith.addi %89, %c0_i32_69 : i32
      %91 = arith.index_cast %90 : i32 to index
      %c0_70 = arith.constant 0 : index
      %92 = vector.load %arg7[%91, %c0_70] : memref<456x16xf32, #tpu.memory_space<vmem>>, vector<48x16xf32>
      %c10 = arith.constant 10 : index
      %c0_71 = arith.constant 0 : index
      %c0_72 = arith.constant 0 : index
      %93 = vector.load %arg4[%c10, %c0_71, %c0_72] : memref<25x16x32xf32, #tpu.memory_space<vmem>>, vector<1x16x32xf32>
      %94 = vector.shape_cast %93 : vector<1x16x32xf32> to vector<16x32xf32>
      %cst_73 = arith.constant dense<0.000000e+00> : vector<48x32xf32>
      %95 = tpu.matmul %92, %94, %cst_73 {dimension_numbers = #tpu.dot_dimension_numbers<[1], [0], [0], [1], [0, 0, 1, 1], [], []>, precision = #tpu.contract_precision<fp32>} : vector<48x16xf32>, vector<16x32xf32>, vector<48x32xf32> -> vector<48x32xf32>
      %96 = arith.addf %88, %95 : vector<48x32xf32>
      %c48_i32_74 = arith.constant 48 : i32
      %97 = arith.addi %7, %c48_i32_74 : i32
      %c1_i32_75 = arith.constant 1 : i32
      %98 = arith.addi %97, %c1_i32_75 : i32
      %99 = arith.index_cast %98 : i32 to index
      %c0_76 = arith.constant 0 : index
      %100 = vector.load %arg7[%99, %c0_76] : memref<456x16xf32, #tpu.memory_space<vmem>>, vector<48x16xf32>
      %c11 = arith.constant 11 : index
      %c0_77 = arith.constant 0 : index
      %c0_78 = arith.constant 0 : index
      %101 = vector.load %arg4[%c11, %c0_77, %c0_78] : memref<25x16x32xf32, #tpu.memory_space<vmem>>, vector<1x16x32xf32>
      %102 = vector.shape_cast %101 : vector<1x16x32xf32> to vector<16x32xf32>
      %cst_79 = arith.constant dense<0.000000e+00> : vector<48x32xf32>
      %103 = tpu.matmul %100, %102, %cst_79 {dimension_numbers = #tpu.dot_dimension_numbers<[1], [0], [0], [1], [0, 0, 1, 1], [], []>, precision = #tpu.contract_precision<fp32>} : vector<48x16xf32>, vector<16x32xf32>, vector<48x32xf32> -> vector<48x32xf32>
      %104 = arith.addf %96, %103 : vector<48x32xf32>
      %c48_i32_80 = arith.constant 48 : i32
      %105 = arith.addi %7, %c48_i32_80 : i32
      %c2_i32_81 = arith.constant 2 : i32
      %106 = arith.addi %105, %c2_i32_81 : i32
      %107 = arith.index_cast %106 : i32 to index
      %c0_82 = arith.constant 0 : index
      %108 = vector.load %arg7[%107, %c0_82] : memref<456x16xf32, #tpu.memory_space<vmem>>, vector<48x16xf32>
      %c12 = arith.constant 12 : index
      %c0_83 = arith.constant 0 : index
      %c0_84 = arith.constant 0 : index
      %109 = vector.load %arg4[%c12, %c0_83, %c0_84] : memref<25x16x32xf32, #tpu.memory_space<vmem>>, vector<1x16x32xf32>
      %110 = vector.shape_cast %109 : vector<1x16x32xf32> to vector<16x32xf32>
      %cst_85 = arith.constant dense<0.000000e+00> : vector<48x32xf32>
      %111 = tpu.matmul %108, %110, %cst_85 {dimension_numbers = #tpu.dot_dimension_numbers<[1], [0], [0], [1], [0, 0, 1, 1], [], []>, precision = #tpu.contract_precision<fp32>} : vector<48x16xf32>, vector<16x32xf32>, vector<48x32xf32> -> vector<48x32xf32>
      %112 = arith.addf %104, %111 : vector<48x32xf32>
      %c48_i32_86 = arith.constant 48 : i32
      %113 = arith.addi %7, %c48_i32_86 : i32
      %c3_i32_87 = arith.constant 3 : i32
      %114 = arith.addi %113, %c3_i32_87 : i32
      %115 = arith.index_cast %114 : i32 to index
      %c0_88 = arith.constant 0 : index
      %116 = vector.load %arg7[%115, %c0_88] : memref<456x16xf32, #tpu.memory_space<vmem>>, vector<48x16xf32>
      %c13 = arith.constant 13 : index
      %c0_89 = arith.constant 0 : index
      %c0_90 = arith.constant 0 : index
      %117 = vector.load %arg4[%c13, %c0_89, %c0_90] : memref<25x16x32xf32, #tpu.memory_space<vmem>>, vector<1x16x32xf32>
      %118 = vector.shape_cast %117 : vector<1x16x32xf32> to vector<16x32xf32>
      %cst_91 = arith.constant dense<0.000000e+00> : vector<48x32xf32>
      %119 = tpu.matmul %116, %118, %cst_91 {dimension_numbers = #tpu.dot_dimension_numbers<[1], [0], [0], [1], [0, 0, 1, 1], [], []>, precision = #tpu.contract_precision<fp32>} : vector<48x16xf32>, vector<16x32xf32>, vector<48x32xf32> -> vector<48x32xf32>
      %120 = arith.addf %112, %119 : vector<48x32xf32>
      %c48_i32_92 = arith.constant 48 : i32
      %121 = arith.addi %7, %c48_i32_92 : i32
      %c4_i32_93 = arith.constant 4 : i32
      %122 = arith.addi %121, %c4_i32_93 : i32
      %123 = arith.index_cast %122 : i32 to index
      %c0_94 = arith.constant 0 : index
      %124 = vector.load %arg7[%123, %c0_94] : memref<456x16xf32, #tpu.memory_space<vmem>>, vector<48x16xf32>
      %c14 = arith.constant 14 : index
      %c0_95 = arith.constant 0 : index
      %c0_96 = arith.constant 0 : index
      %125 = vector.load %arg4[%c14, %c0_95, %c0_96] : memref<25x16x32xf32, #tpu.memory_space<vmem>>, vector<1x16x32xf32>
      %126 = vector.shape_cast %125 : vector<1x16x32xf32> to vector<16x32xf32>
      %cst_97 = arith.constant dense<0.000000e+00> : vector<48x32xf32>
      %127 = tpu.matmul %124, %126, %cst_97 {dimension_numbers = #tpu.dot_dimension_numbers<[1], [0], [0], [1], [0, 0, 1, 1], [], []>, precision = #tpu.contract_precision<fp32>} : vector<48x16xf32>, vector<16x32xf32>, vector<48x32xf32> -> vector<48x32xf32>
      %128 = arith.addf %120, %127 : vector<48x32xf32>
      %c72_i32 = arith.constant 72 : i32
      %129 = arith.addi %7, %c72_i32 : i32
      %c0_i32_98 = arith.constant 0 : i32
      %130 = arith.addi %129, %c0_i32_98 : i32
      %131 = arith.index_cast %130 : i32 to index
      %c0_99 = arith.constant 0 : index
      %132 = vector.load %arg7[%131, %c0_99] : memref<456x16xf32, #tpu.memory_space<vmem>>, vector<48x16xf32>
      %c15 = arith.constant 15 : index
      %c0_100 = arith.constant 0 : index
      %c0_101 = arith.constant 0 : index
      %133 = vector.load %arg4[%c15, %c0_100, %c0_101] : memref<25x16x32xf32, #tpu.memory_space<vmem>>, vector<1x16x32xf32>
      %134 = vector.shape_cast %133 : vector<1x16x32xf32> to vector<16x32xf32>
      %cst_102 = arith.constant dense<0.000000e+00> : vector<48x32xf32>
      %135 = tpu.matmul %132, %134, %cst_102 {dimension_numbers = #tpu.dot_dimension_numbers<[1], [0], [0], [1], [0, 0, 1, 1], [], []>, precision = #tpu.contract_precision<fp32>} : vector<48x16xf32>, vector<16x32xf32>, vector<48x32xf32> -> vector<48x32xf32>
      %136 = arith.addf %128, %135 : vector<48x32xf32>
      %c72_i32_103 = arith.constant 72 : i32
      %137 = arith.addi %7, %c72_i32_103 : i32
      %c1_i32_104 = arith.constant 1 : i32
      %138 = arith.addi %137, %c1_i32_104 : i32
      %139 = arith.index_cast %138 : i32 to index
      %c0_105 = arith.constant 0 : index
      %140 = vector.load %arg7[%139, %c0_105] : memref<456x16xf32, #tpu.memory_space<vmem>>, vector<48x16xf32>
      %c16 = arith.constant 16 : index
      %c0_106 = arith.constant 0 : index
      %c0_107 = arith.constant 0 : index
      %141 = vector.load %arg4[%c16, %c0_106, %c0_107] : memref<25x16x32xf32, #tpu.memory_space<vmem>>, vector<1x16x32xf32>
      %142 = vector.shape_cast %141 : vector<1x16x32xf32> to vector<16x32xf32>
      %cst_108 = arith.constant dense<0.000000e+00> : vector<48x32xf32>
      %143 = tpu.matmul %140, %142, %cst_108 {dimension_numbers = #tpu.dot_dimension_numbers<[1], [0], [0], [1], [0, 0, 1, 1], [], []>, precision = #tpu.contract_precision<fp32>} : vector<48x16xf32>, vector<16x32xf32>, vector<48x32xf32> -> vector<48x32xf32>
      %144 = arith.addf %136, %143 : vector<48x32xf32>
      %c72_i32_109 = arith.constant 72 : i32
      %145 = arith.addi %7, %c72_i32_109 : i32
      %c2_i32_110 = arith.constant 2 : i32
      %146 = arith.addi %145, %c2_i32_110 : i32
      %147 = arith.index_cast %146 : i32 to index
      %c0_111 = arith.constant 0 : index
      %148 = vector.load %arg7[%147, %c0_111] : memref<456x16xf32, #tpu.memory_space<vmem>>, vector<48x16xf32>
      %c17 = arith.constant 17 : index
      %c0_112 = arith.constant 0 : index
      %c0_113 = arith.constant 0 : index
      %149 = vector.load %arg4[%c17, %c0_112, %c0_113] : memref<25x16x32xf32, #tpu.memory_space<vmem>>, vector<1x16x32xf32>
      %150 = vector.shape_cast %149 : vector<1x16x32xf32> to vector<16x32xf32>
      %cst_114 = arith.constant dense<0.000000e+00> : vector<48x32xf32>
      %151 = tpu.matmul %148, %150, %cst_114 {dimension_numbers = #tpu.dot_dimension_numbers<[1], [0], [0], [1], [0, 0, 1, 1], [], []>, precision = #tpu.contract_precision<fp32>} : vector<48x16xf32>, vector<16x32xf32>, vector<48x32xf32> -> vector<48x32xf32>
      %152 = arith.addf %144, %151 : vector<48x32xf32>
      %c72_i32_115 = arith.constant 72 : i32
      %153 = arith.addi %7, %c72_i32_115 : i32
      %c3_i32_116 = arith.constant 3 : i32
      %154 = arith.addi %153, %c3_i32_116 : i32
      %155 = arith.index_cast %154 : i32 to index
      %c0_117 = arith.constant 0 : index
      %156 = vector.load %arg7[%155, %c0_117] : memref<456x16xf32, #tpu.memory_space<vmem>>, vector<48x16xf32>
      %c18 = arith.constant 18 : index
      %c0_118 = arith.constant 0 : index
      %c0_119 = arith.constant 0 : index
      %157 = vector.load %arg4[%c18, %c0_118, %c0_119] : memref<25x16x32xf32, #tpu.memory_space<vmem>>, vector<1x16x32xf32>
      %158 = vector.shape_cast %157 : vector<1x16x32xf32> to vector<16x32xf32>
      %cst_120 = arith.constant dense<0.000000e+00> : vector<48x32xf32>
      %159 = tpu.matmul %156, %158, %cst_120 {dimension_numbers = #tpu.dot_dimension_numbers<[1], [0], [0], [1], [0, 0, 1, 1], [], []>, precision = #tpu.contract_precision<fp32>} : vector<48x16xf32>, vector<16x32xf32>, vector<48x32xf32> -> vector<48x32xf32>
      %160 = arith.addf %152, %159 : vector<48x32xf32>
      %c72_i32_121 = arith.constant 72 : i32
      %161 = arith.addi %7, %c72_i32_121 : i32
      %c4_i32_122 = arith.constant 4 : i32
      %162 = arith.addi %161, %c4_i32_122 : i32
      %163 = arith.index_cast %162 : i32 to index
      %c0_123 = arith.constant 0 : index
      %164 = vector.load %arg7[%163, %c0_123] : memref<456x16xf32, #tpu.memory_space<vmem>>, vector<48x16xf32>
      %c19 = arith.constant 19 : index
      %c0_124 = arith.constant 0 : index
      %c0_125 = arith.constant 0 : index
      %165 = vector.load %arg4[%c19, %c0_124, %c0_125] : memref<25x16x32xf32, #tpu.memory_space<vmem>>, vector<1x16x32xf32>
      %166 = vector.shape_cast %165 : vector<1x16x32xf32> to vector<16x32xf32>
      %cst_126 = arith.constant dense<0.000000e+00> : vector<48x32xf32>
      %167 = tpu.matmul %164, %166, %cst_126 {dimension_numbers = #tpu.dot_dimension_numbers<[1], [0], [0], [1], [0, 0, 1, 1], [], []>, precision = #tpu.contract_precision<fp32>} : vector<48x16xf32>, vector<16x32xf32>, vector<48x32xf32> -> vector<48x32xf32>
      %168 = arith.addf %160, %167 : vector<48x32xf32>
      %c96_i32 = arith.constant 96 : i32
      %169 = arith.addi %7, %c96_i32 : i32
      %c0_i32_127 = arith.constant 0 : i32
      %170 = arith.addi %169, %c0_i32_127 : i32
      %171 = arith.index_cast %170 : i32 to index
      %c0_128 = arith.constant 0 : index
      %172 = vector.load %arg7[%171, %c0_128] : memref<456x16xf32, #tpu.memory_space<vmem>>, vector<48x16xf32>
      %c20 = arith.constant 20 : index
      %c0_129 = arith.constant 0 : index
      %c0_130 = arith.constant 0 : index
      %173 = vector.load %arg4[%c20, %c0_129, %c0_130] : memref<25x16x32xf32, #tpu.memory_space<vmem>>, vector<1x16x32xf32>
      %174 = vector.shape_cast %173 : vector<1x16x32xf32> to vector<16x32xf32>
      %cst_131 = arith.constant dense<0.000000e+00> : vector<48x32xf32>
      %175 = tpu.matmul %172, %174, %cst_131 {dimension_numbers = #tpu.dot_dimension_numbers<[1], [0], [0], [1], [0, 0, 1, 1], [], []>, precision = #tpu.contract_precision<fp32>} : vector<48x16xf32>, vector<16x32xf32>, vector<48x32xf32> -> vector<48x32xf32>
      %176 = arith.addf %168, %175 : vector<48x32xf32>
      %c96_i32_132 = arith.constant 96 : i32
      %177 = arith.addi %7, %c96_i32_132 : i32
      %c1_i32_133 = arith.constant 1 : i32
      %178 = arith.addi %177, %c1_i32_133 : i32
      %179 = arith.index_cast %178 : i32 to index
      %c0_134 = arith.constant 0 : index
      %180 = vector.load %arg7[%179, %c0_134] : memref<456x16xf32, #tpu.memory_space<vmem>>, vector<48x16xf32>
      %c21 = arith.constant 21 : index
      %c0_135 = arith.constant 0 : index
      %c0_136 = arith.constant 0 : index
      %181 = vector.load %arg4[%c21, %c0_135, %c0_136] : memref<25x16x32xf32, #tpu.memory_space<vmem>>, vector<1x16x32xf32>
      %182 = vector.shape_cast %181 : vector<1x16x32xf32> to vector<16x32xf32>
      %cst_137 = arith.constant dense<0.000000e+00> : vector<48x32xf32>
      %183 = tpu.matmul %180, %182, %cst_137 {dimension_numbers = #tpu.dot_dimension_numbers<[1], [0], [0], [1], [0, 0, 1, 1], [], []>, precision = #tpu.contract_precision<fp32>} : vector<48x16xf32>, vector<16x32xf32>, vector<48x32xf32> -> vector<48x32xf32>
      %184 = arith.addf %176, %183 : vector<48x32xf32>
      %c96_i32_138 = arith.constant 96 : i32
      %185 = arith.addi %7, %c96_i32_138 : i32
      %c2_i32_139 = arith.constant 2 : i32
      %186 = arith.addi %185, %c2_i32_139 : i32
      %187 = arith.index_cast %186 : i32 to index
      %c0_140 = arith.constant 0 : index
      %188 = vector.load %arg7[%187, %c0_140] : memref<456x16xf32, #tpu.memory_space<vmem>>, vector<48x16xf32>
      %c22 = arith.constant 22 : index
      %c0_141 = arith.constant 0 : index
      %c0_142 = arith.constant 0 : index
      %189 = vector.load %arg4[%c22, %c0_141, %c0_142] : memref<25x16x32xf32, #tpu.memory_space<vmem>>, vector<1x16x32xf32>
      %190 = vector.shape_cast %189 : vector<1x16x32xf32> to vector<16x32xf32>
      %cst_143 = arith.constant dense<0.000000e+00> : vector<48x32xf32>
      %191 = tpu.matmul %188, %190, %cst_143 {dimension_numbers = #tpu.dot_dimension_numbers<[1], [0], [0], [1], [0, 0, 1, 1], [], []>, precision = #tpu.contract_precision<fp32>} : vector<48x16xf32>, vector<16x32xf32>, vector<48x32xf32> -> vector<48x32xf32>
      %192 = arith.addf %184, %191 : vector<48x32xf32>
      %c96_i32_144 = arith.constant 96 : i32
      %193 = arith.addi %7, %c96_i32_144 : i32
      %c3_i32_145 = arith.constant 3 : i32
      %194 = arith.addi %193, %c3_i32_145 : i32
      %195 = arith.index_cast %194 : i32 to index
      %c0_146 = arith.constant 0 : index
      %196 = vector.load %arg7[%195, %c0_146] : memref<456x16xf32, #tpu.memory_space<vmem>>, vector<48x16xf32>
      %c23 = arith.constant 23 : index
      %c0_147 = arith.constant 0 : index
      %c0_148 = arith.constant 0 : index
      %197 = vector.load %arg4[%c23, %c0_147, %c0_148] : memref<25x16x32xf32, #tpu.memory_space<vmem>>, vector<1x16x32xf32>
      %198 = vector.shape_cast %197 : vector<1x16x32xf32> to vector<16x32xf32>
      %cst_149 = arith.constant dense<0.000000e+00> : vector<48x32xf32>
      %199 = tpu.matmul %196, %198, %cst_149 {dimension_numbers = #tpu.dot_dimension_numbers<[1], [0], [0], [1], [0, 0, 1, 1], [], []>, precision = #tpu.contract_precision<fp32>} : vector<48x16xf32>, vector<16x32xf32>, vector<48x32xf32> -> vector<48x32xf32>
      %200 = arith.addf %192, %199 : vector<48x32xf32>
      %c96_i32_150 = arith.constant 96 : i32
      %201 = arith.addi %7, %c96_i32_150 : i32
      %c4_i32_151 = arith.constant 4 : i32
      %202 = arith.addi %201, %c4_i32_151 : i32
      %203 = arith.index_cast %202 : i32 to index
      %c0_152 = arith.constant 0 : index
      %204 = vector.load %arg7[%203, %c0_152] : memref<456x16xf32, #tpu.memory_space<vmem>>, vector<48x16xf32>
      %c24 = arith.constant 24 : index
      %c0_153 = arith.constant 0 : index
      %c0_154 = arith.constant 0 : index
      %205 = vector.load %arg4[%c24, %c0_153, %c0_154] : memref<25x16x32xf32, #tpu.memory_space<vmem>>, vector<1x16x32xf32>
      %206 = vector.shape_cast %205 : vector<1x16x32xf32> to vector<16x32xf32>
      %cst_155 = arith.constant dense<0.000000e+00> : vector<48x32xf32>
      %207 = tpu.matmul %204, %206, %cst_155 {dimension_numbers = #tpu.dot_dimension_numbers<[1], [0], [0], [1], [0, 0, 1, 1], [], []>, precision = #tpu.contract_precision<fp32>} : vector<48x16xf32>, vector<16x32xf32>, vector<48x32xf32> -> vector<48x32xf32>
      %208 = arith.addf %200, %207 : vector<48x32xf32>
      %209 = vector.broadcast %3 : vector<1x32xf32> to vector<48x32xf32>
      %210 = arith.addf %208, %209 : vector<48x32xf32>
      %cst_156 = arith.constant 0.000000e+00 : f32
      %211 = vector.broadcast %cst_156 : f32 to vector<48x32xf32>
      %212 = arith.maximumf %210, %211 : vector<48x32xf32>
      %213 = vector.extract_strided_slice %212 {offsets = [0, 0], sizes = [24, 32], strides = [1, 1]} : vector<48x32xf32> to vector<24x32xf32>
      %214 = vector.extract_strided_slice %212 {offsets = [24, 0], sizes = [24, 32], strides = [1, 1]} : vector<48x32xf32> to vector<24x32xf32>
      %215 = arith.maximumf %213, %214 : vector<24x32xf32>
      %c0_157 = arith.constant 0 : index
      %c0_158 = arith.constant 0 : index
      %216 = vector.load %arg9[%c0_157, %c0_158] : memref<24x32xf32, #tpu.memory_space<vmem>>, vector<24x32xf32>
      tpu.vector_store %arg9[%c0_157, %c0_158], %215 {strides = array<i32>} : memref<24x32xf32, #tpu.memory_space<vmem>>, vector<24x32xf32>,
      %c0_159 = arith.constant 0 : index
      %c0_160 = arith.constant 0 : index
      %217 = tpu.strided_load %arg9[%c0_159, %c0_160] {strides = array<i32: 2, 1>} : memref<24x32xf32, #tpu.memory_space<vmem>>, vector<7x32xf32>
      %c1_161 = arith.constant 1 : index
      %c0_162 = arith.constant 0 : index
      %218 = tpu.strided_load %arg9[%c1_161, %c0_162] {strides = array<i32: 2, 1>} : memref<24x32xf32, #tpu.memory_space<vmem>>, vector<7x32xf32>
      %219 = arith.maximumf %217, %218 : vector<7x32xf32>
      %c7_i32_163 = arith.constant 7 : i32
      %220 = arith.muli %arg10, %c7_i32_163 : i32
      %c0_164 = arith.constant 0 : index
      %221 = arith.index_cast %220 : i32 to index
      %c0_165 = arith.constant 0 : index
      %222 = vector.load %arg6[%c0_164, %221, %c0_165] : memref<1x49x32xf32, #tpu.memory_space<vmem>>, vector<1x7x32xf32>
      %223 = vector.shape_cast %222 : vector<1x7x32xf32> to vector<7x32xf32>
      %224 = vector.shape_cast %219 : vector<7x32xf32> to vector<1x7x32xf32>
      tpu.vector_store %arg6[%c0_164, %221, %c0_165], %224 {strides = array<i32>} : memref<1x49x32xf32, #tpu.memory_space<vmem>>, vector<1x7x32xf32>,
    }
    %c7_i32_8 = arith.constant 7 : i32
    return
  }
  func.func @transform_0(%arg0: i32) -> (i32, i32, i32) {
    %c0_i32 = arith.constant 0 : i32
    %c0_i32_0 = arith.constant 0 : i32
    %c0_i32_1 = arith.constant 0 : i32
    return %arg0, %c0_i32, %c0_i32_0 : i32, i32, i32
  }
  func.func @transform_1(%arg0: i32) -> (i32, i32, i32) {
    %c0_i32 = arith.constant 0 : i32
    %c0_i32_0 = arith.constant 0 : i32
    %c0_i32_1 = arith.constant 0 : i32
    %c0_i32_2 = arith.constant 0 : i32
    return %c0_i32, %c0_i32_0, %c0_i32_1 : i32, i32, i32
  }
  func.func @transform_2(%arg0: i32) -> (i32, i32) {
    %c0_i32 = arith.constant 0 : i32
    %c0_i32_0 = arith.constant 0 : i32
    %c0_i32_1 = arith.constant 0 : i32
    return %c0_i32, %c0_i32_0 : i32, i32
  }
  func.func @transform_3(%arg0: i32) -> (i32, i32, i32) {
    %c0_i32 = arith.constant 0 : i32
    %c0_i32_0 = arith.constant 0 : i32
    %c0_i32_1 = arith.constant 0 : i32
    %c0_i32_2 = arith.constant 0 : i32
    return %c0_i32, %c0_i32_0, %c0_i32_1 : i32, i32, i32
  }
  func.func @transform_4(%arg0: i32) -> (i32, i32) {
    %c0_i32 = arith.constant 0 : i32
    %c0_i32_0 = arith.constant 0 : i32
    %c0_i32_1 = arith.constant 0 : i32
    return %c0_i32, %c0_i32_0 : i32, i32
  }
  func.func @transform_5(%arg0: i32) -> (i32, i32, i32) {
    %c0_i32 = arith.constant 0 : i32
    %c0_i32_0 = arith.constant 0 : i32
    %c0_i32_1 = arith.constant 0 : i32
    return %arg0, %c0_i32, %c0_i32_0 : i32, i32, i32
  }
}

</mosaic_0001>

<bundles_post_ra>
// kernel: convnet_forward.1
= control target key start
LH: loop header
LB: loop body
LE: loop exit
PB: predicated region body
PF: predicated region fallthrough
CT: control target
= control target key end

     0   :  { %s23862_s18 = smov 0   ;;  %s28670_s0 = inlined_call_operand.vmem [shape: f32[2,1056,1], index: 0, kind: input, shape index: {}]   ;;  %s28671_s1 = inlined_call_operand.vmem [shape: f32[25,1,16], index: 1, kind: input, shape index: {}]   ;;  %s28672_s2 = inlined_call_operand.vmem [shape: f32[1,16], index: 2, kind: input, shape index: {}]   ;;  %s28673_s3 = inlined_call_operand.vmem [shape: f32[25,16,32], index: 3, kind: input, shape index: {}]   ;;  %s28674_s4 = inlined_call_operand.vmem [shape: f32[1,32], index: 4, kind: input, shape index: {}]   ;;  %s28675_s5 = inlined_call_operand.vmem [shape: f32[2,49,32], index: 5, kind: output, shape index: {}]  }
   0x1 LB: > { %s20155_s19 = sadd.s32 4294967295, %s23820_s18   ;;  %p20159_p0 = scmp.ge.s32.totalorder %s23820_s18, 1  ;;  %s23820_s18 = sphi %s23862_s18, %s15_s18  }
   0x2   : > { %p187_p1 = scmp.lt.s32.totalorder %s23820_s18, 3 }
   0x4   : > { %p188_p2 = pnand %p20159_p0, %p187_p1 }
   0x6   : > { %191 = sbr.rel (%p188_p2) target bundleno = 1719 (0x6b7), region = 40 }
   0xb   : > { %p23872_p3 = scmp.lt.s32.totalorder %s20155_s19, 1  ;;  %vm225_vm0 = vcmask 130048   ;;  %v23879_v0 = vld [vmem:[%s28672_s2] ss:$0 sm:$0xff]  ;;  %v23830_v1 = vmov 0.0   ;;  %s23957_s8 = smov 0  }
   0xc   : > { %28691 = vst [vmem:[#allocation5_spill] sm:$0xff] %v23879_v0  ;;  %226 = vst.msk [vmem:[#allocation2] sm:$0xff] %vm225_vm0, %v23830_v1  ;;  %v23941_v2 = vld [vmem:[%s28674_s4] ss:$0 sm:$0xff] }
   0xd   : > { %227 = vst.msk [vmem:[#allocation2 + $0x8] sm:$0xff] %vm225_vm0, %v23830_v1  ;;  %228 = vst.msk [vmem:[#allocation2 + $0x10] sm:$0xff] %vm225_vm0, %v23830_v1  ;;  %s28814_s19 = smov (!%p23872_p3, %s20155_s19), 1 }
   0xe   : > { %229 = vst.msk [vmem:[#allocation2 + $0x18] sm:$0xff] %vm225_vm0, %v23830_v1  ;;  %230 = vst.msk [vmem:[#allocation2 + $0x20] sm:$0xff] %vm225_vm0, %v23830_v1  ;;  %s23776_s25 = smul.u32 1056, %s28814_s19 }
   0xf   : > { %231 = vst.msk [vmem:[#allocation2 + $0x28] sm:$0xff] %vm225_vm0, %v23830_v1  ;;  %232 = vst.msk [vmem:[#allocation2 + $0x30] sm:$0xff] %vm225_vm0, %v23830_v1  ;;  %s23777_s26 = smul.u32 56, %s28814_s19 }
  0x10   : > { %233 = vst.msk [vmem:[#allocation2 + $0x38] sm:$0xff] %vm225_vm0, %v23830_v1  ;;  %234 = vst.msk [vmem:[#allocation2 + $0x40] sm:$0xff] %vm225_vm0, %v23830_v1  ;;  %s23950_s29 = scalar_lea.vmem %s28670_s0, %s23776_s25 }
  0x11   : > { %235 = vst.msk [vmem:[#allocation2 + $0x48] sm:$0xff] %vm225_vm0, %v23830_v1  ;;  %236 = vst.msk [vmem:[#allocation2 + $0x50] sm:$0xff] %vm225_vm0, %v23830_v1  ;;  %s23955_s7 = scalar_lea.vmem %s28675_s5, %s23777_s26 }
  0x12   : > { %237 = vst.msk [vmem:[#allocation2 + $0x58] sm:$0xff] %vm225_vm0, %v23830_v1  ;;  %238 = vst.msk [vmem:[#allocation2 + $0x60] sm:$0xff] %vm225_vm0, %v23830_v1 }
  0x13   : > { %239 = vst.msk [vmem:[#allocation2 + $0x68] sm:$0xff] %vm225_vm0, %v23830_v1  ;;  %240 = vst.msk [vmem:[#allocation2 + $0x70] sm:$0xff] %vm225_vm0, %v23830_v1 }
  0x14   : > { %241 = vst.msk [vmem:[#allocation2 + $0x78] sm:$0xff] %vm225_vm0, %v23830_v1  ;;  %242 = vst.msk [vmem:[#allocation2 + $0x80] sm:$0xff] %vm225_vm0, %v23830_v1 }
  0x15   : > { %243 = vst.msk [vmem:[#allocation2 + $0x88] sm:$0xff] %vm225_vm0, %v23830_v1  ;;  %244 = vst.msk [vmem:[#allocation2 + $0x90] sm:$0xff] %vm225_vm0, %v23830_v1 }
  0x16   : > { %245 = vst.msk [vmem:[#allocation2 + $0x98] sm:$0xff] %vm225_vm0, %v23830_v1  ;;  %246 = vst.msk [vmem:[#allocation2 + $0xa0] sm:$0xff] %vm225_vm0, %v23830_v1 }
  0x17   : > { %247 = vst.msk [vmem:[#allocation2 + $0xa8] sm:$0xff] %vm225_vm0, %v23830_v1  ;;  %248 = vst.msk [vmem:[#allocation2 + $0xb0] sm:$0xff] %vm225_vm0, %v23830_v1 }
  0x18   : > { %249 = vst.msk [vmem:[#allocation2 + $0xb8] sm:$0xff] %vm225_vm0, %v23830_v1  ;;  %250 = vst.msk [vmem:[#allocation2 + $0xc0] sm:$0xff] %vm225_vm0, %v23830_v1 }
  0x19   : > { %251 = vst.msk [vmem:[#allocation2 + $0xc8] sm:$0xff] %vm225_vm0, %v23830_v1  ;;  %252 = vst.msk [vmem:[#allocation2 + $0xd0] sm:$0xff] %vm225_vm0, %v23830_v1 }
  0x1a   : > { %253 = vst.msk [vmem:[#allocation2 + $0xd8] sm:$0xff] %vm225_vm0, %v23830_v1  ;;  %254 = vst.msk [vmem:[#allocation2 + $0xe0] sm:$0xff] %vm225_vm0, %v23830_v1 }
  0x1b   : > { %255 = vst.msk [vmem:[#allocation2 + $0xe8] sm:$0xff] %vm225_vm0, %v23830_v1  ;;  %256 = vst.msk [vmem:[#allocation2 + $0xf0] sm:$0xff] %vm225_vm0, %v23830_v1 }
  0x1c   : > { %257 = vst.msk [vmem:[#allocation2 + $0xf8] sm:$0xff] %vm225_vm0, %v23830_v1  ;;  %258 = vst.msk [vmem:[#allocation2 + $0x100] sm:$0xff] %vm225_vm0, %v23830_v1 }
  0x1d   : > { %259 = vst.msk [vmem:[#allocation2 + $0x108] sm:$0xff] %vm225_vm0, %v23830_v1  ;;  %260 = vst.msk [vmem:[#allocation2 + $0x110] sm:$0xff] %vm225_vm0, %v23830_v1 }
  0x1e   : > { %261 = vst.msk [vmem:[#allocation2 + $0x118] sm:$0xff] %vm225_vm0, %v23830_v1  ;;  %262 = vst.msk [vmem:[#allocation2 + $0x120] sm:$0xff] %vm225_vm0, %v23830_v1 }
  0x1f   : > { %263 = vst.msk [vmem:[#allocation2 + $0x128] sm:$0xff] %vm225_vm0, %v23830_v1  ;;  %264 = vst.msk [vmem:[#allocation2 + $0x130] sm:$0xff] %vm225_vm0, %v23830_v1 }
  0x20   : > { %265 = vst.msk [vmem:[#allocation2 + $0x138] sm:$0xff] %vm225_vm0, %v23830_v1  ;;  %266 = vst.msk [vmem:[#allocation2 + $0x140] sm:$0xff] %vm225_vm0, %v23830_v1 }
  0x21   : > { %267 = vst.msk [vmem:[#allocation2 + $0x148] sm:$0xff] %vm225_vm0, %v23830_v1  ;;  %268 = vst.msk [vmem:[#allocation2 + $0x150] sm:$0xff] %vm225_vm0, %v23830_v1 }
  0x22   : > { %269 = vst.msk [vmem:[#allocation2 + $0x158] sm:$0xff] %vm225_vm0, %v23830_v1  ;;  %270 = vst.msk [vmem:[#allocation2 + $0x160] sm:$0xff] %vm225_vm0, %v23830_v1 }
  0x23   : > { %271 = vst.msk [vmem:[#allocation2 + $0x168] sm:$0xff] %vm225_vm0, %v23830_v1  ;;  %272 = vst.msk [vmem:[#allocation2 + $0x170] sm:$0xff] %vm225_vm0, %v23830_v1 }
  0x24   : > { %273 = vst.msk [vmem:[#allocation2 + $0x178] sm:$0xff] %vm225_vm0, %v23830_v1  ;;  %274 = vst.msk [vmem:[#allocation2 + $0x180] sm:$0xff] %vm225_vm0, %v23830_v1 }
  0x25   : > { %275 = vst.msk [vmem:[#allocation2 + $0x188] sm:$0xff] %vm225_vm0, %v23830_v1  ;;  %276 = vst.msk [vmem:[#allocation2 + $0x190] sm:$0xff] %vm225_vm0, %v23830_v1 }
  0x26   : > { %277 = vst.msk [vmem:[#allocation2 + $0x198] sm:$0xff] %vm225_vm0, %v23830_v1  ;;  %278 = vst.msk [vmem:[#allocation2 + $0x1a0] sm:$0xff] %vm225_vm0, %v23830_v1 }
  0x27   : > { %279 = vst.msk [vmem:[#allocation2 + $0x1a8] sm:$0xff] %vm225_vm0, %v23830_v1  ;;  %280 = vst.msk [vmem:[#allocation2 + $0x1b0] sm:$0xff] %vm225_vm0, %v23830_v1 }
  0x28   : > { %281 = vst.msk [vmem:[#allocation2 + $0x1b8] sm:$0xff] %vm225_vm0, %v23830_v1  ;;  %282 = vst.msk [vmem:[#allocation2 + $0x1c0] sm:$0xff] %vm225_vm0, %v23830_v1 }
  0x29   : > { %28692 = vst [vmem:[#allocation6_spill] sm:$0xff] %v23941_v2 }
  0x2a LB: >> { %v23831_v3 = vmov 0   ;;  %s20162_s9 = sshll.u32 %s23824_s8, 6  ;;  %s20042_s21 = smul.u32 24, %s23824_s8  ;;  %vm2184_vm1 = vcmask 128000   ;;  %s23824_s8 = sphi %s23957_s8, %s290_s8  }
  0x2b   : >> { %23805 = vset.pattern.permute.xlu1 %v23831_v3  ;;  %23804 = vset.pattern.permute.xlu0 %v23831_v3  ;;  %s23964_s10 = scalar_lea.vmem %s23950_s29, %s20162_s9  ;;  %s290_s8 = sadd.s32 1, %s23824_s8  }
  0x2c   : >> { %v295_v4 = vld [vmem:[%s23964_s10 + $0x10] sm:$0xff]  ;;  %v293_v5 = vld [vmem:[%s23964_s10] sm:$0xff]  ;;  %v296_v6 = vld [vmem:[%s23964_s10 + $0x18] sm:$0xff]  ;;  %s20043_s22 = scalar_lea.vmem [#allocation2], %s20042_s21  ;;  %p287_p4 = scmp.ge.s32.totalorder %s290_s8, 14  }
  0x2d   : >> { %314 = vperm.xlu1 %23805, %v295_v4   ;;  %304 = vperm.xlu0 %23804, %v293_v5   ;;  %v294_v7 = vld [vmem:[%s23964_s10 + $0x8] sm:$0xff]  ;;  %v23974_v9 = vld [vmem:[%s23964_s10 + $0x20] sm:$0xff]  ;;  %v23979_v10 = vld [vmem:[%s23964_s10 + $0x38] sm:$0xff]  ;;  %s24805_s23 = smov (%p287_p4), 0  }
  0x2e   : >> { %v23971_v8 = vld [vmem:[%s23964_s10 + $0x28] sm:$0xff]  ;;  %v23982_v11 = vld [vmem:[%s23964_s10 + $0x30] sm:$0xff]  ;;  %v20168_v14 = vld [vmem:[%s23964_s10 + $0x19] sm:$0xff] }
  0x2f   : >> { %v20166_v12 = vld [vmem:[%s23964_s10 + $0x9] sm:$0xff]  ;;  %v20165_v13 = vld [vmem:[%s23964_s10 + $0x1] sm:$0xff]  ;;  %v20167_v15 = vld [vmem:[%s23964_s10 + $0x11] sm:$0xff] }
  0x30   : >> { %v23991_v16 = vld [vmem:[%s23964_s10 + $0x29] sm:$0xff]  ;;  %v23994_v17 = vld [vmem:[%s23964_s10 + $0x21] sm:$0xff]  ;;  %v23999_v18 = vld [vmem:[%s23964_s10 + $0x39] sm:$0xff] }
  0x31   : >> { %319 = vperm.xlu1 %23805, %v296_v6   ;;  %309 = vperm.xlu0 %23804, %v294_v7   ;;  %v24002_v19 = vld [vmem:[%s23964_s10 + $0x31] sm:$0xff]  ;;  %v20176_v21 = vld [vmem:[%s23964_s10 + $0x2] sm:$0xff]  ;;  %v20179_v22 = vld [vmem:[%s23964_s10 + $0x1a] sm:$0xff] }
  0x32   : >> { %v20177_v20 = vld [vmem:[%s23964_s10 + $0xa] sm:$0xff]  ;;  %v20178_v23 = vld [vmem:[%s23964_s10 + $0x12] sm:$0xff]  ;;  %v24014_v25 = vld [vmem:[%s23964_s10 + $0x22] sm:$0xff] }
  0x33   : >> { %v24011_v24 = vld [vmem:[%s23964_s10 + $0x2a] sm:$0xff]  ;;  %v20183_v26 = vld [vmem:[%s23964_s10 + $0x3a] sm:$0xff]  ;;  %v20182_v27 = vld [vmem:[%s23964_s10 + $0x32] sm:$0xff] }
  0x34   : >> { %v20188_v28 = vld [vmem:[%s23964_s10 + $0xb] sm:$0xff]  ;;  %v20187_v29 = vld [vmem:[%s23964_s10 + $0x3] sm:$0xff]  ;;  %v20190_v30 = vld [vmem:[%s23964_s10 + $0x1b] sm:$0xff] }
  0x35   : >> { %329 = vperm.xlu1 %23805, %v23971_v8   ;;  %324 = vperm.xlu0 %23804, %v23974_v9   ;;  %v20189_v31 = vld [vmem:[%s23964_s10 + $0x13] sm:$0xff]  ;;  %v24025_v32 = vld [vmem:[%s23964_s10 + $0x2b] sm:$0xff]  ;;  %v24028_v33 = vld [vmem:[%s23964_s10 + $0x23] sm:$0xff] }
  0x36   : >> { %v24033_v34 = vld [vmem:[%s23964_s10 + $0x3b] sm:$0xff]  ;;  %v24036_v35 = vld [vmem:[%s23964_s10 + $0x33] sm:$0xff]  ;;  %v20198_v37 = vld [vmem:[%s23964_s10 + $0x4] sm:$0xff] }
  0x37   : >> { %v20199_v36 = vld [vmem:[%s23964_s10 + $0xc] sm:$0xff]  ;;  %v20201_v38 = vld [vmem:[%s23964_s10 + $0x1c] sm:$0xff]  ;;  %v20200_v39 = vld [vmem:[%s23964_s10 + $0x14] sm:$0xff] }
  0x38   : >> { %v24045_v40 = vld [vmem:[%s23964_s10 + $0x2c] sm:$0xff]  ;;  %v24048_v41 = vld [vmem:[%s23964_s10 + $0x24] sm:$0xff]  ;;  %v24053_v42 = vld [vmem:[%s23964_s10 + $0x3c] sm:$0xff] }
  0x39   : >> { %339 = vperm.xlu1 %23805, %v23979_v10   ;;  %334 = vperm.xlu0 %23804, %v23982_v11   ;;  %v24056_v43 = vld [vmem:[%s23964_s10 + $0x34] sm:$0xff]  ;;  %v24065_v44 = vld [vmem:[%s23964_s10 + $0x48] sm:$0xff]  ;;  %v24068_v45 = vld [vmem:[%s23964_s10 + $0x40] sm:$0xff] }
  0x3a   : >> { %v24073_v46 = vld [vmem:[%s23964_s10 + $0x58] sm:$0xff]  ;;  %v24076_v47 = vld [vmem:[%s23964_s10 + $0x50] sm:$0xff]  ;;  %v24088_v49 = vld [vmem:[%s23964_s10 + $0x41] sm:$0xff] }
  0x3b   : >> { %v24085_v48 = vld [vmem:[%s23964_s10 + $0x49] sm:$0xff]  ;;  %v24093_v50 = vld [vmem:[%s23964_s10 + $0x59] sm:$0xff]  ;;  %v24096_v51 = vld [vmem:[%s23964_s10 + $0x51] sm:$0xff] }
  0x3c   : >> { %v24103_v52 = vld [vmem:[%s23964_s10 + $0x4a] sm:$0xff]  ;;  %v24106_v53 = vld [vmem:[%s23964_s10 + $0x42] sm:$0xff]  ;;  %v24111_v54 = vld [vmem:[%s23964_s10 + $0x5a] sm:$0xff] }
  0x3d   : >> { %383 = vperm.xlu1 %23805, %v20166_v12   ;;  %378 = vperm.xlu0 %23804, %v20165_v13   ;;  %v24114_v55 = vld [vmem:[%s23964_s10 + $0x52] sm:$0xff]  ;;  %v24138_v63 = vld [vmem:[%s23964_s10 + $0x43] sm:$0xff]  ;;  %v24147_v4 = vld [vmem:[%s23964_s10 + $0x5b] sm:$0xff] }
  0x3e   : >> { %v24135_v62 = vld [vmem:[%s23964_s10 + $0x4b] sm:$0xff]  ;;  %v24150_v5 = vld [vmem:[%s23964_s10 + $0x53] sm:$0xff] }
  0x3f   : >> { %v24171_v12 = vld [vmem:[%s23964_s10 + $0x4c] sm:$0xff]  ;;  %v24174_v13 = vld [vmem:[%s23964_s10 + $0x44] sm:$0xff] }
  0x41   : >> { %393 = vperm.xlu1 %23805, %v20168_v14   ;;  %388 = vperm.xlu0 %23804, %v20167_v15  }
  0x45   : >> { %403 = vperm.xlu1 %23805, %v23991_v16   ;;  %398 = vperm.xlu0 %23804, %v23994_v17  }
  0x49   : >> { %413 = vperm.xlu1 %23805, %v23999_v18   ;;  %408 = vperm.xlu0 %23804, %v24002_v19  }
  0x4d   : >> { %457 = vperm.xlu1 %23805, %v20177_v20   ;;  %452 = vperm.xlu0 %23804, %v20176_v21  }
  0x51   : >> { %467 = vperm.xlu1 %23805, %v20179_v22   ;;  %462 = vperm.xlu0 %23804, %v20178_v23  }
  0x55   : >> { %477 = vperm.xlu1 %23805, %v24011_v24   ;;  %472 = vperm.xlu0 %23804, %v24014_v25  }
  0x59   : >> { %487 = vperm.xlu1 %23805, %v20183_v26   ;;  %482 = vperm.xlu0 %23804, %v20182_v27  }
  0x5d   : >> { %531 = vperm.xlu1 %23805, %v20188_v28   ;;  %526 = vperm.xlu0 %23804, %v20187_v29   ;;  %v24219_v28 = vld [vmem:[%s23964_s10 + $0x78] sm:$0xff]  ;;  %v24222_v29 = vld [vmem:[%s23964_s10 + $0x70] sm:$0xff] }
  0x61   : >> { %541 = vperm.xlu1 %23805, %v20190_v30   ;;  %536 = vperm.xlu0 %23804, %v20189_v31  }
  0x65   : >> { %551 = vperm.xlu1 %23805, %v24025_v32   ;;  %546 = vperm.xlu0 %23804, %v24028_v33  }
  0x69   : >> { %561 = vperm.xlu1 %23805, %v24033_v34   ;;  %556 = vperm.xlu0 %23804, %v24036_v35  }
  0x6d   : >> { %605 = vperm.xlu1 %23805, %v20199_v36   ;;  %600 = vperm.xlu0 %23804, %v20198_v37   ;;  %v24243_v36 = vld [vmem:[%s23964_s10 + $0x69] sm:$0xff]  ;;  %v24246_v37 = vld [vmem:[%s23964_s10 + $0x61] sm:$0xff] }
  0x71   : >> { %615 = vperm.xlu1 %23805, %v20201_v38   ;;  %610 = vperm.xlu0 %23804, %v20200_v39  }
  0x75   : >> { %625 = vperm.xlu1 %23805, %v24045_v40   ;;  %620 = vperm.xlu0 %23804, %v24048_v41  }
  0x79   : >> { %635 = vperm.xlu1 %23805, %v24053_v42   ;;  %630 = vperm.xlu0 %23804, %v24056_v43  }
  0x7d   : >> { %679 = vperm.xlu1 %23805, %v23971_v8   ;;  %674 = vperm.xlu0 %23804, %v23974_v9  }
  0x81   : >> { %689 = vperm.xlu1 %23805, %v23979_v10   ;;  %684 = vperm.xlu0 %23804, %v23982_v11  }
  0x85   : >> { %699 = vperm.xlu1 %23805, %v24065_v44   ;;  %694 = vperm.xlu0 %23804, %v24068_v45  }
  0x89   : >> { %709 = vperm.xlu1 %23805, %v24073_v46   ;;  %704 = vperm.xlu0 %23804, %v24076_v47  }
  0x8d   : >> { %753 = vperm.xlu1 %23805, %v23991_v16   ;;  %748 = vperm.xlu0 %23804, %v23994_v17   ;;  %v24183_v16 = vld [vmem:[%s23964_s10 + $0x5c] sm:$0xff]  ;;  %v24186_v17 = vld [vmem:[%s23964_s10 + $0x54] sm:$0xff] }
  0x91   : >> { %763 = vperm.xlu1 %23805, %v23999_v18   ;;  %758 = vperm.xlu0 %23804, %v24002_v19  }
  0x95   : >> { %773 = vperm.xlu1 %23805, %v24085_v48   ;;  %768 = vperm.xlu0 %23804, %v24088_v49  }
  0x99   : >> { %783 = vperm.xlu1 %23805, %v24093_v50   ;;  %778 = vperm.xlu0 %23804, %v24096_v51  }
  0x9d   : >> { %827 = vperm.xlu1 %23805, %v24011_v24   ;;  %822 = vperm.xlu0 %23804, %v24014_v25   ;;  %v24207_v24 = vld [vmem:[%s23964_s10 + $0x68] sm:$0xff]  ;;  %v24210_v25 = vld [vmem:[%s23964_s10 + $0x60] sm:$0xff] }
  0xa1   : >> { %837 = vperm.xlu1 %23805, %v20183_v26   ;;  %832 = vperm.xlu0 %23804, %v20182_v27  }
  0xa5   : >> { %847 = vperm.xlu1 %23805, %v24103_v52   ;;  %842 = vperm.xlu0 %23804, %v24106_v53  }
  0xa8   : >> { %v24116_v56 = vpop.permute.xlu1 %314  ;;  %v24118_v57 = vpop.permute.xlu0 %304 }
  0xa9   : >> { %857 = vperm.xlu1 %23805, %v24111_v54   ;;  %852 = vperm.xlu0 %23804, %v24114_v55  }
  0xac   : >> { %v24122_v58 = vpop.permute.xlu1 %319  ;;  %v24124_v59 = vpop.permute.xlu0 %309 }
  0xad   : >> { %901 = vperm.xlu1 %23805, %v24025_v32   ;;  %896 = vperm.xlu0 %23804, %v24028_v33  }
  0xb0   : >> { %v24128_v60 = vpop.permute.xlu1 %329  ;;  %v24130_v61 = vpop.permute.xlu0 %324 }
  0xb1   : >> { %911 = vperm.xlu1 %23805, %v24033_v34   ;;  %906 = vperm.xlu0 %23804, %v24036_v35  }
  0xb4   : >> { %v24140_v1 = vpop.permute.xlu1 %339  ;;  %v24142_v3 = vpop.permute.xlu0 %334 }
  0xb5   : >> { %921 = vperm.xlu1 %23805, %v24135_v62   ;;  %916 = vperm.xlu0 %23804, %v24138_v63  }
  0xb8   : >> { %v24152_v6 = vpop.permute.xlu1 %383  ;;  %v24154_v7 = vpop.permute.xlu0 %378 }
  0xb9   : >> { %931 = vperm.xlu1 %23805, %v24147_v4   ;;  %926 = vperm.xlu0 %23804, %v24150_v5  }
  0xbc   : >> { %v24158_v8 = vpop.permute.xlu1 %393  ;;  %v24160_v9 = vpop.permute.xlu0 %388 }
  0xbd   : >> { %975 = vperm.xlu1 %23805, %v24045_v40   ;;  %970 = vperm.xlu0 %23804, %v24048_v41   ;;  %v24255_v40 = vld [vmem:[%s23964_s10 + $0x79] sm:$0xff]  ;;  %v24258_v41 = vld [vmem:[%s23964_s10 + $0x71] sm:$0xff] }
  0xc0   : >> { %v24164_v10 = vpop.permute.xlu1 %403  ;;  %v24166_v11 = vpop.permute.xlu0 %398 }
  0xc1   : >> { %985 = vperm.xlu1 %23805, %v24053_v42   ;;  %980 = vperm.xlu0 %23804, %v24056_v43  }
  0xc4   : >> { %v24176_v14 = vpop.permute.xlu1 %413  ;;  %v24178_v15 = vpop.permute.xlu0 %408 }
  0xc5   : >> { %995 = vperm.xlu1 %23805, %v24171_v12   ;;  %990 = vperm.xlu0 %23804, %v24174_v13  }
  0xc8   : >> { %v24188_v18 = vpop.permute.xlu1 %457  ;;  %v24190_v19 = vpop.permute.xlu0 %452 }
  0xc9   : >> { %1005 = vperm.xlu1 %23805, %v24183_v16   ;;  %1000 = vperm.xlu0 %23804, %v24186_v17  }
  0xcc   : >> { %v24194_v20 = vpop.permute.xlu1 %467  ;;  %v24196_v21 = vpop.permute.xlu0 %462 }
  0xcd   : >> { %1049 = vperm.xlu1 %23805, %v24065_v44   ;;  %1044 = vperm.xlu0 %23804, %v24068_v45  }
  0xd0   : >> { %v24200_v22 = vpop.permute.xlu1 %477  ;;  %v24202_v23 = vpop.permute.xlu0 %472 }
  0xd1   : >> { %1059 = vperm.xlu1 %23805, %v24073_v46   ;;  %1054 = vperm.xlu0 %23804, %v24076_v47  }
  0xd4   : >> { %v24212_v26 = vpop.permute.xlu1 %487  ;;  %v24214_v27 = vpop.permute.xlu0 %482 }
  0xd5   : >> { %1069 = vperm.xlu1 %23805, %v24207_v24   ;;  %1064 = vperm.xlu0 %23804, %v24210_v25  }
  0xd8   : >> { %v24224_v30 = vpop.permute.xlu1 %531  ;;  %v24226_v31 = vpop.permute.xlu0 %526 }
  0xd9   : >> { %1079 = vperm.xlu1 %23805, %v24219_v28   ;;  %1074 = vperm.xlu0 %23804, %v24222_v29  }
  0xdc   : >> { %v24230_v32 = vpop.permute.xlu1 %541  ;;  %v24232_v33 = vpop.permute.xlu0 %536 }
  0xdd   : >> { %1123 = vperm.xlu1 %23805, %v24085_v48   ;;  %1118 = vperm.xlu0 %23804, %v24088_v49   ;;  %v24279_v48 = vld [vmem:[%s23964_s10 + $0x6a] sm:$0xff]  ;;  %v24282_v49 = vld [vmem:[%s23964_s10 + $0x62] sm:$0xff] }
  0xe0   : >> { %v24236_v34 = vpop.permute.xlu1 %551  ;;  %v24238_v35 = vpop.permute.xlu0 %546 }
  0xe1   : >> { %1133 = vperm.xlu1 %23805, %v24093_v50   ;;  %1128 = vperm.xlu0 %23804, %v24096_v51  }
  0xe4   : >> { %v24248_v38 = vpop.permute.xlu1 %561  ;;  %v24250_v39 = vpop.permute.xlu0 %556 }
  0xe5   : >> { %1143 = vperm.xlu1 %23805, %v24243_v36   ;;  %1138 = vperm.xlu0 %23804, %v24246_v37  }
  0xe8   : >> { %v24260_v42 = vpop.permute.xlu1 %605  ;;  %v24262_v43 = vpop.permute.xlu0 %600 }
  0xe9   : >> { %1153 = vperm.xlu1 %23805, %v24255_v40   ;;  %1148 = vperm.xlu0 %23804, %v24258_v41  }
  0xec   : >> { %v24266_v44 = vpop.permute.xlu1 %615  ;;  %v24268_v45 = vpop.permute.xlu0 %610 }
  0xed   : >> { %1197 = vperm.xlu1 %23805, %v24103_v52   ;;  %1192 = vperm.xlu0 %23804, %v24106_v53   ;;  %v24291_v52 = vld [vmem:[%s23964_s10 + $0x7a] sm:$0xff]  ;;  %v24294_v53 = vld [vmem:[%s23964_s10 + $0x72] sm:$0xff] }
  0xf0   : >> { %v24272_v46 = vpop.permute.xlu1 %625  ;;  %v24274_v47 = vpop.permute.xlu0 %620 }
  0xf1   : >> { %28693 = vst [vmem:[#allocation7_spill] sm:$0xff] %v24274_v47  ;;  %1207 = vperm.xlu1 %23805, %v24111_v54   ;;  %1202 = vperm.xlu0 %23804, %v24114_v55  }
  0xf4   : >> { %v24284_v50 = vpop.permute.xlu1 %635  ;;  %v24286_v51 = vpop.permute.xlu0 %630 }
  0xf5   : >> { %28694 = vst [vmem:[#allocation8_spill] sm:$0xff] %v24284_v50  ;;  %28695 = vst [vmem:[#allocation9_spill] sm:$0xff] %v24286_v51  ;;  %1217 = vperm.xlu1 %23805, %v24279_v48   ;;  %1212 = vperm.xlu0 %23804, %v24282_v49  }
  0xf8   : >> { %v24296_v54 = vpop.permute.xlu1 %679  ;;  %v24298_v55 = vpop.permute.xlu0 %674 }
  0xf9   : >> { %28696 = vst [vmem:[#allocation10_spill] sm:$0xff] %v24296_v54  ;;  %28697 = vst [vmem:[#allocation11_spill] sm:$0xff] %v24298_v55  ;;  %1227 = vperm.xlu1 %23805, %v24291_v52   ;;  %1222 = vperm.xlu0 %23804, %v24294_v53   ;;  %v24315_v55 = vld [vmem:[%s23964_s10 + $0x6b] sm:$0xff]  ;;  %v24318_v54 = vld [vmem:[%s23964_s10 + $0x63] sm:$0xff] }
  0xfc   : >> { %v24302_v2 = vpop.permute.xlu1 %689  ;;  %v24304_v0 = vpop.permute.xlu0 %684 }
  0xfd   : >> { %28698 = vst [vmem:[#allocation12_spill] sm:$0xff] %v24302_v2  ;;  %28699 = vst [vmem:[#allocation13_spill] sm:$0xff] %v24304_v0  ;;  %1271 = vperm.xlu1 %23805, %v24135_v62   ;;  %1266 = vperm.xlu0 %23804, %v24138_v63   ;;  %v24327_v62 = vld [vmem:[%s23964_s10 + $0x7b] sm:$0xff]  ;;  %v24330_v63 = vld [vmem:[%s23964_s10 + $0x73] sm:$0xff] }
 0x100   : >> { %v24308_v51 = vpop.permute.xlu1 %699  ;;  %v24310_v50 = vpop.permute.xlu0 %694 }
 0x101   : >> { %28700 = vst [vmem:[#allocation14_spill] sm:$0xff] %v24308_v51  ;;  %28701 = vst [vmem:[#allocation15_spill] sm:$0xff] %v24310_v50  ;;  %1281 = vperm.xlu1 %23805, %v24147_v4   ;;  %1276 = vperm.xlu0 %23804, %v24150_v5  }
 0x104   : >> { %v24320_v47 = vpop.permute.xlu1 %709  ;;  %v24322_v2 = vpop.permute.xlu0 %704 }
 0x105   : >> { %28702 = vst [vmem:[#allocation16_spill] sm:$0xff] %v24320_v47  ;;  %28703 = vst [vmem:[#allocation17_spill] sm:$0xff] %v24322_v2  ;;  %1291 = vperm.xlu1 %23805, %v24315_v55   ;;  %1286 = vperm.xlu0 %23804, %v24318_v54  }
 0x108   : >> { %v24332_v4 = vpop.permute.xlu1 %753  ;;  %v24334_v5 = vpop.permute.xlu0 %748 }
 0x109   : >> { %28704 = vst [vmem:[#allocation18_spill] sm:$0xff] %v24332_v4  ;;  %28705 = vst [vmem:[#allocation19_spill] sm:$0xff] %v24334_v5  ;;  %1301 = vperm.xlu1 %23805, %v24327_v62   ;;  %1296 = vperm.xlu0 %23804, %v24330_v63   ;;  %v24351_v5 = vld [vmem:[%s23964_s10 + $0x6c] sm:$0xff]  ;;  %v24354_v4 = vld [vmem:[%s23964_s10 + $0x64] sm:$0xff] }
 0x10c   : >> { %v24338_v2 = vpop.permute.xlu1 %763  ;;  %v24340_v47 = vpop.permute.xlu0 %758 }
 0x10d   : >> { %28706 = vst [vmem:[#allocation20_spill] sm:$0xff] %v24338_v2  ;;  %28707 = vst [vmem:[#allocation21_spill] sm:$0xff] %v24340_v47  ;;  %1345 = vperm.xlu1 %23805, %v24171_v12   ;;  %1340 = vperm.xlu0 %23804, %v24174_v13   ;;  %v24363_v12 = vld [vmem:[%s23964_s10 + $0x7c] sm:$0xff]  ;;  %v24366_v13 = vld [vmem:[%s23964_s10 + $0x74] sm:$0xff] }
 0x110   : >> { %v24344_v50 = vpop.permute.xlu1 %773  ;;  %v24346_v51 = vpop.permute.xlu0 %768 }
 0x111   : >> { %28708 = vst [vmem:[#allocation22_spill] sm:$0xff] %v24344_v50  ;;  %28709 = vst [vmem:[#allocation23_spill] sm:$0xff] %v24346_v51  ;;  %1355 = vperm.xlu1 %23805, %v24183_v16   ;;  %1350 = vperm.xlu0 %23804, %v24186_v17  }
 0x114   : >> { %v24356_v0 = vpop.permute.xlu1 %783  ;;  %v24358_v2 = vpop.permute.xlu0 %778 }
 0x115   : >> { %28710 = vst [vmem:[#allocation24_spill] sm:$0xff] %v24356_v0  ;;  %28711 = vst [vmem:[#allocation25_spill] sm:$0xff] %v24358_v2  ;;  %1365 = vperm.xlu1 %23805, %v24351_v5   ;;  %1360 = vperm.xlu0 %23804, %v24354_v4  }
 0x118   : >> { %v24368_v16 = vpop.permute.xlu1 %827  ;;  %v24370_v17 = vpop.permute.xlu0 %822 }
 0x119   : >> { %28712 = vst [vmem:[#allocation26_spill] sm:$0xff] %v24368_v16  ;;  %28713 = vst [vmem:[#allocation27_spill] sm:$0xff] %v24370_v17  ;;  %1375 = vperm.xlu1 %23805, %v24363_v12   ;;  %1370 = vperm.xlu0 %23804, %v24366_v13   ;;  %v24387_v17 = vld [vmem:[%s23964_s10 + $0x88] sm:$0xff]  ;;  %v24390_v16 = vld [vmem:[%s23964_s10 + $0x80] sm:$0xff] }
 0x11c   : >> { %v24374_v2 = vpop.permute.xlu1 %837  ;;  %v24376_v0 = vpop.permute.xlu0 %832 }
 0x11d   : >> { %28714 = vst [vmem:[#allocation28_spill] sm:$0xff] %v24374_v2  ;;  %1419 = vperm.xlu1 %23805, %v24207_v24   ;;  %1414 = vperm.xlu0 %23804, %v24210_v25   ;;  %v24399_v24 = vld [vmem:[%s23964_s10 + $0x98] sm:$0xff]  ;;  %v24402_v25 = vld [vmem:[%s23964_s10 + $0x90] sm:$0xff] }
 0x11e   : >> { %28719 = vst [vmem:[#allocation33_spill] sm:$0xff] %v24399_v24  ;;  %28720 = vst [vmem:[#allocation34_spill] sm:$0xff] %v24402_v25 }
 0x120   : >> { %v24380_v51 = vpop.permute.xlu1 %847  ;;  %v24382_v50 = vpop.permute.xlu0 %842 }
 0x121   : >> { %28715 = vst [vmem:[#allocation29_spill] sm:$0xff] %v24380_v51  ;;  %28716 = vst [vmem:[#allocation30_spill] sm:$0xff] %v24382_v50  ;;  %1429 = vperm.xlu1 %23805, %v24219_v28   ;;  %1424 = vperm.xlu0 %23804, %v24222_v29  }
 0x124   : >> { %v24392_v47 = vpop.permute.xlu1 %857  ;;  %v24394_v2 = vpop.permute.xlu0 %852 }
 0x125   : >> { %28717 = vst [vmem:[#allocation31_spill] sm:$0xff] %v24392_v47  ;;  %28718 = vst [vmem:[#allocation32_spill] sm:$0xff] %v24394_v2  ;;  %1439 = vperm.xlu1 %23805, %v24387_v17   ;;  %1434 = vperm.xlu0 %23804, %v24390_v16  }
 0x128   : >> { %v24404_v28 = vpop.permute.xlu1 %901  ;;  %v24406_v29 = vpop.permute.xlu0 %896 }
 0x129   : >> { %28721 = vst [vmem:[#allocation35_spill] sm:$0xff] %v24406_v29  ;;  %1449 = vperm.xlu1 %23805, %v24399_v24   ;;  %1444 = vperm.xlu0 %23804, %v24402_v25   ;;  %v24423_v29 = vld [vmem:[%s23964_s10 + $0x89] sm:$0xff]  ;;  %v24426_v25 = vld [vmem:[%s23964_s10 + $0x81] sm:$0xff] }
 0x12a   : >> { %28724 = vst [vmem:[#allocation38_spill] sm:$0xff] %v24423_v29  ;;  %28725 = vst [vmem:[#allocation39_spill] sm:$0xff] %v24426_v25 }
 0x12c   : >> { %v24410_v2 = vpop.permute.xlu1 %911  ;;  %v24412_v47 = vpop.permute.xlu0 %906 }
 0x12d   : >> { %28722 = vst [vmem:[#allocation36_spill] sm:$0xff] %v24410_v2  ;;  %1493 = vperm.xlu1 %23805, %v24243_v36   ;;  %1488 = vperm.xlu0 %23804, %v24246_v37   ;;  %v24435_v36 = vld [vmem:[%s23964_s10 + $0x99] sm:$0xff]  ;;  %v24438_v37 = vld [vmem:[%s23964_s10 + $0x91] sm:$0xff] }
 0x12e   : >> { %28728 = vst [vmem:[#allocation42_spill] sm:$0xff] %v24435_v36  ;;  %28729 = vst [vmem:[#allocation43_spill] sm:$0xff] %v24438_v37 }
 0x130   : >> { %v24416_v50 = vpop.permute.xlu1 %921  ;;  %v24418_v51 = vpop.permute.xlu0 %916 }
 0x131   : >> { %28723 = vst [vmem:[#allocation37_spill] sm:$0xff] %v24418_v51  ;;  %1503 = vperm.xlu1 %23805, %v24255_v40   ;;  %1498 = vperm.xlu0 %23804, %v24258_v41  }
 0x134   : >> { %v24428_v24 = vpop.permute.xlu1 %931  ;;  %v24430_v2 = vpop.permute.xlu0 %926 }
 0x135   : >> { %28726 = vst [vmem:[#allocation40_spill] sm:$0xff] %v24428_v24  ;;  %28727 = vst [vmem:[#allocation41_spill] sm:$0xff] %v24430_v2  ;;  %1513 = vperm.xlu1 %23805, %v24423_v29   ;;  %1508 = vperm.xlu0 %23804, %v24426_v25  }
 0x138   : >> { %v24440_v40 = vpop.permute.xlu1 %975  ;;  %v24442_v41 = vpop.permute.xlu0 %970 }
 0x139   : >> { %28730 = vst [vmem:[#allocation44_spill] sm:$0xff] %v24440_v40  ;;  %28731 = vst [vmem:[#allocation45_spill] sm:$0xff] %v24442_v41  ;;  %1523 = vperm.xlu1 %23805, %v24435_v36   ;;  %1518 = vperm.xlu0 %23804, %v24438_v37   ;;  %v24459_v36 = vld [vmem:[%s23964_s10 + $0x8a] sm:$0xff]  ;;  %v24462_v37 = vld [vmem:[%s23964_s10 + $0x82] sm:$0xff] }
 0x13a   : >> { %28736 = vst [vmem:[#allocation50_spill] sm:$0xff] %v24459_v36  ;;  %28737 = vst [vmem:[#allocation51_spill] sm:$0xff] %v24462_v37 }
 0x13c   : >> { %v24446_v2 = vpop.permute.xlu1 %985  ;;  %v24448_v29 = vpop.permute.xlu0 %980 }
 0x13d   : >> { %28732 = vst [vmem:[#allocation46_spill] sm:$0xff] %v24446_v2  ;;  %28733 = vst [vmem:[#allocation47_spill] sm:$0xff] %v24448_v29  ;;  %1567 = vperm.xlu1 %23805, %v24279_v48   ;;  %1562 = vperm.xlu0 %23804, %v24282_v49   ;;  %v24471_v48 = vld [vmem:[%s23964_s10 + $0x9a] sm:$0xff]  ;;  %v24474_v49 = vld [vmem:[%s23964_s10 + $0x92] sm:$0xff] }
 0x13e   : >> { %28740 = vst [vmem:[#allocation54_spill] sm:$0xff] %v24471_v48  ;;  %28741 = vst [vmem:[#allocation55_spill] sm:$0xff] %v24474_v49 }
 0x140   : >> { %v24452_v25 = vpop.permute.xlu1 %995  ;;  %v24454_v24 = vpop.permute.xlu0 %990 }
 0x141   : >> { %28734 = vst [vmem:[#allocation48_spill] sm:$0xff] %v24452_v25  ;;  %28735 = vst [vmem:[#allocation49_spill] sm:$0xff] %v24454_v24  ;;  %1577 = vperm.xlu1 %23805, %v24291_v52   ;;  %1572 = vperm.xlu0 %23804, %v24294_v53  }
 0x144   : >> { %v24464_v41 = vpop.permute.xlu1 %1005  ;;  %v24466_v2 = vpop.permute.xlu0 %1000 }
 0x145   : >> { %28738 = vst [vmem:[#allocation52_spill] sm:$0xff] %v24464_v41  ;;  %28739 = vst [vmem:[#allocation53_spill] sm:$0xff] %v24466_v2  ;;  %1587 = vperm.xlu1 %23805, %v24459_v36   ;;  %1582 = vperm.xlu0 %23804, %v24462_v37   ;;  %v20163_v37 = vld [vmem:[%s28671_s1] ss:$0 sm:$0xff] }
 0x148   : >> { %v24476_v52 = vpop.permute.xlu1 %1049  ;;  %v24478_v53 = vpop.permute.xlu0 %1044 }
 0x149   : >> { %28742 = vst [vmem:[#allocation56_spill] sm:$0xff] %v24476_v52  ;;  %28743 = vst [vmem:[#allocation57_spill] sm:$0xff] %v24478_v53  ;;  %1597 = vperm.xlu1 %23805, %v24471_v48   ;;  %1592 = vperm.xlu0 %23804, %v24474_v49   ;;  %v20174_v49 = vld [vmem:[%s28671_s1 + $0x1] ss:$0 sm:$0xff]  ;;  %v24501_v48 = vld [vmem:[%s23964_s10 + $0x8b] sm:$0xff] }
 0x14a   : >> { %28748 = vst [vmem:[#allocation62_spill] sm:$0xff] %v24501_v48  ;;  %v422_v24 = vmul.f32 %v20174_v49, %v24154_v7  ;;  %v24531_v7 = vld [vmem:[%s23964_s10 + $0x93] sm:$0xff] }
 0x14c   : >> { %v24482_v41 = vpop.permute.xlu1 %1059  ;;  %v24484_v2 = vpop.permute.xlu0 %1054 }
 0x14d   : >> { %28744 = vst [vmem:[#allocation58_spill] sm:$0xff] %v24482_v41  ;;  %28745 = vst [vmem:[#allocation59_spill] sm:$0xff] %v24484_v2  ;;  %1641 = vperm.xlu1 %23805, %v24315_v55   ;;  %1636 = vperm.xlu0 %23804, %v24318_v54   ;;  %v24504_v55 = vld [vmem:[%s23964_s10 + $0x83] sm:$0xff]  ;;  %v350_v54 = vmul.f32 %v20163_v37, %v24116_v56  ;;  %v348_v2 = vmul.f32 %v20163_v37, %v24118_v57  ;;  %v20185_v57 = vld [vmem:[%s28671_s1 + $0x2] ss:$0 sm:$0xff] }
 0x14e   : >> { %28749 = vst [vmem:[#allocation63_spill] sm:$0xff] %v24504_v55  ;;  %v423_v41 = vmul.f32 %v20174_v49, %v24152_v6  ;;  %v425_v56 = vmul.f32 %v20174_v49, %v24158_v8  ;;  %v424_v6 = vmul.f32 %v20174_v49, %v24160_v9  ;;  %v354_v8 = vmul.f32 %v20163_v37, %v24142_v3 }
 0x14f   : >> { %v499_v9 = vmul.f32 %v20185_v57, %v24194_v20  ;;  %v430_v40 = vadd.f32 %v422_v24, %v348_v2  ;;  %v498_v3 = vmul.f32 %v20185_v57, %v24196_v21  ;;  %v503_v24 = vmul.f32 %v20185_v57, %v24212_v26 }
 0x150   : >> { %v24491_v36 = vpop.permute.xlu1 %1069  ;;  %v24493_v52 = vpop.permute.xlu0 %1064 }
 0x151   : >> { %28746 = vst [vmem:[#allocation60_spill] sm:$0xff] %v24491_v36  ;;  %28747 = vst [vmem:[#allocation61_spill] sm:$0xff] %v24493_v52  ;;  %1651 = vperm.xlu1 %23805, %v24327_v62   ;;  %1646 = vperm.xlu0 %23804, %v24330_v63   ;;  %v351_v36 = vmul.f32 %v20163_v37, %v24122_v58  ;;  %v349_v52 = vmul.f32 %v20163_v37, %v24124_v59 }
 0x152   : >> { %v353_v63 = vmul.f32 %v20163_v37, %v24128_v60  ;;  %v352_v58 = vmul.f32 %v20163_v37, %v24130_v61  ;;  %v355_v59 = vmul.f32 %v20163_v37, %v24140_v1  ;;  %v427_v60 = vmul.f32 %v20174_v49, %v24164_v10 }
 0x153   : >> { %v431_v25 = vadd.f32 %v423_v41, %v349_v52  ;;  %v497_v61 = vmul.f32 %v20185_v57, %v24188_v18  ;;  %v496_v1 = vmul.f32 %v20185_v57, %v24190_v19  ;;  %v433_v51 = vadd.f32 %v425_v56, %v351_v36  ;;  %v20196_v19 = vld [vmem:[%s28671_s1 + $0x3] ss:$0 sm:$0xff] }
 0x154   : >> { %v24511_v53 = vpop.permute.xlu1 %1079  ;;  %v24513_v62 = vpop.permute.xlu0 %1074  ;;  %v500_v18 = vmul.f32 %v20185_v57, %v24202_v23  ;;  %v571_v23 = vmul.f32 %v20196_v19, %v24224_v30  ;;  %v574_v30 = vmul.f32 %v20196_v19, %v24238_v35  ;;  %v576_v56 = vmul.f32 %v20196_v19, %v24250_v39 }
 0x155   : >> { %28750 = vst [vmem:[#allocation64_spill] sm:$0xff] %v24511_v53  ;;  %28751 = vst [vmem:[#allocation65_spill] sm:$0xff] %v24513_v62  ;;  %1661 = vperm.xlu1 %23805, %v24501_v48   ;;  %1656 = vperm.xlu0 %23804, %v24504_v55   ;;  %v24528_v62 = vld [vmem:[%s23964_s10 + $0x9b] sm:$0xff]  ;;  %v426_v53 = vmul.f32 %v20174_v49, %v24166_v11  ;;  %v429_v48 = vmul.f32 %v20174_v49, %v24176_v14 }
 0x156   : >> { %v428_v55 = vmul.f32 %v20174_v49, %v24178_v15  ;;  %v432_v11 = vadd.f32 %v424_v6, %v350_v54  ;;  %v435_v14 = vadd.f32 %v427_v60, %v353_v63  ;;  %v501_v15 = vmul.f32 %v20185_v57, %v24200_v22  ;;  %v24589_v6 = vld [vmem:[%s23964_s10 + $0x84] sm:$0xff] }
 0x157   : >> { %v434_v20 = vadd.f32 %v426_v53, %v352_v58  ;;  %v437_v37 = vadd.f32 %v429_v48, %v355_v59  ;;  %v505_v21 = vadd.f32 %v497_v61, %v431_v25  ;;  %v504_v36 = vadd.f32 %v496_v1, %v430_v40  ;;  %v20207_v48 = vld [vmem:[%s28671_s1 + $0x4] ss:$0 sm:$0xff]  ;;  %v24586_v59 = vld [vmem:[%s23964_s10 + $0x8c] sm:$0xff] }
 0x158   : >> { %v24540_v10 = vpop.permute.xlu1 %1123  ;;  %v24542_v29 = vpop.permute.xlu0 %1118  ;;  %v436_v2 = vadd.f32 %v428_v55, %v354_v8  ;;  %v507_v41 = vadd.f32 %v499_v9, %v433_v51  ;;  %v502_v49 = vmul.f32 %v20185_v57, %v24214_v27  ;;  %v506_v22 = vadd.f32 %v498_v3, %v432_v11  ;;  %v28753_v9 = vld [vmem:[#allocation8_spill] sm:$0xff] }
 0x159   : >> { %1671 = vperm.xlu1 %23805, %v24528_v62   ;;  %1666 = vperm.xlu0 %23804, %v24531_v7   ;;  %v570_v63 = vmul.f32 %v20196_v19, %v24226_v31  ;;  %v509_v26 = vadd.f32 %v501_v15, %v435_v14  ;;  %v508_v51 = vadd.f32 %v500_v18, %v434_v20  ;;  %v28754_v15 = vld [vmem:[#allocation9_spill] sm:$0xff] }
 0x15a   : >> { %v573_v27 = vmul.f32 %v20196_v19, %v24230_v32  ;;  %v572_v25 = vmul.f32 %v20196_v19, %v24232_v33  ;;  %v511_v40 = vadd.f32 %v503_v24, %v437_v37  ;;  %v575_v53 = vmul.f32 %v20196_v19, %v24236_v34  ;;  %v20229_v37 = vld [vmem:[%s28671_s1 + $0x6] ss:$0 sm:$0xff] }
 0x15b   : >> { %v577_v31 = vmul.f32 %v20196_v19, %v24248_v38  ;;  %v510_v55 = vadd.f32 %v502_v49, %v436_v2  ;;  %v579_v33 = vadd.f32 %v571_v23, %v505_v21  ;;  %v578_v58 = vadd.f32 %v570_v63, %v504_v36  ;;  %v28755_v19 = vld [vmem:[#allocation10_spill] sm:$0xff]  ;;  %v28756_v21 = vld [vmem:[#allocation11_spill] sm:$0xff] }
 0x15c   : >> { %v24554_v52 = vpop.permute.xlu1 %1133  ;;  %v24556_v54 = vpop.permute.xlu0 %1128  ;;  %v647_v34 = vmul.f32 %v20207_v48, %v24266_v44  ;;  %v581_v35 = vadd.f32 %v573_v27, %v507_v41  ;;  %v580_v38 = vadd.f32 %v572_v25, %v506_v22  ;;  %v646_v39 = vmul.f32 %v20207_v48, %v24268_v45  ;;  %v28757_v41 = vld [vmem:[#allocation12_spill] sm:$0xff]  ;;  %v28760_v25 = vld [vmem:[#allocation15_spill] sm:$0xff] }
 0x15d   : >> { %1715 = vperm.xlu1 %23805, %v24351_v5   ;;  %1710 = vperm.xlu0 %23804, %v24354_v4   ;;  %v645_v4 = vmul.f32 %v20207_v48, %v24260_v42  ;;  %v644_v5 = vmul.f32 %v20207_v48, %v24262_v43  ;;  %v649_v42 = vmul.f32 %v20207_v48, %v24272_v46  ;;  %v20218_v43 = vld [vmem:[%s28671_s1 + $0x5] ss:$0 sm:$0xff]  ;;  %v24607_v22 = vld [vmem:[%s23964_s10 + $0x9c] sm:$0xff]  ;;  %v24610_v23 = vld [vmem:[%s23964_s10 + $0x94] sm:$0xff] }
 0x15e   : >> { %v583_v60 = vadd.f32 %v575_v53, %v509_v26  ;;  %v582_v44 = vadd.f32 %v574_v30, %v508_v51  ;;  %v585_v8 = vadd.f32 %v577_v31, %v511_v40  ;;  %v651_v46 = vmul.f32 %v20207_v48, %v28753_v9  ;;  %v28759_v51 = vld [vmem:[#allocation14_spill] sm:$0xff]  ;;  %v28761_v30 = vld [vmem:[#allocation16_spill] sm:$0xff] }
 0x15f   : >> { %v653_v1 = vadd.f32 %v645_v4, %v579_v33  ;;  %v652_v45 = vadd.f32 %v644_v5, %v578_v58  ;;  %v655_v14 = vadd.f32 %v647_v34, %v581_v35  ;;  %v650_v18 = vmul.f32 %v20207_v48, %v28754_v15  ;;  %v28763_v4 = vld [vmem:[#allocation18_spill] sm:$0xff] }
 0x160   : >> { %v24573_v57 = vpop.permute.xlu1 %1143  ;;  %v24575_v32 = vpop.permute.xlu0 %1138  ;;  %v719_v20 = vmul.f32 %v20218_v43, %v28755_v19  ;;  %v654_v2 = vadd.f32 %v646_v39, %v580_v38  ;;  %v657_v24 = vadd.f32 %v649_v42, %v583_v60  ;;  %v718_v36 = vmul.f32 %v20218_v43, %v28756_v21  ;;  %v28764_v38 = vld [vmem:[#allocation19_spill] sm:$0xff]  ;;  %v28767_v15 = vld [vmem:[#allocation22_spill] sm:$0xff] }
 0x161   : >> { %1725 = vperm.xlu1 %23805, %v24363_v12   ;;  %1720 = vperm.xlu0 %23804, %v24366_v13   ;;  %v28752_v12 = vld [vmem:[#allocation7_spill] sm:$0xff]  ;;  %v584_v13 = vadd.f32 %v576_v56, %v510_v55  ;;  %v721_v49 = vmul.f32 %v20218_v43, %v28757_v41  ;;  %v723_v27 = vmul.f32 %v20218_v43, %v28759_v51  ;;  %v28762_v55 = vld [vmem:[#allocation17_spill] sm:$0xff]  ;;  %v28771_v51 = vld [vmem:[#allocation26_spill] sm:$0xff] }
 0x162   : >> { %v648_v61 = vmul.f32 %v20207_v48, %v28752_v12  ;;  %v28758_v48 = vld [vmem:[#allocation13_spill] sm:$0xff]  ;;  %v722_v40 = vmul.f32 %v20218_v43, %v28760_v25  ;;  %v659_v53 = vadd.f32 %v651_v46, %v585_v8  ;;  %v725_v31 = vmul.f32 %v20218_v43, %v28761_v30  ;;  %v28768_v21 = vld [vmem:[#allocation23_spill] sm:$0xff] }
 0x163   : >> { %v720_v26 = vmul.f32 %v20218_v43, %v28758_v48  ;;  %v724_v56 = vmul.f32 %v20218_v43, %v28762_v55  ;;  %v793_v5 = vmul.f32 %v20229_v37, %v28763_v4  ;;  %v658_v34 = vadd.f32 %v650_v18, %v584_v13  ;;  %v28766_v12 = vld [vmem:[#allocation21_spill] sm:$0xff]  ;;  %v28772_v25 = vld [vmem:[#allocation27_spill] sm:$0xff] }
 0x164   : >> { %v24593_v3 = vpop.permute.xlu1 %1153  ;;  %v24595_v11 = vpop.permute.xlu0 %1148  ;;  %v656_v63 = vadd.f32 %v648_v61, %v582_v44  ;;  %v727_v35 = vadd.f32 %v719_v20, %v653_v1  ;;  %v792_v39 = vmul.f32 %v20229_v37, %v28764_v38  ;;  %v726_v42 = vadd.f32 %v718_v36, %v652_v45  ;;  %v28765_v44 = vld [vmem:[#allocation20_spill] sm:$0xff]  ;;  %v20240_v13 = vld [vmem:[%s28671_s1 + $0x7] ss:$0 sm:$0xff] }
 0x165   : >> { %1735 = vperm.xlu1 %23805, %v24586_v59   ;;  %1730 = vperm.xlu0 %23804, %v24589_v6   ;;  %v729_v60 = vadd.f32 %v721_v49, %v655_v14  ;;  %v795_v8 = vmul.f32 %v20229_v37, %v28765_v44  ;;  %v794_v43 = vmul.f32 %v20229_v37, %v28766_v12  ;;  %v28769_v49 = vld [vmem:[#allocation24_spill] sm:$0xff] }
 0x166   : >> { %v728_v61 = vadd.f32 %v720_v26, %v654_v2  ;;  %v731_v9 = vadd.f32 %v723_v27, %v657_v24  ;;  %v730_v46 = vadd.f32 %v722_v40, %v656_v63  ;;  %v797_v19 = vmul.f32 %v20229_v37, %v28767_v15  ;;  %v28770_v24 = vld [vmem:[#allocation25_spill] sm:$0xff]  ;;  %v28777_v38 = vld [vmem:[#allocation32_spill] sm:$0xff] }
 0x167   : >> { %v733_v1 = vadd.f32 %v725_v31, %v659_v53  ;;  %v732_v18 = vadd.f32 %v724_v56, %v658_v34  ;;  %v801_v20 = vadd.f32 %v793_v5, %v727_v35  ;;  %v796_v41 = vmul.f32 %v20229_v37, %v28768_v21  ;;  %v20251_v53 = vld [vmem:[%s28671_s1 + $0x8] ss:$0 sm:$0xff]  ;;  %v28773_v31 = vld [vmem:[#allocation28_spill] sm:$0xff]  ;;  %v28776_v34 = vld [vmem:[#allocation31_spill] sm:$0xff] }
 0x168   : >> { %v24618_v33 = vpop.permute.xlu1 %1197  ;;  %v24620_v58 = vpop.permute.xlu0 %1192  ;;  %v800_v36 = vadd.f32 %v792_v39, %v726_v42  ;;  %v799_v2 = vmul.f32 %v20229_v37, %v28769_v49  ;;  %v798_v63 = vmul.f32 %v20229_v37, %v28770_v24  ;;  %v803_v48 = vadd.f32 %v795_v8, %v729_v60  ;;  %v28774_v37 = vld [vmem:[#allocation29_spill] sm:$0xff] }
 0x169   : >> { %1745 = vperm.xlu1 %23805, %v24607_v22   ;;  %1740 = vperm.xlu0 %23804, %v24610_v23   ;;  %v802_v26 = vadd.f32 %v794_v43, %v728_v61  ;;  %v867_v27 = vmul.f32 %v20240_v13, %v28771_v51  ;;  %v866_v40 = vmul.f32 %v20240_v13, %v28772_v25  ;;  %v28779_v43 = vld [vmem:[#allocation34_spill] sm:$0xff] }
 0x16a   : >> { %v805_v30 = vadd.f32 %v797_v19, %v731_v9  ;;  %v869_v55 = vmul.f32 %v20240_v13, %v28773_v31  ;;  %v868_v56 = vmul.f32 %v20240_v13, %v24376_v0  ;;  %v871_v4 = vmul.f32 %v20240_v13, %v28774_v37  ;;  %v28778_v0 = vld [vmem:[#allocation33_spill] sm:$0xff]  ;;  %v28781_v19 = vld [vmem:[#allocation36_spill] sm:$0xff] }
 0x16b   : >> { %v873_v35 = vmul.f32 %v20240_v13, %v28776_v34  ;;  %v872_v39 = vmul.f32 %v20240_v13, %v28777_v38  ;;  %v807_v44 = vadd.f32 %v799_v2, %v733_v1  ;;  %v806_v8 = vadd.f32 %v798_v63, %v732_v18  ;;  %v28785_v37 = vld [vmem:[#allocation44_spill] sm:$0xff]  ;;  %v28786_v34 = vld [vmem:[#allocation45_spill] sm:$0xff] }
 0x16c   : >> { %v24632_v45 = vpop.permute.xlu1 %1207  ;;  %v24634_v14 = vpop.permute.xlu0 %1202  ;;  %v941_v12 = vmul.f32 %v20251_v53, %v24404_v28  ;;  %v875_v61 = vadd.f32 %v867_v27, %v801_v20  ;;  %v874_v9 = vadd.f32 %v866_v40, %v800_v36  ;;  %v943_v21 = vmul.f32 %v20251_v53, %v28781_v19  ;;  %v20262_v28 = vld [vmem:[%s28671_s1 + $0x9] ss:$0 sm:$0xff]  ;;  %v28782_v40 = vld [vmem:[#allocation37_spill] sm:$0xff] }
 0x16d   : >> { %1789 = vperm.xlu1 %23805, %v24387_v17   ;;  %1784 = vperm.xlu0 %23804, %v24390_v16   ;;  %v804_v17 = vadd.f32 %v796_v41, %v730_v46  ;;  %v28775_v16 = vld [vmem:[#allocation30_spill] sm:$0xff]  ;;  %v28780_v46 = vld [vmem:[#allocation35_spill] sm:$0xff]  ;;  %v877_v49 = vadd.f32 %v869_v55, %v803_v48  ;;  %v876_v24 = vadd.f32 %v868_v56, %v802_v26  ;;  %v28783_v26 = vld [vmem:[#allocation40_spill] sm:$0xff] }
 0x16e   : >> { %v870_v5 = vmul.f32 %v20240_v13, %v28775_v16  ;;  %v940_v15 = vmul.f32 %v20251_v53, %v28780_v46  ;;  %v20379_v41 = vld [vmem:[%s23964_s10 + $0xa8] sm:$0xff]  ;;  %v20378_v13 = vld [vmem:[%s23964_s10 + $0xa0] sm:$0xff]  ;;  %v879_v51 = vadd.f32 %v871_v4, %v805_v30  ;;  %v942_v1 = vmul.f32 %v20251_v53, %v24412_v47  ;;  %v20380_v16 = vld [vmem:[%s23964_s10 + $0xb0] sm:$0xff] }
 0x16f   : >> { %v881_v20 = vadd.f32 %v873_v35, %v807_v44  ;;  %v880_v36 = vadd.f32 %v872_v39, %v806_v8  ;;  %v945_v2 = vmul.f32 %v20251_v53, %v24416_v50  ;;  %v949_v25 = vadd.f32 %v941_v12, %v875_v61  ;;  %v28784_v55 = vld [vmem:[#allocation41_spill] sm:$0xff]  ;;  %v28787_v35 = vld [vmem:[#allocation46_spill] sm:$0xff]  ;;  %v28788_v39 = vld [vmem:[#allocation47_spill] sm:$0xff] }
 0x170   : >> { %v24651_v42 = vpop.permute.xlu1 %1217  ;;  %v24653_v60 = vpop.permute.xlu0 %1212  ;;  %v878_v18 = vadd.f32 %v870_v5, %v804_v17  ;;  %v944_v48 = vmul.f32 %v20251_v53, %v28782_v40  ;;  %v947_v30 = vmul.f32 %v20251_v53, %v28783_v26  ;;  %v948_v47 = vadd.f32 %v940_v15, %v874_v9  ;;  %v20381_v17 = vld [vmem:[%s23964_s10 + $0xb8] sm:$0xff]  ;;  %v20273_v8 = vld [vmem:[%s28671_s1 + $0xa] ss:$0 sm:$0xff]  ;;  %v28790_v61 = vld [vmem:[#allocation49_spill] sm:$0xff] }
 0x171   : >> { %1799 = vperm.xlu1 %23805, %v28778_v0   ;;  %1794 = vperm.xlu0 %23804, %v28779_v43   ;;  %v951_v31 = vadd.f32 %v943_v21, %v877_v49  ;;  %v946_v56 = vmul.f32 %v20251_v53, %v28784_v55  ;;  %v1015_v4 = vmul.f32 %v20262_v28, %v28785_v37  ;;  %v28789_v0 = vld [vmem:[#allocation48_spill] sm:$0xff] }
 0x172   : >> { %v950_v5 = vadd.f32 %v942_v1, %v876_v24  ;;  %v1014_v50 = vmul.f32 %v20262_v28, %v28786_v34  ;;  %v1017_v38 = vmul.f32 %v20262_v28, %v28787_v35  ;;  %v1016_v44 = vmul.f32 %v20262_v28, %v28788_v39  ;;  %v28791_v9 = vld [vmem:[#allocation52_spill] sm:$0xff] }
 0x173   : >> { %v953_v12 = vadd.f32 %v945_v2, %v879_v51  ;;  %v1019_v43 = vmul.f32 %v20262_v28, %v28789_v0  ;;  %v1018_v53 = vmul.f32 %v20262_v28, %v28790_v61  ;;  %v1021_v46 = vmul.f32 %v20262_v28, %v28791_v9  ;;  %v28793_v40 = vld [vmem:[#allocation56_spill] sm:$0xff]  ;;  %v28794_v51 = vld [vmem:[#allocation57_spill] sm:$0xff] }
 0x174   : >> { %v1228_v63 = vpop.permute.xlu1 %1227  ;;  %v1223_v27 = vpop.permute.xlu0 %1222  ;;  %v952_v21 = vadd.f32 %v944_v48, %v878_v18  ;;  %v954_v24 = vadd.f32 %v946_v56, %v880_v36  ;;  %v1023_v1 = vadd.f32 %v1015_v4, %v949_v25  ;;  %v1089_v26 = vmul.f32 %v20273_v8, %v28793_v40  ;;  %v28795_v35 = vld [vmem:[#allocation64_spill] sm:$0xff]  ;;  %v28797_v56 = vld [vmem:[#allocation58_spill] sm:$0xff] }
 0x175   : >> { %1809 = vperm.xlu1 %23805, %v20379_v41   ;;  %1804 = vperm.xlu0 %23804, %v20378_v13   ;;  %v955_v41 = vadd.f32 %v947_v30, %v881_v20  ;;  %v28792_v13 = vld [vmem:[#allocation53_spill] sm:$0xff]  ;;  %v1088_v2 = vmul.f32 %v20273_v8, %v28794_v51  ;;  %v1022_v55 = vadd.f32 %v1014_v50, %v948_v47  ;;  %v28798_v47 = vld [vmem:[#allocation59_spill] sm:$0xff]  ;;  %v28803_v51 = vld [vmem:[#allocation42_spill] sm:$0xff] }
 0x176   : >> { %v1020_v49 = vmul.f32 %v20262_v28, %v28792_v13  ;;  %v1025_v37 = vadd.f32 %v1017_v38, %v951_v31  ;;  %v1024_v34 = vadd.f32 %v1016_v44, %v950_v5  ;;  %v1095_v39 = vmul.f32 %v20273_v8, %v28795_v35  ;;  %v28796_v20 = vld [vmem:[#allocation65_spill] sm:$0xff]  ;;  %v20284_v28 = vld [vmem:[%s28671_s1 + $0xb] ss:$0 sm:$0xff] }
 0x177   : >> { %v1027_v0 = vadd.f32 %v1019_v43, %v953_v12  ;;  %v24688_v61 = vadd.f32 %v1018_v53, %v952_v21  ;;  %v1029_v18 = vadd.f32 %v1021_v46, %v955_v41  ;;  %v1094_v48 = vmul.f32 %v20273_v8, %v28796_v20  ;;  %v28801_v12 = vld [vmem:[#allocation60_spill] sm:$0xff]  ;;  %v20295_v21 = vld [vmem:[%s28671_s1 + $0xc] ss:$0 sm:$0xff] }
 0x178   : >> { %v1272_v15 = vpop.permute.xlu1 %1271  ;;  %v24682_v19 = vpop.permute.xlu0 %1266  ;;  %v1028_v30 = vadd.f32 %v1020_v49, %v954_v24  ;;  %v1091_v4 = vmul.f32 %v20273_v8, %v28797_v56  ;;  %v1090_v31 = vmul.f32 %v20273_v8, %v28798_v47  ;;  %v1097_v5 = vadd.f32 %v1089_v26, %v1023_v1  ;;  %v28802_v26 = vld [vmem:[#allocation61_spill] sm:$0xff]  ;;  %v20390_v35 = vld [vmem:[%s23964_s10 + $0xa9] sm:$0xff] }
 0x179   : >> { %1819 = vperm.xlu1 %23805, %v20381_v17   ;;  %1814 = vperm.xlu0 %23804, %v20380_v16   ;;  %v28799_v17 = vld [vmem:[#allocation38_spill] sm:$0xff]  ;;  %v28800_v16 = vld [vmem:[#allocation39_spill] sm:$0xff]  ;;  %v1096_v50 = vadd.f32 %v1088_v2, %v1022_v55  ;;  %v1169_v38 = vmul.f32 %v20284_v28, %v24593_v3  ;;  %v1168_v44 = vmul.f32 %v20284_v28, %v24595_v11 }
 0x17a   : >> { %v1093_v43 = vmul.f32 %v20273_v8, %v28801_v12  ;;  %v1103_v53 = vadd.f32 %v1095_v39, %v1029_v18  ;;  %v1163_v9 = vmul.f32 %v20284_v28, %v24540_v10  ;;  %v1162_v46 = vmul.f32 %v20284_v28, %v24542_v29  ;;  %v20306_v29 = vld [vmem:[%s28671_s1 + $0xd] ss:$0 sm:$0xff]  ;;  %v28804_v2 = vld [vmem:[#allocation43_spill] sm:$0xff]  ;;  %v20389_v39 = vld [vmem:[%s23964_s10 + $0xa1] sm:$0xff] }
 0x17b   : >> { %v1102_v41 = vadd.f32 %v1094_v48, %v1028_v30  ;;  %v1165_v13 = vmul.f32 %v20284_v28, %v24554_v52  ;;  %v1243_v49 = vmul.f32 %v20295_v21, %v1228_v63  ;;  %v1242_v3 = vmul.f32 %v20295_v21, %v1223_v27 }
 0x17c   : >> { %v1282_v36 = vpop.permute.xlu1 %1281  ;;  %v1277_v25 = vpop.permute.xlu0 %1276  ;;  %v1099_v1 = vadd.f32 %v1091_v4, %v1025_v37  ;;  %v1098_v40 = vadd.f32 %v1090_v31, %v1024_v34  ;;  %v1092_v10 = vmul.f32 %v20273_v8, %v28802_v26  ;;  %v1164_v52 = vmul.f32 %v20284_v28, %v24556_v54 }
 0x17d   : >> { %1863 = vperm.xlu1 %23805, %v28799_v17   ;;  %1858 = vperm.xlu0 %23804, %v28800_v16   ;;  %v1177_v55 = vadd.f32 %v1169_v38, %v1103_v53  ;;  %v1176_v63 = vadd.f32 %v1168_v44, %v1102_v41  ;;  %v1237_v27 = vmul.f32 %v20295_v21, %v24618_v33 }
 0x17e   : >> { %v1101_v37 = vadd.f32 %v1093_v43, %v1027_v0  ;;  %v1171_v34 = vadd.f32 %v1163_v9, %v1097_v5  ;;  %v1170_v18 = vadd.f32 %v1162_v46, %v1096_v50  ;;  %v1236_v8 = vmul.f32 %v20295_v21, %v24620_v58  ;;  %v20317_v5 = vld [vmem:[%s28671_s1 + $0xe] ss:$0 sm:$0xff]  ;;  %v20392_v50 = vld [vmem:[%s23964_s10 + $0xb9] sm:$0xff] }
 0x17f   : >> { %v1173_v20 = vadd.f32 %v1165_v13, %v1099_v1  ;;  %v1251_v48 = vadd.f32 %v1243_v49, %v1177_v55  ;;  %v1250_v30 = vadd.f32 %v1242_v3, %v1176_v63  ;;  %v1311_v56 = vmul.f32 %v20306_v29, %v1272_v15  ;;  %v20391_v15 = vld [vmem:[%s23964_s10 + $0xb1] sm:$0xff] }
 0x180   : >> { %v1292_v24 = vpop.permute.xlu1 %1291  ;;  %v24707_v11 = vpop.permute.xlu0 %1286  ;;  %v1310_v54 = vmul.f32 %v20306_v29, %v24682_v19  ;;  %v1172_v33 = vadd.f32 %v1164_v52, %v1098_v40  ;;  %v1245_v0 = vadd.f32 %v1237_v27, %v1171_v34  ;;  %v1239_v16 = vmul.f32 %v20295_v21, %v24632_v45 }
 0x181   : >> { %1873 = vperm.xlu1 %23805, %v28803_v51   ;;  %1868 = vperm.xlu0 %23804, %v28804_v2   ;;  %v1238_v58 = vmul.f32 %v20295_v21, %v24634_v14  ;;  %v1167_v38 = vmul.f32 %v20284_v28, %v24573_v57  ;;  %v1244_v44 = vadd.f32 %v1236_v8, %v1170_v18 }
 0x182   : >> { %v1166_v43 = vmul.f32 %v20284_v28, %v24575_v32  ;;  %v1319_v53 = vadd.f32 %v1311_v56, %v1245_v0  ;;  %v1313_v9 = vmul.f32 %v20306_v29, %v1282_v36  ;;  %v1312_v46 = vmul.f32 %v20306_v29, %v1277_v25  ;;  %v20400_v56 = vld [vmem:[%s23964_s10 + $0xa2] sm:$0xff]  ;;  %v20328_v0 = vld [vmem:[%s28671_s1 + $0xf] ss:$0 sm:$0xff] }
 0x183   : >> { %v1318_v13 = vadd.f32 %v1310_v54, %v1244_v44  ;;  %v1100_v3 = vadd.f32 %v1092_v10, %v24688_v61  ;;  %v1247_v1 = vadd.f32 %v1239_v16, %v1173_v20  ;;  %v1246_v40 = vadd.f32 %v1238_v58, %v1172_v33  ;;  %v28805_v10 = vld [vmem:[#allocation50_spill] sm:$0xff]  ;;  %v20403_v16 = vld [vmem:[%s23964_s10 + $0xba] sm:$0xff]  ;;  %v20402_v58 = vld [vmem:[%s23964_s10 + $0xb2] sm:$0xff] }
 0x184   : >> { %v1302_v4 = vpop.permute.xlu1 %1301  ;;  %v1297_v47 = vpop.permute.xlu0 %1296  ;;  %v1241_v57 = vmul.f32 %v20295_v21, %v24651_v42  ;;  %v1175_v26 = vadd.f32 %v1167_v38, %v1101_v37  ;;  %v1240_v51 = vmul.f32 %v20295_v21, %v24653_v60  ;;  %v1315_v52 = vmul.f32 %v20306_v29, %v1292_v24  ;;  %v28806_v42 = vld [vmem:[#allocation51_spill] sm:$0xff] }
 0x185   : >> { %v1317_v31 = vmul.f32 %v20306_v29, %v1302_v4  ;;  %v1316_v17 = vmul.f32 %v20306_v29, %v1297_v47  ;;  %1883 = vperm.xlu1 %23805, %v20390_v35   ;;  %1878 = vperm.xlu0 %23804, %v20389_v39   ;;  %v1174_v36 = vadd.f32 %v1166_v43, %v1100_v3 }
 0x186   : >> { %v1321_v25 = vadd.f32 %v1313_v9, %v1247_v1  ;;  %v1320_v2 = vadd.f32 %v1312_v46, %v1246_v40  ;;  %v1314_v27 = vmul.f32 %v20306_v29, %v24707_v11  ;;  %v1249_v39 = vadd.f32 %v1241_v57, %v1175_v26  ;;  %v28807_v29 = vld [vmem:[#allocation54_spill] sm:$0xff] }
 0x187   : >> { %v1325_v19 = vadd.f32 %v1317_v31, %v1251_v48  ;;  %v1324_v12 = vadd.f32 %v1316_v17, %v1250_v30  ;;  %v1248_v60 = vadd.f32 %v1240_v51, %v1174_v36  ;;  %v28808_v48 = vld [vmem:[#allocation55_spill] sm:$0xff]  ;;  %v20411_v51 = vld [vmem:[%s23964_s10 + $0xa3] sm:$0xff] }
 0x188   : >> { %v1346_v41 = vpop.permute.xlu1 %1345  ;;  %v1341_v45 = vpop.permute.xlu0 %1340  ;;  %v1323_v34 = vadd.f32 %v1315_v52, %v1249_v39  ;;  %v20401_v30 = vld [vmem:[%s23964_s10 + $0xaa] sm:$0xff] }
 0x189   : >> { %v1385_v14 = vmul.f32 %v20317_v5, %v1346_v41  ;;  %v1384_v49 = vmul.f32 %v20317_v5, %v1341_v45  ;;  %1893 = vperm.xlu1 %23805, %v20392_v50   ;;  %1888 = vperm.xlu0 %23804, %v20391_v15   ;;  %v1322_v24 = vadd.f32 %v1314_v27, %v1248_v60  ;;  %v20412_v26 = vld [vmem:[%s23964_s10 + $0xab] sm:$0xff]  ;;  %v20413_v27 = vld [vmem:[%s23964_s10 + $0xb3] sm:$0xff] }
 0x18b   : >> { %v1393_v32 = vadd.f32 %v1385_v14, %v1319_v53  ;;  %v1392_v28 = vadd.f32 %v1384_v49, %v1318_v13  ;;  %v28809_v14 = vld [vmem:[#allocation62_spill] sm:$0xff]  ;;  %v28810_v49 = vld [vmem:[#allocation63_spill] sm:$0xff] }
 0x18c   : >> { %v1356_v55 = vpop.permute.xlu1 %1355  ;;  %v1351_v63 = vpop.permute.xlu0 %1350 }
 0x18d   : >> { %v1387_v35 = vmul.f32 %v20317_v5, %v1356_v55  ;;  %v1386_v61 = vmul.f32 %v20317_v5, %v1351_v63  ;;  %1937 = vperm.xlu1 %23805, %v28805_v10   ;;  %1932 = vperm.xlu0 %23804, %v28806_v42   ;;  %v20339_v55 = vld [vmem:[%s28671_s1 + $0x10] ss:$0 sm:$0xff]  ;;  %v20414_v63 = vld [vmem:[%s23964_s10 + $0xbb] sm:$0xff] }
 0x18f   : >> { %v1395_v21 = vadd.f32 %v1387_v35, %v1321_v25  ;;  %v1394_v37 = vadd.f32 %v1386_v61, %v1320_v2 }
 0x190   : >> { %v1366_v18 = vpop.permute.xlu1 %1365  ;;  %v1361_v8 = vpop.permute.xlu0 %1360 }
 0x191   : >> { %v1389_v20 = vmul.f32 %v20317_v5, %v1366_v18  ;;  %v1388_v11 = vmul.f32 %v20317_v5, %v1361_v8  ;;  %1947 = vperm.xlu1 %23805, %v28807_v29   ;;  %1942 = vperm.xlu0 %23804, %v28808_v48  }
 0x193   : >> { %v1397_v4 = vadd.f32 %v1389_v20, %v1323_v34  ;;  %v1396_v47 = vadd.f32 %v1388_v11, %v1322_v24 }
 0x194   : >> { %v1376_v54 = vpop.permute.xlu1 %1375  ;;  %v1371_v31 = vpop.permute.xlu0 %1370 }
 0x195   : >> { %v1391_v17 = vmul.f32 %v20317_v5, %v1376_v54  ;;  %v1390_v33 = vmul.f32 %v20317_v5, %v1371_v31  ;;  %1957 = vperm.xlu1 %23805, %v20401_v30   ;;  %1952 = vperm.xlu0 %23804, %v20400_v56   ;;  %v20423_v30 = vld [vmem:[%s23964_s10 + $0xac] sm:$0xff]  ;;  %v20422_v56 = vld [vmem:[%s23964_s10 + $0xa4] sm:$0xff] }
 0x197   : >> { %v1399_v50 = vadd.f32 %v1391_v17, %v1325_v19  ;;  %v1398_v15 = vadd.f32 %v1390_v33, %v1324_v12  ;;  %v20350_v17 = vld [vmem:[%s28671_s1 + $0x11] ss:$0 sm:$0xff]  ;;  %v20425_v33 = vld [vmem:[%s23964_s10 + $0xbc] sm:$0xff] }
 0x198   : >> { %v1420_v38 = vpop.permute.xlu1 %1419  ;;  %v1415_v44 = vpop.permute.xlu0 %1414 }
 0x199   : >> { %v1459_v43 = vmul.f32 %v20328_v0, %v1420_v38  ;;  %v1458_v53 = vmul.f32 %v20328_v0, %v1415_v44  ;;  %1967 = vperm.xlu1 %23805, %v20403_v16   ;;  %1962 = vperm.xlu0 %23804, %v20402_v58  }
 0x19b   : >> { %v1467_v9 = vadd.f32 %v1459_v43, %v1393_v32  ;;  %v1466_v46 = vadd.f32 %v1458_v53, %v1392_v28 }
 0x19c   : >> { %v1430_v5 = vpop.permute.xlu1 %1429  ;;  %v1425_v41 = vpop.permute.xlu0 %1424 }
 0x19d   : >> { %v1461_v45 = vmul.f32 %v20328_v0, %v1430_v5  ;;  %v1460_v13 = vmul.f32 %v20328_v0, %v1425_v41  ;;  %2011 = vperm.xlu1 %23805, %v28809_v14   ;;  %2006 = vperm.xlu0 %23804, %v28810_v49  }
 0x19f   : >> { %v1469_v19 = vadd.f32 %v1461_v45, %v1395_v21  ;;  %v1468_v12 = vadd.f32 %v1460_v13, %v1394_v37 }
 0x1a0   : >> { %v1440_v3 = vpop.permute.xlu1 %1439  ;;  %v1435_v1 = vpop.permute.xlu0 %1434 }
 0x1a1   : >> { %v1463_v40 = vmul.f32 %v20328_v0, %v1440_v3  ;;  %v1462_v57 = vmul.f32 %v20328_v0, %v1435_v1  ;;  %2021 = vperm.xlu1 %23805, %v24528_v62   ;;  %2016 = vperm.xlu0 %23804, %v24531_v7  }
 0x1a3   : >> { %v1471_v32 = vadd.f32 %v1463_v40, %v1397_v4  ;;  %v1470_v28 = vadd.f32 %v1462_v57, %v1396_v47 }
 0x1a4   : >> { %v1450_v36 = vpop.permute.xlu1 %1449  ;;  %v1445_v25 = vpop.permute.xlu0 %1444 }
 0x1a5   : >> { %v1465_v2 = vmul.f32 %v20328_v0, %v1450_v36  ;;  %v1464_v52 = vmul.f32 %v20328_v0, %v1445_v25  ;;  %2031 = vperm.xlu1 %23805, %v20412_v26   ;;  %2026 = vperm.xlu0 %23804, %v20411_v51   ;;  %v20424_v0 = vld [vmem:[%s23964_s10 + $0xb4] sm:$0xff]  ;;  %v20361_v26 = vld [vmem:[%s28671_s1 + $0x12] ss:$0 sm:$0xff] }
 0x1a7   : >> { %v1473_v35 = vadd.f32 %v1465_v2, %v1399_v50  ;;  %v1472_v62 = vadd.f32 %v1464_v52, %v1398_v15 }
 0x1a8   : >> { %v1494_v61 = vpop.permute.xlu1 %1493  ;;  %v1489_v7 = vpop.permute.xlu0 %1488 }
 0x1a9   : >> { %v1533_v10 = vmul.f32 %v20339_v55, %v1494_v61  ;;  %v1532_v42 = vmul.f32 %v20339_v55, %v1489_v7  ;;  %2041 = vperm.xlu1 %23805, %v20414_v63   ;;  %2036 = vperm.xlu0 %23804, %v20413_v27  }
 0x1ab   : >> { %v1541_v39 = vadd.f32 %v1533_v10, %v1467_v9  ;;  %v1540_v60 = vadd.f32 %v1532_v42, %v1466_v46 }
 0x1ac   : >> { %v1504_v21 = vpop.permute.xlu1 %1503  ;;  %v1499_v37 = vpop.permute.xlu0 %1498 }
 0x1ad   : >> { %v1535_v34 = vmul.f32 %v20339_v55, %v1504_v21  ;;  %v1534_v18 = vmul.f32 %v20339_v55, %v1499_v37  ;;  %2085 = vperm.xlu1 %23805, %v24586_v59   ;;  %2080 = vperm.xlu0 %23804, %v24589_v6  }
 0x1af   : >> { %v1543_v8 = vadd.f32 %v1535_v34, %v1469_v19  ;;  %v1542_v24 = vadd.f32 %v1534_v18, %v1468_v12 }
 0x1b0   : >> { %v1514_v20 = vpop.permute.xlu1 %1513  ;;  %v1509_v11 = vpop.permute.xlu0 %1508 }
 0x1b1   : >> { %v1537_v29 = vmul.f32 %v20339_v55, %v1514_v20  ;;  %v1536_v48 = vmul.f32 %v20339_v55, %v1509_v11  ;;  %2095 = vperm.xlu1 %23805, %v24607_v22   ;;  %2090 = vperm.xlu0 %23804, %v24610_v23   ;;  %v20372_v20 = vld [vmem:[%s28671_s1 + $0x13] ss:$0 sm:$0xff] }
 0x1b3   : >> { %v1545_v4 = vadd.f32 %v1537_v29, %v1471_v32  ;;  %v1544_v47 = vadd.f32 %v1536_v48, %v1470_v28 }
 0x1b4   : >> { %v1524_v54 = vpop.permute.xlu1 %1523  ;;  %v1519_v59 = vpop.permute.xlu0 %1518 }
 0x1b5   : >> { %v1539_v31 = vmul.f32 %v20339_v55, %v1524_v54  ;;  %v1538_v6 = vmul.f32 %v20339_v55, %v1519_v59  ;;  %2105 = vperm.xlu1 %23805, %v20423_v30   ;;  %2100 = vperm.xlu0 %23804, %v20422_v56  }
 0x1b7   : >> { %v1547_v16 = vadd.f32 %v1539_v31, %v1473_v35  ;;  %v1546_v22 = vadd.f32 %v1538_v6, %v1472_v62 }
 0x1b8   : >> { %v1568_v58 = vpop.permute.xlu1 %1567  ;;  %v1563_v23 = vpop.permute.xlu0 %1562 }
 0x1b9   : >> { %v1607_v50 = vmul.f32 %v20350_v17, %v1568_v58  ;;  %v1606_v15 = vmul.f32 %v20350_v17, %v1563_v23  ;;  %2115 = vperm.xlu1 %23805, %v20425_v33   ;;  %2110 = vperm.xlu0 %23804, %v20424_v0  }
 0x1bb   : >> { %v1615_v38 = vadd.f32 %v1607_v50, %v1541_v39  ;;  %v1614_v44 = vadd.f32 %v1606_v15, %v1540_v60 }
 0x1bc   : >> { %v1578_v43 = vpop.permute.xlu1 %1577  ;;  %v1573_v53 = vpop.permute.xlu0 %1572 }
 0x1bd   : >> { %v1609_v9 = vmul.f32 %v20350_v17, %v1578_v43  ;;  %v1608_v46 = vmul.f32 %v20350_v17, %v1573_v53 }
 0x1bf   : >> { %v1617_v5 = vadd.f32 %v1609_v9, %v1543_v8  ;;  %v1616_v41 = vadd.f32 %v1608_v46, %v1542_v24  ;;  %v20383_v9 = vld [vmem:[%s28671_s1 + $0x14] ss:$0 sm:$0xff] }
 0x1c0   : >> { %v1588_v45 = vpop.permute.xlu1 %1587  ;;  %v1583_v13 = vpop.permute.xlu0 %1582 }
 0x1c1   : >> { %v1611_v14 = vmul.f32 %v20350_v17, %v1588_v45  ;;  %v1610_v49 = vmul.f32 %v20350_v17, %v1583_v13 }
 0x1c3   : >> { %v1619_v19 = vadd.f32 %v1611_v14, %v1545_v4  ;;  %v1618_v12 = vadd.f32 %v1610_v49, %v1544_v47 }
 0x1c4   : >> { %v1598_v3 = vpop.permute.xlu1 %1597  ;;  %v1593_v1 = vpop.permute.xlu0 %1592 }
 0x1c5   : >> { %v1613_v40 = vmul.f32 %v20350_v17, %v1598_v3  ;;  %v1612_v57 = vmul.f32 %v20350_v17, %v1593_v1 }
 0x1c7   : >> { %v1621_v51 = vadd.f32 %v1613_v40, %v1547_v16  ;;  %v1620_v32 = vadd.f32 %v1612_v57, %v1546_v22 }
 0x1c8   : >> { %v1642_v28 = vpop.permute.xlu1 %1641  ;;  %v1637_v36 = vpop.permute.xlu0 %1636 }
 0x1c9   : >> { %v1681_v25 = vmul.f32 %v20361_v26, %v1642_v28  ;;  %v1680_v2 = vmul.f32 %v20361_v26, %v1637_v36 }
 0x1cb   : >> { %v1689_v52 = vadd.f32 %v1681_v25, %v1615_v38  ;;  %v1688_v55 = vadd.f32 %v1680_v2, %v1614_v44 }
 0x1cc   : >> { %v1652_v63 = vpop.permute.xlu1 %1651  ;;  %v1647_v27 = vpop.permute.xlu0 %1646 }
 0x1cd   : >> { %v1683_v35 = vmul.f32 %v20361_v26, %v1652_v63  ;;  %v1682_v62 = vmul.f32 %v20361_v26, %v1647_v27 }
 0x1cf   : >> { %v1691_v61 = vadd.f32 %v1683_v35, %v1617_v5  ;;  %v1690_v7 = vadd.f32 %v1682_v62, %v1616_v41 }
 0x1d0   : >> { %v1662_v10 = vpop.permute.xlu1 %1661  ;;  %v1657_v42 = vpop.permute.xlu0 %1656 }
 0x1d1   : >> { %v1685_v39 = vmul.f32 %v20361_v26, %v1662_v10  ;;  %v1684_v60 = vmul.f32 %v20361_v26, %v1657_v42 }
 0x1d3   : >> { %v1693_v21 = vadd.f32 %v1685_v39, %v1619_v19  ;;  %v1692_v37 = vadd.f32 %v1684_v60, %v1618_v12 }
 0x1d4   : >> { %v1672_v34 = vpop.permute.xlu1 %1671  ;;  %v1667_v18 = vpop.permute.xlu0 %1666 }
 0x1d5   : >> { %v1687_v8 = vmul.f32 %v20361_v26, %v1672_v34  ;;  %v1686_v24 = vmul.f32 %v20361_v26, %v1667_v18 }
 0x1d7   : >> { %v1695_v11 = vadd.f32 %v1687_v8, %v1621_v51  ;;  %v1694_v29 = vadd.f32 %v1686_v24, %v1620_v32 }
 0x1d8   : >> { %v1716_v48 = vpop.permute.xlu1 %1715  ;;  %v1711_v30 = vpop.permute.xlu0 %1710 }
 0x1d9   : >> { %v1755_v56 = vmul.f32 %v20372_v20, %v1716_v48  ;;  %v1754_v4 = vmul.f32 %v20372_v20, %v1711_v30 }
 0x1db   : >> { %v1763_v47 = vadd.f32 %v1755_v56, %v1689_v52  ;;  %v1762_v54 = vadd.f32 %v1754_v4, %v1688_v55 }
 0x1dc   : >> { %v1726_v59 = vpop.permute.xlu1 %1725  ;;  %v1721_v31 = vpop.permute.xlu0 %1720 }
 0x1dd   : >> { %v1757_v6 = vmul.f32 %v20372_v20, %v1726_v59  ;;  %v1756_v17 = vmul.f32 %v20372_v20, %v1721_v31 }
 0x1df   : >> { %v1765_v33 = vadd.f32 %v1757_v6, %v1691_v61  ;;  %v1764_v0 = vadd.f32 %v1756_v17, %v1690_v7  ;;  %v20405_v6 = vld [vmem:[%s28671_s1 + $0x16] ss:$0 sm:$0xff] }
 0x1e0   : >> { %v1736_v16 = vpop.permute.xlu1 %1735  ;;  %v1731_v22 = vpop.permute.xlu0 %1730 }
 0x1e1   : >> { %v1759_v58 = vmul.f32 %v20372_v20, %v1736_v16  ;;  %v1758_v23 = vmul.f32 %v20372_v20, %v1731_v22 }
 0x1e3   : >> { %v1767_v50 = vadd.f32 %v1759_v58, %v1693_v21  ;;  %v1766_v15 = vadd.f32 %v1758_v23, %v1692_v37 }
 0x1e4   : >> { %v1746_v38 = vpop.permute.xlu1 %1745  ;;  %v1741_v44 = vpop.permute.xlu0 %1740 }
 0x1e5   : >> { %v1761_v43 = vmul.f32 %v20372_v20, %v1746_v38  ;;  %v1760_v53 = vmul.f32 %v20372_v20, %v1741_v44  ;;  %v20394_v20 = vld [vmem:[%s28671_s1 + $0x15] ss:$0 sm:$0xff]  ;;  %v20416_v44 = vld [vmem:[%s28671_s1 + $0x17] ss:$0 sm:$0xff] }
 0x1e7   : >> { %v1769_v46 = vadd.f32 %v1761_v43, %v1695_v11  ;;  %v1768_v5 = vadd.f32 %v1760_v53, %v1694_v29 }
 0x1e8   : >> { %v1790_v41 = vpop.permute.xlu1 %1789  ;;  %v1785_v45 = vpop.permute.xlu0 %1784 }
 0x1e9   : >> { %v1829_v13 = vmul.f32 %v20383_v9, %v1790_v41  ;;  %v1828_v14 = vmul.f32 %v20383_v9, %v1785_v45 }
 0x1eb   : >> { %v1837_v49 = vadd.f32 %v1829_v13, %v1763_v47  ;;  %v1836_v19 = vadd.f32 %v1828_v14, %v1762_v54 }
 0x1ec   : >> { %v1800_v12 = vpop.permute.xlu1 %1799  ;;  %v1795_v3 = vpop.permute.xlu0 %1794 }
 0x1ed   : >> { %v1831_v1 = vmul.f32 %v20383_v9, %v1800_v12  ;;  %v1830_v40 = vmul.f32 %v20383_v9, %v1795_v3  ;;  %v20427_v3 = vld [vmem:[%s28671_s1 + $0x18] ss:$0 sm:$0xff] }
 0x1ef   : >> { %v1839_v57 = vadd.f32 %v1831_v1, %v1765_v33  ;;  %v1838_v26 = vadd.f32 %v1830_v40, %v1764_v0 }
 0x1f0   : >> { %v1810_v51 = vpop.permute.xlu1 %1809  ;;  %v1805_v32 = vpop.permute.xlu0 %1804 }
 0x1f1   : >> { %v1833_v48 = vmul.f32 %v20383_v9, %v1810_v51  ;;  %v1832_v30 = vmul.f32 %v20383_v9, %v1805_v32 }
 0x1f3   : >> { %v1841_v22 = vadd.f32 %v1833_v48, %v1767_v50  ;;  %v1840_v58 = vadd.f32 %v1832_v30, %v1766_v15 }
 0x1f4   : >> { %v1820_v28 = vpop.permute.xlu1 %1819  ;;  %v1815_v36 = vpop.permute.xlu0 %1814 }
 0x1f5   : >> { %v1835_v56 = vmul.f32 %v20383_v9, %v1820_v28  ;;  %v1834_v4 = vmul.f32 %v20383_v9, %v1815_v36 }
 0x1f7   : >> { %v1843_v43 = vadd.f32 %v1835_v56, %v1769_v46  ;;  %v1842_v53 = vadd.f32 %v1834_v4, %v1768_v5 }
 0x1f8   : >> { %v1864_v25 = vpop.permute.xlu1 %1863  ;;  %v1859_v2 = vpop.permute.xlu0 %1858 }
 0x1f9   : >> { %v1903_v47 = vmul.f32 %v20394_v20, %v1864_v25  ;;  %v1902_v54 = vmul.f32 %v20394_v20, %v1859_v2 }
 0x1fb   : >> { %v1911_v45 = vadd.f32 %v1903_v47, %v1837_v49  ;;  %v1910_v13 = vadd.f32 %v1902_v54, %v1836_v19 }
 0x1fc   : >> { %v1874_v52 = vpop.permute.xlu1 %1873  ;;  %v1869_v55 = vpop.permute.xlu0 %1868 }
 0x1fd   : >> { %v1905_v59 = vmul.f32 %v20394_v20, %v1874_v52  ;;  %v1904_v31 = vmul.f32 %v20394_v20, %v1869_v55 }
 0x1ff   : >> { %v1913_v14 = vadd.f32 %v1905_v59, %v1839_v57  ;;  %v1912_v12 = vadd.f32 %v1904_v31, %v1838_v26 }
 0x200   : >> { %v1884_v63 = vpop.permute.xlu1 %1883  ;;  %v1879_v27 = vpop.permute.xlu0 %1878 }
 0x201   : >> { %v1907_v17 = vmul.f32 %v20394_v20, %v1884_v63  ;;  %v1906_v33 = vmul.f32 %v20394_v20, %v1879_v27 }
 0x203   : >> { %v1915_v50 = vadd.f32 %v1907_v17, %v1841_v22  ;;  %v1914_v15 = vadd.f32 %v1906_v33, %v1840_v58 }
 0x204   : >> { %v1894_v35 = vpop.permute.xlu1 %1893  ;;  %v1889_v62 = vpop.permute.xlu0 %1888 }
 0x205   : >> { %v1909_v23 = vmul.f32 %v20394_v20, %v1894_v35  ;;  %v1908_v38 = vmul.f32 %v20394_v20, %v1889_v62 }
 0x207   : >> { %v1917_v28 = vadd.f32 %v1909_v23, %v1843_v43  ;;  %v1916_v36 = vadd.f32 %v1908_v38, %v1842_v53 }
 0x208   : >> { %v1938_v61 = vpop.permute.xlu1 %1937  ;;  %v1933_v7 = vpop.permute.xlu0 %1932 }
 0x209   : >> { %v1977_v9 = vmul.f32 %v20405_v6, %v1938_v61  ;;  %v1976_v41 = vmul.f32 %v20405_v6, %v1933_v7 }
 0x20b   : >> { %v1985_v25 = vadd.f32 %v1977_v9, %v1911_v45  ;;  %v1984_v2 = vadd.f32 %v1976_v41, %v1910_v13 }
 0x20c   : >> { %v1948_v10 = vpop.permute.xlu1 %1947  ;;  %v1943_v42 = vpop.permute.xlu0 %1942 }
 0x20d   : >> { %v1979_v46 = vmul.f32 %v20405_v6, %v1948_v10  ;;  %v1978_v5 = vmul.f32 %v20405_v6, %v1943_v42 }
 0x210   : >> { %v1958_v39 = vpop.permute.xlu1 %1957  ;;  %v1953_v60 = vpop.permute.xlu0 %1952 }
 0x211   : >> { %v1981_v57 = vmul.f32 %v20405_v6, %v1958_v39  ;;  %v1980_v26 = vmul.f32 %v20405_v6, %v1953_v60 }
 0x213   : >> { %v1989_v4 = vadd.f32 %v1981_v57, %v1915_v50  ;;  %v1988_v47 = vadd.f32 %v1980_v26, %v1914_v15 }
 0x214   : >> { %v1968_v21 = vpop.permute.xlu1 %1967  ;;  %v1963_v37 = vpop.permute.xlu0 %1962 }
 0x215   : >> { %v1983_v52 = vmul.f32 %v20405_v6, %v1968_v21  ;;  %v1982_v55 = vmul.f32 %v20405_v6, %v1963_v37 }
 0x217   : >> { %v1991_v39 = vadd.f32 %v1983_v52, %v1917_v28  ;;  %v1990_v60 = vadd.f32 %v1982_v55, %v1916_v36 }
 0x218   : >> { %v2012_v34 = vpop.permute.xlu1 %2011  ;;  %v2007_v18 = vpop.permute.xlu0 %2006 }
 0x219   : >> { %v2051_v1 = vmul.f32 %v20416_v44, %v2012_v34  ;;  %v2050_v40 = vmul.f32 %v20416_v44, %v2007_v18  ;;  %v1987_v34 = vadd.f32 %v1979_v46, %v1913_v14  ;;  %v1986_v18 = vadd.f32 %v1978_v5, %v1912_v12 }
 0x21b   : >> { %v2059_v63 = vadd.f32 %v2051_v1, %v1985_v25  ;;  %v2058_v27 = vadd.f32 %v2050_v40, %v1984_v2 }
 0x21c   : >> { %v2022_v8 = vpop.permute.xlu1 %2021  ;;  %v2017_v24 = vpop.permute.xlu0 %2016 }
 0x21d   : >> { %v2053_v35 = vmul.f32 %v20416_v44, %v2022_v8  ;;  %v2052_v62 = vmul.f32 %v20416_v44, %v2017_v24 }
 0x21f   : >> { %v2061_v21 = vadd.f32 %v2053_v35, %v1987_v34  ;;  %v2060_v37 = vadd.f32 %v2052_v62, %v1986_v18 }
 0x220   : >> { %v2032_v11 = vpop.permute.xlu1 %2031  ;;  %v2027_v29 = vpop.permute.xlu0 %2026 }
 0x221   : >> { %v2055_v20 = vmul.f32 %v20416_v44, %v2032_v11  ;;  %v2054_v48 = vmul.f32 %v20416_v44, %v2027_v29  ;;  %v28811_v11 = vld [vmem:[#allocation5_spill] sm:$0xff] }
 0x223   : >> { %v2063_v31 = vadd.f32 %v2055_v20, %v1989_v4  ;;  %v2062_v6 = vadd.f32 %v2054_v48, %v1988_v47 }
 0x224   : >> { %v2042_v0 = vpop.permute.xlu1 %2041  ;;  %v2037_v16 = vpop.permute.xlu0 %2036 }
 0x225   : >> { %v2057_v54 = vmul.f32 %v20416_v44, %v2042_v0  ;;  %v2056_v59 = vmul.f32 %v20416_v44, %v2037_v16 }
 0x227   : >> { %v2065_v53 = vadd.f32 %v2057_v54, %v1991_v39  ;;  %v2064_v9 = vadd.f32 %v2056_v59, %v1990_v60 }
 0x228   : >> { %v2086_v51 = vpop.permute.xlu1 %2085  ;;  %v2081_v32 = vpop.permute.xlu0 %2080 }
 0x229   : >> { %v2125_v49 = vmul.f32 %v20427_v3, %v2086_v51  ;;  %v2124_v19 = vmul.f32 %v20427_v3, %v2081_v32 }
 0x22b   : >> { %v2133_v10 = vadd.f32 %v2125_v49, %v2059_v63  ;;  %v2132_v42 = vadd.f32 %v2124_v19, %v2058_v27 }
 0x22c   : >> { %v2096_v61 = vpop.permute.xlu1 %2095  ;;  %v2091_v7 = vpop.permute.xlu0 %2090 }
 0x22d   : >> { %v2127_v30 = vmul.f32 %v20427_v3, %v2096_v61  ;;  %v2126_v56 = vmul.f32 %v20427_v3, %v2091_v7  ;;  %v2147_v29 = vadd.f32 %v28811_v11, %v2133_v10  ;;  %v2146_v22 = vadd.f32 %v28811_v11, %v2132_v42 }
 0x22f   : >> { %v2135_v58 = vadd.f32 %v2127_v30, %v2061_v21  ;;  %v2134_v23 = vadd.f32 %v2126_v56, %v2060_v37  ;;  %v2155_v14 = vmax.f32 %v2147_v29, 0.0  ;;  %v2154_v12 = vmax.f32 %v2146_v22, 0.0 }
 0x230   : >> { %v2106_v8 = vpop.permute.xlu1 %2105  ;;  %v2101_v24 = vpop.permute.xlu0 %2100 }
 0x231   : >> { %v2129_v17 = vmul.f32 %v20427_v3, %v2106_v8  ;;  %v2128_v33 = vmul.f32 %v20427_v3, %v2101_v24  ;;  %v2149_v50 = vadd.f32 %v28811_v11, %v2135_v58  ;;  %v2148_v15 = vadd.f32 %v28811_v11, %v2134_v23 }
 0x233   : >> { %v2137_v38 = vadd.f32 %v2129_v17, %v2063_v31  ;;  %v2136_v43 = vadd.f32 %v2128_v33, %v2062_v6  ;;  %v2157_v25 = vmax.f32 %v2149_v50, 0.0  ;;  %v2156_v2 = vmax.f32 %v2148_v15, 0.0 }
 0x234   : >> { %v2116_v41 = vpop.permute.xlu1 %2115  ;;  %v2111_v45 = vpop.permute.xlu0 %2110 }
 0x235   : >> { %v2151_v0 = vadd.f32 %v28811_v11, %v2137_v38  ;;  %v2150_v16 = vadd.f32 %v28811_v11, %v2136_v43  ;;  %v2131_v44 = vmul.f32 %v20427_v3, %v2116_v41  ;;  %v2130_v13 = vmul.f32 %v20427_v3, %v2111_v45 }
 0x237   : >> { %v2159_v1 = vmax.f32 %v2151_v0, 0.0  ;;  %v2158_v40 = vmax.f32 %v2150_v16, 0.0  ;;  %v2139_v51 = vadd.f32 %v2131_v44, %v2065_v53  ;;  %v2138_v32 = vadd.f32 %v2130_v13, %v2064_v9 }
 0x239   : >> { %v2163_v28 = vmax.f32 %v2155_v14, %v2159_v1  ;;  %v2162_v36 = vmax.f32 %v2154_v12, %v2158_v40  ;;  %v2153_v46 = vadd.f32 %v28811_v11, %v2139_v51  ;;  %v2152_v5 = vadd.f32 %v28811_v11, %v2138_v32 }
 0x23b   : >> { %2167 = vst.msk [vmem:[#allocation3 + $0x8] sm:$0xff] %vm225_vm0, %v2163_v28  ;;  %2166 = vst.msk [vmem:[#allocation3] sm:$0xff] %vm225_vm0, %v2162_v36  ;;  %v2161_v3 = vmax.f32 %v2153_v46, 0.0  ;;  %v2160_v49 = vmax.f32 %v2152_v5, 0.0 }
 0x23d   : >> { %v2165_v19 = vmax.f32 %v2157_v25, %v2161_v3  ;;  %v2164_v57 = vmax.f32 %v2156_v2, %v2160_v49 }
 0x23f   : >> { %2169 = vst.msk [vmem:[#allocation3 + $0x18] sm:$0xff] %vm225_vm0, %v2165_v19  ;;  %2168 = vst.msk [vmem:[#allocation3 + $0x10] sm:$0xff] %vm225_vm0, %v2164_v57 }
 0x242   : >> { %v2170_v26 = vld [vmem:[#allocation3] ss:$2 sm:$0xff]  ;;  %v2174_v52 = vld [vmem:[#allocation3 + $0x1] ss:$2 sm:$0xff] }
 0x243   : >> { %v2177_v55 = vmax.f32 %v2170_v26, %v2174_v52 }
 0x245   : >> { %20429 = vst.msk [vmem:[%s20043_s22 + $0x32] sm:$0xff] %vm225_vm0, %v2177_v55  ;;  %289 = sbr.rel (!%p287_p4) target bundleno = 42 (0x2a), region = 188 }
 0x246   : >> { %v2172_v63 = vld [vmem:[#allocation3 + $0x10] ss:$2 sm:$0x3f]  ;;  %v2176_v27 = vld [vmem:[#allocation3 + $0x11] ss:$2 sm:$0x3f] }
 0x247   : >> { %v2178_v35 = vmax.f32 %v2172_v63, %v2176_v27 }
 0x249   : >> { %20430 = vst.msk [vmem:[%s20043_s22 + $0x3a] sm:$0x3f] %vm2184_vm1, %v2178_v35 }
 0x24a LB: >> { %v20438_v62 = vld [vmem:[%s28673_s3 + $0x18] sm:$0xff]  ;;  %v20437_v61 = vld [vmem:[%s28673_s3 + $0x10] sm:$0xff]  ;;  %s2192_s29 = smul.u32 48, %s23828_s23  ;;  %v2201_v12 = vld [vmem:[%s28673_s3 + $0x8] sm:$0xff]  ;;  %vm19925_vm2 = vcmask 261120   ;;  %vm19935_vm3 = vcmask 260096   ;;  %s23828_s23 = sphi %s24805_s23, %s2191_s23  }
 0x24b   : >> { %v24816_v7 = vand.u32 4294901760, %v20438_v62  ;;  %v24818_v34 = vand.u32 4294901760, %v20437_v61  ;;  %v24901_v5 = vand.u32 4294901760, %v2201_v12  ;;  %v2200_v49 = vld [vmem:[%s28673_s3] sm:$0xff] }
 0x24c   : >> { %s24836_s8 = scalar_lea.vmem [#allocation2], %s2192_s29  ;;  %v24920_v26 = vand.u32 4294901760, %v2200_v49 }
 0x24d   : >> { %21826 = vmatprep.subr.mxu0 %v24816_v7  ;;  %v24823_v18 = vsub.f32 %v20438_v62, %v24816_v7  ;;  %v24826_v20 = vsub.f32 %v20437_v61, %v24818_v34  ;;  %v24915_v19 = vsub.f32 %v2201_v12, %v24901_v5 }
 0x24e   : >> { %21827 = vmatpush3.msra.mxu0 %v24816_v7  ;;  %v24929_v63 = vsub.f32 %v2200_v49, %v24920_v26 }
 0x24f   : >> { %v24830_v48 = vand.u32 4294901760, %v24823_v18  ;;  %21828 = vmatprep.subr.mxu0 %v24818_v34  ;;  %v24834_v10 = vand.u32 4294901760, %v24826_v20  ;;  %v24925_v52 = vand.u32 4294901760, %v24915_v19 }
 0x250   : >> { %v20431_v42 = vld [vmem:[%s24836_s8 + $0x1] sm:$0xff]  ;;  %v20432_v30 = vld [vmem:[%s24836_s8 + $0x9] sm:$0xff]  ;;  %v20433_v56 = vld [vmem:[%s24836_s8 + $0x11] sm:$0xff]  ;;  %21829 = vmatpush3.msra.mxu0 %v24818_v34 }
 0x251   : >> { %v2214_v4 = vsel %vm225_vm0, %v20431_v42, 0  ;;  %v2217_v47 = vsel %vm225_vm0, %v20432_v30, 0  ;;  %v2220_v39 = vsel %vm225_vm0, %v20433_v56, 0  ;;  %v20434_v60 = vld [vmem:[%s24836_s8 + $0x19] sm:$0xff]  ;;  %v20435_v21 = vld [vmem:[%s24836_s8 + $0x21] sm:$0xff]  ;;  %v20436_v37 = vld [vmem:[%s24836_s8 + $0x29] sm:$0xff]  ;;  %v2390_v54 = vsub.f32 %v24823_v18, %v24830_v48  ;;  %21852 = vmatprep.subr.mxu0 %v24823_v18 }
 0x252   : >> { %v2397_v59 = vsub.f32 %v24826_v20, %v24834_v10  ;;  %v24852_v8 = vand.u32 4294901760, %v2214_v4  ;;  %v24855_v24 = vand.u32 4294901760, %v2217_v47  ;;  %v24857_v31 = vand.u32 4294901760, %v2220_v39  ;;  %v2194_v55 = vld [vmem:[%s24836_s8] sm:$0xff]  ;;  %v2195_v62 = vld [vmem:[%s24836_s8 + $0x8] sm:$0xff]  ;;  %v2196_v61 = vld [vmem:[%s24836_s8 + $0x10] sm:$0xff] }
 0x253   : >> { %v2223_v6 = vsel %vm225_vm0, %v20434_v60, 0  ;;  %v2226_v17 = vsel %vm225_vm0, %v20435_v21, 0  ;;  %v2229_v33 = vsel %vm225_vm0, %v20436_v37, 0  ;;  %v2391_v11 = vand.u32 4294901760, %v2390_v54  ;;  %v2197_v56 = vld [vmem:[%s24836_s8 + $0x18] sm:$0xff]  ;;  %v2199_v21 = vld [vmem:[%s24836_s8 + $0x28] sm:$0xff] }
 0x254   : >> { %v2398_v29 = vand.u32 4294901760, %v2397_v59  ;;  %v2299_v22 = vsub.f32 %v2214_v4, %v24852_v8  ;;  %21843 = vmatprep.mubr.f32.mxu1 %v24852_v8  ;;  %v24865_v58 = vsub.f32 %v2217_v47, %v24855_v24  ;;  %v24868_v23 = vsub.f32 %v2220_v39, %v24857_v31  ;;  %v2198_v4 = vld [vmem:[%s24836_s8 + $0x20] sm:$0xff]  ;;  %v20440_v49 = vld [vmem:[%s24836_s8 + $0xa] sm:$0xff] }
 0x255   : >> { %v24870_v38 = vand.u32 4294901760, %v2223_v6  ;;  %v24872_v43 = vand.u32 4294901760, %v2226_v17  ;;  %v24874_v53 = vand.u32 4294901760, %v2229_v33  ;;  %21839 = vmatprep.subr.mxu1 %v2391_v11  ;;  %v3082_v27 = vsub.f32 %v24915_v19, %v24925_v52 }
 0x256   : >> { %v2300_v9 = vand.u32 4294901760, %v2299_v22  ;;  %v2310_v41 = vand.u32 4294901760, %v24865_v58  ;;  %21840 = vmatpush3.msra.mxu1 %v2391_v11  ;;  %v2320_v45 = vand.u32 4294901760, %v24868_v23  ;;  %v2906_v35 = vsel %vm225_vm0, %v2194_v55, 0 }
 0x257   : >> { %v24879_v0 = vsub.f32 %v2223_v6, %v24870_v38  ;;  %v24882_v16 = vsub.f32 %v2226_v17, %v24872_v43  ;;  %v24885_v44 = vsub.f32 %v2229_v33, %v24874_v53  ;;  %21841 = vmatprep.subr.mxu1 %v2398_v29  ;;  %v2909_v42 = vsel %vm225_vm0, %v2195_v62, 0 }
 0x258   : >> { %v2301_v13 = vsub.f32 %v2299_v22, %v2300_v9  ;;  %v2311_v14 = vsub.f32 %v24865_v58, %v2310_v41  ;;  %21842 = vmatpush3.msra.mxu1 %v2398_v29  ;;  %v2321_v50 = vsub.f32 %v24868_v23, %v2320_v45  ;;  %v2912_v30 = vsel %vm225_vm0, %v2196_v61, 0 }
 0x259   : >> { %v2330_v15 = vand.u32 4294901760, %v24879_v0  ;;  %v2340_v1 = vand.u32 4294901760, %v24882_v16  ;;  %v2350_v40 = vand.u32 4294901760, %v24885_v44  ;;  %21844 = vmatmul.mubr.f32.vlgmr.msra.gmra.mxu1 %v24855_v24  ;;  %21865 = vmatprep.subr.mxu1 %v24816_v7  ;;  %v24956_v47 = vand.u32 4294901760, %v2909_v42 }
 0x25a   : >> { %v2302_v51 = vand.u32 4294901760, %v2301_v13  ;;  %v2312_v32 = vand.u32 4294901760, %v2311_v14  ;;  %21866 = vmatpush3.msra.mxu1 %v24816_v7  ;;  %v2322_v28 = vand.u32 4294901760, %v2321_v50  ;;  %21846 = vmatprep.mubr.f32.mxu1 %v24857_v31  ;;  %v24963_v60 = vand.u32 4294901760, %v2912_v30 }
 0x25b   : >> { %v2331_v36 = vsub.f32 %v24879_v0, %v2330_v15  ;;  %v2341_v46 = vsub.f32 %v24882_v16, %v2340_v1  ;;  %21867 = vmatprep.subr.mxu1 %v24818_v34  ;;  %v2351_v2 = vsub.f32 %v24885_v44, %v2350_v40  ;;  %v24973_v54 = vsub.f32 %v2909_v42, %v24956_v47 }
 0x25c   : >> { %21830 = vmatprep.mubr.f32.mxu0 %v2302_v51  ;;  %21868 = vmatpush3.msra.mxu1 %v24818_v34  ;;  %v24980_v17 = vsub.f32 %v2912_v30, %v24963_v60  ;;  %v2921_v11 = vsel %vm225_vm0, %v2199_v21, 0  ;;  %v20444_v30 = vld [vmem:[%s24836_s8 + $0x2a] sm:$0xff] }
 0x25d   : >> { %21831 = vmatmul.mubr.f32.vlgmr.msra.gmra.mxu0 %v2312_v32  ;;  %v2332_v25 = vand.u32 4294901760, %v2331_v36  ;;  %v2342_v3 = vand.u32 4294901760, %v2341_v46  ;;  %21847 = vmatmul.mubr.f32.gmra.mxu1 %v24870_v38  ;;  %v2352_v57 = vand.u32 4294901760, %v2351_v2  ;;  %v3002_v29 = vand.u32 4294901760, %v24973_v54  ;;  %v20439_v46 = vld [vmem:[%s24836_s8 + $0x2] sm:$0xff] }
 0x25e   : >> { %21853 = vmatpush3.msra.mxu0 %v24823_v18  ;;  %21833 = vmatprep.mubr.f32.mxu0 %v2322_v28  ;;  %v24940_v18 = vand.u32 4294901760, %v24929_v63  ;;  %v3624_v21 = vsel %vm225_vm0, %v20444_v30, 0  ;;  %v20450_v30 = vld [vmem:[%s24836_s8 + $0x1b] sm:$0xff] }
 0x25f   : >> { %21854 = vmatprep.subr.mxu0 %v24826_v20  ;;  %21849 = vmatprep.mubr.f32.mxu1 %v24872_v43 }
 0x260   : >> { %21855 = vmatpush3.msra.mxu0 %v24826_v20  ;;  %21891 = vmatprep.subr.mxu1 %v24816_v7  ;;  %v24944_v20 = vand.u32 4294901760, %v2906_v35 }
 0x261   : >> { %21834 = vmatmul.mubr.f32.gmra.mxu0 %v2332_v25  ;;  %21878 = vmatprep.subr.mxu0 %v24830_v48 }
 0x262   : >> { %21836 = vmatprep.mubr.f32.mxu0 %v2342_v3  ;;  %21850 = vmatmul.mubr.f32.gmra.mxu1 %v24874_v53  ;;  %v24961_v39 = vsub.f32 %v2906_v35, %v24944_v20  ;;  %v3609_v3 = vsel %vm225_vm0, %v20439_v46, 0  ;;  %v20442_v35 = vld [vmem:[%s24836_s8 + $0x1a] sm:$0xff] }
 0x263   : >> { %21869 = vmatprep.mubr.f32.mxu1 %v2300_v9  ;;  %v25096_v55 = vand.u32 4294901760, %v3609_v3 }
 0x264   : >> { %v2992_v6 = vand.u32 4294901760, %v24961_v39 }
 0x265   : >> { %21837 = vmatmul.mubr.f32.gmra.mxu0 %v2352_v57  ;;  %v25115_v42 = vsub.f32 %v3609_v3, %v25096_v55 }
 0x266   : >> { %21856 = vmatprep.mubr.f32.mxu0 %v2299_v22  ;;  %21870 = vmatmul.mubr.f32.vlgmr.msra.gmra.mxu1 %v2310_v41  ;;  %v24992_v22 = vand.u32 4294901760, %v2921_v11 }
 0x267   : >> { %21892 = vmatpush3.msra.mxu1 %v24816_v7  ;;  %21872 = vmatprep.mubr.f32.mxu1 %v2320_v45  ;;  %v3083_v7 = vand.u32 4294901760, %v3082_v27 }
 0x268   : >> { %21893 = vmatprep.subr.mxu1 %v24818_v34  ;;  %v25015_v41 = vsub.f32 %v2921_v11, %v24992_v22 }
 0x269   : >> { %21857 = vmatmul.mubr.f32.vlgmr.msra.gmra.mxu0 %v24865_v58  ;;  %21894 = vmatpush3.msra.mxu1 %v24818_v34  ;;  %v2918_v34 = vsel %vm225_vm0, %v2198_v4, 0  ;;  %v2993_v58 = vsub.f32 %v24961_v39, %v2992_v6 }
 0x26a   : >> { %21879 = vmatpush3.msra.mxu0 %v24830_v48  ;;  %21859 = vmatprep.mubr.f32.mxu0 %v24868_v23  ;;  %v3089_v48 = vsub.f32 %v24929_v63, %v24940_v18  ;;  %v24982_v33 = vand.u32 4294901760, %v2918_v34  ;;  %v3012_v23 = vand.u32 4294901760, %v24980_v17  ;;  %v25033_v13 = vand.u32 4294901760, %v25015_v41 }
 0x26b   : >> { %21873 = vmatmul.mubr.f32.gmra.mxu1 %v2330_v15  ;;  %21880 = vmatprep.subr.mxu0 %v24834_v10  ;;  %v2994_v45 = vand.u32 4294901760, %v2993_v58 }
 0x26c   : >> { %21881 = vmatpush3.msra.mxu0 %v24834_v10  ;;  %21875 = vmatprep.mubr.f32.mxu1 %v2340_v1  ;;  %v2915_v10 = vsel %vm225_vm0, %v2197_v56, 0  ;;  %v3090_v37 = vand.u32 4294901760, %v3089_v48  ;;  %v3043_v15 = vsub.f32 %v25015_v41, %v25033_v13 }
 0x26d   : >> { %21860 = vmatmul.mubr.f32.gmra.mxu0 %v24879_v0  ;;  %21904 = vmatprep.subr.mxu0 %v24901_v5  ;;  %v24975_v59 = vand.u32 4294901760, %v2915_v10  ;;  %v3013_v0 = vsub.f32 %v24980_v17, %v3012_v23 }
 0x26e   : >> { %21862 = vmatprep.mubr.f32.mxu0 %v24882_v16  ;;  %21917 = vmatprep.subr.mxu1 %v3083_v7  ;;  %v20446_v16 = vld [vmem:[%s28673_s3 + $0x28] sm:$0xff]  ;;  %v25061_v32 = vand.u32 4294901760, %v3043_v15 }
 0x26f   : >> { %21876 = vmatmul.mubr.f32.gmra.mxu1 %v2350_v40  ;;  %v3014_v14 = vand.u32 4294901760, %v3013_v0  ;;  %v25038_v50 = vand.u32 4294901760, %v20446_v16  ;;  %v20445_v40 = vld [vmem:[%s28673_s3 + $0x20] sm:$0xff] }
 0x270   : >> { %21895 = vmatprep.mubr.f32.mxu1 %v24852_v8  ;;  %v25064_v28 = vand.u32 4294901760, %v20445_v40 }
 0x271   : >> { %21863 = vmatmul.mubr.f32.gmra.mxu0 %v24885_v44  ;;  %v25056_v51 = vsub.f32 %v20446_v16, %v25038_v50 }
 0x272   : >> { %21882 = vmatprep.mubr.f32.mxu0 %v24852_v8  ;;  %v24990_v8 = vsub.f32 %v2915_v10, %v24975_v59  ;;  %v25078_v25 = vsub.f32 %v20445_v40, %v25064_v28 }
 0x273   : >> { %21896 = vmatmul.mubr.f32.vlgmr.msra.gmra.mxu1 %v24855_v24  ;;  %v25071_v36 = vand.u32 4294901760, %v25056_v51 }
 0x274   : >> { %21918 = vmatpush3.msra.mxu1 %v3083_v7  ;;  %21898 = vmatprep.mubr.f32.mxu1 %v24857_v31  ;;  %v25012_v9 = vand.u32 4294901760, %v24990_v8  ;;  %v25092_v57 = vand.u32 4294901760, %v25078_v25  ;;  %v3618_v7 = vsel %vm225_vm0, %v20442_v35, 0  ;;  %v20448_v35 = vld [vmem:[%s24836_s8 + $0xb] sm:$0xff] }
 0x275   : >> { %21883 = vmatmul.mubr.f32.vlgmr.msra.gmra.mxu0 %v24855_v24  ;;  %21919 = vmatprep.subr.mxu1 %v3090_v37  ;;  %v25001_v24 = vsub.f32 %v2918_v34, %v24982_v33  ;;  %v3785_v2 = vsub.f32 %v25056_v51, %v25071_v36  ;;  %v25128_v48 = vand.u32 4294901760, %v3618_v7 }
 0x276   : >> { %21905 = vmatpush3.msra.mxu0 %v24901_v5  ;;  %21885 = vmatprep.mubr.f32.mxu0 %v24857_v31  ;;  %v3003_v31 = vsub.f32 %v24973_v54, %v3002_v29  ;;  %v3023_v44 = vsub.f32 %v24990_v8, %v25012_v9  ;;  %v3792_v62 = vsub.f32 %v25078_v25, %v25092_v57 }
 0x277   : >> { %21899 = vmatmul.mubr.f32.gmra.mxu1 %v24870_v38  ;;  %21906 = vmatprep.subr.mxu0 %v24920_v26 }
 0x278   : >> { %21907 = vmatpush3.msra.mxu0 %v24920_v26  ;;  %21901 = vmatprep.mubr.f32.mxu1 %v24872_v43  ;;  %v3793_v56 = vand.u32 4294901760, %v3792_v62 }
 0x279   : >> { %21886 = vmatmul.mubr.f32.gmra.mxu0 %v24870_v38  ;;  %21920 = vmatpush3.msra.mxu1 %v3090_v37  ;;  %v25021_v38 = vand.u32 4294901760, %v25001_v24 }
 0x27a   : >> { %21888 = vmatprep.mubr.f32.mxu0 %v24872_v43  ;;  %21930 = vmatprep.subr.mxu0 %v24915_v19  ;;  %v3004_v43 = vand.u32 4294901760, %v3003_v31 }
 0x27b   : >> { %21902 = vmatmul.mubr.f32.gmra.mxu1 %v24874_v53  ;;  %21943 = vmatprep.subr.mxu1 %v24901_v5  ;;  %v3033_v12 = vsub.f32 %v25001_v24, %v25021_v38 }
 0x27c   : >> { %21921 = vmatprep.mubr.f32.mxu1 %v24944_v20 }
 0x27d   : >> { %21889 = vmatmul.mubr.f32.gmra.mxu0 %v24874_v53  ;;  %v25042_v53 = vand.u32 4294901760, %v3023_v44  ;;  %v25048_v1 = vand.u32 4294901760, %v3033_v12 }
 0x27e   : >> { %21908 = vmatprep.mubr.f32.mxu0 %v2994_v45  ;;  %v20454_v45 = vld [vmem:[%s28673_s3 + $0x38] sm:$0xff] }
 0x27f   : >> { %21922 = vmatmul.mubr.f32.vlgmr.msra.gmra.mxu1 %v24956_v47  ;;  %v25185_v12 = vand.u32 4294901760, %v20454_v45 }
 0x280   : >> { %21944 = vmatpush3.msra.mxu1 %v24901_v5  ;;  %21924 = vmatprep.mubr.f32.mxu1 %v24963_v60 }
 0x281   : >> { %21909 = vmatmul.mubr.f32.vlgmr.msra.gmra.mxu0 %v3004_v43  ;;  %21945 = vmatprep.subr.mxu1 %v24920_v26  ;;  %v25200_v3 = vsub.f32 %v20454_v45, %v25185_v12 }
 0x282   : >> { %21931 = vmatpush3.msra.mxu0 %v24915_v19  ;;  %21911 = vmatprep.mubr.f32.mxu0 %v3014_v14  ;;  %v20441_v19 = vld [vmem:[%s24836_s8 + $0x12] sm:$0xff] }
 0x283   : >> { %21925 = vmatmul.mubr.f32.gmra.mxu1 %v24975_v59  ;;  %21932 = vmatprep.subr.mxu0 %v24929_v63  ;;  %v3615_v27 = vsel %vm225_vm0, %v20441_v19, 0  ;;  %v25211_v19 = vand.u32 4294901760, %v25200_v3 }
 0x284   : >> { %21933 = vmatpush3.msra.mxu0 %v24929_v63  ;;  %21927 = vmatprep.mubr.f32.mxu1 %v24982_v33  ;;  %v3612_v63 = vsel %vm225_vm0, %v20440_v49, 0 }
 0x285   : >> { %21912 = vmatmul.mubr.f32.gmra.mxu0 %v25042_v53  ;;  %21946 = vmatpush3.msra.mxu1 %v24920_v26  ;;  %v25110_v61 = vand.u32 4294901760, %v3612_v63 }
 0x286   : >> { %21914 = vmatprep.mubr.f32.mxu0 %v25048_v1  ;;  %21956 = vmatprep.subr.mxu0 %v24925_v52 }
 0x287   : >> { %21928 = vmatmul.mubr.f32.gmra.mxu1 %v24992_v22  ;;  %21969 = vmatprep.subr.mxu1 %v24901_v5  ;;  %v25126_v4 = vsub.f32 %v3612_v63, %v25110_v61 }
 0x288   : >> { %21947 = vmatprep.mubr.f32.mxu1 %v2992_v6 }
 0x289   : >> { %21915 = vmatmul.mubr.f32.gmra.mxu0 %v25061_v32  ;;  %v3705_v37 = vand.u32 4294901760, %v25126_v4 }
 0x28a   : >> { %21934 = vmatprep.mubr.f32.mxu0 %v24961_v39  ;;  %v3695_v39 = vand.u32 4294901760, %v25115_v42 }
 0x28b   : >> { %21948 = vmatmul.mubr.f32.vlgmr.msra.gmra.mxu1 %v3002_v29 }
 0x28c   : >> { %21970 = vmatpush3.msra.mxu1 %v24901_v5  ;;  %21950 = vmatprep.mubr.f32.mxu1 %v3012_v23  ;;  %v3786_v5 = vand.u32 4294901760, %v3785_v2  ;;  %v3696_v6 = vsub.f32 %v25115_v42, %v3695_v39  ;;  %v20453_v2 = vld [vmem:[%s28673_s3 + $0x30] sm:$0xff] }
 0x28d   : >> { %21935 = vmatmul.mubr.f32.vlgmr.msra.gmra.mxu0 %v24973_v54  ;;  %21971 = vmatprep.subr.mxu1 %v24920_v26  ;;  %v25145_v54 = vand.u32 4294901760, %v3624_v21  ;;  %v25205_v49 = vand.u32 4294901760, %v20453_v2 }
 0x28e   : >> { %21957 = vmatpush3.msra.mxu0 %v24925_v52  ;;  %21937 = vmatprep.mubr.f32.mxu0 %v24980_v17  ;;  %v20443_v52 = vld [vmem:[%s24836_s8 + $0x22] sm:$0xff]  ;;  %v3697_v58 = vand.u32 4294901760, %v3696_v6 }
 0x28f   : >> { %21951 = vmatmul.mubr.f32.gmra.mxu1 %v25012_v9  ;;  %21958 = vmatprep.subr.mxu0 %v24940_v18  ;;  %v25166_v29 = vsub.f32 %v3624_v21, %v25145_v54  ;;  %v25217_v63 = vsub.f32 %v20453_v2, %v25205_v49  ;;  %v20452_v21 = vld [vmem:[%s24836_s8 + $0x2b] sm:$0xff] }
 0x290   : >> { %21959 = vmatpush3.msra.mxu0 %v24940_v18  ;;  %21953 = vmatprep.mubr.f32.mxu1 %v25021_v38  ;;  %v25117_v18 = vand.u32 4294901760, %v3615_v27 }
 0x291   : >> { %21938 = vmatmul.mubr.f32.gmra.mxu0 %v24990_v8  ;;  %21972 = vmatpush3.msra.mxu1 %v24920_v26  ;;  %v3621_v26 = vsel %vm225_vm0, %v20443_v52, 0  ;;  %v3745_v43 = vand.u32 4294901760, %v25166_v29  ;;  %v20449_v52 = vld [vmem:[%s24836_s8 + $0x13] sm:$0xff]  ;;  %v25231_v62 = vand.u32 4294901760, %v25217_v63 }
 0x292   : >> { %21940 = vmatprep.mubr.f32.mxu0 %v25001_v24  ;;  %21982 = vmatprep.subr.mxu0 %v25038_v50  ;;  %v25133_v10 = vsub.f32 %v3615_v27, %v25117_v18  ;;  %v25135_v34 = vand.u32 4294901760, %v3621_v26 }
 0x293   : >> { %21954 = vmatmul.mubr.f32.gmra.mxu1 %v25033_v13  ;;  %21995 = vmatprep.subr.mxu1 %v3786_v5  ;;  %v3746_v40 = vsub.f32 %v25166_v29, %v3745_v43 }
 0x294   : >> { %21973 = vmatprep.mubr.f32.mxu1 %v24944_v20  ;;  %v3715_v17 = vand.u32 4294901760, %v25133_v10 }
 0x295   : >> { %21941 = vmatmul.mubr.f32.gmra.mxu0 %v25015_v41 }
 0x296   : >> { %21960 = vmatprep.mubr.f32.mxu0 %v24944_v20  ;;  %v25143_v20 = vsub.f32 %v3618_v7, %v25128_v48  ;;  %v3716_v23 = vsub.f32 %v25133_v10, %v3715_v17  ;;  %v4321_v7 = vsel %vm225_vm0, %v20448_v35, 0 }
 0x297   : >> { %21974 = vmatmul.mubr.f32.vlgmr.msra.gmra.mxu1 %v24956_v47 }
 0x298   : >> { %21996 = vmatpush3.msra.mxu1 %v3786_v5  ;;  %21976 = vmatprep.mubr.f32.mxu1 %v24963_v60  ;;  %v3725_v11 = vand.u32 4294901760, %v25143_v20  ;;  %v3717_v44 = vand.u32 4294901760, %v3716_v23  ;;  %v4494_v5 = vsub.f32 %v25200_v3, %v25211_v19 }
 0x299   : >> { %21961 = vmatmul.mubr.f32.vlgmr.msra.gmra.mxu0 %v24956_v47  ;;  %21997 = vmatprep.subr.mxu1 %v3793_v56  ;;  %v25154_v47 = vsub.f32 %v3621_v26, %v25135_v34  ;;  %v4324_v26 = vsel %vm225_vm0, %v20449_v52, 0 }
 0x29a   : >> { %21983 = vmatpush3.msra.mxu0 %v25038_v50  ;;  %21963 = vmatprep.mubr.f32.mxu0 %v24963_v60  ;;  %v3706_v60 = vsub.f32 %v25126_v4, %v3705_v37  ;;  %v3726_v16 = vsub.f32 %v25143_v20, %v3725_v11 }
 0x29b   : >> { %21977 = vmatmul.mubr.f32.gmra.mxu1 %v24975_v59  ;;  %21984 = vmatprep.subr.mxu0 %v25064_v28  ;;  %v3735_v31 = vand.u32 4294901760, %v25154_v47 }
 0x29c   : >> { %21985 = vmatpush3.msra.mxu0 %v25064_v28  ;;  %21979 = vmatprep.mubr.f32.mxu1 %v24982_v33  ;;  %v3707_v0 = vand.u32 4294901760, %v3706_v60  ;;  %v3727_v15 = vand.u32 4294901760, %v3726_v16 }
 0x29d   : >> { %21964 = vmatmul.mubr.f32.gmra.mxu0 %v24975_v59  ;;  %21998 = vmatpush3.msra.mxu1 %v3793_v56  ;;  %v3736_v14 = vsub.f32 %v25154_v47, %v3735_v31  ;;  %v4501_v56 = vsub.f32 %v25217_v63, %v25231_v62 }
 0x29e   : >> { %21966 = vmatprep.mubr.f32.mxu0 %v24982_v33  ;;  %22008 = vmatprep.subr.mxu0 %v25056_v51 }
 0x29f   : >> { %21980 = vmatmul.mubr.f32.gmra.mxu1 %v24992_v22  ;;  %22021 = vmatprep.subr.mxu1 %v25038_v50  ;;  %v3737_v46 = vand.u32 4294901760, %v3736_v14 }
 0x2a0   : >> { %21999 = vmatprep.mubr.f32.mxu1 %v25096_v55 }
 0x2a1   : >> { %21967 = vmatmul.mubr.f32.gmra.mxu0 %v24992_v22 }
 0x2a2   : >> { %21986 = vmatprep.mubr.f32.mxu0 %v3697_v58 }
 0x2a3   : >> { %22000 = vmatmul.mubr.f32.vlgmr.msra.gmra.mxu1 %v25110_v61 }
 0x2a4   : >> { %22022 = vmatpush3.msra.mxu1 %v25038_v50  ;;  %22002 = vmatprep.mubr.f32.mxu1 %v25117_v18 }
 0x2a5   : >> { %21987 = vmatmul.mubr.f32.vlgmr.msra.gmra.mxu0 %v3707_v0  ;;  %22023 = vmatprep.subr.mxu1 %v25064_v28 }
 0x2a6   : >> { %22009 = vmatpush3.msra.mxu0 %v25056_v51  ;;  %21989 = vmatprep.mubr.f32.mxu0 %v3717_v44  ;;  %v3747_v51 = vand.u32 4294901760, %v3746_v40 }
 0x2a7   : >> { %22003 = vmatmul.mubr.f32.gmra.mxu1 %v25128_v48  ;;  %22010 = vmatprep.subr.mxu0 %v25078_v25 }
 0x2a8   : >> { %22011 = vmatpush3.msra.mxu0 %v25078_v25  ;;  %22005 = vmatprep.mubr.f32.mxu1 %v25135_v34  ;;  %v20447_v25 = vld [vmem:[%s24836_s8 + $0x3] sm:$0xff] }
 0x2a9   : >> { %21990 = vmatmul.mubr.f32.gmra.mxu0 %v3727_v15  ;;  %22024 = vmatpush3.msra.mxu1 %v25064_v28  ;;  %v4318_v27 = vsel %vm225_vm0, %v20447_v25, 0 }
 0x2aa   : >> { %21992 = vmatprep.mubr.f32.mxu0 %v3737_v46  ;;  %22034 = vmatprep.subr.mxu0 %v25071_v36 }
 0x2ab   : >> { %22006 = vmatmul.mubr.f32.gmra.mxu1 %v25145_v54  ;;  %22047 = vmatprep.subr.mxu1 %v25038_v50 }
 0x2ac   : >> { %22025 = vmatprep.mubr.f32.mxu1 %v3695_v39 }
 0x2ad   : >> { %21993 = vmatmul.mubr.f32.gmra.mxu0 %v3747_v51 }
 0x2ae   : >> { %22012 = vmatprep.mubr.f32.mxu0 %v25115_v42  ;;  %v25235_v42 = vand.u32 4294901760, %v4318_v27 }
 0x2af   : >> { %22026 = vmatmul.mubr.f32.vlgmr.msra.gmra.mxu1 %v3705_v37  ;;  %v4502_v37 = vand.u32 4294901760, %v4501_v56 }
 0x2b0   : >> { %22048 = vmatpush3.msra.mxu1 %v25038_v50  ;;  %22028 = vmatprep.mubr.f32.mxu1 %v3715_v17  ;;  %v4495_v50 = vand.u32 4294901760, %v4494_v5  ;;  %v25254_v39 = vsub.f32 %v4318_v27, %v25235_v42  ;;  %v20461_v5 = vld [vmem:[%s28673_s3 + $0x40] sm:$0xff] }
 0x2b1   : >> { %22013 = vmatmul.mubr.f32.vlgmr.msra.gmra.mxu0 %v25126_v4  ;;  %22049 = vmatprep.subr.mxu1 %v25064_v28  ;;  %v25249_v4 = vand.u32 4294901760, %v4321_v7  ;;  %v25345_v35 = vand.u32 4294901760, %v20461_v5 }
 0x2b2   : >> { %22035 = vmatpush3.msra.mxu0 %v25071_v36  ;;  %22015 = vmatprep.mubr.f32.mxu0 %v25133_v10  ;;  %v20451_v36 = vld [vmem:[%s24836_s8 + $0x23] sm:$0xff]  ;;  %v25256_v10 = vand.u32 4294901760, %v4324_v26  ;;  %v4404_v17 = vand.u32 4294901760, %v25254_v39 }
 0x2b3   : >> { %22029 = vmatmul.mubr.f32.gmra.mxu1 %v3725_v11  ;;  %22036 = vmatprep.subr.mxu0 %v25092_v57  ;;  %v4333_v11 = vsel %vm225_vm0, %v20452_v21, 0  ;;  %v20458_v21 = vld [vmem:[%s24836_s8 + $0x1c] sm:$0xff] }
 0x2b4   : >> { %22037 = vmatpush3.msra.mxu0 %v25092_v57  ;;  %22031 = vmatprep.mubr.f32.mxu1 %v3735_v31  ;;  %v4327_v57 = vsel %vm225_vm0, %v20450_v30, 0  ;;  %v25285_v58 = vand.u32 4294901760, %v4333_v11  ;;  %v4405_v23 = vsub.f32 %v25254_v39, %v4404_v17  ;;  %v20456_v30 = vld [vmem:[%s24836_s8 + $0xc] sm:$0xff] }
 0x2b5   : >> { %22016 = vmatmul.mubr.f32.gmra.mxu0 %v25143_v20  ;;  %22050 = vmatpush3.msra.mxu1 %v25064_v28  ;;  %v4330_v28 = vsel %vm225_vm0, %v20451_v36, 0  ;;  %v25266_v20 = vsub.f32 %v4321_v7, %v25249_v4  ;;  %v25268_v6 = vand.u32 4294901760, %v4327_v57  ;;  %v25357_v7 = vsub.f32 %v20461_v5, %v25345_v35  ;;  %v20457_v36 = vld [vmem:[%s24836_s8 + $0x14] sm:$0xff] }
 0x2b6   : >> { %22018 = vmatprep.mubr.f32.mxu0 %v25154_v47  ;;  %22060 = vmatprep.subr.mxu0 %v25185_v12  ;;  %v25273_v47 = vsub.f32 %v4324_v26, %v25256_v10  ;;  %v25275_v60 = vand.u32 4294901760, %v4330_v28  ;;  %v25306_v0 = vsub.f32 %v4333_v11, %v25285_v58  ;;  %v4406_v16 = vand.u32 4294901760, %v4405_v23  ;;  %v20460_v11 = vld [vmem:[%s24836_s8 + $0x2c] sm:$0xff] }
 0x2b7   : >> { %22032 = vmatmul.mubr.f32.gmra.mxu1 %v3745_v43  ;;  %22073 = vmatprep.subr.mxu1 %v4495_v50  ;;  %v25371_v56 = vand.u32 4294901760, %v25357_v7 }
 0x2b8   : >> { %22051 = vmatprep.mubr.f32.mxu1 %v25096_v55  ;;  %v4424_v31 = vand.u32 4294901760, %v25273_v47  ;;  %v4454_v15 = vand.u32 4294901760, %v25306_v0 }
 0x2b9   : >> { %22019 = vmatmul.mubr.f32.gmra.mxu0 %v25166_v29  ;;  %v4414_v29 = vand.u32 4294901760, %v25266_v20 }
 0x2ba   : >> { %22038 = vmatprep.mubr.f32.mxu0 %v25096_v55  ;;  %v25283_v55 = vsub.f32 %v4327_v57, %v25268_v6  ;;  %v4425_v43 = vsub.f32 %v25273_v47, %v4424_v31  ;;  %v4455_v51 = vsub.f32 %v25306_v0, %v4454_v15  ;;  %v5030_v57 = vsel %vm225_vm0, %v20456_v30, 0 }
 0x2bb   : >> { %22052 = vmatmul.mubr.f32.vlgmr.msra.gmra.mxu1 %v25110_v61 }
 0x2bc   : >> { %22074 = vmatpush3.msra.mxu1 %v4495_v50  ;;  %22054 = vmatprep.mubr.f32.mxu1 %v25117_v18  ;;  %v4434_v45 = vand.u32 4294901760, %v25283_v55  ;;  %v4426_v40 = vand.u32 4294901760, %v4425_v43 }
 0x2bd   : >> { %22039 = vmatmul.mubr.f32.vlgmr.msra.gmra.mxu0 %v25110_v61  ;;  %22075 = vmatprep.subr.mxu1 %v4502_v37  ;;  %v25294_v61 = vsub.f32 %v4330_v28, %v25275_v60  ;;  %v5033_v28 = vsel %vm225_vm0, %v20457_v36, 0 }
 0x2be   : >> { %22061 = vmatpush3.msra.mxu0 %v25185_v12  ;;  %22041 = vmatprep.mubr.f32.mxu0 %v25117_v18  ;;  %v4415_v18 = vsub.f32 %v25266_v20, %v4414_v29  ;;  %v4435_v14 = vsub.f32 %v25283_v55, %v4434_v45 }
 0x2bf   : >> { %22055 = vmatmul.mubr.f32.gmra.mxu1 %v25128_v48  ;;  %22062 = vmatprep.subr.mxu0 %v25205_v49  ;;  %v4444_v44 = vand.u32 4294901760, %v25294_v61 }
 0x2c0   : >> { %22063 = vmatpush3.msra.mxu0 %v25205_v49  ;;  %22057 = vmatprep.mubr.f32.mxu1 %v25135_v34 }
 0x2c1   : >> { %22042 = vmatmul.mubr.f32.gmra.mxu0 %v25128_v48  ;;  %22076 = vmatpush3.msra.mxu1 %v4502_v37  ;;  %v20462_v48 = vld [vmem:[%s28673_s3 + $0x48] sm:$0xff]  ;;  %v4445_v46 = vsub.f32 %v25294_v61, %v4444_v44  ;;  %v5210_v37 = vsub.f32 %v25357_v7, %v25371_v56 }
 0x2c2   : >> { %22044 = vmatprep.mubr.f32.mxu0 %v25135_v34  ;;  %22086 = vmatprep.subr.mxu0 %v25200_v3  ;;  %v4416_v34 = vand.u32 4294901760, %v4415_v18  ;;  %v25325_v2 = vand.u32 4294901760, %v20462_v48 }
 0x2c3   : >> { %22058 = vmatmul.mubr.f32.gmra.mxu1 %v25145_v54  ;;  %22099 = vmatprep.subr.mxu1 %v25185_v12  ;;  %v4446_v25 = vand.u32 4294901760, %v4445_v46 }
 0x2c4   : >> { %22077 = vmatprep.mubr.f32.mxu1 %v25235_v42  ;;  %v25340_v27 = vsub.f32 %v20462_v48, %v25325_v2 }
 0x2c5   : >> { %22045 = vmatmul.mubr.f32.gmra.mxu0 %v25145_v54  ;;  %v4436_v54 = vand.u32 4294901760, %v4435_v14 }
 0x2c6   : >> { %22064 = vmatprep.mubr.f32.mxu0 %v4406_v16  ;;  %v25351_v52 = vand.u32 4294901760, %v25340_v27 }
 0x2c7   : >> { %22078 = vmatmul.mubr.f32.vlgmr.msra.gmra.mxu1 %v25249_v4 }
 0x2c8   : >> { %22100 = vmatpush3.msra.mxu1 %v25185_v12  ;;  %22080 = vmatprep.mubr.f32.mxu1 %v25256_v10  ;;  %v5203_v50 = vsub.f32 %v25340_v27, %v25351_v52 }
 0x2c9   : >> { %22065 = vmatmul.mubr.f32.vlgmr.msra.gmra.mxu0 %v4416_v34  ;;  %22101 = vmatprep.subr.mxu1 %v25205_v49 }
 0x2ca   : >> { %22087 = vmatpush3.msra.mxu0 %v25200_v3  ;;  %22067 = vmatprep.mubr.f32.mxu0 %v4426_v40  ;;  %v4456_v3 = vand.u32 4294901760, %v4455_v51 }
 0x2cb   : >> { %22081 = vmatmul.mubr.f32.gmra.mxu1 %v25268_v6  ;;  %22088 = vmatprep.subr.mxu0 %v25217_v63 }
 0x2cc   : >> { %22089 = vmatpush3.msra.mxu0 %v25217_v63  ;;  %22083 = vmatprep.mubr.f32.mxu1 %v25275_v60  ;;  %v20455_v63 = vld [vmem:[%s24836_s8 + $0x4] sm:$0xff] }
 0x2cd   : >> { %22068 = vmatmul.mubr.f32.gmra.mxu0 %v4436_v54  ;;  %22102 = vmatpush3.msra.mxu1 %v25205_v49  ;;  %v5027_v26 = vsel %vm225_vm0, %v20455_v63, 0 }
 0x2ce   : >> { %22070 = vmatprep.mubr.f32.mxu0 %v4446_v25  ;;  %22112 = vmatprep.subr.mxu0 %v25211_v19 }
 0x2cf   : >> { %22084 = vmatmul.mubr.f32.gmra.mxu1 %v25285_v58  ;;  %22125 = vmatprep.subr.mxu1 %v25185_v12 }
 0x2d0   : >> { %22103 = vmatprep.mubr.f32.mxu1 %v4404_v17 }
 0x2d1   : >> { %22071 = vmatmul.mubr.f32.gmra.mxu0 %v4456_v3 }
 0x2d2   : >> { %22090 = vmatprep.mubr.f32.mxu0 %v25254_v39  ;;  %v25375_v39 = vand.u32 4294901760, %v5027_v26 }
 0x2d3   : >> { %22104 = vmatmul.mubr.f32.vlgmr.msra.gmra.mxu1 %v4414_v29  ;;  %v5211_v29 = vand.u32 4294901760, %v5210_v37 }
 0x2d4   : >> { %22126 = vmatpush3.msra.mxu1 %v25185_v12  ;;  %22106 = vmatprep.mubr.f32.mxu1 %v4424_v31  ;;  %v5204_v12 = vand.u32 4294901760, %v5203_v50  ;;  %v25394_v17 = vsub.f32 %v5027_v26, %v25375_v39  ;;  %v20469_v50 = vld [vmem:[%s28673_s3 + $0x50] sm:$0xff] }
 0x2d5   : >> { %22091 = vmatmul.mubr.f32.vlgmr.msra.gmra.mxu0 %v25266_v20  ;;  %22127 = vmatprep.subr.mxu1 %v25205_v49  ;;  %v25389_v20 = vand.u32 4294901760, %v5030_v57 }
 0x2d6   : >> { %22113 = vmatpush3.msra.mxu0 %v25211_v19  ;;  %22093 = vmatprep.mubr.f32.mxu0 %v25273_v47  ;;  %v20459_v19 = vld [vmem:[%s24836_s8 + $0x24] sm:$0xff]  ;;  %v25396_v47 = vand.u32 4294901760, %v5033_v28  ;;  %v5113_v31 = vand.u32 4294901760, %v25394_v17 }
 0x2d7   : >> { %22107 = vmatmul.mubr.f32.gmra.mxu1 %v4434_v45  ;;  %22114 = vmatprep.subr.mxu0 %v25231_v62  ;;  %v5042_v45 = vsel %vm225_vm0, %v20460_v11, 0 }
 0x2d8   : >> { %22115 = vmatpush3.msra.mxu0 %v25231_v62  ;;  %22109 = vmatprep.mubr.f32.mxu1 %v4444_v44  ;;  %v5036_v62 = vsel %vm225_vm0, %v20458_v21, 0  ;;  %v25425_v16 = vand.u32 4294901760, %v5042_v45  ;;  %v5114_v43 = vsub.f32 %v25394_v17, %v5113_v31  ;;  %v20466_v21 = vld [vmem:[%s24836_s8 + $0x30] sm:$0xff] }
 0x2d9   : >> { %22094 = vmatmul.mubr.f32.gmra.mxu0 %v25283_v55  ;;  %22128 = vmatpush3.msra.mxu1 %v25205_v49  ;;  %v5039_v49 = vsel %vm225_vm0, %v20459_v19, 0  ;;  %v25406_v55 = vsub.f32 %v5030_v57, %v25389_v20  ;;  %v25408_v23 = vand.u32 4294901760, %v5036_v62 }
 0x2da   : >> { %22096 = vmatprep.mubr.f32.mxu0 %v25294_v61  ;;  %22138 = vmatprep.subr.mxu0 %v25325_v2  ;;  %v25413_v61 = vsub.f32 %v5033_v28, %v25396_v47  ;;  %v25415_v18 = vand.u32 4294901760, %v5039_v49  ;;  %v25444_v34 = vsub.f32 %v5042_v45, %v25425_v16  ;;  %v5115_v14 = vand.u32 4294901760, %v5114_v43 }
 0x2db   : >> { %22110 = vmatmul.mubr.f32.gmra.mxu1 %v4454_v15  ;;  %22151 = vmatprep.subr.mxu1 %v5204_v12 }
 0x2dc   : >> { %22129 = vmatprep.mubr.f32.mxu1 %v25235_v42  ;;  %v5133_v44 = vand.u32 4294901760, %v25413_v61  ;;  %v5163_v54 = vand.u32 4294901760, %v25444_v34 }
 0x2dd   : >> { %22097 = vmatmul.mubr.f32.gmra.mxu0 %v25306_v0  ;;  %v5123_v0 = vand.u32 4294901760, %v25406_v55 }
 0x2de   : >> { %22116 = vmatprep.mubr.f32.mxu0 %v25235_v42  ;;  %v25423_v42 = vsub.f32 %v5036_v62, %v25408_v23  ;;  %v5134_v15 = vsub.f32 %v25413_v61, %v5133_v44 }
 0x2df   : >> { %22130 = vmatmul.mubr.f32.vlgmr.msra.gmra.mxu1 %v25249_v4 }
 0x2e0   : >> { %22152 = vmatpush3.msra.mxu1 %v5204_v12  ;;  %22132 = vmatprep.mubr.f32.mxu1 %v25256_v10  ;;  %v5143_v48 = vand.u32 4294901760, %v25423_v42  ;;  %v5135_v51 = vand.u32 4294901760, %v5134_v15  ;;  %v20472_v15 = vld [vmem:[%s24836_s8 + $0x21] sm:$0xff] }
 0x2e1   : >> { %22117 = vmatmul.mubr.f32.vlgmr.msra.gmra.mxu0 %v25249_v4  ;;  %22153 = vmatprep.subr.mxu1 %v5211_v29  ;;  %v25434_v4 = vsub.f32 %v5039_v49, %v25415_v18 }
 0x2e2   : >> { %22139 = vmatpush3.msra.mxu0 %v25325_v2  ;;  %22119 = vmatprep.mubr.f32.mxu0 %v25256_v10  ;;  %v5124_v10 = vsub.f32 %v25406_v55, %v5123_v0  ;;  %v5144_v46 = vsub.f32 %v25423_v42, %v5143_v48 }
 0x2e3   : >> { %22133 = vmatmul.mubr.f32.gmra.mxu1 %v25268_v6  ;;  %22140 = vmatprep.subr.mxu0 %v25345_v35  ;;  %v5153_v40 = vand.u32 4294901760, %v25434_v4 }
 0x2e4   : >> { %22141 = vmatpush3.msra.mxu0 %v25345_v35  ;;  %22135 = vmatprep.mubr.f32.mxu1 %v25275_v60  ;;  %v5145_v3 = vand.u32 4294901760, %v5144_v46 }
 0x2e5   : >> { %22120 = vmatmul.mubr.f32.gmra.mxu0 %v25268_v6  ;;  %22154 = vmatpush3.msra.mxu1 %v5211_v29  ;;  %v20470_v6 = vld [vmem:[%s28673_s3 + $0x58] sm:$0xff]  ;;  %v5154_v25 = vsub.f32 %v25434_v4, %v5153_v40 }
 0x2e6   : >> { %22122 = vmatprep.mubr.f32.mxu0 %v25275_v60  ;;  %22164 = vmatprep.subr.mxu0 %v25340_v27  ;;  %v5125_v60 = vand.u32 4294901760, %v5124_v10  ;;  %v25461_v5 = vand.u32 4294901760, %v20470_v6 }
 0x2e7   : >> { %22136 = vmatmul.mubr.f32.gmra.mxu1 %v25285_v58  ;;  %22177 = vmatprep.subr.mxu1 %v25325_v2  ;;  %v5155_v63 = vand.u32 4294901760, %v5154_v25  ;;  %v20474_v25 = vld [vmem:[%s24836_s8 + $0x31] sm:$0xff] }
 0x2e8   : >> { %22155 = vmatprep.mubr.f32.mxu1 %v25375_v39  ;;  %v25474_v26 = vsub.f32 %v20470_v6, %v25461_v5 }
 0x2e9   : >> { %22123 = vmatmul.mubr.f32.gmra.mxu0 %v25285_v58  ;;  %v5164_v58 = vsub.f32 %v25444_v34, %v5163_v54 }
 0x2ea   : >> { %22142 = vmatprep.mubr.f32.mxu0 %v5115_v14  ;;  %v25485_v36 = vand.u32 4294901760, %v25474_v26 }
 0x2eb   : >> { %22156 = vmatmul.mubr.f32.vlgmr.msra.gmra.mxu1 %v25389_v20  ;;  %v5165_v30 = vand.u32 4294901760, %v5164_v58 }
 0x2ec   : >> { %22178 = vmatpush3.msra.mxu1 %v25325_v2  ;;  %22158 = vmatprep.mubr.f32.mxu1 %v25396_v47  ;;  %v5912_v57 = vsub.f32 %v25474_v26, %v25485_v36 }
 0x2ed   : >> { %22143 = vmatmul.mubr.f32.vlgmr.msra.gmra.mxu0 %v5125_v60  ;;  %22179 = vmatprep.subr.mxu1 %v25345_v35 }
 0x2ee   : >> { %22165 = vmatpush3.msra.mxu0 %v25340_v27  ;;  %22145 = vmatprep.mubr.f32.mxu0 %v5135_v51  ;;  %v25479_v27 = vand.u32 4294901760, %v20469_v50  ;;  %v5913_v28 = vand.u32 4294901760, %v5912_v57 }
 0x2ef   : >> { %22159 = vmatmul.mubr.f32.gmra.mxu1 %v25408_v23  ;;  %22166 = vmatprep.subr.mxu0 %v25357_v7 }
 0x2f0   : >> { %22167 = vmatpush3.msra.mxu0 %v25357_v7  ;;  %22161 = vmatprep.mubr.f32.mxu1 %v25415_v18  ;;  %v25490_v7 = vsub.f32 %v20469_v50, %v25479_v27 }
 0x2f1   : >> { %22146 = vmatmul.mubr.f32.gmra.mxu0 %v5145_v3  ;;  %22180 = vmatpush3.msra.mxu1 %v25345_v35 }
 0x2f2   : >> { %22148 = vmatprep.mubr.f32.mxu0 %v5155_v63  ;;  %22190 = vmatprep.subr.mxu0 %v25351_v52  ;;  %v25499_v12 = vand.u32 4294901760, %v25490_v7 }
 0x2f3   : >> { %22162 = vmatmul.mubr.f32.gmra.mxu1 %v25425_v16  ;;  %22203 = vmatprep.subr.mxu1 %v25325_v2 }
 0x2f4   : >> { %22181 = vmatprep.mubr.f32.mxu1 %v5113_v31  ;;  %v5919_v19 = vsub.f32 %v25490_v7, %v25499_v12 }
 0x2f5   : >> { %22149 = vmatmul.mubr.f32.gmra.mxu0 %v5165_v30 }
 0x2f6   : >> { %22168 = vmatprep.mubr.f32.mxu0 %v25394_v17  ;;  %v5920_v17 = vand.u32 4294901760, %v5919_v19 }
 0x2f7   : >> { %22182 = vmatmul.mubr.f32.vlgmr.msra.gmra.mxu1 %v5123_v0 }
 0x2f8   : >> { %22204 = vmatpush3.msra.mxu1 %v25325_v2  ;;  %22184 = vmatprep.mubr.f32.mxu1 %v5133_v44  ;;  %v20467_v2 = vld [vmem:[%s24836_s8 + $0x38] sm:$0xff] }
 0x2f9   : >> { %22169 = vmatmul.mubr.f32.vlgmr.msra.gmra.mxu0 %v25406_v55  ;;  %22205 = vmatprep.subr.mxu1 %v25345_v35  ;;  %v5748_v37 = vsel %vm225_vm0, %v20467_v2, 0 }
 0x2fa   : >> { %22191 = vmatpush3.msra.mxu0 %v25351_v52  ;;  %22171 = vmatprep.mubr.f32.mxu0 %v25413_v61  ;;  %v5745_v52 = vsel %vm225_vm0, %v20466_v21, 0  ;;  %v25521_v62 = vand.u32 4294901760, %v5748_v37 }
 0x2fb   : >> { %22185 = vmatmul.mubr.f32.gmra.mxu1 %v5143_v48  ;;  %22192 = vmatprep.subr.mxu0 %v25371_v56 }
 0x2fc   : >> { %22193 = vmatpush3.msra.mxu0 %v25371_v56  ;;  %22187 = vmatprep.mubr.f32.mxu1 %v5153_v40  ;;  %v20468_v56 = vld [vmem:[%s24836_s8 + $0x40] sm:$0xff] }
 0x2fd   : >> { %22172 = vmatmul.mubr.f32.gmra.mxu0 %v25423_v42  ;;  %22206 = vmatpush3.msra.mxu1 %v25345_v35  ;;  %v25518_v35 = vand.u32 4294901760, %v5745_v52  ;;  %v5751_v49 = vsel %vm225_vm0, %v20468_v56, 0 }
 0x2fe   : >> { %22174 = vmatprep.mubr.f32.mxu0 %v25434_v4  ;;  %22216 = vmatprep.subr.mxu0 %v25461_v5  ;;  %v25530_v29 = vand.u32 4294901760, %v5751_v49  ;;  %v20471_v4 = vld [vmem:[%s24836_s8 + $0x19] sm:$0xff] }
 0x2ff   : >> { %22188 = vmatmul.mubr.f32.gmra.mxu1 %v5163_v54  ;;  %22229 = vmatprep.subr.mxu1 %v5913_v28  ;;  %v25528_v11 = vsub.f32 %v5745_v52, %v25518_v35 }
 0x300   : >> { %22207 = vmatprep.mubr.f32.mxu1 %v25375_v39  ;;  %v25544_v55 = vsub.f32 %v5751_v49, %v25530_v29 }
 0x301   : >> { %22175 = vmatmul.mubr.f32.gmra.mxu0 %v25444_v34  ;;  %v6445_v34 = vsel %vm225_vm0, %v20471_v4, 0 }
 0x302   : >> { %22194 = vmatprep.mubr.f32.mxu0 %v25375_v39  ;;  %v25535_v39 = vsub.f32 %v5748_v37, %v25521_v62  ;;  %v5872_v61 = vand.u32 4294901760, %v25544_v55 }
 0x303   : >> { %22208 = vmatmul.mubr.f32.vlgmr.msra.gmra.mxu1 %v25389_v20 }
 0x304   : >> { %22230 = vmatpush3.msra.mxu1 %v5913_v28  ;;  %22210 = vmatprep.mubr.f32.mxu1 %v25396_v47  ;;  %v20476_v28 = vld [vmem:[%s24836_s8 + $0x41] sm:$0xff] }
 0x305   : >> { %22195 = vmatmul.mubr.f32.vlgmr.msra.gmra.mxu0 %v25389_v20  ;;  %22231 = vmatprep.subr.mxu1 %v5920_v17  ;;  %v5852_v20 = vand.u32 4294901760, %v25528_v11 }
 0x306   : >> { %22217 = vmatpush3.msra.mxu0 %v25461_v5  ;;  %22197 = vmatprep.mubr.f32.mxu0 %v25396_v47  ;;  %v5862_v47 = vand.u32 4294901760, %v25535_v39 }
 0x307   : >> { %22211 = vmatmul.mubr.f32.gmra.mxu1 %v25408_v23  ;;  %22218 = vmatprep.subr.mxu0 %v25479_v27  ;;  %v5853_v31 = vsub.f32 %v25528_v11, %v5852_v20 }
 0x308   : >> { %22219 = vmatpush3.msra.mxu0 %v25479_v27  ;;  %22213 = vmatprep.mubr.f32.mxu1 %v25415_v18 }
 0x309   : >> { %22198 = vmatmul.mubr.f32.gmra.mxu0 %v25408_v23  ;;  %22232 = vmatpush3.msra.mxu1 %v5920_v17  ;;  %v20478_v23 = vld [vmem:[%s28673_s3 + $0x68] sm:$0xff]  ;;  %v5854_v0 = vand.u32 4294901760, %v5853_v31 }
 0x30a   : >> { %22200 = vmatprep.mubr.f32.mxu0 %v25415_v18  ;;  %22242 = vmatprep.subr.mxu0 %v25474_v26  ;;  %v5863_v18 = vsub.f32 %v25535_v39, %v5862_v47  ;;  %v25565_v45 = vand.u32 4294901760, %v20478_v23 }
 0x30b   : >> { %22214 = vmatmul.mubr.f32.gmra.mxu1 %v25425_v16  ;;  %22255 = vmatprep.subr.mxu1 %v25461_v5 }
 0x30c   : >> { %22233 = vmatprep.mubr.f32.mxu1 %v24975_v59  ;;  %v5864_v42 = vand.u32 4294901760, %v5863_v18 }
 0x30d   : >> { %22201 = vmatmul.mubr.f32.gmra.mxu0 %v25425_v16  ;;  %v20477_v16 = vld [vmem:[%s28673_s3 + $0x60] sm:$0xff] }
 0x30e   : >> { %22220 = vmatprep.mubr.f32.mxu0 %v25042_v53  ;;  %v5873_v53 = vsub.f32 %v25544_v55, %v5872_v61 }
 0x30f   : >> { %22234 = vmatmul.mubr.f32.vlgmr.msra.gmra.mxu1 %v24982_v33 }
 0x310   : >> { %22256 = vmatpush3.msra.mxu1 %v25461_v5  ;;  %22236 = vmatprep.mubr.f32.mxu1 %v24992_v22  ;;  %v5874_v43 = vand.u32 4294901760, %v5873_v53 }
 0x311   : >> { %22221 = vmatmul.mubr.f32.vlgmr.msra.gmra.mxu0 %v25048_v1  ;;  %22257 = vmatprep.subr.mxu1 %v25479_v27  ;;  %v25582_v1 = vsub.f32 %v20478_v23, %v25565_v45 }
 0x312   : >> { %22243 = vmatpush3.msra.mxu0 %v25474_v26  ;;  %22223 = vmatprep.mubr.f32.mxu0 %v25061_v32  ;;  %v25587_v32 = vand.u32 4294901760, %v20477_v16 }
 0x313   : >> { %22237 = vmatmul.mubr.f32.gmra.mxu1 %v25518_v35  ;;  %22244 = vmatprep.subr.mxu0 %v25490_v7  ;;  %v25593_v44 = vand.u32 4294901760, %v25582_v1 }
 0x314   : >> { %22245 = vmatpush3.msra.mxu0 %v25490_v7  ;;  %22239 = vmatprep.mubr.f32.mxu1 %v25521_v62  ;;  %v25598_v10 = vsub.f32 %v20477_v16, %v25587_v32  ;;  %v6454_v7 = vsel %vm225_vm0, %v20474_v25, 0 }
 0x315   : >> { %22224 = vmatmul.mubr.f32.gmra.mxu0 %v5854_v0  ;;  %22258 = vmatpush3.msra.mxu1 %v25479_v27  ;;  %v6621_v14 = vsub.f32 %v25582_v1, %v25593_v44  ;;  %v25652_v56 = vand.u32 4294901760, %v6454_v7 }
 0x316   : >> { %22226 = vmatprep.mubr.f32.mxu0 %v5864_v42  ;;  %22268 = vmatprep.subr.mxu0 %v25485_v36 }
 0x317   : >> { %22240 = vmatmul.mubr.f32.gmra.mxu1 %v25530_v29  ;;  %22281 = vmatprep.subr.mxu1 %v25461_v5 }
 0x318   : >> { %22259 = vmatprep.mubr.f32.mxu1 %v25012_v9  ;;  %v20473_v9 = vld [vmem:[%s24836_s8 + $0x29] sm:$0xff] }
 0x319   : >> { %22227 = vmatmul.mubr.f32.gmra.mxu0 %v5874_v43  ;;  %v21845_v48 = vpop.f32.mrf.mxu1  ;;  %v6451_v51 = vsel %vm225_vm0, %v20473_v9, 0 }
 0x31a   : >> { %22246 = vmatprep.mubr.f32.mxu0 %v24990_v8  ;;  %v25612_v8 = vand.u32 4294901760, %v25598_v10 }
 0x31b   : >> { %22260 = vmatmul.mubr.f32.vlgmr.msra.gmra.mxu1 %v25021_v38  ;;  %v2435_v40 = vpop.f32.mrf.mxu1  ;;  %v25614_v38 = vand.u32 4294901760, %v6445_v34 }
 0x31c   : >> { %22282 = vmatpush3.msra.mxu1 %v25461_v5  ;;  %22262 = vmatprep.mubr.f32.mxu1 %v25033_v13  ;;  %v6448_v13 = vsel %vm225_vm0, %v20472_v15, 0  ;;  %v6628_v63 = vsub.f32 %v25598_v10, %v25612_v8 }
 0x31d   : >> { %v21832_v6 = vpop.f32.mrf.mxu0  ;;  %22247 = vmatmul.mubr.f32.vlgmr.msra.gmra.mxu0 %v25001_v24  ;;  %22283 = vmatprep.subr.mxu1 %v25479_v27  ;;  %v21848_v54 = vpop.f32.mrf.mxu1  ;;  %v6622_v24 = vand.u32 4294901760, %v6621_v14  ;;  %v25633_v50 = vsub.f32 %v6445_v34, %v25614_v38  ;;  %v25635_v26 = vand.u32 4294901760, %v6448_v13 }
 0x31e   : >> { %v2442_v60 = vadd.f32 %v21845_v48, %v21832_v6  ;;  %22269 = vmatpush3.msra.mxu0 %v25485_v36  ;;  %22249 = vmatprep.mubr.f32.mxu0 %v25015_v41  ;;  %v20475_v41 = vld [vmem:[%s24836_s8 + $0x39] sm:$0xff]  ;;  %v25639_v36 = vand.u32 4294901760, %v6451_v51  ;;  %v6629_v19 = vand.u32 4294901760, %v6628_v63 }
 0x31f   : >> { %v2304_v46 = vpop.f32.mrf.mxu0  ;;  %22263 = vmatmul.mubr.f32.gmra.mxu1 %v5852_v20  ;;  %22270 = vmatprep.subr.mxu0 %v25499_v12  ;;  %v2447_v58 = vpop.f32.mrf.mxu1  ;;  %v6531_v52 = vand.u32 4294901760, %v25633_v50  ;;  %v25650_v37 = vsub.f32 %v6448_v13, %v25635_v26 }
 0x320   : >> { %v2436_v5 = vadd.f32 %v2435_v40, %v2304_v46  ;;  %22271 = vmatpush3.msra.mxu0 %v25499_v12  ;;  %22265 = vmatprep.mubr.f32.mxu1 %v5862_v47  ;;  %v25656_v17 = vsub.f32 %v6451_v51, %v25639_v36 }
 0x321   : >> { %v21835_v3 = vpop.f32.mrf.mxu0  ;;  %22250 = vmatmul.mubr.f32.gmra.mxu0 %v25528_v11  ;;  %22284 = vmatpush3.msra.mxu1 %v25479_v27  ;;  %v6457_v27 = vsel %vm225_vm0, %v20475_v41, 0  ;;  %v6460_v11 = vsel %vm225_vm0, %v20476_v28, 0  ;;  %v6541_v31 = vand.u32 4294901760, %v25650_v37 }
 0x322   : >> { %v2454_v30 = vadd.f32 %v21848_v54, %v21835_v3  ;;  %22252 = vmatprep.mubr.f32.mxu0 %v25535_v39  ;;  %22294 = vmatprep.subr.mxu0 %v25565_v45  ;;  %v21851_v12 = vpop.f32.mrf.mxu1  ;;  %v25658_v49 = vand.u32 4294901760, %v6457_v27  ;;  %v25671_v18 = vand.u32 4294901760, %v6460_v11 }
 0x323   : >> { %v2324_v57 = vpop.f32.mrf.mxu0  ;;  %22266 = vmatmul.mubr.f32.gmra.mxu1 %v5872_v61  ;;  %22307 = vmatprep.subr.mxu1 %v6622_v24  ;;  %v25669_v61 = vsub.f32 %v6454_v7, %v25652_v56  ;;  %v6542_v14 = vsub.f32 %v25650_v37, %v6541_v31 }
 0x324   : >> { %22285 = vmatprep.mubr.f32.mxu1 %v24975_v59  ;;  %v2459_v2 = vpop.f32.mrf.mxu1  ;;  %v25677_v53 = vsub.f32 %v6457_v27, %v25658_v49  ;;  %v25689_v40 = vsub.f32 %v6460_v11, %v25671_v18  ;;  %v20485_v11 = vld [vmem:[%s28673_s3 + $0x70] sm:$0xff] }
 0x325   : >> { %v21838_v21 = vpop.f32.mrf.mxu0  ;;  %22253 = vmatmul.mubr.f32.gmra.mxu0 %v25544_v55  ;;  %v6561_v15 = vand.u32 4294901760, %v25669_v61  ;;  %v6543_v25 = vand.u32 4294901760, %v6542_v14 }
 0x326   : >> { %22272 = vmatprep.mubr.f32.mxu0 %v24975_v59  ;;  %v21871_v20 = vpop.f32.mrf.mxu1  ;;  %v6532_v59 = vsub.f32 %v25633_v50, %v6531_v52  ;;  %v6581_v41 = vand.u32 4294901760, %v25689_v40 }
 0x327   : >> { %v2344_v39 = vpop.f32.mrf.mxu0  ;;  %22286 = vmatmul.mubr.f32.vlgmr.msra.gmra.mxu1 %v24982_v33 }
 0x328   : >> { %v2460_v55 = vadd.f32 %v2459_v2, %v2344_v39  ;;  %22308 = vmatpush3.msra.mxu1 %v6622_v24  ;;  %22288 = vmatprep.mubr.f32.mxu1 %v24992_v22  ;;  %v2651_v23 = vpop.f32.mrf.mxu1  ;;  %v6533_v34 = vand.u32 4294901760, %v6532_v59  ;;  %v6582_v28 = vsub.f32 %v25689_v40, %v6581_v41 }
 0x329   : >> { %v21858_v47 = vpop.f32.mrf.mxu0  ;;  %22273 = vmatmul.mubr.f32.vlgmr.msra.gmra.mxu0 %v24982_v33  ;;  %22309 = vmatprep.subr.mxu1 %v6629_v19  ;;  %v6551_v33 = vand.u32 4294901760, %v25656_v17 }
 0x32a   : >> { %v2549_v0 = vadd.f32 %v21858_v47, %v2442_v60  ;;  %22295 = vmatpush3.msra.mxu0 %v25565_v45  ;;  %22275 = vmatprep.mubr.f32.mxu0 %v24992_v22  ;;  %v6571_v60 = vand.u32 4294901760, %v25677_v53 }
 0x32b   : >> { %v2541_v42 = vpop.f32.mrf.mxu0  ;;  %v21874_v16 = vpop.f32.mrf.mxu1  ;;  %22289 = vmatmul.mubr.f32.gmra.mxu1 %v25518_v35  ;;  %22296 = vmatprep.subr.mxu0 %v25587_v32 }
 0x32c   : >> { %v2660_v43 = vadd.f32 %v21871_v20, %v2549_v0  ;;  %v2542_v4 = vadd.f32 %v2541_v42, %v2436_v5  ;;  %22297 = vmatpush3.msra.mxu0 %v25587_v32  ;;  %22291 = vmatprep.mubr.f32.mxu1 %v25521_v62  ;;  %v6562_v5 = vsub.f32 %v25669_v61, %v6561_v15  ;;  %v6583_v0 = vand.u32 4294901760, %v6582_v28 }
 0x32d   : >> { %v21861_v48 = vpop.f32.mrf.mxu0  ;;  %22276 = vmatmul.mubr.f32.gmra.mxu0 %v25518_v35  ;;  %v2667_v22 = vpop.f32.mrf.mxu1  ;;  %22310 = vmatpush3.msra.mxu1 %v6629_v19  ;;  %v6552_v35 = vsub.f32 %v25656_v17, %v6551_v33  ;;  %v6572_v58 = vsub.f32 %v25677_v53, %v6571_v60  ;;  %v25732_v42 = vand.u32 4294901760, %v20485_v11 }
 0x32e   : >> { %v2652_v9 = vadd.f32 %v2651_v23, %v2542_v4  ;;  %v2563_v6 = vadd.f32 %v21861_v48, %v2454_v30  ;;  %22278 = vmatprep.mubr.f32.mxu0 %v25521_v62  ;;  %22320 = vmatprep.subr.mxu0 %v25582_v1  ;;  %v20486_v62 = vld [vmem:[%s28673_s3 + $0x78] sm:$0xff]  ;;  %v6563_v27 = vand.u32 4294901760, %v6562_v5 }
 0x32f   : >> { %v2555_v13 = vpop.f32.mrf.mxu0  ;;  %v21877_v46 = vpop.f32.mrf.mxu1  ;;  %22292 = vmatmul.mubr.f32.gmra.mxu1 %v25530_v29  ;;  %22333 = vmatprep.subr.mxu1 %v25565_v45  ;;  %v6553_v3 = vand.u32 4294901760, %v6552_v35  ;;  %v25712_v7 = vand.u32 4294901760, %v20486_v62  ;;  %v6573_v19 = vand.u32 4294901760, %v6572_v58  ;;  %v20479_v22 = vld [vmem:[%s24836_s8 + $0x1a] sm:$0xff] }
 0x330   : >> { %v2676_v54 = vadd.f32 %v21874_v16, %v2563_v6  ;;  %22311 = vmatprep.mubr.f32.mxu1 %v25614_v38  ;;  %v25744_v6 = vsub.f32 %v20485_v11, %v25732_v42  ;;  %v7154_v35 = vsel %vm225_vm0, %v20479_v22, 0  ;;  %v20480_v13 = vld [vmem:[%s24836_s8 + $0x22] sm:$0xff] }
 0x331   : >> { %v21864_v24 = vpop.f32.mrf.mxu0  ;;  %22279 = vmatmul.mubr.f32.gmra.mxu0 %v25530_v29  ;;  %v2683_v51 = vpop.f32.mrf.mxu1  ;;  %v7157_v5 = vsel %vm225_vm0, %v20480_v13, 0  ;;  %v20484_v11 = vld [vmem:[%s24836_s8 + $0x42] sm:$0xff] }
 0x332   : >> { %22298 = vmatprep.mubr.f32.mxu0 %v6533_v34 }
 0x333   : >> { %v2569_v63 = vpop.f32.mrf.mxu0  ;;  %v21897_v30 = vpop.f32.mrf.mxu1  ;;  %22312 = vmatmul.mubr.f32.vlgmr.msra.gmra.mxu1 %v25635_v26 }
 0x334   : >> { %v2570_v29 = vadd.f32 %v2569_v63, %v2460_v55  ;;  %22334 = vmatpush3.msra.mxu1 %v25565_v45  ;;  %22314 = vmatprep.mubr.f32.mxu1 %v25639_v36  ;;  %v25727_v55 = vsub.f32 %v20486_v62, %v25712_v7 }
 0x335   : >> { %v21884_v57 = vpop.f32.mrf.mxu0  ;;  %22299 = vmatmul.mubr.f32.vlgmr.msra.gmra.mxu0 %v6543_v25  ;;  %v2871_v12 = vpop.f32.mrf.mxu1  ;;  %22335 = vmatprep.subr.mxu1 %v25587_v32  ;;  %v25760_v25 = vand.u32 4294901760, %v25744_v6 }
 0x336   : >> { %v2684_v21 = vadd.f32 %v2683_v51, %v2570_v29  ;;  %v2775_v2 = vadd.f32 %v21884_v57, %v2660_v43  ;;  %22321 = vmatpush3.msra.mxu0 %v25582_v1  ;;  %22301 = vmatprep.mubr.f32.mxu0 %v6553_v3 }
 0x337   : >> { %v2768_v39 = vpop.f32.mrf.mxu0  ;;  %v21900_v20 = vpop.f32.mrf.mxu1  ;;  %22315 = vmatmul.mubr.f32.gmra.mxu1 %v25652_v56  ;;  %22322 = vmatprep.subr.mxu0 %v25598_v10 }
 0x338   : >> { %v2878_v47 = vadd.f32 %v21897_v30, %v2775_v2  ;;  %v2769_v23 = vadd.f32 %v2768_v39, %v2652_v9  ;;  %22323 = vmatpush3.msra.mxu0 %v25598_v10  ;;  %22317 = vmatprep.mubr.f32.mxu1 %v25658_v49  ;;  %v25738_v10 = vand.u32 4294901760, %v25727_v55  ;;  %v20482_v30 = vld [vmem:[%s24836_s8 + $0x32] sm:$0xff] }
 0x339   : >> { %v21887_v1 = vpop.f32.mrf.mxu0  ;;  %22302 = vmatmul.mubr.f32.gmra.mxu0 %v6563_v27  ;;  %v2883_v59 = vpop.f32.mrf.mxu1  ;;  %22336 = vmatpush3.msra.mxu1 %v25587_v32 }
 0x33a   : >> { %v2872_v16 = vadd.f32 %v2871_v12, %v2769_v23  ;;  %v2787_v43 = vadd.f32 %v21887_v1, %v2676_v54  ;;  %22304 = vmatprep.mubr.f32.mxu0 %v6573_v19  ;;  %22346 = vmatprep.subr.mxu0 %v25593_v44  ;;  %v7330_v62 = vsub.f32 %v25727_v55, %v25738_v10 }
 0x33b   : >> { %v2780_v4 = vpop.f32.mrf.mxu0  ;;  %v21903_v48 = vpop.f32.mrf.mxu1  ;;  %22318 = vmatmul.mubr.f32.gmra.mxu1 %v25671_v18  ;;  %22359 = vmatprep.subr.mxu1 %v25565_v45 }
 0x33c   : >> { %v2890_v34 = vadd.f32 %v21900_v20, %v2787_v43  ;;  %22337 = vmatprep.mubr.f32.mxu1 %v6531_v52  ;;  %v20481_v52 = vld [vmem:[%s24836_s8 + $0x2a] sm:$0xff]  ;;  %v7331_v63 = vand.u32 4294901760, %v7330_v62 }
 0x33d   : >> { %v21890_v14 = vpop.f32.mrf.mxu0  ;;  %22305 = vmatmul.mubr.f32.gmra.mxu0 %v6583_v0  ;;  %v2895_v9 = vpop.f32.mrf.mxu1 }
 0x33e   : >> { %22324 = vmatprep.mubr.f32.mxu0 %v25633_v50 }
 0x33f   : >> { %v2792_v46 = vpop.f32.mrf.mxu0  ;;  %v21923_v54 = vpop.f32.mrf.mxu1  ;;  %22338 = vmatmul.mubr.f32.vlgmr.msra.gmra.mxu1 %v6541_v31  ;;  %v25762_v31 = vand.u32 4294901760, %v7154_v35 }
 0x340   : >> { %v2793_v24 = vadd.f32 %v2792_v46, %v2684_v21  ;;  %22360 = vmatpush3.msra.mxu1 %v25565_v45  ;;  %22340 = vmatprep.mubr.f32.mxu1 %v6551_v33 }
 0x341   : >> { %v21910_v51 = vpop.f32.mrf.mxu0  ;;  %22325 = vmatmul.mubr.f32.vlgmr.msra.gmra.mxu0 %v25650_v37  ;;  %v3127_v50 = vpop.f32.mrf.mxu1  ;;  %22361 = vmatprep.subr.mxu1 %v25587_v32  ;;  %v7160_v37 = vsel %vm225_vm0, %v20481_v52, 0  ;;  %v25783_v28 = vsub.f32 %v7154_v35, %v25762_v31 }
 0x342   : >> { %v2896_v3 = vadd.f32 %v2895_v9, %v2793_v24  ;;  %v3007_v45 = vadd.f32 %v21910_v51, %v2878_v47  ;;  %22347 = vmatpush3.msra.mxu0 %v25593_v44  ;;  %22327 = vmatprep.mubr.f32.mxu0 %v25656_v17  ;;  %v25775_v44 = vand.u32 4294901760, %v7157_v5  ;;  %v20483_v17 = vld [vmem:[%s24836_s8 + $0x3a] sm:$0xff] }
 0x343   : >> { %v2996_v33 = vpop.f32.mrf.mxu0  ;;  %v21926_v58 = vpop.f32.mrf.mxu1  ;;  %22341 = vmatmul.mubr.f32.gmra.mxu1 %v6561_v15  ;;  %22348 = vmatprep.subr.mxu0 %v25612_v8  ;;  %v7337_v15 = vsub.f32 %v25744_v6, %v25760_v25  ;;  %v7240_v1 = vand.u32 4294901760, %v25783_v28 }
 0x344   : >> { %v3134_v29 = vadd.f32 %v21923_v54, %v3007_v45  ;;  %v2997_v57 = vadd.f32 %v2996_v33, %v2872_v16  ;;  %22349 = vmatpush3.msra.mxu0 %v25612_v8  ;;  %22343 = vmatprep.mubr.f32.mxu1 %v6571_v60  ;;  %v25785_v8 = vand.u32 4294901760, %v7160_v37  ;;  %v25796_v20 = vsub.f32 %v7157_v5, %v25775_v44 }
 0x345   : >> { %v21913_v12 = vpop.f32.mrf.mxu0  ;;  %22328 = vmatmul.mubr.f32.gmra.mxu0 %v25669_v61  ;;  %v3139_v27 = vpop.f32.mrf.mxu1  ;;  %22362 = vmatpush3.msra.mxu1 %v25587_v32  ;;  %v7163_v61 = vsel %vm225_vm0, %v20482_v30, 0  ;;  %v7166_v32 = vsel %vm225_vm0, %v20483_v17, 0  ;;  %v7338_v23 = vand.u32 4294901760, %v7337_v15  ;;  %v7169_v16 = vsel %vm225_vm0, %v20484_v11, 0 }
 0x346   : >> { %v3128_v21 = vadd.f32 %v3127_v50, %v2997_v57  ;;  %v3027_v60 = vadd.f32 %v21913_v12, %v2890_v34  ;;  %22330 = vmatprep.mubr.f32.mxu0 %v25677_v53  ;;  %22372 = vmatprep.subr.mxu0 %v25712_v7  ;;  %v25801_v59 = vsub.f32 %v7160_v37, %v25785_v8  ;;  %v25806_v0 = vand.u32 4294901760, %v7166_v32 }
 0x347   : >> { %v3016_v2 = vpop.f32.mrf.mxu0  ;;  %v21929_v19 = vpop.f32.mrf.mxu1  ;;  %22344 = vmatmul.mubr.f32.gmra.mxu1 %v6581_v41  ;;  %22385 = vmatprep.subr.mxu1 %v7331_v63  ;;  %v25803_v41 = vand.u32 4294901760, %v7163_v61  ;;  %v7250_v34 = vand.u32 4294901760, %v25796_v20  ;;  %v25819_v9 = vand.u32 4294901760, %v7169_v16 }
 0x348   : >> { %v3146_v39 = vadd.f32 %v21926_v58, %v3027_v60  ;;  %22363 = vmatprep.mubr.f32.mxu1 %v25614_v38  ;;  %v25825_v46 = vsub.f32 %v7166_v32, %v25806_v0 }
 0x349   : >> { %v21916_v53 = vpop.f32.mrf.mxu0  ;;  %22331 = vmatmul.mubr.f32.gmra.mxu0 %v25689_v40  ;;  %v3151_v47 = vpop.f32.mrf.mxu1  ;;  %v25817_v14 = vsub.f32 %v7163_v61, %v25803_v41  ;;  %v7251_v5 = vsub.f32 %v25796_v20, %v7250_v34  ;;  %v25837_v45 = vsub.f32 %v7169_v16, %v25819_v9 }
 0x34a   : >> { %22350 = vmatprep.mubr.f32.mxu0 %v25614_v38  ;;  %v7241_v38 = vsub.f32 %v25783_v28, %v7240_v1  ;;  %v7280_v58 = vand.u32 4294901760, %v25825_v46 }
 0x34b   : >> { %v3036_v43 = vpop.f32.mrf.mxu0  ;;  %v21949_v4 = vpop.f32.mrf.mxu1  ;;  %22364 = vmatmul.mubr.f32.vlgmr.msra.gmra.mxu1 %v25635_v26  ;;  %v7252_v12 = vand.u32 4294901760, %v7251_v5  ;;  %v7290_v15 = vand.u32 4294901760, %v25837_v45 }
 0x34c   : >> { %v3037_v40 = vadd.f32 %v3036_v43, %v2896_v3  ;;  %22386 = vmatpush3.msra.mxu1 %v7331_v63  ;;  %22366 = vmatprep.mubr.f32.mxu1 %v25639_v36  ;;  %v7242_v50 = vand.u32 4294901760, %v7241_v38  ;;  %v7270_v3 = vand.u32 4294901760, %v25817_v14  ;;  %v7281_v60 = vsub.f32 %v25825_v46, %v7280_v58  ;;  %v20493_v43 = vld [vmem:[%s28673_s3 + $0x80] sm:$0xff] }
 0x34d   : >> { %v21936_v48 = vpop.f32.mrf.mxu0  ;;  %22351 = vmatmul.mubr.f32.vlgmr.msra.gmra.mxu0 %v25635_v26  ;;  %v3343_v22 = vpop.f32.mrf.mxu1  ;;  %22387 = vmatprep.subr.mxu1 %v7338_v23  ;;  %v7260_v26 = vand.u32 4294901760, %v25801_v59  ;;  %v7291_v53 = vsub.f32 %v25837_v45, %v7290_v15 }
 0x34e   : >> { %v3152_v35 = vadd.f32 %v3151_v47, %v3037_v40  ;;  %v3241_v13 = vadd.f32 %v21936_v48, %v3134_v29  ;;  %22373 = vmatpush3.msra.mxu0 %v25712_v7  ;;  %22353 = vmatprep.mubr.f32.mxu0 %v25639_v36  ;;  %v7271_v27 = vsub.f32 %v25817_v14, %v7270_v3  ;;  %v7282_v16 = vand.u32 4294901760, %v7281_v60 }
 0x34f   : >> { %v3233_v54 = vpop.f32.mrf.mxu0  ;;  %v21952_v62 = vpop.f32.mrf.mxu1  ;;  %22367 = vmatmul.mubr.f32.gmra.mxu1 %v25652_v56  ;;  %22374 = vmatprep.subr.mxu0 %v25732_v42 }
 0x350   : >> { %v3352_v52 = vadd.f32 %v21949_v4, %v3241_v13  ;;  %v3234_v24 = vadd.f32 %v3233_v54, %v3128_v21  ;;  %22375 = vmatpush3.msra.mxu0 %v25732_v42  ;;  %22369 = vmatprep.mubr.f32.mxu1 %v25658_v49  ;;  %v7292_v13 = vand.u32 4294901760, %v7291_v53  ;;  %v25882_v54 = vand.u32 4294901760, %v20493_v43 }
 0x351   : >> { %v21939_v51 = vpop.f32.mrf.mxu0  ;;  %22354 = vmatmul.mubr.f32.gmra.mxu0 %v25652_v56  ;;  %v3359_v36 = vpop.f32.mrf.mxu1  ;;  %22388 = vmatpush3.msra.mxu1 %v7338_v23  ;;  %v7261_v56 = vsub.f32 %v25801_v59, %v7260_v26 }
 0x352   : >> { %v3344_v37 = vadd.f32 %v3343_v22, %v3234_v24  ;;  %v3255_v33 = vadd.f32 %v21939_v51, %v3146_v39  ;;  %22356 = vmatprep.mubr.f32.mxu0 %v25658_v49  ;;  %22398 = vmatprep.subr.mxu0 %v25727_v55  ;;  %v20494_v49 = vld [vmem:[%s28673_s3 + $0x88] sm:$0xff]  ;;  %v7272_v39 = vand.u32 4294901760, %v7271_v27  ;;  %v20487_v36 = vld [vmem:[%s24836_s8 + $0x1b] sm:$0xff] }
 0x353   : >> { %v3247_v63 = vpop.f32.mrf.mxu0  ;;  %v21955_v30 = vpop.f32.mrf.mxu1  ;;  %22370 = vmatmul.mubr.f32.gmra.mxu1 %v25671_v18  ;;  %22411 = vmatprep.subr.mxu1 %v25712_v7  ;;  %v7262_v21 = vand.u32 4294901760, %v7261_v56  ;;  %v25860_v19 = vand.u32 4294901760, %v20494_v49  ;;  %v7863_v56 = vsel %vm225_vm0, %v20487_v36, 0 }
 0x354   : >> { %v3368_v29 = vadd.f32 %v21952_v62, %v3255_v33  ;;  %22389 = vmatprep.mubr.f32.mxu1 %v25762_v31  ;;  %v25898_v33 = vsub.f32 %v20493_v43, %v25882_v54 }
 0x355   : >> { %v21942_v57 = vpop.f32.mrf.mxu0  ;;  %22357 = vmatmul.mubr.f32.gmra.mxu0 %v25671_v18  ;;  %v3375_v17 = vpop.f32.mrf.mxu1  ;;  %v25875_v48 = vsub.f32 %v20494_v49, %v25860_v19  ;;  %v20488_v49 = vld [vmem:[%s24836_s8 + $0x23] sm:$0xff] }
 0x356   : >> { %22376 = vmatprep.mubr.f32.mxu0 %v7242_v50  ;;  %v20489_v57 = vld [vmem:[%s24836_s8 + $0x2b] sm:$0xff] }
 0x357   : >> { %v3261_v61 = vpop.f32.mrf.mxu0  ;;  %v21975_v2 = vpop.f32.mrf.mxu1  ;;  %22390 = vmatmul.mubr.f32.vlgmr.msra.gmra.mxu1 %v25775_v44 }
 0x358   : >> { %v3262_v18 = vadd.f32 %v3261_v61, %v3152_v35  ;;  %22412 = vmatpush3.msra.mxu1 %v25712_v7  ;;  %22392 = vmatprep.mubr.f32.mxu1 %v25785_v8  ;;  %v7869_v61 = vsel %vm225_vm0, %v20489_v57, 0 }
 0x359   : >> { %v21962_v32 = vpop.f32.mrf.mxu0  ;;  %22377 = vmatmul.mubr.f32.vlgmr.msra.gmra.mxu0 %v7252_v12  ;;  %v3563_v11 = vpop.f32.mrf.mxu1  ;;  %22413 = vmatprep.subr.mxu1 %v25732_v42  ;;  %v25916_v12 = vand.u32 4294901760, %v7863_v56 }
 0x35a   : >> { %v3376_v47 = vadd.f32 %v3375_v17, %v3262_v18  ;;  %v3467_v23 = vadd.f32 %v21962_v32, %v3352_v52  ;;  %22399 = vmatpush3.msra.mxu0 %v25727_v55  ;;  %22379 = vmatprep.mubr.f32.mxu0 %v7262_v21 }
 0x35b   : >> { %v3460_v4 = vpop.f32.mrf.mxu0  ;;  %v21978_v40 = vpop.f32.mrf.mxu1  ;;  %22393 = vmatmul.mubr.f32.gmra.mxu1 %v25803_v41  ;;  %22400 = vmatprep.subr.mxu0 %v25744_v6 }
 0x35c   : >> { %v25877_v22 = vadd.f32 %v21975_v2, %v3467_v23  ;;  %v3461_v38 = vadd.f32 %v3460_v4, %v3344_v37  ;;  %22401 = vmatpush3.msra.mxu0 %v25744_v6  ;;  %22395 = vmatprep.mubr.f32.mxu1 %v25806_v0  ;;  %v25890_v6 = vand.u32 4294901760, %v25875_v48  ;;  %v20490_v2 = vld [vmem:[%s24836_s8 + $0x33] sm:$0xff]  ;;  %v20492_v23 = vld [vmem:[%s24836_s8 + $0x43] sm:$0xff] }
 0x35d   : >> { %v21965_v55 = vpop.f32.mrf.mxu0  ;;  %22380 = vmatmul.mubr.f32.gmra.mxu0 %v7272_v39  ;;  %v3575_v35 = vpop.f32.mrf.mxu1  ;;  %22414 = vmatpush3.msra.mxu1 %v25732_v42 }
 0x35e   : >> { %v25884_v62 = vadd.f32 %v3563_v11, %v3461_v38  ;;  %v3479_v52 = vadd.f32 %v21965_v55, %v3368_v29  ;;  %22382 = vmatprep.mubr.f32.mxu0 %v7282_v16  ;;  %22424 = vmatprep.subr.mxu0 %v25738_v10  ;;  %v8039_v29 = vsub.f32 %v25875_v48, %v25890_v6  ;;  %v7878_v35 = vsel %vm225_vm0, %v20492_v23, 0 }
 0x35f   : >> { %v3472_v24 = vpop.f32.mrf.mxu0  ;;  %v21981_v51 = vpop.f32.mrf.mxu1  ;;  %22396 = vmatmul.mubr.f32.gmra.mxu1 %v25819_v9  ;;  %22437 = vmatprep.subr.mxu1 %v25712_v7  ;;  %v25937_v11 = vsub.f32 %v7863_v56, %v25916_v12 }
 0x360   : >> { %v25893_v50 = vadd.f32 %v21978_v40, %v3479_v52  ;;  %22415 = vmatprep.mubr.f32.mxu1 %v7240_v1  ;;  %v8040_v60 = vand.u32 4294901760, %v8039_v29 }
 0x361   : >> { %v21968_v5 = vpop.f32.mrf.mxu0  ;;  %22383 = vmatmul.mubr.f32.gmra.mxu0 %v7292_v13  ;;  %v3587_v37 = vpop.f32.mrf.mxu1  ;;  %v7949_v4 = vand.u32 4294901760, %v25937_v11 }
 0x362   : >> { %22402 = vmatprep.mubr.f32.mxu0 %v25783_v28 }
 0x363   : >> { %v3484_v63 = vpop.f32.mrf.mxu0  ;;  %v22001_v30 = vpop.f32.mrf.mxu1  ;;  %22416 = vmatmul.mubr.f32.vlgmr.msra.gmra.mxu1 %v7250_v34  ;;  %v25914_v34 = vand.u32 4294901760, %v25898_v33 }
 0x364   : >> { %v3485_v1 = vadd.f32 %v3484_v63, %v3376_v47  ;;  %22438 = vmatpush3.msra.mxu1 %v25712_v7  ;;  %22418 = vmatprep.mubr.f32.mxu1 %v7260_v26  ;;  %v7866_v26 = vsel %vm225_vm0, %v20488_v49, 0 }
 0x365   : >> { %v21988_v17 = vpop.f32.mrf.mxu0  ;;  %22403 = vmatmul.mubr.f32.vlgmr.msra.gmra.mxu0 %v25796_v20  ;;  %v3830_v28 = vpop.f32.mrf.mxu1  ;;  %22439 = vmatprep.subr.mxu1 %v25732_v42  ;;  %v25939_v39 = vand.u32 4294901760, %v7866_v26 }
 0x366   : >> { %v25918_v27 = vadd.f32 %v3587_v37, %v3485_v1  ;;  %v3837_v7 = vadd.f32 %v22001_v30, %v21988_v17  ;;  %22425 = vmatpush3.msra.mxu0 %v25738_v10  ;;  %22405 = vmatprep.mubr.f32.mxu0 %v25801_v59  ;;  %v20491_v10 = vld [vmem:[%s24836_s8 + $0x3b] sm:$0xff]  ;;  %v25975_v37 = vand.u32 4294901760, %v7878_v35 }
 0x367   : >> { %v3699_v20 = vpop.f32.mrf.mxu0  ;;  %v22004_v21 = vpop.f32.mrf.mxu1  ;;  %22419 = vmatmul.mubr.f32.gmra.mxu1 %v7270_v3  ;;  %22426 = vmatprep.subr.mxu0 %v25760_v25  ;;  %v8046_v3 = vsub.f32 %v25898_v33, %v25914_v34  ;;  %v25954_v40 = vsub.f32 %v7866_v26, %v25939_v39 }
 0x368   : >> { %v3831_v18 = vadd.f32 %v3830_v28, %v3699_v20  ;;  %22427 = vmatpush3.msra.mxu0 %v25760_v25  ;;  %22421 = vmatprep.mubr.f32.mxu1 %v7280_v58  ;;  %v25943_v58 = vand.u32 4294901760, %v7869_v61  ;;  %v25993_v26 = vsub.f32 %v7878_v35, %v25975_v37 }
 0x369   : >> { %v21991_v59 = vpop.f32.mrf.mxu0  ;;  %22406 = vmatmul.mubr.f32.gmra.mxu0 %v25817_v14  ;;  %v3842_v32 = vpop.f32.mrf.mxu1  ;;  %22440 = vmatpush3.msra.mxu1 %v25732_v42  ;;  %v7872_v14 = vsel %vm225_vm0, %v20490_v2, 0  ;;  %v7875_v42 = vsel %vm225_vm0, %v20491_v10, 0  ;;  %v8047_v43 = vand.u32 4294901760, %v8046_v3  ;;  %v7959_v36 = vand.u32 4294901760, %v25954_v40 }
 0x36a   : >> { %v3849_v25 = vadd.f32 %v22004_v21, %v21991_v59  ;;  %22408 = vmatprep.mubr.f32.mxu0 %v25825_v46  ;;  %22450 = vmatprep.subr.mxu0 %v25860_v19  ;;  %v25956_v38 = vand.u32 4294901760, %v7872_v14  ;;  %v25962_v55 = vand.u32 4294901760, %v7875_v42 }
 0x36b   : >> { %v3719_v53 = vpop.f32.mrf.mxu0  ;;  %v22007_v47 = vpop.f32.mrf.mxu1  ;;  %22422 = vmatmul.mubr.f32.gmra.mxu1 %v7290_v15  ;;  %22463 = vmatprep.subr.mxu1 %v8040_v60  ;;  %v25960_v15 = vsub.f32 %v7869_v61, %v25943_v58  ;;  %v7960_v28 = vsub.f32 %v25954_v40, %v7959_v36 }
 0x36c   : >> { %22441 = vmatprep.mubr.f32.mxu1 %v25762_v31  ;;  %v25973_v5 = vsub.f32 %v7872_v14, %v25956_v38  ;;  %v25981_v63 = vsub.f32 %v7875_v42, %v25962_v55 }
 0x36d   : >> { %v21994_v16 = vpop.f32.mrf.mxu0  ;;  %22409 = vmatmul.mubr.f32.gmra.mxu0 %v25837_v45  ;;  %v3854_v46 = vpop.f32.mrf.mxu1  ;;  %v7961_v32 = vand.u32 4294901760, %v7960_v28 }
 0x36e   : >> { %22428 = vmatprep.mubr.f32.mxu0 %v25762_v31  ;;  %v7950_v31 = vsub.f32 %v25937_v11, %v7949_v4 }
 0x36f   : >> { %v3739_v13 = vpop.f32.mrf.mxu0  ;;  %v22027_v45 = vpop.f32.mrf.mxu1  ;;  %22442 = vmatmul.mubr.f32.vlgmr.msra.gmra.mxu1 %v25775_v44 }
 0x370   : >> { %v3855_v52 = vadd.f32 %v3854_v46, %v3739_v13  ;;  %22464 = vmatpush3.msra.mxu1 %v8040_v60  ;;  %22444 = vmatprep.mubr.f32.mxu1 %v25785_v8  ;;  %v7951_v17 = vand.u32 4294901760, %v7950_v31  ;;  %v7989_v60 = vand.u32 4294901760, %v25981_v63 }
 0x371   : >> { %v22014_v24 = vpop.f32.mrf.mxu0  ;;  %22429 = vmatmul.mubr.f32.vlgmr.msra.gmra.mxu0 %v25775_v44  ;;  %v4046_v51 = vpop.f32.mrf.mxu1  ;;  %22465 = vmatprep.subr.mxu1 %v8047_v43  ;;  %v7969_v44 = vand.u32 4294901760, %v25960_v15 }
 0x372   : >> { %v3944_v56 = vadd.f32 %v22014_v24, %v3837_v7  ;;  %22451 = vmatpush3.msra.mxu0 %v25860_v19  ;;  %22431 = vmatprep.mubr.f32.mxu0 %v25785_v8  ;;  %v7979_v7 = vand.u32 4294901760, %v25973_v5  ;;  %v7990_v53 = vsub.f32 %v25981_v63, %v7989_v60  ;;  %v20501_v24 = vld [vmem:[%s28673_s3 + $0x90] sm:$0xff] }
 0x373   : >> { %v3936_v30 = vpop.f32.mrf.mxu0  ;;  %v22030_v29 = vpop.f32.mrf.mxu1  ;;  %22445 = vmatmul.mubr.f32.gmra.mxu1 %v25803_v41  ;;  %22452 = vmatprep.subr.mxu0 %v25882_v54 }
 0x374   : >> { %v4055_v49 = vadd.f32 %v22027_v45, %v3944_v56  ;;  %v3937_v1 = vadd.f32 %v3936_v30, %v3831_v18  ;;  %22453 = vmatpush3.msra.mxu0 %v25882_v54  ;;  %22447 = vmatprep.mubr.f32.mxu1 %v25806_v0  ;;  %v7980_v3 = vsub.f32 %v25973_v5, %v7979_v7 }
 0x375   : >> { %v22017_v57 = vpop.f32.mrf.mxu0  ;;  %22432 = vmatmul.mubr.f32.gmra.mxu0 %v25803_v41  ;;  %v4062_v8 = vpop.f32.mrf.mxu1  ;;  %22466 = vmatpush3.msra.mxu1 %v8047_v43  ;;  %v7970_v41 = vsub.f32 %v25960_v15, %v7969_v44 }
 0x376   : >> { %v4047_v20 = vadd.f32 %v4046_v51, %v3937_v1  ;;  %v3958_v21 = vadd.f32 %v22017_v57, %v3849_v25  ;;  %22434 = vmatprep.mubr.f32.mxu0 %v25806_v0  ;;  %22476 = vmatprep.subr.mxu0 %v25875_v48  ;;  %v20502_v0 = vld [vmem:[%s28673_s3 + $0x98] sm:$0xff]  ;;  %v7999_v25 = vand.u32 4294901760, %v25993_v26  ;;  %v7981_v43 = vand.u32 4294901760, %v7980_v3  ;;  %v20496_v3 = vld [vmem:[%s24836_s8 + $0x24] sm:$0xff] }
 0x377   : >> { %v3950_v61 = vpop.f32.mrf.mxu0  ;;  %v22033_v2 = vpop.f32.mrf.mxu1  ;;  %22448 = vmatmul.mubr.f32.gmra.mxu1 %v25819_v9  ;;  %22489 = vmatprep.subr.mxu1 %v25860_v19  ;;  %v7971_v14 = vand.u32 4294901760, %v7970_v41  ;;  %v26016_v23 = vand.u32 4294901760, %v20502_v0  ;;  %v26036_v57 = vand.u32 4294901760, %v20501_v24  ;;  %v20495_v41 = vld [vmem:[%s24836_s8 + $0x1c] sm:$0xff] }
 0x378   : >> { %v4071_v18 = vadd.f32 %v22030_v29, %v3958_v21  ;;  %22467 = vmatprep.mubr.f32.mxu1 %v25916_v12  ;;  %v8000_v35 = vsub.f32 %v25993_v26, %v7999_v25 }
 0x379   : >> { %v22020_v10 = vpop.f32.mrf.mxu0  ;;  %22435 = vmatmul.mubr.f32.gmra.mxu0 %v25819_v9  ;;  %v4078_v59 = vpop.f32.mrf.mxu1  ;;  %v26031_v56 = vsub.f32 %v20502_v0, %v26016_v23  ;;  %v26054_v0 = vsub.f32 %v20501_v24, %v26036_v57 }
 0x37a   : >> { %22454 = vmatprep.mubr.f32.mxu0 %v7951_v17  ;;  %v8001_v1 = vand.u32 4294901760, %v8000_v35 }
 0x37b   : >> { %v3964_v47 = vpop.f32.mrf.mxu0  ;;  %v22053_v42 = vpop.f32.mrf.mxu1  ;;  %22468 = vmatmul.mubr.f32.vlgmr.msra.gmra.mxu1 %v25939_v39  ;;  %v26045_v21 = vand.u32 4294901760, %v26031_v56 }
 0x37c   : >> { %v3965_v9 = vadd.f32 %v3964_v47, %v3855_v52  ;;  %22490 = vmatpush3.msra.mxu1 %v25860_v19  ;;  %22470 = vmatprep.mubr.f32.mxu1 %v25943_v58  ;;  %v7991_v52 = vand.u32 4294901760, %v7990_v53 }
 0x37d   : >> { %v22040_v16 = vpop.f32.mrf.mxu0  ;;  %22455 = vmatmul.mubr.f32.vlgmr.msra.gmra.mxu0 %v7961_v32  ;;  %v4266_v46 = vpop.f32.mrf.mxu1  ;;  %22491 = vmatprep.subr.mxu1 %v25882_v54 }
 0x37e   : >> { %v4079_v13 = vadd.f32 %v4078_v59, %v3965_v9  ;;  %v4170_v45 = vadd.f32 %v22040_v16, %v4055_v49  ;;  %22477 = vmatpush3.msra.mxu0 %v25875_v48  ;;  %22457 = vmatprep.mubr.f32.mxu0 %v7971_v14  ;;  %v8572_v59 = vsel %vm225_vm0, %v20495_v41, 0 }
 0x37f   : >> { %v4163_v51 = vpop.f32.mrf.mxu0  ;;  %v22056_v31 = vpop.f32.mrf.mxu1  ;;  %22471 = vmatmul.mubr.f32.gmra.mxu1 %v25956_v38  ;;  %22478 = vmatprep.subr.mxu0 %v25898_v33  ;;  %v26075_v47 = vand.u32 4294901760, %v8572_v59 }
 0x380   : >> { %v4273_v30 = vadd.f32 %v22053_v42, %v4170_v45  ;;  %v4164_v29 = vadd.f32 %v4163_v51, %v4047_v20  ;;  %22479 = vmatpush3.msra.mxu0 %v25898_v33  ;;  %22473 = vmatprep.mubr.f32.mxu1 %v25962_v55 }
 0x381   : >> { %v22043_v48 = vpop.f32.mrf.mxu0  ;;  %22458 = vmatmul.mubr.f32.gmra.mxu0 %v7981_v43  ;;  %v4278_v49 = vpop.f32.mrf.mxu1  ;;  %22492 = vmatpush3.msra.mxu1 %v25882_v54  ;;  %v20498_v43 = vld [vmem:[%s24836_s8 + $0x34] sm:$0xff] }
 0x382   : >> { %v26039_v8 = vadd.f32 %v4273_v30, %v25877_v22  ;;  %v4267_v17 = vadd.f32 %v4266_v46, %v4164_v29  ;;  %v4182_v28 = vadd.f32 %v22043_v48, %v4071_v18  ;;  %22460 = vmatprep.mubr.f32.mxu0 %v7991_v52  ;;  %22502 = vmatprep.subr.mxu0 %v25890_v6 }
 0x383   : >> { %v4175_v33 = vpop.f32.mrf.mxu0  ;;  %v22059_v20 = vpop.f32.mrf.mxu1  ;;  %22474 = vmatmul.mubr.f32.gmra.mxu1 %v25975_v37  ;;  %22515 = vmatprep.subr.mxu1 %v25860_v19 }
 0x384   : >> { %v26049_v61 = vadd.f32 %v4267_v17, %v25884_v62  ;;  %v4285_v22 = vadd.f32 %v22056_v31, %v4182_v28  ;;  %22493 = vmatprep.mubr.f32.mxu1 %v7949_v4  ;;  %v8748_v4 = vsub.f32 %v26031_v56, %v26045_v21  ;;  %v20500_v31 = vld [vmem:[%s24836_s8 + $0x44] sm:$0xff] }
 0x385   : >> { %v22046_v2 = vpop.f32.mrf.mxu0  ;;  %22461 = vmatmul.mubr.f32.gmra.mxu0 %v8001_v1  ;;  %v4290_v18 = vpop.f32.mrf.mxu1  ;;  %v8587_v28 = vsel %vm225_vm0, %v20500_v31, 0 }
 0x386   : >> { %v26057_v10 = vadd.f32 %v4285_v22, %v25893_v50  ;;  %22480 = vmatprep.mubr.f32.mxu0 %v25937_v11  ;;  %v20497_v50 = vld [vmem:[%s24836_s8 + $0x2c] sm:$0xff]  ;;  %v8749_v16 = vand.u32 4294901760, %v8748_v4 }
 0x387   : >> { %v4187_v62 = vpop.f32.mrf.mxu0  ;;  %v22079_v32 = vpop.f32.mrf.mxu1  ;;  %22494 = vmatmul.mubr.f32.vlgmr.msra.gmra.mxu1 %v7959_v36  ;;  %v26073_v36 = vand.u32 4294901760, %v26054_v0  ;;  %v8578_v46 = vsel %vm225_vm0, %v20497_v50, 0 }
 0x388   : >> { %v4188_v14 = vadd.f32 %v4187_v62, %v4079_v13  ;;  %22516 = vmatpush3.msra.mxu1 %v25860_v19  ;;  %22496 = vmatprep.mubr.f32.mxu1 %v7969_v44  ;;  %v8575_v19 = vsel %vm225_vm0, %v20496_v3, 0 }
 0x389   : >> { %v22066_v53 = vpop.f32.mrf.mxu0  ;;  %22481 = vmatmul.mubr.f32.vlgmr.msra.gmra.mxu0 %v25954_v40  ;;  %v4539_v11 = vpop.f32.mrf.mxu1  ;;  %22517 = vmatprep.subr.mxu1 %v25882_v54  ;;  %v8755_v45 = vsub.f32 %v26054_v0, %v26073_v36  ;;  %v26099_v52 = vand.u32 4294901760, %v8575_v19 }
 0x38a   : >> { %v4291_v42 = vadd.f32 %v4290_v18, %v4188_v14  ;;  %v4546_v9 = vadd.f32 %v22079_v32, %v22066_v53  ;;  %22503 = vmatpush3.msra.mxu0 %v25890_v6  ;;  %22483 = vmatprep.mubr.f32.mxu0 %v25960_v15  ;;  %v20499_v6 = vld [vmem:[%s24836_s8 + $0x3c] sm:$0xff] }
 0x38b   : >> { %v4408_v44 = vpop.f32.mrf.mxu0  ;;  %v22082_v40 = vpop.f32.mrf.mxu1  ;;  %22497 = vmatmul.mubr.f32.gmra.mxu1 %v7979_v7  ;;  %22504 = vmatprep.subr.mxu0 %v25914_v34  ;;  %v8756_v29 = vand.u32 4294901760, %v8755_v45  ;;  %v26114_v49 = vsub.f32 %v8575_v19, %v26099_v52 }
 0x38c   : >> { %v26086_v35 = vadd.f32 %v4291_v42, %v25918_v27  ;;  %v4540_v13 = vadd.f32 %v4539_v11, %v4408_v44  ;;  %22505 = vmatpush3.msra.mxu0 %v25914_v34  ;;  %22499 = vmatprep.mubr.f32.mxu1 %v7989_v60  ;;  %v26097_v27 = vsub.f32 %v8572_v59, %v26075_v47  ;;  %v26103_v60 = vand.u32 4294901760, %v8578_v46 }
 0x38d   : >> { %v22069_v15 = vpop.f32.mrf.mxu0  ;;  %22484 = vmatmul.mubr.f32.gmra.mxu0 %v25973_v5  ;;  %v4551_v7 = vpop.f32.mrf.mxu1  ;;  %22518 = vmatpush3.msra.mxu1 %v25882_v54  ;;  %v8581_v5 = vsel %vm225_vm0, %v20498_v43, 0  ;;  %v8584_v54 = vsel %vm225_vm0, %v20499_v6, 0  ;;  %v8668_v2 = vand.u32 4294901760, %v26114_v49  ;;  %v26135_v59 = vand.u32 4294901760, %v8587_v28 }
 0x38e   : >> { %v4558_v34 = vadd.f32 %v22082_v40, %v22069_v15  ;;  %22486 = vmatprep.mubr.f32.mxu0 %v25981_v63  ;;  %22528 = vmatprep.subr.mxu0 %v26016_v23  ;;  %v8658_v48 = vand.u32 4294901760, %v26097_v27  ;;  %v26116_v1 = vand.u32 4294901760, %v8581_v5  ;;  %v26122_v17 = vand.u32 4294901760, %v8584_v54 }
 0x38f   : >> { %v4428_v24 = vpop.f32.mrf.mxu0  ;;  %v22085_v51 = vpop.f32.mrf.mxu1  ;;  %22500 = vmatmul.mubr.f32.gmra.mxu1 %v7999_v25  ;;  %22541 = vmatprep.subr.mxu1 %v8749_v16  ;;  %v26120_v25 = vsub.f32 %v8578_v46, %v26103_v60  ;;  %v8669_v42 = vsub.f32 %v26114_v49, %v8668_v2  ;;  %v26153_v19 = vsub.f32 %v8587_v28, %v26135_v59 }
 0x390   : >> { %22519 = vmatprep.mubr.f32.mxu1 %v25916_v12  ;;  %v26133_v18 = vsub.f32 %v8581_v5, %v26116_v1  ;;  %v26141_v32 = vsub.f32 %v8584_v54, %v26122_v17 }
 0x391   : >> { %v22072_v30 = vpop.f32.mrf.mxu0  ;;  %22487 = vmatmul.mubr.f32.gmra.mxu0 %v25993_v26  ;;  %v4563_v63 = vpop.f32.mrf.mxu1  ;;  %v8670_v7 = vand.u32 4294901760, %v8669_v42 }
 0x392   : >> { %22506 = vmatprep.mubr.f32.mxu0 %v25916_v12  ;;  %v8659_v12 = vsub.f32 %v26097_v27, %v8658_v48 }
 0x393   : >> { %v4448_v33 = vpop.f32.mrf.mxu0  ;;  %v22105_v26 = vpop.f32.mrf.mxu1  ;;  %22520 = vmatmul.mubr.f32.vlgmr.msra.gmra.mxu1 %v25939_v39 }
 0x394   : >> { %v4564_v20 = vadd.f32 %v4563_v63, %v4448_v33  ;;  %22542 = vmatpush3.msra.mxu1 %v8749_v16  ;;  %22522 = vmatprep.mubr.f32.mxu1 %v25943_v58  ;;  %v8660_v11 = vand.u32 4294901760, %v8659_v12  ;;  %v8698_v16 = vand.u32 4294901760, %v26141_v32 }
 0x395   : >> { %v22092_v41 = vpop.f32.mrf.mxu0  ;;  %22507 = vmatmul.mubr.f32.vlgmr.msra.gmra.mxu0 %v25939_v39  ;;  %v4755_v22 = vpop.f32.mrf.mxu1  ;;  %22543 = vmatprep.subr.mxu1 %v8756_v29  ;;  %v8678_v39 = vand.u32 4294901760, %v26120_v25 }
 0x396   : >> { %v4653_v62 = vadd.f32 %v22092_v41, %v4546_v9  ;;  %22529 = vmatpush3.msra.mxu0 %v26016_v23  ;;  %22509 = vmatprep.mubr.f32.mxu0 %v25943_v58  ;;  %v8688_v9 = vand.u32 4294901760, %v26133_v18  ;;  %v8699_v24 = vsub.f32 %v26141_v32, %v8698_v16  ;;  %v20509_v41 = vld [vmem:[%s28673_s3 + $0xa0] sm:$0xff] }
 0x397   : >> { %v4645_v4 = vpop.f32.mrf.mxu0  ;;  %v22108_v3 = vpop.f32.mrf.mxu1  ;;  %22523 = vmatmul.mubr.f32.gmra.mxu1 %v25956_v38  ;;  %22530 = vmatprep.subr.mxu0 %v26036_v57 }
 0x398   : >> { %v4764_v14 = vadd.f32 %v22105_v26, %v4653_v62  ;;  %v4646_v50 = vadd.f32 %v4645_v4, %v4540_v13  ;;  %22531 = vmatpush3.msra.mxu0 %v26036_v57  ;;  %22525 = vmatprep.mubr.f32.mxu1 %v25962_v55  ;;  %v8689_v45 = vsub.f32 %v26133_v18, %v8688_v9 }
 0x399   : >> { %v22095_v53 = vpop.f32.mrf.mxu0  ;;  %22510 = vmatmul.mubr.f32.gmra.mxu0 %v25956_v38  ;;  %v4771_v58 = vpop.f32.mrf.mxu1  ;;  %22544 = vmatpush3.msra.mxu1 %v8756_v29  ;;  %v8679_v38 = vsub.f32 %v26120_v25, %v8678_v39 }
 0x39a   : >> { %v4756_v44 = vadd.f32 %v4755_v22, %v4646_v50  ;;  %v4667_v40 = vadd.f32 %v22095_v53, %v4558_v34  ;;  %22512 = vmatprep.mubr.f32.mxu0 %v25962_v55  ;;  %22554 = vmatprep.subr.mxu0 %v26031_v56  ;;  %v20510_v55 = vld [vmem:[%s28673_s3 + $0xa8] sm:$0xff]  ;;  %v8708_v34 = vand.u32 4294901760, %v26153_v19  ;;  %v8690_v29 = vand.u32 4294901760, %v8689_v45  ;;  %v20504_v45 = vld [vmem:[%s24836_s8 + $0x38] sm:$0xff] }
 0x39b   : >> { %v4659_v46 = vpop.f32.mrf.mxu0  ;;  %v22111_v43 = vpop.f32.mrf.mxu1  ;;  %22526 = vmatmul.mubr.f32.gmra.mxu1 %v25975_v37  ;;  %22567 = vmatprep.subr.mxu1 %v26016_v23  ;;  %v8680_v5 = vand.u32 4294901760, %v8679_v38  ;;  %v26176_v31 = vand.u32 4294901760, %v20510_v55  ;;  %v26196_v53 = vand.u32 4294901760, %v20509_v41  ;;  %v20503_v38 = vld [vmem:[%s24836_s8 + $0x30] sm:$0xff] }
 0x39c   : >> { %v4780_v13 = vadd.f32 %v22108_v3, %v4667_v40  ;;  %22545 = vmatprep.mubr.f32.mxu1 %v26075_v47  ;;  %v8709_v28 = vsub.f32 %v26153_v19, %v8708_v34 }
 0x39d   : >> { %v22098_v6 = vpop.f32.mrf.mxu0  ;;  %22513 = vmatmul.mubr.f32.gmra.mxu0 %v25975_v37  ;;  %v4787_v15 = vpop.f32.mrf.mxu1  ;;  %v26191_v62 = vsub.f32 %v20510_v55, %v26176_v31  ;;  %v26214_v55 = vsub.f32 %v20509_v41, %v26196_v53 }
 0x39e   : >> { %22532 = vmatprep.mubr.f32.mxu0 %v8660_v11  ;;  %v8710_v50 = vand.u32 4294901760, %v8709_v28 }
 0x39f   : >> { %v4673_v51 = vpop.f32.mrf.mxu0  ;;  %v22131_v54 = vpop.f32.mrf.mxu1  ;;  %22546 = vmatmul.mubr.f32.vlgmr.msra.gmra.mxu1 %v26099_v52  ;;  %v26205_v40 = vand.u32 4294901760, %v26191_v62 }
 0x3a0   : >> { %v4674_v37 = vadd.f32 %v4673_v51, %v4564_v20  ;;  %22568 = vmatpush3.msra.mxu1 %v26016_v23  ;;  %22548 = vmatprep.mubr.f32.mxu1 %v26103_v60  ;;  %v8700_v20 = vand.u32 4294901760, %v8699_v24 }
 0x3a1   : >> { %v22118_v30 = vpop.f32.mrf.mxu0  ;;  %22533 = vmatmul.mubr.f32.vlgmr.msra.gmra.mxu0 %v8670_v7  ;;  %v4975_v63 = vpop.f32.mrf.mxu1  ;;  %22569 = vmatprep.subr.mxu1 %v26036_v57 }
 0x3a2   : >> { %v4788_v33 = vadd.f32 %v4787_v15, %v4674_v37  ;;  %v4879_v26 = vadd.f32 %v22118_v30, %v4764_v14  ;;  %22555 = vmatpush3.msra.mxu0 %v26031_v56  ;;  %22535 = vmatprep.mubr.f32.mxu0 %v8680_v5  ;;  %v9281_v15 = vsel %vm225_vm0, %v20503_v38, 0 }
 0x3a3   : >> { %v4872_v22 = vpop.f32.mrf.mxu0  ;;  %v22134_v12 = vpop.f32.mrf.mxu1  ;;  %22549 = vmatmul.mubr.f32.gmra.mxu1 %v26116_v1  ;;  %22556 = vmatprep.subr.mxu0 %v26054_v0  ;;  %v26235_v51 = vand.u32 4294901760, %v9281_v15 }
 0x3a4   : >> { %v4982_v4 = vadd.f32 %v22131_v54, %v4879_v26  ;;  %v4873_v3 = vadd.f32 %v4872_v22, %v4756_v44  ;;  %22557 = vmatpush3.msra.mxu0 %v26054_v0  ;;  %22551 = vmatprep.mubr.f32.mxu1 %v26122_v17 }
 0x3a5   : >> { %v22121_v56 = vpop.f32.mrf.mxu0  ;;  %22536 = vmatmul.mubr.f32.gmra.mxu0 %v8690_v29  ;;  %v4987_v14 = vpop.f32.mrf.mxu1  ;;  %22570 = vmatpush3.msra.mxu1 %v26036_v57  ;;  %v20506_v29 = vld [vmem:[%s24836_s8 + $0x48] sm:$0xff] }
 0x3a6   : >> { %v26199_v58 = vadd.f32 %v4982_v4, %v26039_v8  ;;  %v4976_v11 = vadd.f32 %v4975_v63, %v4873_v3  ;;  %v4891_v42 = vadd.f32 %v22121_v56, %v4780_v13  ;;  %22538 = vmatprep.mubr.f32.mxu0 %v8700_v20  ;;  %22580 = vmatprep.subr.mxu0 %v26045_v21 }
 0x3a7   : >> { %v4884_v0 = vpop.f32.mrf.mxu0  ;;  %v22137_v44 = vpop.f32.mrf.mxu1  ;;  %22552 = vmatmul.mubr.f32.gmra.mxu1 %v26135_v59  ;;  %22593 = vmatprep.subr.mxu1 %v26016_v23 }
 0x3a8   : >> { %v26209_v46 = vadd.f32 %v4976_v11, %v26049_v61  ;;  %v4994_v8 = vadd.f32 %v22134_v12, %v4891_v42  ;;  %22571 = vmatprep.mubr.f32.mxu1 %v8658_v48  ;;  %v9457_v48 = vsub.f32 %v26191_v62, %v26205_v40  ;;  %v20508_v12 = vld [vmem:[%s24836_s8 + $0x58] sm:$0xff] }
 0x3a9   : >> { %v22124_v43 = vpop.f32.mrf.mxu0  ;;  %22539 = vmatmul.mubr.f32.gmra.mxu0 %v8710_v50  ;;  %v4999_v13 = vpop.f32.mrf.mxu1  ;;  %v9296_v42 = vsel %vm225_vm0, %v20508_v12, 0 }
 0x3aa   : >> { %v26217_v6 = vadd.f32 %v4994_v8, %v26057_v10  ;;  %22558 = vmatprep.mubr.f32.mxu0 %v26097_v27  ;;  %v20505_v10 = vld [vmem:[%s24836_s8 + $0x40] sm:$0xff]  ;;  %v9458_v30 = vand.u32 4294901760, %v9457_v48 }
 0x3ab   : >> { %v4896_v61 = vpop.f32.mrf.mxu0  ;;  %v22157_v7 = vpop.f32.mrf.mxu1  ;;  %22572 = vmatmul.mubr.f32.vlgmr.msra.gmra.mxu1 %v8668_v2  ;;  %v26233_v2 = vand.u32 4294901760, %v26214_v55  ;;  %v9287_v63 = vsel %vm225_vm0, %v20505_v10, 0 }
 0x3ac   : >> { %v4897_v5 = vadd.f32 %v4896_v61, %v4788_v33  ;;  %22594 = vmatpush3.msra.mxu1 %v26016_v23  ;;  %22574 = vmatprep.mubr.f32.mxu1 %v8678_v39  ;;  %v9284_v23 = vsel %vm225_vm0, %v20504_v45, 0 }
 0x3ad   : >> { %v22144_v24 = vpop.f32.mrf.mxu0  ;;  %22559 = vmatmul.mubr.f32.vlgmr.msra.gmra.mxu0 %v26114_v49  ;;  %v5248_v27 = vpop.f32.mrf.mxu1  ;;  %22595 = vmatprep.subr.mxu1 %v26036_v57  ;;  %v9464_v26 = vsub.f32 %v26214_v55, %v26233_v2  ;;  %v26259_v20 = vand.u32 4294901760, %v9284_v23 }
 0x3ae   : >> { %v5000_v54 = vadd.f32 %v4999_v13, %v4897_v5  ;;  %v5255_v37 = vadd.f32 %v22157_v7, %v22144_v24  ;;  %22581 = vmatpush3.msra.mxu0 %v26045_v21  ;;  %22561 = vmatprep.mubr.f32.mxu0 %v26120_v25  ;;  %v20507_v21 = vld [vmem:[%s24836_s8 + $0x50] sm:$0xff] }
 0x3af   : >> { %v5117_v39 = vpop.f32.mrf.mxu0  ;;  %v22160_v49 = vpop.f32.mrf.mxu1  ;;  %22575 = vmatmul.mubr.f32.gmra.mxu1 %v8688_v9  ;;  %22582 = vmatprep.subr.mxu0 %v26073_v36  ;;  %v9465_v3 = vand.u32 4294901760, %v9464_v26  ;;  %v26274_v14 = vsub.f32 %v9284_v23, %v26259_v20 }
 0x3b0   : >> { %v26246_v28 = vadd.f32 %v5000_v54, %v26086_v35  ;;  %v5249_v33 = vadd.f32 %v5248_v27, %v5117_v39  ;;  %22583 = vmatpush3.msra.mxu0 %v26073_v36  ;;  %22577 = vmatprep.mubr.f32.mxu1 %v8698_v16  ;;  %v26257_v35 = vsub.f32 %v9281_v15, %v26235_v51  ;;  %v26263_v16 = vand.u32 4294901760, %v9287_v63 }
 0x3b1   : >> { %v22147_v25 = vpop.f32.mrf.mxu0  ;;  %22562 = vmatmul.mubr.f32.gmra.mxu0 %v26133_v18  ;;  %v5260_v9 = vpop.f32.mrf.mxu1  ;;  %22596 = vmatpush3.msra.mxu1 %v26036_v57  ;;  %v9290_v18 = vsel %vm225_vm0, %v20506_v29, 0  ;;  %v9293_v57 = vsel %vm225_vm0, %v20507_v21, 0  ;;  %v9377_v43 = vand.u32 4294901760, %v26274_v14  ;;  %v26295_v15 = vand.u32 4294901760, %v9296_v42 }
 0x3b2   : >> { %v5267_v36 = vadd.f32 %v22160_v49, %v22147_v25  ;;  %22564 = vmatprep.mubr.f32.mxu0 %v26141_v32  ;;  %22606 = vmatprep.subr.mxu0 %v26176_v31  ;;  %v9367_v56 = vand.u32 4294901760, %v26257_v35  ;;  %v26276_v50 = vand.u32 4294901760, %v9290_v18  ;;  %v26282_v11 = vand.u32 4294901760, %v9293_v57 }
 0x3b3   : >> { %v5137_v41 = vpop.f32.mrf.mxu0  ;;  %v22163_v22 = vpop.f32.mrf.mxu1  ;;  %22578 = vmatmul.mubr.f32.gmra.mxu1 %v8708_v34  ;;  %22619 = vmatprep.subr.mxu1 %v9458_v30  ;;  %v26280_v34 = vsub.f32 %v9287_v63, %v26263_v16  ;;  %v9378_v54 = vsub.f32 %v26274_v14, %v9377_v43  ;;  %v26313_v23 = vsub.f32 %v9296_v42, %v26295_v15 }
 0x3b4   : >> { %22597 = vmatprep.mubr.f32.mxu1 %v26075_v47  ;;  %v26293_v13 = vsub.f32 %v9290_v18, %v26276_v50  ;;  %v26301_v7 = vsub.f32 %v9293_v57, %v26282_v11 }
 0x3b5   : >> { %v22150_v4 = vpop.f32.mrf.mxu0  ;;  %22565 = vmatmul.mubr.f32.gmra.mxu0 %v26153_v19  ;;  %v5272_v32 = vpop.f32.mrf.mxu1  ;;  %v9379_v9 = vand.u32 4294901760, %v9378_v54 }
 0x3b6   : >> { %22584 = vmatprep.mubr.f32.mxu0 %v26075_v47  ;;  %v9368_v47 = vsub.f32 %v26257_v35, %v9367_v56 }
 0x3b7   : >> { %v5157_v0 = vpop.f32.mrf.mxu0  ;;  %v22183_v19 = vpop.f32.mrf.mxu1  ;;  %22598 = vmatmul.mubr.f32.vlgmr.msra.gmra.mxu1 %v26099_v52 }
 0x3b8   : >> { %v5273_v44 = vadd.f32 %v5272_v32, %v5157_v0  ;;  %22620 = vmatpush3.msra.mxu1 %v9458_v30  ;;  %22600 = vmatprep.mubr.f32.mxu1 %v26103_v60  ;;  %v9369_v27 = vand.u32 4294901760, %v9368_v47  ;;  %v9407_v30 = vand.u32 4294901760, %v26301_v7 }
 0x3b9   : >> { %v22170_v38 = vpop.f32.mrf.mxu0  ;;  %22585 = vmatmul.mubr.f32.vlgmr.msra.gmra.mxu0 %v26099_v52  ;;  %v5464_v8 = vpop.f32.mrf.mxu1  ;;  %22621 = vmatprep.subr.mxu1 %v9465_v3  ;;  %v9387_v52 = vand.u32 4294901760, %v26280_v34 }
 0x3ba   : >> { %v5362_v61 = vadd.f32 %v22170_v38, %v5255_v37  ;;  %22607 = vmatpush3.msra.mxu0 %v26176_v31  ;;  %22587 = vmatprep.mubr.f32.mxu0 %v26103_v60  ;;  %v9397_v37 = vand.u32 4294901760, %v26293_v13  ;;  %v9408_v41 = vsub.f32 %v26301_v7, %v9407_v30  ;;  %v20517_v38 = vld [vmem:[%s28673_s3 + $0xb0] sm:$0xff] }
 0x3bb   : >> { %v5354_v48 = vpop.f32.mrf.mxu0  ;;  %v22186_v45 = vpop.f32.mrf.mxu1  ;;  %22601 = vmatmul.mubr.f32.gmra.mxu1 %v26116_v1  ;;  %22608 = vmatprep.subr.mxu0 %v26196_v53 }
 0x3bc   : >> { %v5473_v5 = vadd.f32 %v22183_v19, %v5362_v61  ;;  %v5355_v10 = vadd.f32 %v5354_v48, %v5249_v33  ;;  %22609 = vmatpush3.msra.mxu0 %v26196_v53  ;;  %22603 = vmatprep.mubr.f32.mxu1 %v26122_v17  ;;  %v9398_v26 = vsub.f32 %v26293_v13, %v9397_v37 }
 0x3bd   : >> { %v22173_v24 = vpop.f32.mrf.mxu0  ;;  %22588 = vmatmul.mubr.f32.gmra.mxu0 %v26116_v1  ;;  %v5480_v60 = vpop.f32.mrf.mxu1  ;;  %22622 = vmatpush3.msra.mxu1 %v9465_v3  ;;  %v9388_v1 = vsub.f32 %v26280_v34, %v9387_v52 }
 0x3be   : >> { %v5465_v39 = vadd.f32 %v5464_v8, %v5355_v10  ;;  %v5376_v49 = vadd.f32 %v22173_v24, %v5267_v36  ;;  %22590 = vmatprep.mubr.f32.mxu0 %v26122_v17  ;;  %22632 = vmatprep.subr.mxu0 %v26191_v62  ;;  %v20518_v17 = vld [vmem:[%s28673_s3 + $0xb8] sm:$0xff]  ;;  %v9417_v36 = vand.u32 4294901760, %v26313_v23  ;;  %v9399_v3 = vand.u32 4294901760, %v9398_v26 }
 0x3bf   : >> { %v5368_v63 = vpop.f32.mrf.mxu0  ;;  %v22189_v29 = vpop.f32.mrf.mxu1  ;;  %22604 = vmatmul.mubr.f32.gmra.mxu1 %v26135_v59  ;;  %22645 = vmatprep.subr.mxu1 %v26176_v31  ;;  %v9389_v18 = vand.u32 4294901760, %v9388_v1  ;;  %v26336_v12 = vand.u32 4294901760, %v20518_v17  ;;  %v26356_v24 = vand.u32 4294901760, %v20517_v38  ;;  %v20511_v1 = vld [vmem:[%s24836_s8 + $0x31] sm:$0xff]  ;;  %v20512_v26 = vld [vmem:[%s24836_s8 + $0x39] sm:$0xff] }
 0x3c0   : >> { %v5489_v33 = vadd.f32 %v22186_v45, %v5376_v49  ;;  %22623 = vmatprep.mubr.f32.mxu1 %v26235_v51  ;;  %v9418_v42 = vsub.f32 %v26313_v23, %v9417_v36 }
 0x3c1   : >> { %v22176_v21 = vpop.f32.mrf.mxu0  ;;  %22591 = vmatmul.mubr.f32.gmra.mxu0 %v26135_v59  ;;  %v5496_v25 = vpop.f32.mrf.mxu1  ;;  %v26351_v61 = vsub.f32 %v20518_v17, %v26336_v12  ;;  %v26374_v17 = vsub.f32 %v20517_v38, %v26356_v24 }
 0x3c2   : >> { %22610 = vmatprep.mubr.f32.mxu0 %v9369_v27  ;;  %v9419_v10 = vand.u32 4294901760, %v9418_v42 }
 0x3c3   : >> { %v5382_v22 = vpop.f32.mrf.mxu0  ;;  %v22209_v57 = vpop.f32.mrf.mxu1  ;;  %22624 = vmatmul.mubr.f32.vlgmr.msra.gmra.mxu1 %v26259_v20  ;;  %v26365_v49 = vand.u32 4294901760, %v26351_v61 }
 0x3c4   : >> { %v5383_v59 = vadd.f32 %v5382_v22, %v5273_v44  ;;  %22646 = vmatpush3.msra.mxu1 %v26176_v31  ;;  %22626 = vmatprep.mubr.f32.mxu1 %v26263_v16  ;;  %v9409_v44 = vand.u32 4294901760, %v9408_v41 }
 0x3c5   : >> { %v22196_v4 = vpop.f32.mrf.mxu0  ;;  %22611 = vmatmul.mubr.f32.vlgmr.msra.gmra.mxu0 %v9379_v9  ;;  %v5684_v32 = vpop.f32.mrf.mxu1  ;;  %22647 = vmatprep.subr.mxu1 %v26196_v53 }
 0x3c6   : >> { %v5497_v0 = vadd.f32 %v5496_v25, %v5383_v59  ;;  %v5588_v19 = vadd.f32 %v22196_v4, %v5473_v5  ;;  %22633 = vmatpush3.msra.mxu0 %v26191_v62  ;;  %22613 = vmatprep.mubr.f32.mxu0 %v9389_v18  ;;  %v9990_v25 = vsel %vm225_vm0, %v20511_v1, 0 }
 0x3c7   : >> { %v5581_v8 = vpop.f32.mrf.mxu0  ;;  %v22212_v47 = vpop.f32.mrf.mxu1  ;;  %22627 = vmatmul.mubr.f32.gmra.mxu1 %v26276_v50  ;;  %22634 = vmatprep.subr.mxu0 %v26214_v55  ;;  %v26395_v22 = vand.u32 4294901760, %v9990_v25 }
 0x3c8   : >> { %v5691_v48 = vadd.f32 %v22209_v57, %v5588_v19  ;;  %v5582_v45 = vadd.f32 %v5581_v8, %v5465_v39  ;;  %22635 = vmatpush3.msra.mxu0 %v26214_v55  ;;  %22629 = vmatprep.mubr.f32.mxu1 %v26282_v11 }
 0x3c9   : >> { %v22199_v62 = vpop.f32.mrf.mxu0  ;;  %22614 = vmatmul.mubr.f32.gmra.mxu0 %v9399_v3  ;;  %v5696_v5 = vpop.f32.mrf.mxu1  ;;  %22648 = vmatpush3.msra.mxu1 %v26196_v53  ;;  %v20514_v3 = vld [vmem:[%s24836_s8 + $0x49] sm:$0xff] }
 0x3ca   : >> { %v26359_v60 = vadd.f32 %v5691_v48, %v26199_v58  ;;  %v5685_v27 = vadd.f32 %v5684_v32, %v5582_v45  ;;  %v5600_v54 = vadd.f32 %v22199_v62, %v5489_v33  ;;  %22616 = vmatprep.mubr.f32.mxu0 %v9409_v44  ;;  %22658 = vmatprep.subr.mxu0 %v26205_v40 }
 0x3cb   : >> { %v5593_v55 = vpop.f32.mrf.mxu0  ;;  %v22215_v39 = vpop.f32.mrf.mxu1  ;;  %22630 = vmatmul.mubr.f32.gmra.mxu1 %v26295_v15  ;;  %22671 = vmatprep.subr.mxu1 %v26176_v31 }
 0x3cc   : >> { %v26369_v63 = vadd.f32 %v5685_v27, %v26209_v46  ;;  %v5703_v58 = vadd.f32 %v22212_v47, %v5600_v54  ;;  %22649 = vmatprep.mubr.f32.mxu1 %v9367_v56  ;;  %v10166_v56 = vsub.f32 %v26351_v61, %v26365_v49  ;;  %v20516_v47 = vld [vmem:[%s24836_s8 + $0x59] sm:$0xff] }
 0x3cd   : >> { %v22202_v29 = vpop.f32.mrf.mxu0  ;;  %22617 = vmatmul.mubr.f32.gmra.mxu0 %v9419_v10  ;;  %v5708_v33 = vpop.f32.mrf.mxu1  ;;  %v10005_v54 = vsel %vm225_vm0, %v20516_v47, 0 }
 0x3ce   : >> { %v26377_v21 = vadd.f32 %v5703_v58, %v26217_v6  ;;  %22636 = vmatprep.mubr.f32.mxu0 %v26257_v35  ;;  %v20513_v6 = vld [vmem:[%s24836_s8 + $0x41] sm:$0xff]  ;;  %v10167_v4 = vand.u32 4294901760, %v10166_v56 }
 0x3cf   : >> { %v5605_v46 = vpop.f32.mrf.mxu0  ;;  %v22235_v9 = vpop.f32.mrf.mxu1  ;;  %22650 = vmatmul.mubr.f32.vlgmr.msra.gmra.mxu1 %v9377_v43  ;;  %v26393_v43 = vand.u32 4294901760, %v26374_v17  ;;  %v9996_v32 = vsel %vm225_vm0, %v20513_v6, 0 }
 0x3d0   : >> { %v5606_v18 = vadd.f32 %v5605_v46, %v5497_v0  ;;  %22672 = vmatpush3.msra.mxu1 %v26176_v31  ;;  %22652 = vmatprep.mubr.f32.mxu1 %v9387_v52  ;;  %v9993_v31 = vsel %vm225_vm0, %v20512_v26, 0 }
 0x3d1   : >> { %v22222_v41 = vpop.f32.mrf.mxu0  ;;  %22637 = vmatmul.mubr.f32.vlgmr.msra.gmra.mxu0 %v26274_v14  ;;  %v5957_v35 = vpop.f32.mrf.mxu1  ;;  %22673 = vmatprep.subr.mxu1 %v26196_v53  ;;  %v10173_v19 = vsub.f32 %v26374_v17, %v26393_v43  ;;  %v26419_v44 = vand.u32 4294901760, %v9993_v31 }
 0x3d2   : >> { %v5709_v57 = vadd.f32 %v5708_v33, %v5606_v18  ;;  %v5964_v59 = vadd.f32 %v22235_v9, %v22222_v41  ;;  %22659 = vmatpush3.msra.mxu0 %v26205_v40  ;;  %22639 = vmatprep.mubr.f32.mxu0 %v26280_v34  ;;  %v20515_v40 = vld [vmem:[%s24836_s8 + $0x51] sm:$0xff] }
 0x3d3   : >> { %v5826_v52 = vpop.f32.mrf.mxu0  ;;  %v22238_v14 = vpop.f32.mrf.mxu1  ;;  %22653 = vmatmul.mubr.f32.gmra.mxu1 %v9397_v37  ;;  %22660 = vmatprep.subr.mxu0 %v26233_v2  ;;  %v10174_v45 = vand.u32 4294901760, %v10173_v19  ;;  %v26434_v5 = vsub.f32 %v9993_v31, %v26419_v44 }
 0x3d4   : >> { %v26406_v42 = vadd.f32 %v5709_v57, %v26246_v28  ;;  %v5958_v0 = vadd.f32 %v5957_v35, %v5826_v52  ;;  %22661 = vmatpush3.msra.mxu0 %v26233_v2  ;;  %22655 = vmatprep.mubr.f32.mxu1 %v9407_v30  ;;  %v26417_v28 = vsub.f32 %v9990_v25, %v26395_v22  ;;  %v26423_v30 = vand.u32 4294901760, %v9996_v32 }
 0x3d5   : >> { %v22225_v34 = vpop.f32.mrf.mxu0  ;;  %22640 = vmatmul.mubr.f32.gmra.mxu0 %v26293_v13  ;;  %v5969_v37 = vpop.f32.mrf.mxu1  ;;  %22674 = vmatpush3.msra.mxu1 %v26196_v53  ;;  %v9999_v13 = vsel %vm225_vm0, %v20514_v3, 0  ;;  %v10002_v53 = vsel %vm225_vm0, %v20515_v40, 0  ;;  %v10086_v29 = vand.u32 4294901760, %v26434_v5  ;;  %v26455_v25 = vand.u32 4294901760, %v10005_v54 }
 0x3d6   : >> { %v5976_v2 = vadd.f32 %v22238_v14, %v22225_v34  ;;  %22642 = vmatprep.mubr.f32.mxu0 %v26301_v7  ;;  %22684 = vmatprep.subr.mxu0 %v26336_v12  ;;  %v10076_v62 = vand.u32 4294901760, %v26417_v28  ;;  %v26436_v10 = vand.u32 4294901760, %v9999_v13  ;;  %v26442_v27 = vand.u32 4294901760, %v10002_v53 }
 0x3d7   : >> { %v5846_v38 = vpop.f32.mrf.mxu0  ;;  %v22241_v8 = vpop.f32.mrf.mxu1  ;;  %22656 = vmatmul.mubr.f32.gmra.mxu1 %v9417_v36  ;;  %22697 = vmatprep.subr.mxu1 %v10167_v4  ;;  %v26440_v36 = vsub.f32 %v9996_v32, %v26423_v30  ;;  %v10087_v57 = vsub.f32 %v26434_v5, %v10086_v29  ;;  %v26473_v31 = vsub.f32 %v10005_v54, %v26455_v25 }
 0x3d8   : >> { %22675 = vmatprep.mubr.f32.mxu1 %v26235_v51  ;;  %v26453_v33 = vsub.f32 %v9999_v13, %v26436_v10  ;;  %v26461_v9 = vsub.f32 %v10002_v53, %v26442_v27 }
 0x3d9   : >> { %v22228_v48 = vpop.f32.mrf.mxu0  ;;  %22643 = vmatmul.mubr.f32.gmra.mxu0 %v26313_v23  ;;  %v5981_v7 = vpop.f32.mrf.mxu1  ;;  %v10088_v37 = vand.u32 4294901760, %v10087_v57 }
 0x3da   : >> { %22662 = vmatprep.mubr.f32.mxu0 %v26235_v51  ;;  %v10077_v51 = vsub.f32 %v26417_v28, %v10076_v62 }
 0x3db   : >> { %v5866_v55 = vpop.f32.mrf.mxu0  ;;  %v22261_v23 = vpop.f32.mrf.mxu1  ;;  %22676 = vmatmul.mubr.f32.vlgmr.msra.gmra.mxu1 %v26259_v20 }
 0x3dc   : >> { %v5982_v39 = vadd.f32 %v5981_v7, %v5866_v55  ;;  %22698 = vmatpush3.msra.mxu1 %v10167_v4  ;;  %22678 = vmatprep.mubr.f32.mxu1 %v26263_v16  ;;  %v10078_v35 = vand.u32 4294901760, %v10077_v51  ;;  %v10116_v4 = vand.u32 4294901760, %v26461_v9 }
 0x3dd   : >> { %v22248_v1 = vpop.f32.mrf.mxu0  ;;  %22663 = vmatmul.mubr.f32.vlgmr.msra.gmra.mxu0 %v26259_v20  ;;  %v6173_v58 = vpop.f32.mrf.mxu1  ;;  %22699 = vmatprep.subr.mxu1 %v10174_v45  ;;  %v10096_v20 = vand.u32 4294901760, %v26440_v36 }
 0x3de   : >> { %v6071_v46 = vadd.f32 %v22248_v1, %v5964_v59  ;;  %22685 = vmatpush3.msra.mxu0 %v26336_v12  ;;  %22665 = vmatprep.mubr.f32.mxu0 %v26263_v16  ;;  %v10106_v59 = vand.u32 4294901760, %v26453_v33  ;;  %v10117_v38 = vsub.f32 %v26461_v9, %v10116_v4  ;;  %v20525_v1 = vld [vmem:[%s28673_s3 + $0xc0] sm:$0xff] }
 0x3df   : >> { %v6063_v56 = vpop.f32.mrf.mxu0  ;;  %v22264_v26 = vpop.f32.mrf.mxu1  ;;  %22679 = vmatmul.mubr.f32.gmra.mxu1 %v26276_v50  ;;  %22686 = vmatprep.subr.mxu0 %v26356_v24 }
 0x3e0   : >> { %v6182_v18 = vadd.f32 %v22261_v23, %v6071_v46  ;;  %v6064_v6 = vadd.f32 %v6063_v56, %v5958_v0  ;;  %22687 = vmatpush3.msra.mxu0 %v26356_v24  ;;  %22681 = vmatprep.mubr.f32.mxu1 %v26282_v11  ;;  %v10107_v19 = vsub.f32 %v26453_v33, %v10106_v59 }
 0x3e1   : >> { %v22251_v41 = vpop.f32.mrf.mxu0  ;;  %22666 = vmatmul.mubr.f32.gmra.mxu0 %v26276_v50  ;;  %v6189_v16 = vpop.f32.mrf.mxu1  ;;  %22700 = vmatpush3.msra.mxu1 %v10174_v45  ;;  %v10097_v50 = vsub.f32 %v26440_v36, %v10096_v20 }
 0x3e2   : >> { %v6174_v52 = vadd.f32 %v6173_v58, %v6064_v6  ;;  %v6085_v14 = vadd.f32 %v22251_v41, %v5976_v2  ;;  %22668 = vmatprep.mubr.f32.mxu0 %v26282_v11  ;;  %22710 = vmatprep.subr.mxu0 %v26351_v61  ;;  %v20526_v11 = vld [vmem:[%s28673_s3 + $0xc8] sm:$0xff]  ;;  %v10126_v2 = vand.u32 4294901760, %v26473_v31  ;;  %v10108_v45 = vand.u32 4294901760, %v10107_v19  ;;  %v20520_v19 = vld [vmem:[%s24836_s8 + $0x3a] sm:$0xff] }
 0x3e3   : >> { %v6077_v32 = vpop.f32.mrf.mxu0  ;;  %v22267_v3 = vpop.f32.mrf.mxu1  ;;  %22682 = vmatmul.mubr.f32.gmra.mxu1 %v26295_v15  ;;  %22723 = vmatprep.subr.mxu1 %v26336_v12  ;;  %v10098_v13 = vand.u32 4294901760, %v10097_v50  ;;  %v26496_v47 = vand.u32 4294901760, %v20526_v11  ;;  %v26516_v41 = vand.u32 4294901760, %v20525_v1  ;;  %v20519_v50 = vld [vmem:[%s24836_s8 + $0x32] sm:$0xff] }
 0x3e4   : >> { %v6198_v0 = vadd.f32 %v22264_v26, %v6085_v14  ;;  %22701 = vmatprep.mubr.f32.mxu1 %v26395_v22  ;;  %v10127_v54 = vsub.f32 %v26473_v31, %v10126_v2 }
 0x3e5   : >> { %v22254_v40 = vpop.f32.mrf.mxu0  ;;  %22669 = vmatmul.mubr.f32.gmra.mxu0 %v26295_v15  ;;  %v6205_v34 = vpop.f32.mrf.mxu1  ;;  %v26511_v46 = vsub.f32 %v20526_v11, %v26496_v47  ;;  %v26534_v11 = vsub.f32 %v20525_v1, %v26516_v41 }
 0x3e6   : >> { %22688 = vmatprep.mubr.f32.mxu0 %v10078_v35  ;;  %v10128_v6 = vand.u32 4294901760, %v10127_v54 }
 0x3e7   : >> { %v6091_v8 = vpop.f32.mrf.mxu0  ;;  %v22287_v53 = vpop.f32.mrf.mxu1  ;;  %22702 = vmatmul.mubr.f32.vlgmr.msra.gmra.mxu1 %v26419_v44  ;;  %v26525_v14 = vand.u32 4294901760, %v26511_v46 }
 0x3e8   : >> { %v6092_v15 = vadd.f32 %v6091_v8, %v5982_v39  ;;  %22724 = vmatpush3.msra.mxu1 %v26336_v12  ;;  %22704 = vmatprep.mubr.f32.mxu1 %v26423_v30  ;;  %v10118_v39 = vand.u32 4294901760, %v10117_v38 }
 0x3e9   : >> { %v22274_v48 = vpop.f32.mrf.mxu0  ;;  %22689 = vmatmul.mubr.f32.vlgmr.msra.gmra.mxu0 %v10088_v37  ;;  %v6393_v7 = vpop.f32.mrf.mxu1  ;;  %22725 = vmatprep.subr.mxu1 %v26356_v24 }
 0x3ea   : >> { %v6206_v55 = vadd.f32 %v6205_v34, %v6092_v15  ;;  %v6297_v23 = vadd.f32 %v22274_v48, %v6182_v18  ;;  %22711 = vmatpush3.msra.mxu0 %v26351_v61  ;;  %22691 = vmatprep.mubr.f32.mxu0 %v10098_v13  ;;  %v10699_v34 = vsel %vm225_vm0, %v20519_v50, 0 }
 0x3eb   : >> { %v6290_v58 = vpop.f32.mrf.mxu0  ;;  %v22290_v51 = vpop.f32.mrf.mxu1  ;;  %22705 = vmatmul.mubr.f32.gmra.mxu1 %v26436_v10  ;;  %22712 = vmatprep.subr.mxu0 %v26374_v17  ;;  %v26555_v8 = vand.u32 4294901760, %v10699_v34 }
 0x3ec   : >> { %v6400_v56 = vadd.f32 %v22287_v53, %v6297_v23  ;;  %v6291_v26 = vadd.f32 %v6290_v58, %v6174_v52  ;;  %22713 = vmatpush3.msra.mxu0 %v26374_v17  ;;  %22707 = vmatprep.mubr.f32.mxu1 %v26442_v27 }
 0x3ed   : >> { %v22277_v61 = vpop.f32.mrf.mxu0  ;;  %22692 = vmatmul.mubr.f32.gmra.mxu0 %v10108_v45  ;;  %v6405_v18 = vpop.f32.mrf.mxu1  ;;  %22726 = vmatpush3.msra.mxu1 %v26356_v24  ;;  %v20522_v45 = vld [vmem:[%s24836_s8 + $0x4a] sm:$0xff] }
 0x3ee   : >> { %v26519_v16 = vadd.f32 %v6400_v56, %v26359_v60  ;;  %v6394_v35 = vadd.f32 %v6393_v7, %v6291_v26  ;;  %v6309_v57 = vadd.f32 %v22277_v61, %v6198_v0  ;;  %22694 = vmatprep.mubr.f32.mxu0 %v10118_v39  ;;  %22736 = vmatprep.subr.mxu0 %v26365_v49 }
 0x3ef   : >> { %v6302_v17 = vpop.f32.mrf.mxu0  ;;  %v22293_v52 = vpop.f32.mrf.mxu1  ;;  %22708 = vmatmul.mubr.f32.gmra.mxu1 %v26455_v25  ;;  %22749 = vmatprep.subr.mxu1 %v26336_v12 }
 0x3f0   : >> { %v26529_v32 = vadd.f32 %v6394_v35, %v26369_v63  ;;  %v6412_v60 = vadd.f32 %v22290_v51, %v6309_v57  ;;  %22727 = vmatprep.mubr.f32.mxu1 %v10076_v62  ;;  %v10875_v62 = vsub.f32 %v26511_v46, %v26525_v14  ;;  %v20524_v51 = vld [vmem:[%s24836_s8 + $0x5a] sm:$0xff] }
 0x3f1   : >> { %v22280_v3 = vpop.f32.mrf.mxu0  ;;  %22695 = vmatmul.mubr.f32.gmra.mxu0 %v10128_v6  ;;  %v6417_v0 = vpop.f32.mrf.mxu1  ;;  %v10714_v57 = vsel %vm225_vm0, %v20524_v51, 0 }
 0x3f2   : >> { %v26537_v40 = vadd.f32 %v6412_v60, %v26377_v21  ;;  %22714 = vmatprep.mubr.f32.mxu0 %v26417_v28  ;;  %v20521_v21 = vld [vmem:[%s24836_s8 + $0x42] sm:$0xff]  ;;  %v10876_v48 = vand.u32 4294901760, %v10875_v62 }
 0x3f3   : >> { %v6314_v63 = vpop.f32.mrf.mxu0  ;;  %v22313_v37 = vpop.f32.mrf.mxu1  ;;  %22728 = vmatmul.mubr.f32.vlgmr.msra.gmra.mxu1 %v10086_v29  ;;  %v26553_v29 = vand.u32 4294901760, %v26534_v11  ;;  %v10705_v7 = vsel %vm225_vm0, %v20521_v21, 0 }
 0x3f4   : >> { %v6315_v13 = vadd.f32 %v6314_v63, %v6206_v55  ;;  %22750 = vmatpush3.msra.mxu1 %v26336_v12  ;;  %22730 = vmatprep.mubr.f32.mxu1 %v10096_v20  ;;  %v10702_v12 = vsel %vm225_vm0, %v20520_v19, 0 }
 0x3f5   : >> { %v22300_v38 = vpop.f32.mrf.mxu0  ;;  %22715 = vmatmul.mubr.f32.vlgmr.msra.gmra.mxu0 %v26434_v5  ;;  %v6666_v28 = vpop.f32.mrf.mxu1  ;;  %22751 = vmatprep.subr.mxu1 %v26356_v24  ;;  %v10882_v23 = vsub.f32 %v26534_v11, %v26553_v29  ;;  %v26579_v39 = vand.u32 4294901760, %v10702_v12 }
 0x3f6   : >> { %v6418_v53 = vadd.f32 %v6417_v0, %v6315_v13  ;;  %v6673_v15 = vadd.f32 %v22313_v37, %v22300_v38  ;;  %22737 = vmatpush3.msra.mxu0 %v26365_v49  ;;  %22717 = vmatprep.mubr.f32.mxu0 %v26440_v36  ;;  %v20523_v49 = vld [vmem:[%s24836_s8 + $0x52] sm:$0xff] }
 0x3f7   : >> { %v6535_v20 = vpop.f32.mrf.mxu0  ;;  %v22316_v5 = vpop.f32.mrf.mxu1  ;;  %22731 = vmatmul.mubr.f32.gmra.mxu1 %v10106_v59  ;;  %22738 = vmatprep.subr.mxu0 %v26393_v43  ;;  %v10883_v26 = vand.u32 4294901760, %v10882_v23  ;;  %v26594_v18 = vsub.f32 %v10702_v12, %v26579_v39 }
 0x3f8   : >> { %v26566_v54 = vadd.f32 %v6418_v53, %v26406_v42  ;;  %v6667_v55 = vadd.f32 %v6666_v28, %v6535_v20  ;;  %22739 = vmatpush3.msra.mxu0 %v26393_v43  ;;  %22733 = vmatprep.mubr.f32.mxu1 %v10116_v4  ;;  %v26577_v42 = vsub.f32 %v10699_v34, %v26555_v8  ;;  %v26583_v4 = vand.u32 4294901760, %v10705_v7 }
 0x3f9   : >> { %v22303_v36 = vpop.f32.mrf.mxu0  ;;  %22718 = vmatmul.mubr.f32.gmra.mxu0 %v26453_v33  ;;  %v6678_v59 = vpop.f32.mrf.mxu1  ;;  %22752 = vmatpush3.msra.mxu1 %v26356_v24  ;;  %v10708_v33 = vsel %vm225_vm0, %v20522_v45, 0  ;;  %v10711_v24 = vsel %vm225_vm0, %v20523_v49, 0  ;;  %v10795_v3 = vand.u32 4294901760, %v26594_v18  ;;  %v26615_v34 = vand.u32 4294901760, %v10714_v57 }
 0x3fa   : >> { %v6685_v43 = vadd.f32 %v22316_v5, %v22303_v36  ;;  %22720 = vmatprep.mubr.f32.mxu0 %v26461_v9  ;;  %22762 = vmatprep.subr.mxu0 %v26496_v47  ;;  %v10785_v61 = vand.u32 4294901760, %v26577_v42  ;;  %v26596_v6 = vand.u32 4294901760, %v10708_v33  ;;  %v26602_v35 = vand.u32 4294901760, %v10711_v24 }
 0x3fb   : >> { %v6555_v1 = vpop.f32.mrf.mxu0  ;;  %v22319_v58 = vpop.f32.mrf.mxu1  ;;  %22734 = vmatmul.mubr.f32.gmra.mxu1 %v10126_v2  ;;  %22775 = vmatprep.subr.mxu1 %v10876_v48  ;;  %v26600_v2 = vsub.f32 %v10705_v7, %v26583_v4  ;;  %v10796_v53 = vsub.f32 %v26594_v18, %v10795_v3  ;;  %v26633_v12 = vsub.f32 %v10714_v57, %v26615_v34 }
 0x3fc   : >> { %22753 = vmatprep.mubr.f32.mxu1 %v26395_v22  ;;  %v26613_v0 = vsub.f32 %v10708_v33, %v26596_v6  ;;  %v26621_v37 = vsub.f32 %v10711_v24, %v26602_v35 }
 0x3fd   : >> { %v22306_v56 = vpop.f32.mrf.mxu0  ;;  %22721 = vmatmul.mubr.f32.gmra.mxu0 %v26473_v31  ;;  %v6690_v9 = vpop.f32.mrf.mxu1  ;;  %v10797_v59 = vand.u32 4294901760, %v10796_v53 }
 0x3fe   : >> { %22740 = vmatprep.mubr.f32.mxu0 %v26395_v22  ;;  %v10786_v22 = vsub.f32 %v26577_v42, %v10785_v61 }
 0x3ff   : >> { %v6575_v17 = vpop.f32.mrf.mxu0  ;;  %v22339_v31 = vpop.f32.mrf.mxu1  ;;  %22754 = vmatmul.mubr.f32.vlgmr.msra.gmra.mxu1 %v26419_v44 }
 0x400   : >> { %v6691_v52 = vadd.f32 %v6690_v9, %v6575_v17  ;;  %22776 = vmatpush3.msra.mxu1 %v10876_v48  ;;  %22756 = vmatprep.mubr.f32.mxu1 %v26423_v30  ;;  %v10787_v28 = vand.u32 4294901760, %v10786_v22  ;;  %v10825_v48 = vand.u32 4294901760, %v26621_v37 }
 0x401   : >> { %v22326_v50 = vpop.f32.mrf.mxu0  ;;  %22741 = vmatmul.mubr.f32.vlgmr.msra.gmra.mxu0 %v26419_v44  ;;  %v6882_v60 = vpop.f32.mrf.mxu1  ;;  %22777 = vmatprep.subr.mxu1 %v10883_v26  ;;  %v10805_v44 = vand.u32 4294901760, %v26600_v2 }
 0x402   : >> { %v6780_v63 = vadd.f32 %v22326_v50, %v6673_v15  ;;  %22763 = vmatpush3.msra.mxu0 %v26496_v47  ;;  %22743 = vmatprep.mubr.f32.mxu0 %v26423_v30  ;;  %v10815_v15 = vand.u32 4294901760, %v26613_v0  ;;  %v10826_v1 = vsub.f32 %v26621_v37, %v10825_v48  ;;  %v20533_v50 = vld [vmem:[%s28673_s3 + $0xd0] sm:$0xff] }
 0x403   : >> { %v6772_v62 = vpop.f32.mrf.mxu0  ;;  %v22342_v19 = vpop.f32.mrf.mxu1  ;;  %22757 = vmatmul.mubr.f32.gmra.mxu1 %v26436_v10  ;;  %22764 = vmatprep.subr.mxu0 %v26516_v41 }
 0x404   : >> { %v6891_v13 = vadd.f32 %v22339_v31, %v6780_v63  ;;  %v6773_v21 = vadd.f32 %v6772_v62, %v6667_v55  ;;  %22765 = vmatpush3.msra.mxu0 %v26516_v41  ;;  %22759 = vmatprep.mubr.f32.mxu1 %v26442_v27  ;;  %v10816_v23 = vsub.f32 %v26613_v0, %v10815_v15 }
 0x405   : >> { %v22329_v38 = vpop.f32.mrf.mxu0  ;;  %22744 = vmatmul.mubr.f32.gmra.mxu0 %v26436_v10  ;;  %v6898_v30 = vpop.f32.mrf.mxu1  ;;  %22778 = vmatpush3.msra.mxu1 %v10883_v26  ;;  %v10806_v10 = vsub.f32 %v26600_v2, %v10805_v44 }
 0x406   : >> { %v6883_v20 = vadd.f32 %v6882_v60, %v6773_v21  ;;  %v6794_v5 = vadd.f32 %v22329_v38, %v6685_v43  ;;  %22746 = vmatprep.mubr.f32.mxu0 %v26442_v27  ;;  %22788 = vmatprep.subr.mxu0 %v26511_v46  ;;  %v20534_v27 = vld [vmem:[%s28673_s3 + $0xd8] sm:$0xff]  ;;  %v10835_v43 = vand.u32 4294901760, %v26633_v12  ;;  %v10817_v26 = vand.u32 4294901760, %v10816_v23 }
 0x407   : >> { %v6786_v7 = vpop.f32.mrf.mxu0  ;;  %v22345_v45 = vpop.f32.mrf.mxu1  ;;  %22760 = vmatmul.mubr.f32.gmra.mxu1 %v26455_v25  ;;  %22801 = vmatprep.subr.mxu1 %v26496_v47  ;;  %v10807_v33 = vand.u32 4294901760, %v10806_v10  ;;  %v26656_v51 = vand.u32 4294901760, %v20534_v27  ;;  %v26676_v38 = vand.u32 4294901760, %v20533_v50  ;;  %v20527_v10 = vld [vmem:[%s24836_s8 + $0x33] sm:$0xff]  ;;  %v20528_v23 = vld [vmem:[%s24836_s8 + $0x3b] sm:$0xff] }
 0x408   : >> { %v6907_v55 = vadd.f32 %v22342_v19, %v6794_v5  ;;  %22779 = vmatprep.mubr.f32.mxu1 %v26555_v8  ;;  %v10836_v57 = vsub.f32 %v26633_v12, %v10835_v43 }
 0x409   : >> { %v22332_v49 = vpop.f32.mrf.mxu0  ;;  %22747 = vmatmul.mubr.f32.gmra.mxu0 %v26455_v25  ;;  %v6914_v36 = vpop.f32.mrf.mxu1  ;;  %v26671_v63 = vsub.f32 %v20534_v27, %v26656_v51  ;;  %v26694_v27 = vsub.f32 %v20533_v50, %v26676_v38 }
 0x40a   : >> { %22766 = vmatprep.mubr.f32.mxu0 %v10787_v28  ;;  %v10837_v21 = vand.u32 4294901760, %v10836_v57 }
 0x40b   : >> { %v6800_v58 = vpop.f32.mrf.mxu0  ;;  %v22365_v24 = vpop.f32.mrf.mxu1  ;;  %22780 = vmatmul.mubr.f32.vlgmr.msra.gmra.mxu1 %v26579_v39  ;;  %v26685_v5 = vand.u32 4294901760, %v26671_v63 }
 0x40c   : >> { %v6801_v25 = vadd.f32 %v6800_v58, %v6691_v52  ;;  %22802 = vmatpush3.msra.mxu1 %v26496_v47  ;;  %22782 = vmatprep.mubr.f32.mxu1 %v26583_v4  ;;  %v10827_v52 = vand.u32 4294901760, %v10826_v1 }
 0x40d   : >> { %v22352_v56 = vpop.f32.mrf.mxu0  ;;  %22767 = vmatmul.mubr.f32.vlgmr.msra.gmra.mxu0 %v10797_v59  ;;  %v7102_v9 = vpop.f32.mrf.mxu1  ;;  %22803 = vmatprep.subr.mxu1 %v26516_v41 }
 0x40e   : >> { %v6915_v17 = vadd.f32 %v6914_v36, %v6801_v25  ;;  %v7006_v31 = vadd.f32 %v22352_v56, %v6891_v13  ;;  %22789 = vmatpush3.msra.mxu0 %v26511_v46  ;;  %22769 = vmatprep.mubr.f32.mxu0 %v10807_v33  ;;  %v11408_v36 = vsel %vm225_vm0, %v20527_v10, 0 }
 0x40f   : >> { %v6999_v60 = vpop.f32.mrf.mxu0  ;;  %v22368_v22 = vpop.f32.mrf.mxu1  ;;  %22783 = vmatmul.mubr.f32.gmra.mxu1 %v26596_v6  ;;  %22790 = vmatprep.subr.mxu0 %v26534_v11  ;;  %v26715_v58 = vand.u32 4294901760, %v11408_v36 }
 0x410   : >> { %v7109_v62 = vadd.f32 %v22365_v24, %v7006_v31  ;;  %v7000_v19 = vadd.f32 %v6999_v60, %v6883_v20  ;;  %22791 = vmatpush3.msra.mxu0 %v26534_v11  ;;  %22785 = vmatprep.mubr.f32.mxu1 %v26602_v35 }
 0x411   : >> { %v22355_v46 = vpop.f32.mrf.mxu0  ;;  %22770 = vmatmul.mubr.f32.gmra.mxu0 %v10817_v26  ;;  %v7114_v13 = vpop.f32.mrf.mxu1  ;;  %22804 = vmatpush3.msra.mxu1 %v26516_v41  ;;  %v20530_v26 = vld [vmem:[%s24836_s8 + $0x4b] sm:$0xff] }
 0x412   : >> { %v26679_v30 = vadd.f32 %v7109_v62, %v26519_v16  ;;  %v7103_v28 = vadd.f32 %v7102_v9, %v7000_v19  ;;  %v7018_v53 = vadd.f32 %v22355_v46, %v6907_v55  ;;  %22772 = vmatprep.mubr.f32.mxu0 %v10827_v52  ;;  %22814 = vmatprep.subr.mxu0 %v26525_v14 }
 0x413   : >> { %v7011_v11 = vpop.f32.mrf.mxu0  ;;  %v22371_v20 = vpop.f32.mrf.mxu1  ;;  %22786 = vmatmul.mubr.f32.gmra.mxu1 %v26615_v34  ;;  %22827 = vmatprep.subr.mxu1 %v26496_v47 }
 0x414   : >> { %v26689_v7 = vadd.f32 %v7103_v28, %v26529_v32  ;;  %v7121_v16 = vadd.f32 %v22368_v22, %v7018_v53  ;;  %22805 = vmatprep.mubr.f32.mxu1 %v10785_v61  ;;  %v11584_v61 = vsub.f32 %v26671_v63, %v26685_v5  ;;  %v20532_v22 = vld [vmem:[%s24836_s8 + $0x5b] sm:$0xff] }
 0x415   : >> { %v22358_v45 = vpop.f32.mrf.mxu0  ;;  %22773 = vmatmul.mubr.f32.gmra.mxu0 %v10837_v21  ;;  %v7126_v55 = vpop.f32.mrf.mxu1  ;;  %v11423_v53 = vsel %vm225_vm0, %v20532_v22, 0 }
 0x416   : >> { %v26697_v49 = vadd.f32 %v7121_v16, %v26537_v40  ;;  %22792 = vmatprep.mubr.f32.mxu0 %v26577_v42  ;;  %v20529_v40 = vld [vmem:[%s24836_s8 + $0x43] sm:$0xff]  ;;  %v11585_v56 = vand.u32 4294901760, %v11584_v61 }
 0x417   : >> { %v7023_v32 = vpop.f32.mrf.mxu0  ;;  %v22391_v59 = vpop.f32.mrf.mxu1  ;;  %22806 = vmatmul.mubr.f32.vlgmr.msra.gmra.mxu1 %v10795_v3  ;;  %v26713_v3 = vand.u32 4294901760, %v26694_v27  ;;  %v11414_v9 = vsel %vm225_vm0, %v20529_v40, 0 }
 0x418   : >> { %v7024_v33 = vadd.f32 %v7023_v32, %v6915_v17  ;;  %22828 = vmatpush3.msra.mxu1 %v26496_v47  ;;  %22808 = vmatprep.mubr.f32.mxu1 %v10805_v44  ;;  %v11411_v47 = vsel %vm225_vm0, %v20528_v23, 0 }
 0x419   : >> { %v22378_v1 = vpop.f32.mrf.mxu0  ;;  %22793 = vmatmul.mubr.f32.vlgmr.msra.gmra.mxu0 %v26594_v18  ;;  %v7375_v42 = vpop.f32.mrf.mxu1  ;;  %22829 = vmatprep.subr.mxu1 %v26516_v41  ;;  %v11591_v31 = vsub.f32 %v26694_v27, %v26713_v3  ;;  %v26739_v52 = vand.u32 4294901760, %v11411_v47 }
 0x41a   : >> { %v7127_v24 = vadd.f32 %v7126_v55, %v7024_v33  ;;  %v7382_v25 = vadd.f32 %v22391_v59, %v22378_v1  ;;  %22815 = vmatpush3.msra.mxu0 %v26525_v14  ;;  %22795 = vmatprep.mubr.f32.mxu0 %v26600_v2  ;;  %v20531_v14 = vld [vmem:[%s24836_s8 + $0x53] sm:$0xff] }
 0x41b   : >> { %v7244_v44 = vpop.f32.mrf.mxu0  ;;  %v22394_v18 = vpop.f32.mrf.mxu1  ;;  %22809 = vmatmul.mubr.f32.gmra.mxu1 %v10815_v15  ;;  %22816 = vmatprep.subr.mxu0 %v26553_v29  ;;  %v11592_v19 = vand.u32 4294901760, %v11591_v31  ;;  %v26754_v13 = vsub.f32 %v11411_v47, %v26739_v52 }
 0x41c   : >> { %v26726_v57 = vadd.f32 %v7127_v24, %v26566_v54  ;;  %v7376_v17 = vadd.f32 %v7375_v42, %v7244_v44  ;;  %22817 = vmatpush3.msra.mxu0 %v26553_v29  ;;  %22811 = vmatprep.mubr.f32.mxu1 %v10825_v48  ;;  %v26737_v54 = vsub.f32 %v11408_v36, %v26715_v58  ;;  %v26743_v48 = vand.u32 4294901760, %v11414_v9 }
 0x41d   : >> { %v22381_v2 = vpop.f32.mrf.mxu0  ;;  %22796 = vmatmul.mubr.f32.gmra.mxu0 %v26613_v0  ;;  %v7387_v15 = vpop.f32.mrf.mxu1  ;;  %22830 = vmatpush3.msra.mxu1 %v26516_v41  ;;  %v11417_v0 = vsel %vm225_vm0, %v20530_v26, 0  ;;  %v11420_v41 = vsel %vm225_vm0, %v20531_v14, 0  ;;  %v11504_v45 = vand.u32 4294901760, %v26754_v13  ;;  %v26775_v36 = vand.u32 4294901760, %v11423_v53 }
 0x41e   : >> { %v7394_v29 = vadd.f32 %v22394_v18, %v22381_v2  ;;  %22798 = vmatprep.mubr.f32.mxu0 %v26621_v37  ;;  %22840 = vmatprep.subr.mxu0 %v26656_v51  ;;  %v11494_v46 = vand.u32 4294901760, %v26737_v54  ;;  %v26756_v21 = vand.u32 4294901760, %v11417_v0  ;;  %v26762_v28 = vand.u32 4294901760, %v11420_v41 }
 0x41f   : >> { %v7264_v50 = vpop.f32.mrf.mxu0  ;;  %v22397_v60 = vpop.f32.mrf.mxu1  ;;  %22812 = vmatmul.mubr.f32.gmra.mxu1 %v10835_v43  ;;  %22853 = vmatprep.subr.mxu1 %v11585_v56  ;;  %v26760_v43 = vsub.f32 %v11414_v9, %v26743_v48  ;;  %v11505_v24 = vsub.f32 %v26754_v13, %v11504_v45  ;;  %v26793_v47 = vsub.f32 %v11423_v53, %v26775_v36 }
 0x420   : >> { %22831 = vmatprep.mubr.f32.mxu1 %v26555_v8  ;;  %v26773_v55 = vsub.f32 %v11417_v0, %v26756_v21  ;;  %v26781_v59 = vsub.f32 %v11420_v41, %v26762_v28 }
 0x421   : >> { %v22384_v62 = vpop.f32.mrf.mxu0  ;;  %22799 = vmatmul.mubr.f32.gmra.mxu0 %v26633_v12  ;;  %v7399_v37 = vpop.f32.mrf.mxu1  ;;  %v11506_v15 = vand.u32 4294901760, %v11505_v24 }
 0x422   : >> { %22818 = vmatprep.mubr.f32.mxu0 %v26555_v8  ;;  %v11495_v8 = vsub.f32 %v26737_v54, %v11494_v46 }
 0x423   : >> { %v7284_v11 = vpop.f32.mrf.mxu0  ;;  %v22417_v12 = vpop.f32.mrf.mxu1  ;;  %22832 = vmatmul.mubr.f32.vlgmr.msra.gmra.mxu1 %v26579_v39 }
 0x424   : >> { %v7400_v20 = vadd.f32 %v7399_v37, %v7284_v11  ;;  %22854 = vmatpush3.msra.mxu1 %v11585_v56  ;;  %22834 = vmatprep.mubr.f32.mxu1 %v26583_v4  ;;  %v11496_v42 = vand.u32 4294901760, %v11495_v8  ;;  %v11534_v56 = vand.u32 4294901760, %v26781_v59 }
 0x425   : >> { %v22404_v10 = vpop.f32.mrf.mxu0  ;;  %22819 = vmatmul.mubr.f32.vlgmr.msra.gmra.mxu0 %v26579_v39  ;;  %v7591_v16 = vpop.f32.mrf.mxu1  ;;  %22855 = vmatprep.subr.mxu1 %v11592_v19  ;;  %v11514_v39 = vand.u32 4294901760, %v26760_v43 }
 0x426   : >> { %v7489_v32 = vadd.f32 %v22404_v10, %v7382_v25  ;;  %22841 = vmatpush3.msra.mxu0 %v26656_v51  ;;  %22821 = vmatprep.mubr.f32.mxu0 %v26583_v4  ;;  %v11524_v25 = vand.u32 4294901760, %v26773_v55  ;;  %v11535_v50 = vsub.f32 %v26781_v59, %v11534_v56  ;;  %v20541_v10 = vld [vmem:[%s28673_s3 + $0xe0] sm:$0xff] }
 0x427   : >> { %v7481_v61 = vpop.f32.mrf.mxu0  ;;  %v22420_v23 = vpop.f32.mrf.mxu1  ;;  %22835 = vmatmul.mubr.f32.gmra.mxu1 %v26596_v6  ;;  %22842 = vmatprep.subr.mxu0 %v26676_v38 }
 0x428   : >> { %v7600_v33 = vadd.f32 %v22417_v12, %v7489_v32  ;;  %v7482_v40 = vadd.f32 %v7481_v61, %v7376_v17  ;;  %22843 = vmatpush3.msra.mxu0 %v26676_v38  ;;  %22837 = vmatprep.mubr.f32.mxu1 %v26602_v35  ;;  %v11525_v31 = vsub.f32 %v26773_v55, %v11524_v25 }
 0x429   : >> { %v22407_v1 = vpop.f32.mrf.mxu0  ;;  %22822 = vmatmul.mubr.f32.gmra.mxu0 %v26596_v6  ;;  %v7607_v4 = vpop.f32.mrf.mxu1  ;;  %22856 = vmatpush3.msra.mxu1 %v11592_v19  ;;  %v11515_v6 = vsub.f32 %v26760_v43, %v11514_v39 }
 0x42a   : >> { %v7592_v44 = vadd.f32 %v7591_v16, %v7482_v40  ;;  %v7503_v18 = vadd.f32 %v22407_v1, %v7394_v29  ;;  %22824 = vmatprep.mubr.f32.mxu0 %v26602_v35  ;;  %22866 = vmatprep.subr.mxu0 %v26671_v63  ;;  %v20542_v35 = vld [vmem:[%s28673_s3 + $0xe8] sm:$0xff]  ;;  %v11544_v29 = vand.u32 4294901760, %v26793_v47  ;;  %v11526_v19 = vand.u32 4294901760, %v11525_v31  ;;  %v20536_v31 = vld [vmem:[%s24836_s8 + $0x3c] sm:$0xff] }
 0x42b   : >> { %v7495_v9 = vpop.f32.mrf.mxu0  ;;  %v22423_v26 = vpop.f32.mrf.mxu1  ;;  %22838 = vmatmul.mubr.f32.gmra.mxu1 %v26615_v34  ;;  %22879 = vmatprep.subr.mxu1 %v26656_v51  ;;  %v11516_v0 = vand.u32 4294901760, %v11515_v6  ;;  %v26816_v22 = vand.u32 4294901760, %v20542_v35  ;;  %v26836_v1 = vand.u32 4294901760, %v20541_v10  ;;  %v20535_v6 = vld [vmem:[%s24836_s8 + $0x34] sm:$0xff] }
 0x42c   : >> { %v7616_v17 = vadd.f32 %v22420_v23, %v7503_v18  ;;  %22857 = vmatprep.mubr.f32.mxu1 %v26715_v58  ;;  %v11545_v53 = vsub.f32 %v26793_v47, %v11544_v29 }
 0x42d   : >> { %v22410_v14 = vpop.f32.mrf.mxu0  ;;  %22825 = vmatmul.mubr.f32.gmra.mxu0 %v26615_v34  ;;  %v7623_v2 = vpop.f32.mrf.mxu1  ;;  %v26831_v32 = vsub.f32 %v20542_v35, %v26816_v22  ;;  %v26854_v35 = vsub.f32 %v20541_v10, %v26836_v1 }
 0x42e   : >> { %22844 = vmatprep.mubr.f32.mxu0 %v11496_v42  ;;  %v11546_v40 = vand.u32 4294901760, %v11545_v53 }
 0x42f   : >> { %v7509_v60 = vpop.f32.mrf.mxu0  ;;  %v22443_v41 = vpop.f32.mrf.mxu1  ;;  %22858 = vmatmul.mubr.f32.vlgmr.msra.gmra.mxu1 %v26739_v52  ;;  %v26845_v18 = vand.u32 4294901760, %v26831_v32 }
 0x430   : >> { %v7510_v34 = vadd.f32 %v7509_v60, %v7400_v20  ;;  %22880 = vmatpush3.msra.mxu1 %v26656_v51  ;;  %22860 = vmatprep.mubr.f32.mxu1 %v26743_v48  ;;  %v11536_v20 = vand.u32 4294901760, %v11535_v50 }
 0x431   : >> { %v22430_v62 = vpop.f32.mrf.mxu0  ;;  %22845 = vmatmul.mubr.f32.vlgmr.msra.gmra.mxu0 %v11506_v15  ;;  %v7811_v37 = vpop.f32.mrf.mxu1  ;;  %22881 = vmatprep.subr.mxu1 %v26676_v38 }
 0x432   : >> { %v7624_v11 = vadd.f32 %v7623_v2, %v7510_v34  ;;  %v7715_v12 = vadd.f32 %v22430_v62, %v7600_v33  ;;  %22867 = vmatpush3.msra.mxu0 %v26671_v63  ;;  %22847 = vmatprep.mubr.f32.mxu0 %v11516_v0  ;;  %v12117_v2 = vsel %vm225_vm0, %v20535_v6, 0 }
 0x433   : >> { %v7708_v16 = vpop.f32.mrf.mxu0  ;;  %v22446_v8 = vpop.f32.mrf.mxu1  ;;  %22861 = vmatmul.mubr.f32.gmra.mxu1 %v26756_v21  ;;  %22868 = vmatprep.subr.mxu0 %v26694_v27  ;;  %v26875_v60 = vand.u32 4294901760, %v12117_v2 }
 0x434   : >> { %v7818_v61 = vadd.f32 %v22443_v41, %v7715_v12  ;;  %v7709_v23 = vadd.f32 %v7708_v16, %v7592_v44  ;;  %22869 = vmatpush3.msra.mxu0 %v26694_v27  ;;  %22863 = vmatprep.mubr.f32.mxu1 %v26762_v28 }
 0x435   : >> { %v22433_v63 = vpop.f32.mrf.mxu0  ;;  %22848 = vmatmul.mubr.f32.gmra.mxu0 %v11526_v19  ;;  %v7823_v33 = vpop.f32.mrf.mxu1  ;;  %22882 = vmatpush3.msra.mxu1 %v26676_v38  ;;  %v20538_v19 = vld [vmem:[%s24836_s8 + $0x4c] sm:$0xff] }
 0x436   : >> { %v26839_v4 = vadd.f32 %v7818_v61, %v26679_v30  ;;  %v7812_v42 = vadd.f32 %v7811_v37, %v7709_v23  ;;  %v7727_v24 = vadd.f32 %v22433_v63, %v7616_v17  ;;  %22850 = vmatprep.mubr.f32.mxu0 %v11536_v20  ;;  %22892 = vmatprep.subr.mxu0 %v26685_v5 }
 0x437   : >> { %v7720_v27 = vpop.f32.mrf.mxu0  ;;  %v22449_v44 = vpop.f32.mrf.mxu1  ;;  %22864 = vmatmul.mubr.f32.gmra.mxu1 %v26775_v36  ;;  %22905 = vmatprep.subr.mxu1 %v26656_v51 }
 0x438   : >> { %v26849_v9 = vadd.f32 %v7812_v42, %v26689_v7  ;;  %v7830_v30 = vadd.f32 %v22446_v8, %v7727_v24  ;;  %22883 = vmatprep.mubr.f32.mxu1 %v11494_v46  ;;  %v12293_v46 = vsub.f32 %v26831_v32, %v26845_v18  ;;  %v20540_v8 = vld [vmem:[%s24836_s8 + $0x5c] sm:$0xff] }
 0x439   : >> { %v22436_v26 = vpop.f32.mrf.mxu0  ;;  %22851 = vmatmul.mubr.f32.gmra.mxu0 %v11546_v40  ;;  %v7835_v17 = vpop.f32.mrf.mxu1  ;;  %v12132_v24 = vsel %vm225_vm0, %v20540_v8, 0 }
 0x43a   : >> { %v26857_v14 = vadd.f32 %v7830_v30, %v26697_v49  ;;  %22870 = vmatprep.mubr.f32.mxu0 %v26737_v54  ;;  %v20537_v49 = vld [vmem:[%s24836_s8 + $0x44] sm:$0xff]  ;;  %v12294_v62 = vand.u32 4294901760, %v12293_v46 }
 0x43b   : >> { %v7732_v7 = vpop.f32.mrf.mxu0  ;;  %v22469_v15 = vpop.f32.mrf.mxu1  ;;  %22884 = vmatmul.mubr.f32.vlgmr.msra.gmra.mxu1 %v11504_v45  ;;  %v26873_v45 = vand.u32 4294901760, %v26854_v35  ;;  %v12123_v37 = vsel %vm225_vm0, %v20537_v49, 0 }
 0x43c   : >> { %v7733_v0 = vadd.f32 %v7732_v7, %v7624_v11  ;;  %22906 = vmatpush3.msra.mxu1 %v26656_v51  ;;  %22886 = vmatprep.mubr.f32.mxu1 %v11514_v39  ;;  %v12120_v51 = vsel %vm225_vm0, %v20536_v31, 0 }
 0x43d   : >> { %v22456_v50 = vpop.f32.mrf.mxu0  ;;  %22871 = vmatmul.mubr.f32.vlgmr.msra.gmra.mxu0 %v26754_v13  ;;  %v8084_v54 = vpop.f32.mrf.mxu1  ;;  %22907 = vmatprep.subr.mxu1 %v26676_v38  ;;  %v12300_v12 = vsub.f32 %v26854_v35, %v26873_v45  ;;  %v26899_v20 = vand.u32 4294901760, %v12120_v51 }
 0x43e   : >> { %v7836_v41 = vadd.f32 %v7835_v17, %v7733_v0  ;;  %v8091_v34 = vadd.f32 %v22469_v15, %v22456_v50  ;;  %22893 = vmatpush3.msra.mxu0 %v26685_v5  ;;  %22873 = vmatprep.mubr.f32.mxu0 %v26760_v43  ;;  %v20539_v5 = vld [vmem:[%s24836_s8 + $0x54] sm:$0xff] }
 0x43f   : >> { %v7953_v39 = vpop.f32.mrf.mxu0  ;;  %v22472_v13 = vpop.f32.mrf.mxu1  ;;  %22887 = vmatmul.mubr.f32.gmra.mxu1 %v11524_v25  ;;  %22894 = vmatprep.subr.mxu0 %v26713_v3  ;;  %v12301_v23 = vand.u32 4294901760, %v12300_v12  ;;  %v26914_v33 = vsub.f32 %v12120_v51, %v26899_v20 }
 0x440   : >> { %v26886_v53 = vadd.f32 %v7836_v41, %v26726_v57  ;;  %v8085_v11 = vadd.f32 %v8084_v54, %v7953_v39  ;;  %22895 = vmatpush3.msra.mxu0 %v26713_v3  ;;  %22889 = vmatprep.mubr.f32.mxu1 %v11534_v56  ;;  %v26897_v57 = vsub.f32 %v12117_v2, %v26875_v60  ;;  %v26903_v56 = vand.u32 4294901760, %v12123_v37 }
 0x441   : >> { %v22459_v43 = vpop.f32.mrf.mxu0  ;;  %22874 = vmatmul.mubr.f32.gmra.mxu0 %v26773_v55  ;;  %v8096_v25 = vpop.f32.mrf.mxu1  ;;  %22908 = vmatpush3.msra.mxu1 %v26676_v38  ;;  %v12126_v55 = vsel %vm225_vm0, %v20538_v19, 0  ;;  %v12129_v38 = vsel %vm225_vm0, %v20539_v5, 0  ;;  %v12213_v26 = vand.u32 4294901760, %v26914_v33  ;;  %v26935_v2 = vand.u32 4294901760, %v12132_v24 }
 0x442   : >> { %v8103_v3 = vadd.f32 %v22472_v13, %v22459_v43  ;;  %22876 = vmatprep.mubr.f32.mxu0 %v26781_v59  ;;  %22918 = vmatprep.subr.mxu0 %v26816_v22  ;;  %v12203_v63 = vand.u32 4294901760, %v26897_v57  ;;  %v26916_v40 = vand.u32 4294901760, %v12126_v55  ;;  %v26922_v42 = vand.u32 4294901760, %v12129_v38 }
 0x443   : >> { %v7973_v10 = vpop.f32.mrf.mxu0  ;;  %v22475_v16 = vpop.f32.mrf.mxu1  ;;  %22890 = vmatmul.mubr.f32.gmra.mxu1 %v11544_v29  ;;  %22931 = vmatprep.subr.mxu1 %v12294_v62  ;;  %v26920_v29 = vsub.f32 %v12123_v37, %v26903_v56  ;;  %v12214_v41 = vsub.f32 %v26914_v33, %v12213_v26  ;;  %v26953_v51 = vsub.f32 %v12132_v24, %v26935_v2 }
 0x444   : >> { %22909 = vmatprep.mubr.f32.mxu1 %v26715_v58  ;;  %v26933_v17 = vsub.f32 %v12126_v55, %v26916_v40  ;;  %v26941_v15 = vsub.f32 %v12129_v38, %v26922_v42 }
 0x445   : >> { %v22462_v61 = vpop.f32.mrf.mxu0  ;;  %22877 = vmatmul.mubr.f32.gmra.mxu0 %v26793_v47  ;;  %v8108_v59 = vpop.f32.mrf.mxu1  ;;  %v12215_v25 = vand.u32 4294901760, %v12214_v41 }
 0x446   : >> { %22896 = vmatprep.mubr.f32.mxu0 %v26715_v58  ;;  %v12204_v58 = vsub.f32 %v26897_v57, %v12203_v63 }
 0x447   : >> { %v7993_v27 = vpop.f32.mrf.mxu0  ;;  %v22495_v47 = vpop.f32.mrf.mxu1  ;;  %22910 = vmatmul.mubr.f32.vlgmr.msra.gmra.mxu1 %v26739_v52 }
 0x448   : >> { %v8109_v44 = vadd.f32 %v8108_v59, %v7993_v27  ;;  %22932 = vmatpush3.msra.mxu1 %v12294_v62  ;;  %22912 = vmatprep.mubr.f32.mxu1 %v26743_v48  ;;  %v12205_v54 = vand.u32 4294901760, %v12204_v58  ;;  %v12243_v62 = vand.u32 4294901760, %v26941_v15 }
 0x449   : >> { %v22482_v6 = vpop.f32.mrf.mxu0  ;;  %22897 = vmatmul.mubr.f32.vlgmr.msra.gmra.mxu0 %v26739_v52  ;;  %v8300_v30 = vpop.f32.mrf.mxu1  ;;  %22933 = vmatprep.subr.mxu1 %v12301_v23  ;;  %v12223_v52 = vand.u32 4294901760, %v26920_v29 }
 0x44a   : >> { %v8198_v7 = vadd.f32 %v22482_v6, %v8091_v34  ;;  %22919 = vmatpush3.msra.mxu0 %v26816_v22  ;;  %22899 = vmatprep.mubr.f32.mxu0 %v26743_v48  ;;  %v12233_v34 = vand.u32 4294901760, %v26933_v17  ;;  %v12244_v10 = vsub.f32 %v26941_v15, %v12243_v62  ;;  %v20549_v6 = vld [vmem:[%s28673_s3 + $0xf0] sm:$0xff] }
 0x44b   : >> { %v8190_v46 = vpop.f32.mrf.mxu0  ;;  %v22498_v31 = vpop.f32.mrf.mxu1  ;;  %22913 = vmatmul.mubr.f32.gmra.mxu1 %v26756_v21  ;;  %22920 = vmatprep.subr.mxu0 %v26836_v1 }
 0x44c   : >> { %v8309_v0 = vadd.f32 %v22495_v47, %v8198_v7  ;;  %v8191_v49 = vadd.f32 %v8190_v46, %v8085_v11  ;;  %22921 = vmatpush3.msra.mxu0 %v26836_v1  ;;  %22915 = vmatprep.mubr.f32.mxu1 %v26762_v28  ;;  %v12234_v12 = vsub.f32 %v26933_v17, %v12233_v34 }
 0x44d   : >> { %v22485_v50 = vpop.f32.mrf.mxu0  ;;  %22900 = vmatmul.mubr.f32.gmra.mxu0 %v26756_v21  ;;  %v8316_v48 = vpop.f32.mrf.mxu1  ;;  %22934 = vmatpush3.msra.mxu1 %v12301_v23  ;;  %v12224_v21 = vsub.f32 %v26920_v29, %v12223_v52 }
 0x44e   : >> { %v8301_v39 = vadd.f32 %v8300_v30, %v8191_v49  ;;  %v8212_v13 = vadd.f32 %v22485_v50, %v8103_v3  ;;  %22902 = vmatprep.mubr.f32.mxu0 %v26762_v28  ;;  %22944 = vmatprep.subr.mxu0 %v26831_v32  ;;  %v20550_v28 = vld [vmem:[%s28673_s3 + $0xf8] sm:$0xff]  ;;  %v12253_v3 = vand.u32 4294901760, %v26953_v51  ;;  %v12235_v23 = vand.u32 4294901760, %v12234_v12  ;;  %v20544_v12 = vld [vmem:[%s24836_s8 + $0x50] sm:$0xff] }
 0x44f   : >> { %v8204_v37 = vpop.f32.mrf.mxu0  ;;  %v22501_v19 = vpop.f32.mrf.mxu1  ;;  %22916 = vmatmul.mubr.f32.gmra.mxu1 %v26775_v36  ;;  %22957 = vmatprep.subr.mxu1 %v26816_v22  ;;  %v12225_v55 = vand.u32 4294901760, %v12224_v21  ;;  %v26976_v8 = vand.u32 4294901760, %v20550_v28  ;;  %v26996_v50 = vand.u32 4294901760, %v20549_v6  ;;  %v20543_v21 = vld [vmem:[%s24836_s8 + $0x48] sm:$0xff] }
 0x450   : >> { %v8325_v11 = vadd.f32 %v22498_v31, %v8212_v13  ;;  %22935 = vmatprep.mubr.f32.mxu1 %v26875_v60  ;;  %v12254_v24 = vsub.f32 %v26953_v51, %v12253_v3 }
 0x451   : >> { %v22488_v5 = vpop.f32.mrf.mxu0  ;;  %22903 = vmatmul.mubr.f32.gmra.mxu0 %v26775_v36  ;;  %v8332_v43 = vpop.f32.mrf.mxu1  ;;  %v26991_v7 = vsub.f32 %v20550_v28, %v26976_v8  ;;  %v27014_v28 = vsub.f32 %v20549_v6, %v26996_v50 }
 0x452   : >> { %22922 = vmatprep.mubr.f32.mxu0 %v12205_v54  ;;  %v12255_v49 = vand.u32 4294901760, %v12254_v24 }
 0x453   : >> { %v8218_v16 = vpop.f32.mrf.mxu0  ;;  %v22521_v38 = vpop.f32.mrf.mxu1  ;;  %22936 = vmatmul.mubr.f32.vlgmr.msra.gmra.mxu1 %v26899_v20  ;;  %v27005_v13 = vand.u32 4294901760, %v26991_v7 }
 0x454   : >> { %v8219_v36 = vadd.f32 %v8218_v16, %v8109_v44  ;;  %22958 = vmatpush3.msra.mxu1 %v26816_v22  ;;  %22938 = vmatprep.mubr.f32.mxu1 %v26903_v56  ;;  %v12245_v44 = vand.u32 4294901760, %v12244_v10 }
 0x455   : >> { %v22508_v61 = vpop.f32.mrf.mxu0  ;;  %22923 = vmatmul.mubr.f32.vlgmr.msra.gmra.mxu0 %v12215_v25  ;;  %v8520_v59 = vpop.f32.mrf.mxu1  ;;  %22959 = vmatprep.subr.mxu1 %v26836_v1 }
 0x456   : >> { %v8333_v27 = vadd.f32 %v8332_v43, %v8219_v36  ;;  %v8424_v47 = vadd.f32 %v22508_v61, %v8309_v0  ;;  %22945 = vmatpush3.msra.mxu0 %v26831_v32  ;;  %22925 = vmatprep.mubr.f32.mxu0 %v12225_v55  ;;  %v12826_v43 = vsel %vm225_vm0, %v20543_v21, 0 }
 0x457   : >> { %v8417_v30 = vpop.f32.mrf.mxu0  ;;  %v22524_v58 = vpop.f32.mrf.mxu1  ;;  %22939 = vmatmul.mubr.f32.gmra.mxu1 %v26916_v40  ;;  %22946 = vmatprep.subr.mxu0 %v26854_v35  ;;  %v27035_v16 = vand.u32 4294901760, %v12826_v43 }
 0x458   : >> { %v8527_v46 = vadd.f32 %v22521_v38, %v8424_v47  ;;  %v8418_v31 = vadd.f32 %v8417_v30, %v8301_v39  ;;  %22947 = vmatpush3.msra.mxu0 %v26854_v35  ;;  %22941 = vmatprep.mubr.f32.mxu1 %v26922_v42 }
 0x459   : >> { %v22511_v32 = vpop.f32.mrf.mxu0  ;;  %22926 = vmatmul.mubr.f32.gmra.mxu0 %v12235_v23  ;;  %v8532_v0 = vpop.f32.mrf.mxu1  ;;  %22960 = vmatpush3.msra.mxu1 %v26836_v1  ;;  %v20546_v23 = vld [vmem:[%s24836_s8 + $0x60] sm:$0xff] }
 0x45a   : >> { %v26999_v48 = vadd.f32 %v8527_v46, %v26839_v4  ;;  %v8521_v54 = vadd.f32 %v8520_v59, %v8418_v31  ;;  %v8436_v41 = vadd.f32 %v22511_v32, %v8325_v11  ;;  %22928 = vmatprep.mubr.f32.mxu0 %v12245_v44  ;;  %22970 = vmatprep.subr.mxu0 %v26845_v18 }
 0x45b   : >> { %v8429_v35 = vpop.f32.mrf.mxu0  ;;  %v22527_v39 = vpop.f32.mrf.mxu1  ;;  %22942 = vmatmul.mubr.f32.gmra.mxu1 %v26935_v2  ;;  %22983 = vmatprep.subr.mxu1 %v26816_v22 }
 0x45c   : >> { %v27009_v37 = vadd.f32 %v8521_v54, %v26849_v9  ;;  %v8539_v4 = vadd.f32 %v22524_v58, %v8436_v41  ;;  %22961 = vmatprep.mubr.f32.mxu1 %v12203_v63  ;;  %v13002_v63 = vsub.f32 %v26991_v7, %v27005_v13  ;;  %v20548_v58 = vld [vmem:[%s24836_s8 + $0x70] sm:$0xff] }
 0x45d   : >> { %v22514_v19 = vpop.f32.mrf.mxu0  ;;  %22929 = vmatmul.mubr.f32.gmra.mxu0 %v12255_v49  ;;  %v8544_v11 = vpop.f32.mrf.mxu1  ;;  %v12841_v41 = vsel %vm225_vm0, %v20548_v58, 0 }
 0x45e   : >> { %v27017_v5 = vadd.f32 %v8539_v4, %v26857_v14  ;;  %22948 = vmatprep.mubr.f32.mxu0 %v26897_v57  ;;  %v20545_v14 = vld [vmem:[%s24836_s8 + $0x58] sm:$0xff]  ;;  %v13003_v61 = vand.u32 4294901760, %v13002_v63 }
 0x45f   : >> { %v8441_v9 = vpop.f32.mrf.mxu0  ;;  %v22547_v25 = vpop.f32.mrf.mxu1  ;;  %22962 = vmatmul.mubr.f32.vlgmr.msra.gmra.mxu1 %v12213_v26  ;;  %v27033_v26 = vand.u32 4294901760, %v27014_v28  ;;  %v12832_v59 = vsel %vm225_vm0, %v20545_v14, 0 }
 0x460   : >> { %v8442_v55 = vadd.f32 %v8441_v9, %v8333_v27  ;;  %22984 = vmatpush3.msra.mxu1 %v26816_v22  ;;  %22964 = vmatprep.mubr.f32.mxu1 %v12223_v52  ;;  %v12829_v22 = vsel %vm225_vm0, %v20544_v12, 0 }
 0x461   : >> { %v22534_v10 = vpop.f32.mrf.mxu0  ;;  %22949 = vmatmul.mubr.f32.vlgmr.msra.gmra.mxu0 %v26914_v33  ;;  %v8793_v57 = vpop.f32.mrf.mxu1  ;;  %22985 = vmatprep.subr.mxu1 %v26836_v1  ;;  %v13009_v47 = vsub.f32 %v27014_v28, %v27033_v26  ;;  %v27059_v44 = vand.u32 4294901760, %v12829_v22 }
 0x462   : >> { %v8545_v38 = vadd.f32 %v8544_v11, %v8442_v55  ;;  %v8800_v36 = vadd.f32 %v22547_v25, %v22534_v10  ;;  %22971 = vmatpush3.msra.mxu0 %v26845_v18  ;;  %22951 = vmatprep.mubr.f32.mxu0 %v26920_v29  ;;  %v20547_v18 = vld [vmem:[%s24836_s8 + $0x68] sm:$0xff] }
 0x463   : >> { %v8662_v52 = vpop.f32.mrf.mxu0  ;;  %v22550_v33 = vpop.f32.mrf.mxu1  ;;  %22965 = vmatmul.mubr.f32.gmra.mxu1 %v12233_v34  ;;  %22972 = vmatprep.subr.mxu0 %v26873_v45  ;;  %v13010_v31 = vand.u32 4294901760, %v13009_v47  ;;  %v27074_v0 = vsub.f32 %v12829_v22, %v27059_v44 }
 0x464   : >> { %v27046_v24 = vadd.f32 %v8545_v38, %v26886_v53  ;;  %v8794_v27 = vadd.f32 %v8793_v57, %v8662_v52  ;;  %22973 = vmatpush3.msra.mxu0 %v26873_v45  ;;  %22967 = vmatprep.mubr.f32.mxu1 %v12243_v62  ;;  %v27057_v53 = vsub.f32 %v12826_v43, %v27035_v16  ;;  %v27063_v62 = vand.u32 4294901760, %v12832_v59 }
 0x465   : >> { %v22537_v29 = vpop.f32.mrf.mxu0  ;;  %22952 = vmatmul.mubr.f32.gmra.mxu0 %v26933_v17  ;;  %v8805_v34 = vpop.f32.mrf.mxu1  ;;  %22986 = vmatpush3.msra.mxu1 %v26836_v1  ;;  %v12835_v17 = vsel %vm225_vm0, %v20546_v23, 0  ;;  %v12838_v1 = vsel %vm225_vm0, %v20547_v18, 0  ;;  %v12922_v19 = vand.u32 4294901760, %v27074_v0  ;;  %v27095_v43 = vand.u32 4294901760, %v12841_v41 }
 0x466   : >> { %v8812_v45 = vadd.f32 %v22550_v33, %v22537_v29  ;;  %22954 = vmatprep.mubr.f32.mxu0 %v26941_v15  ;;  %22996 = vmatprep.subr.mxu0 %v26976_v8  ;;  %v12912_v32 = vand.u32 4294901760, %v27057_v53  ;;  %v27076_v49 = vand.u32 4294901760, %v12835_v17  ;;  %v27082_v54 = vand.u32 4294901760, %v12838_v1 }
 0x467   : >> { %v8682_v6 = vpop.f32.mrf.mxu0  ;;  %v22553_v30 = vpop.f32.mrf.mxu1  ;;  %22968 = vmatmul.mubr.f32.gmra.mxu1 %v12253_v3  ;;  %23009 = vmatprep.subr.mxu1 %v13003_v61  ;;  %v27080_v3 = vsub.f32 %v12832_v59, %v27063_v62  ;;  %v12923_v38 = vsub.f32 %v27074_v0, %v12922_v19  ;;  %v27113_v22 = vsub.f32 %v12841_v41, %v27095_v43 }
 0x468   : >> { %22987 = vmatprep.mubr.f32.mxu1 %v26875_v60  ;;  %v27093_v11 = vsub.f32 %v12835_v17, %v27076_v49  ;;  %v27101_v25 = vsub.f32 %v12838_v1, %v27082_v54 }
 0x469   : >> { %v22540_v46 = vpop.f32.mrf.mxu0  ;;  %22955 = vmatmul.mubr.f32.gmra.mxu0 %v26953_v51  ;;  %v8817_v15 = vpop.f32.mrf.mxu1  ;;  %v12924_v34 = vand.u32 4294901760, %v12923_v38 }
 0x46a   : >> { %22974 = vmatprep.mubr.f32.mxu0 %v26875_v60  ;;  %v12913_v60 = vsub.f32 %v27057_v53, %v12912_v32 }
 0x46b   : >> { %v8702_v35 = vpop.f32.mrf.mxu0  ;;  %v22573_v51 = vpop.f32.mrf.mxu1  ;;  %22988 = vmatmul.mubr.f32.vlgmr.msra.gmra.mxu1 %v26899_v20 }
 0x46c   : >> { %v8818_v39 = vadd.f32 %v8817_v15, %v8702_v35  ;;  %23010 = vmatpush3.msra.mxu1 %v13003_v61  ;;  %22990 = vmatprep.mubr.f32.mxu1 %v26903_v56  ;;  %v12914_v57 = vand.u32 4294901760, %v12913_v60  ;;  %v12952_v61 = vand.u32 4294901760, %v27101_v25 }
 0x46d   : >> { %v22560_v21 = vpop.f32.mrf.mxu0  ;;  %22975 = vmatmul.mubr.f32.vlgmr.msra.gmra.mxu0 %v26899_v20  ;;  %v9009_v4 = vpop.f32.mrf.mxu1  ;;  %23011 = vmatprep.subr.mxu1 %v13010_v31  ;;  %v12932_v20 = vand.u32 4294901760, %v27080_v3 }
 0x46e   : >> { %v8907_v9 = vadd.f32 %v22560_v21, %v8800_v36  ;;  %22997 = vmatpush3.msra.mxu0 %v26976_v8  ;;  %22977 = vmatprep.mubr.f32.mxu0 %v26903_v56  ;;  %v12942_v36 = vand.u32 4294901760, %v27093_v11  ;;  %v12953_v6 = vsub.f32 %v27101_v25, %v12952_v61  ;;  %v20557_v21 = vld [vmem:[%s28673_s3 + $0x100] sm:$0xff] }
 0x46f   : >> { %v8899_v63 = vpop.f32.mrf.mxu0  ;;  %v22576_v12 = vpop.f32.mrf.mxu1  ;;  %22991 = vmatmul.mubr.f32.gmra.mxu1 %v26916_v40  ;;  %22998 = vmatprep.subr.mxu0 %v26996_v50 }
 0x470   : >> { %v9018_v55 = vadd.f32 %v22573_v51, %v8907_v9  ;;  %v8900_v14 = vadd.f32 %v8899_v63, %v8794_v27  ;;  %22999 = vmatpush3.msra.mxu0 %v26996_v50  ;;  %22993 = vmatprep.mubr.f32.mxu1 %v26922_v42  ;;  %v12943_v47 = vsub.f32 %v27093_v11, %v12942_v36 }
 0x471   : >> { %v22563_v10 = vpop.f32.mrf.mxu0  ;;  %22978 = vmatmul.mubr.f32.gmra.mxu0 %v26916_v40  ;;  %v9025_v56 = vpop.f32.mrf.mxu1  ;;  %23012 = vmatpush3.msra.mxu1 %v13010_v31  ;;  %v12933_v40 = vsub.f32 %v27080_v3, %v12932_v20 }
 0x472   : >> { %v9010_v52 = vadd.f32 %v9009_v4, %v8900_v14  ;;  %v8921_v33 = vadd.f32 %v22563_v10, %v8812_v45  ;;  %22980 = vmatprep.mubr.f32.mxu0 %v26922_v42  ;;  %23022 = vmatprep.subr.mxu0 %v26991_v7  ;;  %v20558_v42 = vld [vmem:[%s28673_s3 + $0x108] sm:$0xff]  ;;  %v12962_v45 = vand.u32 4294901760, %v27113_v22  ;;  %v12944_v31 = vand.u32 4294901760, %v12943_v47  ;;  %v20552_v47 = vld [vmem:[%s24836_s8 + $0x51] sm:$0xff] }
 0x473   : >> { %v8913_v59 = vpop.f32.mrf.mxu0  ;;  %v22579_v23 = vpop.f32.mrf.mxu1  ;;  %22994 = vmatmul.mubr.f32.gmra.mxu1 %v26935_v2  ;;  %23035 = vmatprep.subr.mxu1 %v26976_v8  ;;  %v12934_v17 = vand.u32 4294901760, %v12933_v40  ;;  %v27136_v58 = vand.u32 4294901760, %v20558_v42  ;;  %v27156_v10 = vand.u32 4294901760, %v20557_v21  ;;  %v20551_v40 = vld [vmem:[%s24836_s8 + $0x49] sm:$0xff] }
 0x474   : >> { %v9034_v27 = vadd.f32 %v22576_v12, %v8921_v33  ;;  %23013 = vmatprep.mubr.f32.mxu1 %v27035_v16  ;;  %v12963_v41 = vsub.f32 %v27113_v22, %v12962_v45 }
 0x475   : >> { %v22566_v18 = vpop.f32.mrf.mxu0  ;;  %22981 = vmatmul.mubr.f32.gmra.mxu0 %v26935_v2  ;;  %v9041_v29 = vpop.f32.mrf.mxu1  ;;  %v27151_v9 = vsub.f32 %v20558_v42, %v27136_v58  ;;  %v27174_v42 = vsub.f32 %v20557_v21, %v27156_v10 }
 0x476   : >> { %23000 = vmatprep.mubr.f32.mxu0 %v12914_v57  ;;  %v12964_v14 = vand.u32 4294901760, %v12963_v41 }
 0x477   : >> { %v8927_v30 = vpop.f32.mrf.mxu0  ;;  %v22599_v1 = vpop.f32.mrf.mxu1  ;;  %23014 = vmatmul.mubr.f32.vlgmr.msra.gmra.mxu1 %v27059_v44  ;;  %v27165_v33 = vand.u32 4294901760, %v27151_v9 }
 0x478   : >> { %v8928_v2 = vadd.f32 %v8927_v30, %v8818_v39  ;;  %23036 = vmatpush3.msra.mxu1 %v26976_v8  ;;  %23016 = vmatprep.mubr.f32.mxu1 %v27063_v62  ;;  %v12954_v39 = vand.u32 4294901760, %v12953_v6 }
 0x479   : >> { %v22586_v46 = vpop.f32.mrf.mxu0  ;;  %23001 = vmatmul.mubr.f32.vlgmr.msra.gmra.mxu0 %v12924_v34  ;;  %v9229_v15 = vpop.f32.mrf.mxu1  ;;  %23037 = vmatprep.subr.mxu1 %v26996_v50 }
 0x47a   : >> { %v9042_v35 = vadd.f32 %v9041_v29, %v8928_v2  ;;  %v9133_v51 = vadd.f32 %v22586_v46, %v9018_v55  ;;  %23023 = vmatpush3.msra.mxu0 %v26991_v7  ;;  %23003 = vmatprep.mubr.f32.mxu0 %v12934_v17  ;;  %v13535_v29 = vsel %vm225_vm0, %v20551_v40, 0 }
 0x47b   : >> { %v9126_v4 = vpop.f32.mrf.mxu0  ;;  %v22602_v60 = vpop.f32.mrf.mxu1  ;;  %23017 = vmatmul.mubr.f32.gmra.mxu1 %v27076_v49  ;;  %23024 = vmatprep.subr.mxu0 %v27014_v28  ;;  %v27195_v30 = vand.u32 4294901760, %v13535_v29 }
 0x47c   : >> { %v9236_v63 = vadd.f32 %v22599_v1, %v9133_v51  ;;  %v9127_v12 = vadd.f32 %v9126_v4, %v9010_v52  ;;  %23025 = vmatpush3.msra.mxu0 %v27014_v28  ;;  %23019 = vmatprep.mubr.f32.mxu1 %v27082_v54 }
 0x47d   : >> { %v22589_v7 = vpop.f32.mrf.mxu0  ;;  %23004 = vmatmul.mubr.f32.gmra.mxu0 %v12944_v31  ;;  %v9241_v55 = vpop.f32.mrf.mxu1  ;;  %23038 = vmatpush3.msra.mxu1 %v26996_v50  ;;  %v20554_v31 = vld [vmem:[%s24836_s8 + $0x61] sm:$0xff] }
 0x47e   : >> { %v27159_v56 = vadd.f32 %v9236_v63, %v26999_v48  ;;  %v9230_v57 = vadd.f32 %v9229_v15, %v9127_v12  ;;  %v9145_v38 = vadd.f32 %v22589_v7, %v9034_v27  ;;  %23006 = vmatprep.mubr.f32.mxu0 %v12954_v39  ;;  %23048 = vmatprep.subr.mxu0 %v27005_v13 }
 0x47f   : >> { %v9138_v28 = vpop.f32.mrf.mxu0  ;;  %v22605_v52 = vpop.f32.mrf.mxu1  ;;  %23020 = vmatmul.mubr.f32.gmra.mxu1 %v27095_v43  ;;  %23061 = vmatprep.subr.mxu1 %v26976_v8 }
 0x480   : >> { %v27169_v59 = vadd.f32 %v9230_v57, %v27009_v37  ;;  %v9248_v48 = vadd.f32 %v22602_v60, %v9145_v38  ;;  %23039 = vmatprep.mubr.f32.mxu1 %v12912_v32  ;;  %v13711_v32 = vsub.f32 %v27151_v9, %v27165_v33  ;;  %v20556_v60 = vld [vmem:[%s24836_s8 + $0x71] sm:$0xff] }
 0x481   : >> { %v22592_v23 = vpop.f32.mrf.mxu0  ;;  %23007 = vmatmul.mubr.f32.gmra.mxu0 %v12964_v14  ;;  %v9253_v27 = vpop.f32.mrf.mxu1  ;;  %v13550_v38 = vsel %vm225_vm0, %v20556_v60, 0 }
 0x482   : >> { %v27177_v18 = vadd.f32 %v9248_v48, %v27017_v5  ;;  %23026 = vmatprep.mubr.f32.mxu0 %v27057_v53  ;;  %v20553_v5 = vld [vmem:[%s24836_s8 + $0x59] sm:$0xff]  ;;  %v13712_v46 = vand.u32 4294901760, %v13711_v32 }
 0x483   : >> { %v9150_v37 = vpop.f32.mrf.mxu0  ;;  %v22625_v34 = vpop.f32.mrf.mxu1  ;;  %23040 = vmatmul.mubr.f32.vlgmr.msra.gmra.mxu1 %v12922_v19  ;;  %v27193_v19 = vand.u32 4294901760, %v27174_v42  ;;  %v13541_v15 = vsel %vm225_vm0, %v20553_v5, 0 }
 0x484   : >> { %v9151_v17 = vadd.f32 %v9150_v37, %v9042_v35  ;;  %23062 = vmatpush3.msra.mxu1 %v26976_v8  ;;  %23042 = vmatprep.mubr.f32.mxu1 %v12932_v20  ;;  %v13538_v8 = vsel %vm225_vm0, %v20552_v47, 0 }
 0x485   : >> { %v22612_v6 = vpop.f32.mrf.mxu0  ;;  %23027 = vmatmul.mubr.f32.vlgmr.msra.gmra.mxu0 %v27074_v0  ;;  %v9502_v53 = vpop.f32.mrf.mxu1  ;;  %23063 = vmatprep.subr.mxu1 %v26996_v50  ;;  %v13718_v51 = vsub.f32 %v27174_v42, %v27193_v19  ;;  %v27219_v39 = vand.u32 4294901760, %v13538_v8 }
 0x486   : >> { %v9254_v1 = vadd.f32 %v9253_v27, %v9151_v17  ;;  %v9509_v2 = vadd.f32 %v22625_v34, %v22612_v6  ;;  %23049 = vmatpush3.msra.mxu0 %v27005_v13  ;;  %23029 = vmatprep.mubr.f32.mxu0 %v27080_v3  ;;  %v20555_v13 = vld [vmem:[%s24836_s8 + $0x69] sm:$0xff] }
 0x487   : >> { %v9371_v20 = vpop.f32.mrf.mxu0  ;;  %v22628_v0 = vpop.f32.mrf.mxu1  ;;  %23043 = vmatmul.mubr.f32.gmra.mxu1 %v12942_v36  ;;  %23050 = vmatprep.subr.mxu0 %v27033_v26  ;;  %v13719_v12 = vand.u32 4294901760, %v13718_v51  ;;  %v27234_v55 = vsub.f32 %v13538_v8, %v27219_v39 }
 0x488   : >> { %v27206_v41 = vadd.f32 %v9254_v1, %v27046_v24  ;;  %v9503_v35 = vadd.f32 %v9502_v53, %v9371_v20  ;;  %23051 = vmatpush3.msra.mxu0 %v27033_v26  ;;  %23045 = vmatprep.mubr.f32.mxu1 %v12952_v61  ;;  %v27217_v24 = vsub.f32 %v13535_v29, %v27195_v30  ;;  %v27223_v61 = vand.u32 4294901760, %v13541_v15 }
 0x489   : >> { %v22615_v3 = vpop.f32.mrf.mxu0  ;;  %23030 = vmatmul.mubr.f32.gmra.mxu0 %v27093_v11  ;;  %v9514_v36 = vpop.f32.mrf.mxu1  ;;  %23064 = vmatpush3.msra.mxu1 %v26996_v50  ;;  %v13544_v11 = vsel %vm225_vm0, %v20554_v31, 0  ;;  %v13547_v50 = vsel %vm225_vm0, %v20555_v13, 0  ;;  %v13631_v23 = vand.u32 4294901760, %v27234_v55  ;;  %v27255_v29 = vand.u32 4294901760, %v13550_v38 }
 0x48a   : >> { %v9521_v26 = vadd.f32 %v22628_v0, %v22615_v3  ;;  %23032 = vmatprep.mubr.f32.mxu0 %v27101_v25  ;;  %23074 = vmatprep.subr.mxu0 %v27136_v58  ;;  %v13621_v7 = vand.u32 4294901760, %v27217_v24  ;;  %v27236_v14 = vand.u32 4294901760, %v13544_v11  ;;  %v27242_v57 = vand.u32 4294901760, %v13547_v50 }
 0x48b   : >> { %v9391_v21 = vpop.f32.mrf.mxu0  ;;  %v22631_v4 = vpop.f32.mrf.mxu1  ;;  %23046 = vmatmul.mubr.f32.gmra.mxu1 %v12962_v45  ;;  %23087 = vmatprep.subr.mxu1 %v13712_v46  ;;  %v27240_v45 = vsub.f32 %v13541_v15, %v27223_v61  ;;  %v13632_v1 = vsub.f32 %v27234_v55, %v13631_v23  ;;  %v27273_v8 = vsub.f32 %v13550_v38, %v27255_v29 }
 0x48c   : >> { %23065 = vmatprep.mubr.f32.mxu1 %v27035_v16  ;;  %v27253_v27 = vsub.f32 %v13544_v11, %v27236_v14  ;;  %v27261_v34 = vsub.f32 %v13547_v50, %v27242_v57 }
 0x48d   : >> { %v22618_v63 = vpop.f32.mrf.mxu0  ;;  %23033 = vmatmul.mubr.f32.gmra.mxu0 %v27113_v22  ;;  %v9526_v25 = vpop.f32.mrf.mxu1  ;;  %v13633_v36 = vand.u32 4294901760, %v13632_v1 }
 0x48e   : >> { %23052 = vmatprep.mubr.f32.mxu0 %v27035_v16  ;;  %v13622_v16 = vsub.f32 %v27217_v24, %v13621_v7 }
 0x48f   : >> { %v9411_v28 = vpop.f32.mrf.mxu0  ;;  %v22651_v22 = vpop.f32.mrf.mxu1  ;;  %23066 = vmatmul.mubr.f32.vlgmr.msra.gmra.mxu1 %v27059_v44 }
 0x490   : >> { %v9527_v52 = vadd.f32 %v9526_v25, %v9411_v28  ;;  %23088 = vmatpush3.msra.mxu1 %v13712_v46  ;;  %23068 = vmatprep.mubr.f32.mxu1 %v27063_v62  ;;  %v13623_v53 = vand.u32 4294901760, %v13622_v16  ;;  %v13661_v46 = vand.u32 4294901760, %v27261_v34 }
 0x491   : >> { %v22638_v40 = vpop.f32.mrf.mxu0  ;;  %23053 = vmatmul.mubr.f32.vlgmr.msra.gmra.mxu0 %v27059_v44  ;;  %v9718_v48 = vpop.f32.mrf.mxu1  ;;  %23089 = vmatprep.subr.mxu1 %v13719_v12  ;;  %v13641_v44 = vand.u32 4294901760, %v27240_v45 }
 0x492   : >> { %v9616_v37 = vadd.f32 %v22638_v40, %v9509_v2  ;;  %23075 = vmatpush3.msra.mxu0 %v27136_v58  ;;  %23055 = vmatprep.mubr.f32.mxu0 %v27063_v62  ;;  %v13651_v2 = vand.u32 4294901760, %v27253_v27  ;;  %v13662_v21 = vsub.f32 %v27261_v34, %v13661_v46  ;;  %v20565_v40 = vld [vmem:[%s28673_s3 + $0x110] sm:$0xff] }
 0x493   : >> { %v9608_v32 = vpop.f32.mrf.mxu0  ;;  %v22654_v47 = vpop.f32.mrf.mxu1  ;;  %23069 = vmatmul.mubr.f32.gmra.mxu1 %v27076_v49  ;;  %23076 = vmatprep.subr.mxu0 %v27156_v10 }
 0x494   : >> { %v9727_v17 = vadd.f32 %v22651_v22, %v9616_v37  ;;  %v9609_v5 = vadd.f32 %v9608_v32, %v9503_v35  ;;  %23077 = vmatpush3.msra.mxu0 %v27156_v10  ;;  %23071 = vmatprep.mubr.f32.mxu1 %v27082_v54  ;;  %v13652_v51 = vsub.f32 %v27253_v27, %v13651_v2 }
 0x495   : >> { %v22641_v6 = vpop.f32.mrf.mxu0  ;;  %23056 = vmatmul.mubr.f32.gmra.mxu0 %v27076_v49  ;;  %v9734_v62 = vpop.f32.mrf.mxu1  ;;  %23090 = vmatpush3.msra.mxu1 %v13719_v12  ;;  %v13642_v49 = vsub.f32 %v27240_v45, %v13641_v44 }
 0x496   : >> { %v9719_v20 = vadd.f32 %v9718_v48, %v9609_v5  ;;  %v9630_v0 = vadd.f32 %v22641_v6, %v9521_v26  ;;  %23058 = vmatprep.mubr.f32.mxu0 %v27082_v54  ;;  %23100 = vmatprep.subr.mxu0 %v27151_v9  ;;  %v20566_v54 = vld [vmem:[%s28673_s3 + $0x118] sm:$0xff]  ;;  %v13671_v26 = vand.u32 4294901760, %v27273_v8  ;;  %v13653_v12 = vand.u32 4294901760, %v13652_v51 }
 0x497   : >> { %v9622_v15 = vpop.f32.mrf.mxu0  ;;  %v22657_v31 = vpop.f32.mrf.mxu1  ;;  %23072 = vmatmul.mubr.f32.gmra.mxu1 %v27095_v43  ;;  %23113 = vmatprep.subr.mxu1 %v27136_v58  ;;  %v13643_v11 = vand.u32 4294901760, %v13642_v49  ;;  %v27296_v60 = vand.u32 4294901760, %v20566_v54  ;;  %v27316_v6 = vand.u32 4294901760, %v20565_v40  ;;  %v20559_v49 = vld [vmem:[%s24836_s8 + $0x4a] sm:$0xff]  ;;  %v20560_v51 = vld [vmem:[%s24836_s8 + $0x52] sm:$0xff] }
 0x498   : >> { %v9743_v35 = vadd.f32 %v22654_v47, %v9630_v0  ;;  %23091 = vmatprep.mubr.f32.mxu1 %v27195_v30  ;;  %v13672_v38 = vsub.f32 %v27273_v8, %v13671_v26 }
 0x499   : >> { %v22644_v13 = vpop.f32.mrf.mxu0  ;;  %23059 = vmatmul.mubr.f32.gmra.mxu0 %v27095_v43  ;;  %v9750_v3 = vpop.f32.mrf.mxu1  ;;  %v27311_v37 = vsub.f32 %v20566_v54, %v27296_v60  ;;  %v27334_v54 = vsub.f32 %v20565_v40, %v27316_v6 }
 0x49a   : >> { %23078 = vmatprep.mubr.f32.mxu0 %v13623_v53  ;;  %v13673_v5 = vand.u32 4294901760, %v13672_v38 }
 0x49b   : >> { %v9636_v4 = vpop.f32.mrf.mxu0  ;;  %v22677_v50 = vpop.f32.mrf.mxu1  ;;  %23092 = vmatmul.mubr.f32.vlgmr.msra.gmra.mxu1 %v27219_v39  ;;  %v27325_v0 = vand.u32 4294901760, %v27311_v37 }
 0x49c   : >> { %v9637_v43 = vadd.f32 %v9636_v4, %v9527_v52  ;;  %23114 = vmatpush3.msra.mxu1 %v27136_v58  ;;  %23094 = vmatprep.mubr.f32.mxu1 %v27223_v61  ;;  %v13663_v52 = vand.u32 4294901760, %v13662_v21 }
 0x49d   : >> { %v22664_v63 = vpop.f32.mrf.mxu0  ;;  %23079 = vmatmul.mubr.f32.vlgmr.msra.gmra.mxu0 %v13633_v36  ;;  %v9938_v25 = vpop.f32.mrf.mxu1  ;;  %23115 = vmatprep.subr.mxu1 %v27156_v10 }
 0x49e   : >> { %v9751_v28 = vadd.f32 %v9750_v3, %v9637_v43  ;;  %v9842_v22 = vadd.f32 %v22664_v63, %v9727_v17  ;;  %23101 = vmatpush3.msra.mxu0 %v27151_v9  ;;  %23081 = vmatprep.mubr.f32.mxu0 %v13643_v11  ;;  %v14244_v3 = vsel %vm225_vm0, %v20559_v49, 0 }
 0x49f   : >> { %v9835_v48 = vpop.f32.mrf.mxu0  ;;  %v22680_v16 = vpop.f32.mrf.mxu1  ;;  %23095 = vmatmul.mubr.f32.gmra.mxu1 %v27236_v14  ;;  %23102 = vmatprep.subr.mxu0 %v27174_v42  ;;  %v27355_v4 = vand.u32 4294901760, %v14244_v3 }
 0x4a0   : >> { %v9945_v32 = vadd.f32 %v22677_v50, %v9842_v22  ;;  %v9836_v47 = vadd.f32 %v9835_v48, %v9719_v20  ;;  %23103 = vmatpush3.msra.mxu0 %v27174_v42  ;;  %23097 = vmatprep.mubr.f32.mxu1 %v27242_v57 }
 0x4a1   : >> { %v22667_v9 = vpop.f32.mrf.mxu0  ;;  %23082 = vmatmul.mubr.f32.gmra.mxu0 %v13653_v12  ;;  %v9950_v17 = vpop.f32.mrf.mxu1  ;;  %23116 = vmatpush3.msra.mxu1 %v27156_v10  ;;  %v20562_v12 = vld [vmem:[%s24836_s8 + $0x62] sm:$0xff] }
 0x4a2   : >> { %v27319_v62 = vadd.f32 %v9945_v32, %v27159_v56  ;;  %v9939_v53 = vadd.f32 %v9938_v25, %v9836_v47  ;;  %v9854_v1 = vadd.f32 %v22667_v9, %v9743_v35  ;;  %23084 = vmatprep.mubr.f32.mxu0 %v13663_v52  ;;  %23126 = vmatprep.subr.mxu0 %v27165_v33 }
 0x4a3   : >> { %v9847_v42 = vpop.f32.mrf.mxu0  ;;  %v22683_v20 = vpop.f32.mrf.mxu1  ;;  %23098 = vmatmul.mubr.f32.gmra.mxu1 %v27255_v29  ;;  %23139 = vmatprep.subr.mxu1 %v27136_v58 }
 0x4a4   : >> { %v27329_v15 = vadd.f32 %v9939_v53, %v27169_v59  ;;  %v9957_v56 = vadd.f32 %v22680_v16, %v9854_v1  ;;  %23117 = vmatprep.mubr.f32.mxu1 %v13621_v7  ;;  %v14420_v7 = vsub.f32 %v27311_v37, %v27325_v0  ;;  %v20564_v16 = vld [vmem:[%s24836_s8 + $0x72] sm:$0xff] }
 0x4a5   : >> { %v22670_v31 = vpop.f32.mrf.mxu0  ;;  %23085 = vmatmul.mubr.f32.gmra.mxu0 %v13673_v5  ;;  %v9962_v35 = vpop.f32.mrf.mxu1  ;;  %v14259_v1 = vsel %vm225_vm0, %v20564_v16, 0 }
 0x4a6   : >> { %v27337_v13 = vadd.f32 %v9957_v56, %v27177_v18  ;;  %23104 = vmatprep.mubr.f32.mxu0 %v27217_v24  ;;  %v20561_v18 = vld [vmem:[%s24836_s8 + $0x5a] sm:$0xff]  ;;  %v14421_v63 = vand.u32 4294901760, %v14420_v7 }
 0x4a7   : >> { %v9859_v59 = vpop.f32.mrf.mxu0  ;;  %v22703_v36 = vpop.f32.mrf.mxu1  ;;  %23118 = vmatmul.mubr.f32.vlgmr.msra.gmra.mxu1 %v13631_v23  ;;  %v27353_v23 = vand.u32 4294901760, %v27334_v54  ;;  %v14250_v25 = vsel %vm225_vm0, %v20561_v18, 0 }
 0x4a8   : >> { %v9860_v11 = vadd.f32 %v9859_v59, %v9751_v28  ;;  %23140 = vmatpush3.msra.mxu1 %v27136_v58  ;;  %23120 = vmatprep.mubr.f32.mxu1 %v13641_v44  ;;  %v14247_v58 = vsel %vm225_vm0, %v20560_v51, 0 }
 0x4a9   : >> { %v22690_v21 = vpop.f32.mrf.mxu0  ;;  %23105 = vmatmul.mubr.f32.vlgmr.msra.gmra.mxu0 %v27234_v55  ;;  %v10211_v24 = vpop.f32.mrf.mxu1  ;;  %23141 = vmatprep.subr.mxu1 %v27156_v10  ;;  %v14427_v22 = vsub.f32 %v27334_v54, %v27353_v23  ;;  %v27379_v52 = vand.u32 4294901760, %v14247_v58 }
 0x4aa   : >> { %v9963_v50 = vadd.f32 %v9962_v35, %v9860_v11  ;;  %v10218_v43 = vadd.f32 %v22703_v36, %v22690_v21  ;;  %23127 = vmatpush3.msra.mxu0 %v27165_v33  ;;  %23107 = vmatprep.mubr.f32.mxu0 %v27240_v45  ;;  %v20563_v33 = vld [vmem:[%s24836_s8 + $0x6a] sm:$0xff] }
 0x4ab   : >> { %v10080_v44 = vpop.f32.mrf.mxu0  ;;  %v22706_v55 = vpop.f32.mrf.mxu1  ;;  %23121 = vmatmul.mubr.f32.gmra.mxu1 %v13651_v2  ;;  %23128 = vmatprep.subr.mxu0 %v27193_v19  ;;  %v14428_v47 = vand.u32 4294901760, %v14427_v22  ;;  %v27394_v17 = vsub.f32 %v14247_v58, %v27379_v52 }
 0x4ac   : >> { %v27366_v38 = vadd.f32 %v9963_v50, %v27206_v41  ;;  %v10212_v28 = vadd.f32 %v10211_v24, %v10080_v44  ;;  %23129 = vmatpush3.msra.mxu0 %v27193_v19  ;;  %23123 = vmatprep.mubr.f32.mxu1 %v13661_v46  ;;  %v27377_v41 = vsub.f32 %v14244_v3, %v27355_v4  ;;  %v27383_v46 = vand.u32 4294901760, %v14250_v25 }
 0x4ad   : >> { %v22693_v45 = vpop.f32.mrf.mxu0  ;;  %23108 = vmatmul.mubr.f32.gmra.mxu0 %v27253_v27  ;;  %v10223_v2 = vpop.f32.mrf.mxu1  ;;  %23142 = vmatpush3.msra.mxu1 %v27156_v10  ;;  %v14253_v27 = vsel %vm225_vm0, %v20562_v12, 0  ;;  %v14256_v10 = vsel %vm225_vm0, %v20563_v33, 0  ;;  %v14340_v31 = vand.u32 4294901760, %v27394_v17  ;;  %v27415_v3 = vand.u32 4294901760, %v14259_v1 }
 0x4ae   : >> { %v10230_v19 = vadd.f32 %v22706_v55, %v22693_v45  ;;  %23110 = vmatprep.mubr.f32.mxu0 %v27261_v34  ;;  %23152 = vmatprep.subr.mxu0 %v27296_v60  ;;  %v14330_v9 = vand.u32 4294901760, %v27377_v41  ;;  %v27396_v5 = vand.u32 4294901760, %v14253_v27  ;;  %v27402_v53 = vand.u32 4294901760, %v14256_v10 }
 0x4af   : >> { %v10100_v40 = vpop.f32.mrf.mxu0  ;;  %v22709_v48 = vpop.f32.mrf.mxu1  ;;  %23124 = vmatmul.mubr.f32.gmra.mxu1 %v13671_v26  ;;  %23165 = vmatprep.subr.mxu1 %v14421_v63  ;;  %v27400_v26 = vsub.f32 %v14250_v25, %v27383_v46  ;;  %v14341_v50 = vsub.f32 %v27394_v17, %v14340_v31  ;;  %v27433_v58 = vsub.f32 %v14259_v1, %v27415_v3 }
 0x4b0   : >> { %23143 = vmatprep.mubr.f32.mxu1 %v27195_v30  ;;  %v27413_v35 = vsub.f32 %v14253_v27, %v27396_v5  ;;  %v27421_v36 = vsub.f32 %v14256_v10, %v27402_v53 }
 0x4b1   : >> { %v22696_v32 = vpop.f32.mrf.mxu0  ;;  %23111 = vmatmul.mubr.f32.gmra.mxu0 %v27273_v8  ;;  %v10235_v34 = vpop.f32.mrf.mxu1  ;;  %v14342_v2 = vand.u32 4294901760, %v14341_v50 }
 0x4b2   : >> { %23130 = vmatprep.mubr.f32.mxu0 %v27195_v30  ;;  %v14331_v30 = vsub.f32 %v27377_v41, %v14330_v9 }
 0x4b3   : >> { %v10120_v42 = vpop.f32.mrf.mxu0  ;;  %v22729_v8 = vpop.f32.mrf.mxu1  ;;  %23144 = vmatmul.mubr.f32.vlgmr.msra.gmra.mxu1 %v27219_v39 }
 0x4b4   : >> { %v10236_v20 = vadd.f32 %v10235_v34, %v10120_v42  ;;  %23166 = vmatpush3.msra.mxu1 %v14421_v63  ;;  %23146 = vmatprep.mubr.f32.mxu1 %v27223_v61  ;;  %v14332_v24 = vand.u32 4294901760, %v14331_v30  ;;  %v14370_v63 = vand.u32 4294901760, %v27421_v36 }
 0x4b5   : >> { %v22716_v49 = vpop.f32.mrf.mxu0  ;;  %23131 = vmatmul.mubr.f32.vlgmr.msra.gmra.mxu0 %v27219_v39  ;;  %v10427_v56 = vpop.f32.mrf.mxu1  ;;  %23167 = vmatprep.subr.mxu1 %v14428_v47  ;;  %v14350_v39 = vand.u32 4294901760, %v27400_v26 }
 0x4b6   : >> { %v10325_v59 = vadd.f32 %v22716_v49, %v10218_v43  ;;  %23153 = vmatpush3.msra.mxu0 %v27296_v60  ;;  %23133 = vmatprep.mubr.f32.mxu0 %v27223_v61  ;;  %v14360_v43 = vand.u32 4294901760, %v27413_v35  ;;  %v14371_v40 = vsub.f32 %v27421_v36, %v14370_v63  ;;  %v20573_v49 = vld [vmem:[%s28673_s3 + $0x120] sm:$0xff] }
 0x4b7   : >> { %v10317_v7 = vpop.f32.mrf.mxu0  ;;  %v22732_v51 = vpop.f32.mrf.mxu1  ;;  %23147 = vmatmul.mubr.f32.gmra.mxu1 %v27236_v14  ;;  %23154 = vmatprep.subr.mxu0 %v27316_v6 }
 0x4b8   : >> { %v10436_v11 = vadd.f32 %v22729_v8, %v10325_v59  ;;  %v10318_v18 = vadd.f32 %v10317_v7, %v10212_v28  ;;  %23155 = vmatpush3.msra.mxu0 %v27316_v6  ;;  %23149 = vmatprep.mubr.f32.mxu1 %v27242_v57  ;;  %v14361_v22 = vsub.f32 %v27413_v35, %v14360_v43 }
 0x4b9   : >> { %v22719_v21 = vpop.f32.mrf.mxu0  ;;  %23134 = vmatmul.mubr.f32.gmra.mxu0 %v27236_v14  ;;  %v10443_v61 = vpop.f32.mrf.mxu1  ;;  %23168 = vmatpush3.msra.mxu1 %v14428_v47  ;;  %v14351_v14 = vsub.f32 %v27400_v26, %v14350_v39 }
 0x4ba   : >> { %v10428_v44 = vadd.f32 %v10427_v56, %v10318_v18  ;;  %v10339_v55 = vadd.f32 %v22719_v21, %v10230_v19  ;;  %23136 = vmatprep.mubr.f32.mxu0 %v27242_v57  ;;  %23178 = vmatprep.subr.mxu0 %v27311_v37  ;;  %v20574_v57 = vld [vmem:[%s28673_s3 + $0x128] sm:$0xff]  ;;  %v14380_v19 = vand.u32 4294901760, %v27433_v58  ;;  %v14362_v47 = vand.u32 4294901760, %v14361_v22  ;;  %v20568_v22 = vld [vmem:[%s24836_s8 + $0x53] sm:$0xff] }
 0x4bb   : >> { %v10331_v25 = vpop.f32.mrf.mxu0  ;;  %v22735_v12 = vpop.f32.mrf.mxu1  ;;  %23150 = vmatmul.mubr.f32.gmra.mxu1 %v27255_v29  ;;  %23191 = vmatprep.subr.mxu1 %v27296_v60  ;;  %v14352_v27 = vand.u32 4294901760, %v14351_v14  ;;  %v27456_v16 = vand.u32 4294901760, %v20574_v57  ;;  %v27476_v21 = vand.u32 4294901760, %v20573_v49  ;;  %v20567_v14 = vld [vmem:[%s24836_s8 + $0x4b] sm:$0xff] }
 0x4bc   : >> { %v10452_v28 = vadd.f32 %v22732_v51, %v10339_v55  ;;  %23169 = vmatprep.mubr.f32.mxu1 %v27355_v4  ;;  %v14381_v1 = vsub.f32 %v27433_v58, %v14380_v19 }
 0x4bd   : >> { %v22722_v33 = vpop.f32.mrf.mxu0  ;;  %23137 = vmatmul.mubr.f32.gmra.mxu0 %v27255_v29  ;;  %v10459_v45 = vpop.f32.mrf.mxu1  ;;  %v27471_v59 = vsub.f32 %v20574_v57, %v27456_v16  ;;  %v27494_v57 = vsub.f32 %v20573_v49, %v27476_v21 }
 0x4be   : >> { %23156 = vmatprep.mubr.f32.mxu0 %v14332_v24  ;;  %v14382_v18 = vand.u32 4294901760, %v14381_v1 }
 0x4bf   : >> { %v10345_v48 = vpop.f32.mrf.mxu0  ;;  %v22755_v10 = vpop.f32.mrf.mxu1  ;;  %23170 = vmatmul.mubr.f32.vlgmr.msra.gmra.mxu1 %v27379_v52  ;;  %v27485_v55 = vand.u32 4294901760, %v27471_v59 }
 0x4c0   : >> { %v10346_v29 = vadd.f32 %v10345_v48, %v10236_v20  ;;  %23192 = vmatpush3.msra.mxu1 %v27296_v60  ;;  %23172 = vmatprep.mubr.f32.mxu1 %v27383_v46  ;;  %v14372_v20 = vand.u32 4294901760, %v14371_v40 }
 0x4c1   : >> { %v22742_v32 = vpop.f32.mrf.mxu0  ;;  %23157 = vmatmul.mubr.f32.vlgmr.msra.gmra.mxu0 %v14342_v2  ;;  %v10647_v34 = vpop.f32.mrf.mxu1  ;;  %23193 = vmatprep.subr.mxu1 %v27316_v6 }
 0x4c2   : >> { %v10460_v42 = vadd.f32 %v10459_v45, %v10346_v29  ;;  %v10551_v8 = vadd.f32 %v22742_v32, %v10436_v11  ;;  %23179 = vmatpush3.msra.mxu0 %v27311_v37  ;;  %23159 = vmatprep.mubr.f32.mxu0 %v14352_v27  ;;  %v14953_v45 = vsel %vm225_vm0, %v20567_v14, 0 }
 0x4c3   : >> { %v10544_v56 = vpop.f32.mrf.mxu0  ;;  %v22758_v30 = vpop.f32.mrf.mxu1  ;;  %23173 = vmatmul.mubr.f32.gmra.mxu1 %v27396_v5  ;;  %23180 = vmatprep.subr.mxu0 %v27334_v54  ;;  %v27515_v48 = vand.u32 4294901760, %v14953_v45 }
 0x4c4   : >> { %v10654_v7 = vadd.f32 %v22755_v10, %v10551_v8  ;;  %v10545_v51 = vadd.f32 %v10544_v56, %v10428_v44  ;;  %23181 = vmatpush3.msra.mxu0 %v27334_v54  ;;  %23175 = vmatprep.mubr.f32.mxu1 %v27402_v53 }
 0x4c5   : >> { %v22745_v37 = vpop.f32.mrf.mxu0  ;;  %23160 = vmatmul.mubr.f32.gmra.mxu0 %v14362_v47  ;;  %v10659_v11 = vpop.f32.mrf.mxu1  ;;  %23194 = vmatpush3.msra.mxu1 %v27316_v6  ;;  %v20570_v47 = vld [vmem:[%s24836_s8 + $0x63] sm:$0xff] }
 0x4c6   : >> { %v27479_v61 = vadd.f32 %v10654_v7, %v27319_v62  ;;  %v10648_v24 = vadd.f32 %v10647_v34, %v10545_v51  ;;  %v10563_v50 = vadd.f32 %v22745_v37, %v10452_v28  ;;  %23162 = vmatprep.mubr.f32.mxu0 %v14372_v20  ;;  %23204 = vmatprep.subr.mxu0 %v27325_v0 }
 0x4c7   : >> { %v10556_v54 = vpop.f32.mrf.mxu0  ;;  %v22761_v44 = vpop.f32.mrf.mxu1  ;;  %23176 = vmatmul.mubr.f32.gmra.mxu1 %v27415_v3  ;;  %23217 = vmatprep.subr.mxu1 %v27296_v60 }
 0x4c8   : >> { %v27489_v25 = vadd.f32 %v10648_v24, %v27329_v15  ;;  %v10666_v62 = vadd.f32 %v22758_v30, %v10563_v50  ;;  %23195 = vmatprep.mubr.f32.mxu1 %v14330_v9  ;;  %v15129_v9 = vsub.f32 %v27471_v59, %v27485_v55  ;;  %v20572_v30 = vld [vmem:[%s24836_s8 + $0x73] sm:$0xff] }
 0x4c9   : >> { %v22748_v12 = vpop.f32.mrf.mxu0  ;;  %23163 = vmatmul.mubr.f32.gmra.mxu0 %v14382_v18  ;;  %v10671_v28 = vpop.f32.mrf.mxu1  ;;  %v14968_v50 = vsel %vm225_vm0, %v20572_v30, 0 }
 0x4ca   : >> { %v27497_v33 = vadd.f32 %v10666_v62, %v27337_v13  ;;  %23182 = vmatprep.mubr.f32.mxu0 %v27377_v41  ;;  %v20569_v13 = vld [vmem:[%s24836_s8 + $0x5b] sm:$0xff]  ;;  %v15130_v32 = vand.u32 4294901760, %v15129_v9 }
 0x4cb   : >> { %v10568_v15 = vpop.f32.mrf.mxu0  ;;  %v22781_v2 = vpop.f32.mrf.mxu1  ;;  %23196 = vmatmul.mubr.f32.vlgmr.msra.gmra.mxu1 %v14340_v31  ;;  %v27513_v31 = vand.u32 4294901760, %v27494_v57  ;;  %v14959_v34 = vsel %vm225_vm0, %v20569_v13, 0 }
 0x4cc   : >> { %v10569_v27 = vadd.f32 %v10568_v15, %v10460_v42  ;;  %23218 = vmatpush3.msra.mxu1 %v27296_v60  ;;  %23198 = vmatprep.mubr.f32.mxu1 %v14350_v39  ;;  %v14956_v60 = vsel %vm225_vm0, %v20568_v22, 0 }
 0x4cd   : >> { %v22768_v40 = vpop.f32.mrf.mxu0  ;;  %23183 = vmatmul.mubr.f32.vlgmr.msra.gmra.mxu0 %v27394_v17  ;;  %v10920_v41 = vpop.f32.mrf.mxu1  ;;  %23219 = vmatprep.subr.mxu1 %v27316_v6  ;;  %v15136_v8 = vsub.f32 %v27494_v57, %v27513_v31  ;;  %v27539_v20 = vand.u32 4294901760, %v14956_v60 }
 0x4ce   : >> { %v10672_v10 = vadd.f32 %v10671_v28, %v10569_v27  ;;  %v10927_v29 = vadd.f32 %v22781_v2, %v22768_v40  ;;  %23205 = vmatpush3.msra.mxu0 %v27325_v0  ;;  %23185 = vmatprep.mubr.f32.mxu0 %v27400_v26  ;;  %v20571_v0 = vld [vmem:[%s24836_s8 + $0x6b] sm:$0xff] }
 0x4cf   : >> { %v10789_v39 = vpop.f32.mrf.mxu0  ;;  %v22784_v17 = vpop.f32.mrf.mxu1  ;;  %23199 = vmatmul.mubr.f32.gmra.mxu1 %v14360_v43  ;;  %23206 = vmatprep.subr.mxu0 %v27353_v23  ;;  %v15137_v51 = vand.u32 4294901760, %v15136_v8  ;;  %v27554_v11 = vsub.f32 %v14956_v60, %v27539_v20 }
 0x4d0   : >> { %v27526_v1 = vadd.f32 %v10672_v10, %v27366_v38  ;;  %v10921_v42 = vadd.f32 %v10920_v41, %v10789_v39  ;;  %23207 = vmatpush3.msra.mxu0 %v27353_v23  ;;  %23201 = vmatprep.mubr.f32.mxu1 %v14370_v63  ;;  %v27537_v38 = vsub.f32 %v14953_v45, %v27515_v48  ;;  %v27543_v63 = vand.u32 4294901760, %v14959_v34 }
 0x4d1   : >> { %v22771_v26 = vpop.f32.mrf.mxu0  ;;  %23186 = vmatmul.mubr.f32.gmra.mxu0 %v27413_v35  ;;  %v10932_v43 = vpop.f32.mrf.mxu1  ;;  %23220 = vmatpush3.msra.mxu1 %v27316_v6  ;;  %v14962_v35 = vsel %vm225_vm0, %v20570_v47, 0  ;;  %v14965_v6 = vsel %vm225_vm0, %v20571_v0, 0  ;;  %v15049_v12 = vand.u32 4294901760, %v27554_v11  ;;  %v27575_v45 = vand.u32 4294901760, %v14968_v50 }
 0x4d2   : >> { %v10939_v23 = vadd.f32 %v22784_v17, %v22771_v26  ;;  %23188 = vmatprep.mubr.f32.mxu0 %v27421_v36  ;;  %23230 = vmatprep.subr.mxu0 %v27456_v16  ;;  %v15039_v37 = vand.u32 4294901760, %v27537_v38  ;;  %v27556_v18 = vand.u32 4294901760, %v14962_v35  ;;  %v27562_v24 = vand.u32 4294901760, %v14965_v6 }
 0x4d3   : >> { %v10809_v49 = vpop.f32.mrf.mxu0  ;;  %v22787_v56 = vpop.f32.mrf.mxu1  ;;  %23202 = vmatmul.mubr.f32.gmra.mxu1 %v14380_v19  ;;  %23243 = vmatprep.subr.mxu1 %v15130_v32  ;;  %v27560_v19 = vsub.f32 %v14959_v34, %v27543_v63  ;;  %v15050_v10 = vsub.f32 %v27554_v11, %v15049_v12  ;;  %v27593_v60 = vsub.f32 %v14968_v50, %v27575_v45 }
 0x4d4   : >> { %23221 = vmatprep.mubr.f32.mxu1 %v27355_v4  ;;  %v27573_v28 = vsub.f32 %v14962_v35, %v27556_v18  ;;  %v27581_v2 = vsub.f32 %v14965_v6, %v27562_v24 }
 0x4d5   : >> { %v22774_v7 = vpop.f32.mrf.mxu0  ;;  %23189 = vmatmul.mubr.f32.gmra.mxu0 %v27433_v58  ;;  %v10944_v36 = vpop.f32.mrf.mxu1  ;;  %v15051_v43 = vand.u32 4294901760, %v15050_v10 }
 0x4d6   : >> { %23208 = vmatprep.mubr.f32.mxu0 %v27355_v4  ;;  %v15040_v4 = vsub.f32 %v27537_v38, %v15039_v37 }
 0x4d7   : >> { %v10829_v54 = vpop.f32.mrf.mxu0  ;;  %v22807_v58 = vpop.f32.mrf.mxu1  ;;  %23222 = vmatmul.mubr.f32.vlgmr.msra.gmra.mxu1 %v27379_v52 }
 0x4d8   : >> { %v10945_v44 = vadd.f32 %v10944_v36, %v10829_v54  ;;  %23244 = vmatpush3.msra.mxu1 %v15130_v32  ;;  %23224 = vmatprep.mubr.f32.mxu1 %v27383_v46  ;;  %v15041_v41 = vand.u32 4294901760, %v15040_v4  ;;  %v15079_v32 = vand.u32 4294901760, %v27581_v2 }
 0x4d9   : >> { %v22794_v14 = vpop.f32.mrf.mxu0  ;;  %23209 = vmatmul.mubr.f32.vlgmr.msra.gmra.mxu0 %v27379_v52  ;;  %v11136_v62 = vpop.f32.mrf.mxu1  ;;  %23245 = vmatprep.subr.mxu1 %v15137_v51  ;;  %v15059_v52 = vand.u32 4294901760, %v27560_v19 }
 0x4da   : >> { %v11034_v15 = vadd.f32 %v22794_v14, %v10927_v29  ;;  %23231 = vmatpush3.msra.mxu0 %v27456_v16  ;;  %23211 = vmatprep.mubr.f32.mxu0 %v27383_v46  ;;  %v15069_v29 = vand.u32 4294901760, %v27573_v28  ;;  %v15080_v49 = vsub.f32 %v27581_v2, %v15079_v32  ;;  %v20581_v14 = vld [vmem:[%s28673_s3 + $0x130] sm:$0xff] }
 0x4db   : >> { %v11026_v9 = vpop.f32.mrf.mxu0  ;;  %v22810_v22 = vpop.f32.mrf.mxu1  ;;  %23225 = vmatmul.mubr.f32.gmra.mxu1 %v27396_v5  ;;  %23232 = vmatprep.subr.mxu0 %v27476_v21 }
 0x4dc   : >> { %v11145_v27 = vadd.f32 %v22807_v58, %v11034_v15  ;;  %v11027_v13 = vadd.f32 %v11026_v9, %v10921_v42  ;;  %23233 = vmatpush3.msra.mxu0 %v27476_v21  ;;  %23227 = vmatprep.mubr.f32.mxu1 %v27402_v53  ;;  %v15070_v8 = vsub.f32 %v27573_v28, %v15069_v29 }
 0x4dd   : >> { %v22797_v40 = vpop.f32.mrf.mxu0  ;;  %23212 = vmatmul.mubr.f32.gmra.mxu0 %v27396_v5  ;;  %v11152_v46 = vpop.f32.mrf.mxu1  ;;  %23246 = vmatpush3.msra.mxu1 %v15137_v51  ;;  %v15060_v5 = vsub.f32 %v27560_v19, %v15059_v52 }
 0x4de   : >> { %v11137_v39 = vadd.f32 %v11136_v62, %v11027_v13  ;;  %v11048_v17 = vadd.f32 %v22797_v40, %v10939_v23  ;;  %23214 = vmatprep.mubr.f32.mxu0 %v27402_v53  ;;  %23256 = vmatprep.subr.mxu0 %v27471_v59  ;;  %v20582_v53 = vld [vmem:[%s28673_s3 + $0x138] sm:$0xff]  ;;  %v15089_v23 = vand.u32 4294901760, %v27593_v60  ;;  %v15071_v51 = vand.u32 4294901760, %v15070_v8 }
 0x4df   : >> { %v11040_v34 = vpop.f32.mrf.mxu0  ;;  %v22813_v47 = vpop.f32.mrf.mxu1  ;;  %23228 = vmatmul.mubr.f32.gmra.mxu1 %v27415_v3  ;;  %23269 = vmatprep.subr.mxu1 %v27456_v16  ;;  %v15061_v35 = vand.u32 4294901760, %v15060_v5  ;;  %v27616_v30 = vand.u32 4294901760, %v20582_v53  ;;  %v27636_v40 = vand.u32 4294901760, %v20581_v14  ;;  %v20575_v5 = vld [vmem:[%s24836_s8 + $0x4c] sm:$0xff]  ;;  %v20576_v8 = vld [vmem:[%s24836_s8 + $0x54] sm:$0xff] }
 0x4e0   : >> { %v11161_v42 = vadd.f32 %v22810_v22, %v11048_v17  ;;  %23247 = vmatprep.mubr.f32.mxu1 %v27515_v48  ;;  %v15090_v50 = vsub.f32 %v27593_v60, %v15089_v23 }
 0x4e1   : >> { %v22800_v0 = vpop.f32.mrf.mxu0  ;;  %23215 = vmatmul.mubr.f32.gmra.mxu0 %v27415_v3  ;;  %v11168_v26 = vpop.f32.mrf.mxu1  ;;  %v27631_v15 = vsub.f32 %v20582_v53, %v27616_v30  ;;  %v27654_v53 = vsub.f32 %v20581_v14, %v27636_v40 }
 0x4e2   : >> { %23234 = vmatprep.mubr.f32.mxu0 %v15041_v41  ;;  %v15091_v13 = vand.u32 4294901760, %v15090_v50 }
 0x4e3   : >> { %v11054_v56 = vpop.f32.mrf.mxu0  ;;  %v22833_v6 = vpop.f32.mrf.mxu1  ;;  %23248 = vmatmul.mubr.f32.vlgmr.msra.gmra.mxu1 %v27539_v20  ;;  %v27645_v17 = vand.u32 4294901760, %v27631_v15 }
 0x4e4   : >> { %v11055_v3 = vadd.f32 %v11054_v56, %v10945_v44  ;;  %23270 = vmatpush3.msra.mxu1 %v27456_v16  ;;  %23250 = vmatprep.mubr.f32.mxu1 %v27543_v63  ;;  %v15081_v44 = vand.u32 4294901760, %v15080_v49 }
 0x4e5   : >> { %v22820_v7 = vpop.f32.mrf.mxu0  ;;  %23235 = vmatmul.mubr.f32.vlgmr.msra.gmra.mxu0 %v15051_v43  ;;  %v11356_v36 = vpop.f32.mrf.mxu1  ;;  %23271 = vmatprep.subr.mxu1 %v27476_v21 }
 0x4e6   : >> { %v11169_v54 = vadd.f32 %v11168_v26, %v11055_v3  ;;  %v11260_v58 = vadd.f32 %v22820_v7, %v11145_v27  ;;  %23257 = vmatpush3.msra.mxu0 %v27471_v59  ;;  %23237 = vmatprep.mubr.f32.mxu0 %v15061_v35  ;;  %v15662_v26 = vsel %vm225_vm0, %v20575_v5, 0 }
 0x4e7   : >> { %v11253_v62 = vpop.f32.mrf.mxu0  ;;  %v22836_v4 = vpop.f32.mrf.mxu1  ;;  %23251 = vmatmul.mubr.f32.gmra.mxu1 %v27556_v18  ;;  %23258 = vmatprep.subr.mxu0 %v27494_v57  ;;  %v27675_v56 = vand.u32 4294901760, %v15662_v26 }
 0x4e8   : >> { %v11363_v9 = vadd.f32 %v22833_v6, %v11260_v58  ;;  %v11254_v22 = vadd.f32 %v11253_v62, %v11137_v39  ;;  %23259 = vmatpush3.msra.mxu0 %v27494_v57  ;;  %23253 = vmatprep.mubr.f32.mxu1 %v27562_v24 }
 0x4e9   : >> { %v22823_v59 = vpop.f32.mrf.mxu0  ;;  %23238 = vmatmul.mubr.f32.gmra.mxu0 %v15071_v51  ;;  %v11368_v27 = vpop.f32.mrf.mxu1  ;;  %23272 = vmatpush3.msra.mxu1 %v27476_v21  ;;  %v20578_v51 = vld [vmem:[%s24836_s8 + $0x64] sm:$0xff] }
 0x4ea   : >> { %v27639_v46 = vadd.f32 %v11363_v9, %v27479_v61  ;;  %v11357_v41 = vadd.f32 %v11356_v36, %v11254_v22  ;;  %v11272_v10 = vadd.f32 %v22823_v59, %v11161_v42  ;;  %23240 = vmatprep.mubr.f32.mxu0 %v15081_v44  ;;  %23282 = vmatprep.subr.mxu0 %v27485_v55 }
 0x4eb   : >> { %v11265_v57 = vpop.f32.mrf.mxu0  ;;  %v22839_v39 = vpop.f32.mrf.mxu1  ;;  %23254 = vmatmul.mubr.f32.gmra.mxu1 %v27575_v45  ;;  %23295 = vmatprep.subr.mxu1 %v27456_v16 }
 0x4ec   : >> { %v27649_v34 = vadd.f32 %v11357_v41, %v27489_v25  ;;  %v11375_v61 = vadd.f32 %v22836_v4, %v11272_v10  ;;  %23273 = vmatprep.mubr.f32.mxu1 %v15039_v37  ;;  %v15838_v37 = vsub.f32 %v27631_v15, %v27645_v17  ;;  %v20580_v4 = vld [vmem:[%s24836_s8 + $0x74] sm:$0xff] }
 0x4ed   : >> { %v22826_v47 = vpop.f32.mrf.mxu0  ;;  %23241 = vmatmul.mubr.f32.gmra.mxu0 %v15091_v13  ;;  %v11380_v42 = vpop.f32.mrf.mxu1  ;;  %v15677_v10 = vsel %vm225_vm0, %v20580_v4, 0 }
 0x4ee   : >> { %v27657_v0 = vadd.f32 %v11375_v61, %v27497_v33  ;;  %23260 = vmatprep.mubr.f32.mxu0 %v27537_v38  ;;  %v20577_v33 = vld [vmem:[%s24836_s8 + $0x5c] sm:$0xff]  ;;  %v15839_v7 = vand.u32 4294901760, %v15838_v37 }
 0x4ef   : >> { %v11277_v25 = vpop.f32.mrf.mxu0  ;;  %v22859_v43 = vpop.f32.mrf.mxu1  ;;  %23274 = vmatmul.mubr.f32.vlgmr.msra.gmra.mxu1 %v15049_v12  ;;  %v27673_v12 = vand.u32 4294901760, %v27654_v53  ;;  %v15668_v36 = vsel %vm225_vm0, %v20577_v33, 0 }
 0x4f0   : >> { %v11278_v35 = vadd.f32 %v11277_v25, %v11169_v54  ;;  %23296 = vmatpush3.msra.mxu1 %v27456_v16  ;;  %23276 = vmatprep.mubr.f32.mxu1 %v15059_v52  ;;  %v15665_v16 = vsel %vm225_vm0, %v20576_v8, 0 }
 0x4f1   : >> { %v22846_v49 = vpop.f32.mrf.mxu0  ;;  %23261 = vmatmul.mubr.f32.vlgmr.msra.gmra.mxu0 %v27554_v11  ;;  %v11629_v38 = vpop.f32.mrf.mxu1  ;;  %23297 = vmatprep.subr.mxu1 %v27476_v21  ;;  %v15845_v58 = vsub.f32 %v27654_v53, %v27673_v12  ;;  %v27699_v44 = vand.u32 4294901760, %v15665_v16 }
 0x4f2   : >> { %v11381_v6 = vadd.f32 %v11380_v42, %v11278_v35  ;;  %v11636_v3 = vadd.f32 %v22859_v43, %v22846_v49  ;;  %23283 = vmatpush3.msra.mxu0 %v27485_v55  ;;  %23263 = vmatprep.mubr.f32.mxu0 %v27560_v19  ;;  %v20579_v55 = vld [vmem:[%s24836_s8 + $0x6c] sm:$0xff] }
 0x4f3   : >> { %v11498_v52 = vpop.f32.mrf.mxu0  ;;  %v22862_v11 = vpop.f32.mrf.mxu1  ;;  %23277 = vmatmul.mubr.f32.gmra.mxu1 %v15069_v29  ;;  %23284 = vmatprep.subr.mxu0 %v27513_v31  ;;  %v15846_v22 = vand.u32 4294901760, %v15845_v58  ;;  %v27714_v27 = vsub.f32 %v15665_v16, %v27699_v44 }
 0x4f4   : >> { %v27686_v50 = vadd.f32 %v11381_v6, %v27526_v1  ;;  %v11630_v54 = vadd.f32 %v11629_v38, %v11498_v52  ;;  %23285 = vmatpush3.msra.mxu0 %v27513_v31  ;;  %23279 = vmatprep.mubr.f32.mxu1 %v15079_v32  ;;  %v27697_v1 = vsub.f32 %v15662_v26, %v27675_v56  ;;  %v27703_v32 = vand.u32 4294901760, %v15668_v36 }
 0x4f5   : >> { %v22849_v19 = vpop.f32.mrf.mxu0  ;;  %23264 = vmatmul.mubr.f32.gmra.mxu0 %v27573_v28  ;;  %v11641_v29 = vpop.f32.mrf.mxu1  ;;  %23298 = vmatpush3.msra.mxu1 %v27476_v21  ;;  %v15671_v28 = vsel %vm225_vm0, %v20578_v51, 0  ;;  %v15674_v21 = vsel %vm225_vm0, %v20579_v55, 0  ;;  %v15758_v47 = vand.u32 4294901760, %v27714_v27  ;;  %v27735_v26 = vand.u32 4294901760, %v15677_v10 }
 0x4f6   : >> { %v11648_v31 = vadd.f32 %v22862_v11, %v22849_v19  ;;  %23266 = vmatprep.mubr.f32.mxu0 %v27581_v2  ;;  %23308 = vmatprep.subr.mxu0 %v27616_v30  ;;  %v15748_v59 = vand.u32 4294901760, %v27697_v1  ;;  %v27716_v13 = vand.u32 4294901760, %v15671_v28  ;;  %v27722_v41 = vand.u32 4294901760, %v15674_v21 }
 0x4f7   : >> { %v11518_v14 = vpop.f32.mrf.mxu0  ;;  %v22865_v62 = vpop.f32.mrf.mxu1  ;;  %23280 = vmatmul.mubr.f32.gmra.mxu1 %v15089_v23  ;;  %23321 = vmatprep.subr.mxu1 %v15839_v7  ;;  %v27720_v23 = vsub.f32 %v15668_v36, %v27703_v32  ;;  %v15759_v6 = vsub.f32 %v27714_v27, %v15758_v47  ;;  %v27753_v16 = vsub.f32 %v15677_v10, %v27735_v26 }
 0x4f8   : >> { %23299 = vmatprep.mubr.f32.mxu1 %v27515_v48  ;;  %v27733_v42 = vsub.f32 %v15671_v28, %v27716_v13  ;;  %v27741_v43 = vsub.f32 %v15674_v21, %v27722_v41 }
 0x4f9   : >> { %v22852_v9 = vpop.f32.mrf.mxu0  ;;  %23267 = vmatmul.mubr.f32.gmra.mxu0 %v27593_v60  ;;  %v11653_v2 = vpop.f32.mrf.mxu1  ;;  %v15760_v29 = vand.u32 4294901760, %v15759_v6 }
 0x4fa   : >> { %23286 = vmatprep.mubr.f32.mxu0 %v27515_v48  ;;  %v15749_v48 = vsub.f32 %v27697_v1, %v15748_v59 }
 0x4fb   : >> { %v11538_v57 = vpop.f32.mrf.mxu0  ;;  %v22885_v60 = vpop.f32.mrf.mxu1  ;;  %23300 = vmatmul.mubr.f32.vlgmr.msra.gmra.mxu1 %v27539_v20 }
 0x4fc   : >> { %v11654_v39 = vadd.f32 %v11653_v2, %v11538_v57  ;;  %23322 = vmatpush3.msra.mxu1 %v15839_v7  ;;  %23302 = vmatprep.mubr.f32.mxu1 %v27543_v63  ;;  %v15750_v38 = vand.u32 4294901760, %v15749_v48  ;;  %v15788_v7 = vand.u32 4294901760, %v27741_v43 }
 0x4fd   : >> { %v22872_v5 = vpop.f32.mrf.mxu0  ;;  %23287 = vmatmul.mubr.f32.vlgmr.msra.gmra.mxu0 %v27539_v20  ;;  %v11845_v61 = vpop.f32.mrf.mxu1  ;;  %23323 = vmatprep.subr.mxu1 %v15846_v22  ;;  %v15768_v20 = vand.u32 4294901760, %v27720_v23 }
 0x4fe   : >> { %v11743_v25 = vadd.f32 %v22872_v5, %v11636_v3  ;;  %23309 = vmatpush3.msra.mxu0 %v27616_v30  ;;  %23289 = vmatprep.mubr.f32.mxu0 %v27543_v63  ;;  %v15778_v3 = vand.u32 4294901760, %v27733_v42  ;;  %v15789_v14 = vsub.f32 %v27741_v43, %v15788_v7  ;;  %v20589_v5 = vld [vmem:[%s28673_s3 + $0x140] sm:$0xff] }
 0x4ff   : >> { %v11735_v37 = vpop.f32.mrf.mxu0  ;;  %v22888_v8 = vpop.f32.mrf.mxu1  ;;  %23303 = vmatmul.mubr.f32.gmra.mxu1 %v27556_v18  ;;  %23310 = vmatprep.subr.mxu0 %v27636_v40 }
 0x500   : >> { %v11854_v35 = vadd.f32 %v22885_v60, %v11743_v25  ;;  %v11736_v33 = vadd.f32 %v11735_v37, %v11630_v54  ;;  %23311 = vmatpush3.msra.mxu0 %v27636_v40  ;;  %23305 = vmatprep.mubr.f32.mxu1 %v27562_v24  ;;  %v15779_v58 = vsub.f32 %v27733_v42, %v15778_v3 }
 0x501   : >> { %v22875_v49 = vpop.f32.mrf.mxu0  ;;  %23290 = vmatmul.mubr.f32.gmra.mxu0 %v27556_v18  ;;  %v11861_v63 = vpop.f32.mrf.mxu1  ;;  %23324 = vmatpush3.msra.mxu1 %v15846_v22  ;;  %v15769_v18 = vsub.f32 %v27720_v23, %v15768_v20 }
 0x502   : >> { %v11846_v52 = vadd.f32 %v11845_v61, %v11736_v33  ;;  %v11757_v11 = vadd.f32 %v22875_v49, %v11648_v31  ;;  %23292 = vmatprep.mubr.f32.mxu0 %v27562_v24  ;;  %23334 = vmatprep.subr.mxu0 %v27631_v15  ;;  %v20590_v24 = vld [vmem:[%s28673_s3 + $0x148] sm:$0xff]  ;;  %v15798_v31 = vand.u32 4294901760, %v27753_v16  ;;  %v15780_v22 = vand.u32 4294901760, %v15779_v58 }
 0x503   : >> { %v11749_v36 = vpop.f32.mrf.mxu0  ;;  %v22891_v51 = vpop.f32.mrf.mxu1  ;;  %23306 = vmatmul.mubr.f32.gmra.mxu1 %v27575_v45  ;;  %23347 = vmatprep.subr.mxu1 %v27616_v30  ;;  %v15770_v28 = vand.u32 4294901760, %v15769_v18  ;;  %v27776_v4 = vand.u32 4294901760, %v20590_v24  ;;  %v27796_v49 = vand.u32 4294901760, %v20589_v5  ;;  %v20583_v18 = vld [vmem:[%s24836_s8 + $0x60] sm:$0xff]  ;;  %v20584_v58 = vld [vmem:[%s24836_s8 + $0x68] sm:$0xff] }
 0x504   : >> { %v11870_v54 = vadd.f32 %v22888_v8, %v11757_v11  ;;  %23325 = vmatprep.mubr.f32.mxu1 %v27675_v56  ;;  %v15799_v10 = vsub.f32 %v27753_v16, %v15798_v31 }
 0x505   : >> { %v22878_v55 = vpop.f32.mrf.mxu0  ;;  %23293 = vmatmul.mubr.f32.gmra.mxu0 %v27575_v45  ;;  %v11877_v19 = vpop.f32.mrf.mxu1  ;;  %v27791_v25 = vsub.f32 %v20590_v24, %v27776_v4  ;;  %v27814_v24 = vsub.f32 %v20589_v5, %v27796_v49 }
 0x506   : >> { %23312 = vmatprep.mubr.f32.mxu0 %v15750_v38  ;;  %v15800_v33 = vand.u32 4294901760, %v15799_v10 }
 0x507   : >> { %v11763_v62 = vpop.f32.mrf.mxu0  ;;  %v22911_v21 = vpop.f32.mrf.mxu1  ;;  %23326 = vmatmul.mubr.f32.vlgmr.msra.gmra.mxu1 %v27699_v44  ;;  %v27805_v11 = vand.u32 4294901760, %v27791_v25 }
 0x508   : >> { %v11764_v45 = vadd.f32 %v11763_v62, %v11654_v39  ;;  %23348 = vmatpush3.msra.mxu1 %v27616_v30  ;;  %23328 = vmatprep.mubr.f32.mxu1 %v27703_v32  ;;  %v15790_v39 = vand.u32 4294901760, %v15789_v14 }
 0x509   : >> { %v22898_v9 = vpop.f32.mrf.mxu0  ;;  %23313 = vmatmul.mubr.f32.vlgmr.msra.gmra.mxu0 %v15760_v29  ;;  %v12065_v2 = vpop.f32.mrf.mxu1  ;;  %23349 = vmatprep.subr.mxu1 %v27636_v40 }
 0x50a   : >> { %v11878_v57 = vadd.f32 %v11877_v19, %v11764_v45  ;;  %v11969_v60 = vadd.f32 %v22898_v9, %v11854_v35  ;;  %23335 = vmatpush3.msra.mxu0 %v27631_v15  ;;  %23315 = vmatprep.mubr.f32.mxu0 %v15770_v28  ;;  %v16371_v19 = vsel %vm225_vm0, %v20583_v18, 0 }
 0x50b   : >> { %v11962_v61 = vpop.f32.mrf.mxu0  ;;  %v22914_v48 = vpop.f32.mrf.mxu1  ;;  %23329 = vmatmul.mubr.f32.gmra.mxu1 %v27716_v13  ;;  %23336 = vmatprep.subr.mxu0 %v27654_v53  ;;  %v27835_v62 = vand.u32 4294901760, %v16371_v19 }
 0x50c   : >> { %v12072_v37 = vadd.f32 %v22911_v21, %v11969_v60  ;;  %v11963_v8 = vadd.f32 %v11962_v61, %v11846_v52  ;;  %23337 = vmatpush3.msra.mxu0 %v27654_v53  ;;  %23331 = vmatprep.mubr.f32.mxu1 %v27722_v41 }
 0x50d   : >> { %v22901_v15 = vpop.f32.mrf.mxu0  ;;  %23316 = vmatmul.mubr.f32.gmra.mxu0 %v15780_v22  ;;  %v12077_v35 = vpop.f32.mrf.mxu1  ;;  %23350 = vmatpush3.msra.mxu1 %v27636_v40  ;;  %v20586_v22 = vld [vmem:[%s24836_s8 + $0x78] sm:$0xff] }
 0x50e   : >> { %v27799_v63 = vadd.f32 %v12072_v37, %v27639_v46  ;;  %v12066_v38 = vadd.f32 %v12065_v2, %v11963_v8  ;;  %v11981_v6 = vadd.f32 %v22901_v15, %v11870_v54  ;;  %23318 = vmatprep.mubr.f32.mxu0 %v15790_v39  ;;  %23360 = vmatprep.subr.mxu0 %v27645_v17 }
 0x50f   : >> { %v11974_v53 = vpop.f32.mrf.mxu0  ;;  %v22917_v52 = vpop.f32.mrf.mxu1  ;;  %23332 = vmatmul.mubr.f32.gmra.mxu1 %v27735_v26  ;;  %23373 = vmatprep.subr.mxu1 %v27616_v30 }
 0x510   : >> { %v27809_v36 = vadd.f32 %v12066_v38, %v27649_v34  ;;  %v12084_v46 = vadd.f32 %v22914_v48, %v11981_v6  ;;  %23351 = vmatprep.mubr.f32.mxu1 %v15748_v59  ;;  %v16547_v59 = vsub.f32 %v27791_v25, %v27805_v11  ;;  %v20588_v48 = vld [vmem:[%s24836_s8 + $0x88] sm:$0xff] }
 0x511   : >> { %v22904_v51 = vpop.f32.mrf.mxu0  ;;  %23319 = vmatmul.mubr.f32.gmra.mxu0 %v15800_v33  ;;  %v12089_v54 = vpop.f32.mrf.mxu1  ;;  %v16386_v6 = vsel %vm225_vm0, %v20588_v48, 0 }
 0x512   : >> { %v27817_v55 = vadd.f32 %v12084_v46, %v27657_v0  ;;  %23338 = vmatprep.mubr.f32.mxu0 %v27697_v1  ;;  %v20585_v0 = vld [vmem:[%s24836_s8 + $0x70] sm:$0xff]  ;;  %v16548_v9 = vand.u32 4294901760, %v16547_v59 }
 0x513   : >> { %v11986_v34 = vpop.f32.mrf.mxu0  ;;  %v22937_v29 = vpop.f32.mrf.mxu1  ;;  %23352 = vmatmul.mubr.f32.vlgmr.msra.gmra.mxu1 %v15758_v47  ;;  %v27833_v47 = vand.u32 4294901760, %v27814_v24  ;;  %v16377_v2 = vsel %vm225_vm0, %v20585_v0, 0 }
 0x514   : >> { %v11987_v28 = vadd.f32 %v11986_v34, %v11878_v57  ;;  %23374 = vmatpush3.msra.mxu1 %v27616_v30  ;;  %23354 = vmatprep.mubr.f32.mxu1 %v15768_v20  ;;  %v16374_v30 = vsel %vm225_vm0, %v20584_v58, 0 }
 0x515   : >> { %v22924_v14 = vpop.f32.mrf.mxu0  ;;  %23339 = vmatmul.mubr.f32.vlgmr.msra.gmra.mxu0 %v27714_v27  ;;  %v12338_v1 = vpop.f32.mrf.mxu1  ;;  %23375 = vmatprep.subr.mxu1 %v27636_v40  ;;  %v16554_v60 = vsub.f32 %v27814_v24, %v27833_v47  ;;  %v27859_v39 = vand.u32 4294901760, %v16374_v30 }
 0x516   : >> { %v12090_v21 = vadd.f32 %v12089_v54, %v11987_v28  ;;  %v12345_v45 = vadd.f32 %v22937_v29, %v22924_v14  ;;  %23361 = vmatpush3.msra.mxu0 %v27645_v17  ;;  %23341 = vmatprep.mubr.f32.mxu0 %v27720_v23  ;;  %v20587_v17 = vld [vmem:[%s24836_s8 + $0x80] sm:$0xff] }
 0x517   : >> { %v12207_v20 = vpop.f32.mrf.mxu0  ;;  %v22940_v27 = vpop.f32.mrf.mxu1  ;;  %23355 = vmatmul.mubr.f32.gmra.mxu1 %v15778_v3  ;;  %23362 = vmatprep.subr.mxu0 %v27673_v12  ;;  %v16555_v8 = vand.u32 4294901760, %v16554_v60  ;;  %v27874_v35 = vsub.f32 %v16374_v30, %v27859_v39 }
 0x518   : >> { %v27846_v10 = vadd.f32 %v12090_v21, %v27686_v50  ;;  %v12339_v57 = vadd.f32 %v12338_v1, %v12207_v20  ;;  %23363 = vmatpush3.msra.mxu0 %v27673_v12  ;;  %23357 = vmatprep.mubr.f32.mxu1 %v15788_v7  ;;  %v27857_v50 = vsub.f32 %v16371_v19, %v27835_v62  ;;  %v27863_v7 = vand.u32 4294901760, %v16377_v2 }
 0x519   : >> { %v22927_v23 = vpop.f32.mrf.mxu0  ;;  %23342 = vmatmul.mubr.f32.gmra.mxu0 %v27733_v42  ;;  %v12350_v3 = vpop.f32.mrf.mxu1  ;;  %23376 = vmatpush3.msra.mxu1 %v27636_v40  ;;  %v16380_v42 = vsel %vm225_vm0, %v20586_v22, 0  ;;  %v16383_v40 = vsel %vm225_vm0, %v20587_v17, 0  ;;  %v16467_v51 = vand.u32 4294901760, %v27874_v35  ;;  %v27895_v19 = vand.u32 4294901760, %v16386_v6 }
 0x51a   : >> { %v12357_v12 = vadd.f32 %v22940_v27, %v22927_v23  ;;  %23344 = vmatprep.mubr.f32.mxu0 %v27741_v43  ;;  %23386 = vmatprep.subr.mxu0 %v27776_v4  ;;  %v16457_v15 = vand.u32 4294901760, %v27857_v50  ;;  %v27876_v33 = vand.u32 4294901760, %v16380_v42  ;;  %v27882_v38 = vand.u32 4294901760, %v16383_v40 }
 0x51b   : >> { %v12227_v5 = vpop.f32.mrf.mxu0  ;;  %v22943_v61 = vpop.f32.mrf.mxu1  ;;  %23358 = vmatmul.mubr.f32.gmra.mxu1 %v15798_v31  ;;  %23399 = vmatprep.subr.mxu1 %v16548_v9  ;;  %v27880_v31 = vsub.f32 %v16377_v2, %v27863_v7  ;;  %v16468_v21 = vsub.f32 %v27874_v35, %v16467_v51  ;;  %v27913_v30 = vsub.f32 %v16386_v6, %v27895_v19 }
 0x51c   : >> { %23377 = vmatprep.mubr.f32.mxu1 %v27675_v56  ;;  %v27893_v54 = vsub.f32 %v16380_v42, %v27876_v33  ;;  %v27901_v29 = vsub.f32 %v16383_v40, %v27882_v38 }
 0x51d   : >> { %v22930_v37 = vpop.f32.mrf.mxu0  ;;  %23345 = vmatmul.mubr.f32.gmra.mxu0 %v27753_v16  ;;  %v12362_v43 = vpop.f32.mrf.mxu1  ;;  %v16469_v3 = vand.u32 4294901760, %v16468_v21 }
 0x51e   : >> { %23364 = vmatprep.mubr.f32.mxu0 %v27675_v56  ;;  %v16458_v56 = vsub.f32 %v27857_v50, %v16457_v15 }
 0x51f   : >> { %v12247_v53 = vpop.f32.mrf.mxu0  ;;  %v22963_v16 = vpop.f32.mrf.mxu1  ;;  %23378 = vmatmul.mubr.f32.vlgmr.msra.gmra.mxu1 %v27699_v44 }
 0x520   : >> { %v12363_v52 = vadd.f32 %v12362_v43, %v12247_v53  ;;  %23400 = vmatpush3.msra.mxu1 %v16548_v9  ;;  %23380 = vmatprep.mubr.f32.mxu1 %v27703_v32  ;;  %v16459_v1 = vand.u32 4294901760, %v16458_v56  ;;  %v16497_v9 = vand.u32 4294901760, %v27901_v29 }
 0x521   : >> { %v22950_v18 = vpop.f32.mrf.mxu0  ;;  %23365 = vmatmul.mubr.f32.vlgmr.msra.gmra.mxu0 %v27699_v44  ;;  %v12554_v46 = vpop.f32.mrf.mxu1  ;;  %23401 = vmatprep.subr.mxu1 %v16555_v8  ;;  %v16477_v44 = vand.u32 4294901760, %v27880_v31 }
 0x522   : >> { %v12452_v34 = vadd.f32 %v22950_v18, %v12345_v45  ;;  %23387 = vmatpush3.msra.mxu0 %v27776_v4  ;;  %23367 = vmatprep.mubr.f32.mxu0 %v27703_v32  ;;  %v16487_v45 = vand.u32 4294901760, %v27893_v54  ;;  %v16498_v5 = vsub.f32 %v27901_v29, %v16497_v9  ;;  %v20597_v18 = vld [vmem:[%s28673_s3 + $0x150] sm:$0xff] }
 0x523   : >> { %v12444_v59 = vpop.f32.mrf.mxu0  ;;  %v22966_v58 = vpop.f32.mrf.mxu1  ;;  %23381 = vmatmul.mubr.f32.gmra.mxu1 %v27716_v13  ;;  %23388 = vmatprep.subr.mxu0 %v27796_v49 }
 0x524   : >> { %v12563_v28 = vadd.f32 %v22963_v16, %v12452_v34  ;;  %v12445_v0 = vadd.f32 %v12444_v59, %v12339_v57  ;;  %23389 = vmatpush3.msra.mxu0 %v27796_v49  ;;  %23383 = vmatprep.mubr.f32.mxu1 %v27722_v41  ;;  %v16488_v60 = vsub.f32 %v27893_v54, %v16487_v45 }
 0x525   : >> { %v22953_v14 = vpop.f32.mrf.mxu0  ;;  %23368 = vmatmul.mubr.f32.gmra.mxu0 %v27716_v13  ;;  %v12570_v32 = vpop.f32.mrf.mxu1  ;;  %23402 = vmatpush3.msra.mxu1 %v16555_v8  ;;  %v16478_v13 = vsub.f32 %v27880_v31, %v16477_v44 }
 0x526   : >> { %v12555_v20 = vadd.f32 %v12554_v46, %v12445_v0  ;;  %v12466_v27 = vadd.f32 %v22953_v14, %v12357_v12  ;;  %23370 = vmatprep.mubr.f32.mxu0 %v27722_v41  ;;  %23412 = vmatprep.subr.mxu0 %v27791_v25  ;;  %v20598_v41 = vld [vmem:[%s28673_s3 + $0x158] sm:$0xff]  ;;  %v16507_v12 = vand.u32 4294901760, %v27913_v30  ;;  %v16489_v8 = vand.u32 4294901760, %v16488_v60  ;;  %v20592_v60 = vld [vmem:[%s24836_s8 + $0x69] sm:$0xff] }
 0x527   : >> { %v12458_v2 = vpop.f32.mrf.mxu0  ;;  %v22969_v22 = vpop.f32.mrf.mxu1  ;;  %23384 = vmatmul.mubr.f32.gmra.mxu1 %v27735_v26  ;;  %23425 = vmatprep.subr.mxu1 %v27776_v4  ;;  %v16479_v42 = vand.u32 4294901760, %v16478_v13  ;;  %v27936_v48 = vand.u32 4294901760, %v20598_v41  ;;  %v27956_v14 = vand.u32 4294901760, %v20597_v18  ;;  %v20591_v13 = vld [vmem:[%s24836_s8 + $0x61] sm:$0xff] }
 0x528   : >> { %v12579_v57 = vadd.f32 %v22966_v58, %v12466_v27  ;;  %23403 = vmatprep.mubr.f32.mxu1 %v27835_v62  ;;  %v16508_v6 = vsub.f32 %v27913_v30, %v16507_v12 }
 0x529   : >> { %v22956_v17 = vpop.f32.mrf.mxu0  ;;  %23371 = vmatmul.mubr.f32.gmra.mxu0 %v27735_v26  ;;  %v12586_v23 = vpop.f32.mrf.mxu1  ;;  %v27951_v34 = vsub.f32 %v20598_v41, %v27936_v48  ;;  %v27974_v41 = vsub.f32 %v20597_v18, %v27956_v14 }
 0x52a   : >> { %23390 = vmatprep.mubr.f32.mxu0 %v16459_v1  ;;  %v16509_v0 = vand.u32 4294901760, %v16508_v6 }
 0x52b   : >> { %v12472_v61 = vpop.f32.mrf.mxu0  ;;  %v22989_v40 = vpop.f32.mrf.mxu1  ;;  %23404 = vmatmul.mubr.f32.vlgmr.msra.gmra.mxu1 %v27859_v39  ;;  %v27965_v27 = vand.u32 4294901760, %v27951_v34 }
 0x52c   : >> { %v12473_v26 = vadd.f32 %v12472_v61, %v12363_v52  ;;  %23426 = vmatpush3.msra.mxu1 %v27776_v4  ;;  %23406 = vmatprep.mubr.f32.mxu1 %v27863_v7  ;;  %v16499_v52 = vand.u32 4294901760, %v16498_v5 }
 0x52d   : >> { %v22976_v37 = vpop.f32.mrf.mxu0  ;;  %23391 = vmatmul.mubr.f32.vlgmr.msra.gmra.mxu0 %v16469_v3  ;;  %v12774_v43 = vpop.f32.mrf.mxu1  ;;  %23427 = vmatprep.subr.mxu1 %v27796_v49 }
 0x52e   : >> { %v12587_v53 = vadd.f32 %v12586_v23, %v12473_v26  ;;  %v12678_v16 = vadd.f32 %v22976_v37, %v12563_v28  ;;  %23413 = vmatpush3.msra.mxu0 %v27791_v25  ;;  %23393 = vmatprep.mubr.f32.mxu0 %v16479_v42  ;;  %v17080_v23 = vsel %vm225_vm0, %v20591_v13, 0 }
 0x52f   : >> { %v12671_v46 = vpop.f32.mrf.mxu0  ;;  %v22992_v56 = vpop.f32.mrf.mxu1  ;;  %23407 = vmatmul.mubr.f32.gmra.mxu1 %v27876_v33  ;;  %23414 = vmatprep.subr.mxu0 %v27814_v24  ;;  %v27995_v61 = vand.u32 4294901760, %v17080_v23 }
 0x530   : >> { %v12781_v59 = vadd.f32 %v22989_v40, %v12678_v16  ;;  %v12672_v58 = vadd.f32 %v12671_v46, %v12555_v20  ;;  %23415 = vmatpush3.msra.mxu0 %v27814_v24  ;;  %23409 = vmatprep.mubr.f32.mxu1 %v27882_v38 }
 0x531   : >> { %v22979_v25 = vpop.f32.mrf.mxu0  ;;  %23394 = vmatmul.mubr.f32.gmra.mxu0 %v16489_v8  ;;  %v12786_v28 = vpop.f32.mrf.mxu1  ;;  %23428 = vmatpush3.msra.mxu1 %v27796_v49  ;;  %v20594_v8 = vld [vmem:[%s24836_s8 + $0x79] sm:$0xff] }
 0x532   : >> { %v27959_v32 = vadd.f32 %v12781_v59, %v27799_v63  ;;  %v12775_v1 = vadd.f32 %v12774_v43, %v12672_v58  ;;  %v12690_v21 = vadd.f32 %v22979_v25, %v12579_v57  ;;  %23396 = vmatprep.mubr.f32.mxu0 %v16499_v52  ;;  %23438 = vmatprep.subr.mxu0 %v27805_v11 }
 0x533   : >> { %v12683_v24 = vpop.f32.mrf.mxu0  ;;  %v22995_v20 = vpop.f32.mrf.mxu1  ;;  %23410 = vmatmul.mubr.f32.gmra.mxu1 %v27895_v19  ;;  %23451 = vmatprep.subr.mxu1 %v27776_v4 }
 0x534   : >> { %v27969_v2 = vadd.f32 %v12775_v1, %v27809_v36  ;;  %v12793_v63 = vadd.f32 %v22992_v56, %v12690_v21  ;;  %23429 = vmatprep.mubr.f32.mxu1 %v16457_v15  ;;  %v17256_v15 = vsub.f32 %v27951_v34, %v27965_v27  ;;  %v20596_v56 = vld [vmem:[%s24836_s8 + $0x89] sm:$0xff] }
 0x535   : >> { %v22982_v22 = vpop.f32.mrf.mxu0  ;;  %23397 = vmatmul.mubr.f32.gmra.mxu0 %v16509_v0  ;;  %v12798_v57 = vpop.f32.mrf.mxu1  ;;  %v17095_v21 = vsel %vm225_vm0, %v20596_v56, 0 }
 0x536   : >> { %v27977_v17 = vadd.f32 %v12793_v63, %v27817_v55  ;;  %23416 = vmatprep.mubr.f32.mxu0 %v27857_v50  ;;  %v20593_v55 = vld [vmem:[%s24836_s8 + $0x71] sm:$0xff]  ;;  %v17257_v37 = vand.u32 4294901760, %v17256_v15 }
 0x537   : >> { %v12695_v36 = vpop.f32.mrf.mxu0  ;;  %v23015_v3 = vpop.f32.mrf.mxu1  ;;  %23430 = vmatmul.mubr.f32.vlgmr.msra.gmra.mxu1 %v16467_v51  ;;  %v27993_v51 = vand.u32 4294901760, %v27974_v41  ;;  %v17086_v43 = vsel %vm225_vm0, %v20593_v55, 0 }
 0x538   : >> { %v12696_v42 = vadd.f32 %v12695_v36, %v12587_v53  ;;  %23452 = vmatpush3.msra.mxu1 %v27776_v4  ;;  %23432 = vmatprep.mubr.f32.mxu1 %v16477_v44  ;;  %v17083_v4 = vsel %vm225_vm0, %v20592_v60, 0 }
 0x539   : >> { %v23002_v5 = vpop.f32.mrf.mxu0  ;;  %23417 = vmatmul.mubr.f32.vlgmr.msra.gmra.mxu0 %v27874_v35  ;;  %v13047_v50 = vpop.f32.mrf.mxu1  ;;  %23453 = vmatprep.subr.mxu1 %v27796_v49  ;;  %v17263_v16 = vsub.f32 %v27974_v41, %v27993_v51  ;;  %v28019_v52 = vand.u32 4294901760, %v17083_v4 }
 0x53a   : >> { %v12799_v40 = vadd.f32 %v12798_v57, %v12696_v42  ;;  %v13054_v26 = vadd.f32 %v23015_v3, %v23002_v5  ;;  %23439 = vmatpush3.msra.mxu0 %v27805_v11  ;;  %23419 = vmatprep.mubr.f32.mxu0 %v27880_v31  ;;  %v20595_v11 = vld [vmem:[%s24836_s8 + $0x81] sm:$0xff] }
 0x53b   : >> { %v12916_v44 = vpop.f32.mrf.mxu0  ;;  %v23018_v35 = vpop.f32.mrf.mxu1  ;;  %23433 = vmatmul.mubr.f32.gmra.mxu1 %v16487_v45  ;;  %23440 = vmatprep.subr.mxu0 %v27833_v47  ;;  %v17264_v58 = vand.u32 4294901760, %v17263_v16  ;;  %v28034_v28 = vsub.f32 %v17083_v4, %v28019_v52 }
 0x53c   : >> { %v28006_v6 = vadd.f32 %v12799_v40, %v27846_v10  ;;  %v13048_v53 = vadd.f32 %v13047_v50, %v12916_v44  ;;  %23441 = vmatpush3.msra.mxu0 %v27833_v47  ;;  %23435 = vmatprep.mubr.f32.mxu1 %v16497_v9  ;;  %v28017_v10 = vsub.f32 %v17080_v23, %v27995_v61  ;;  %v28023_v9 = vand.u32 4294901760, %v17086_v43 }
 0x53d   : >> { %v23005_v31 = vpop.f32.mrf.mxu0  ;;  %23420 = vmatmul.mubr.f32.gmra.mxu0 %v27893_v54  ;;  %v13059_v45 = vpop.f32.mrf.mxu1  ;;  %23454 = vmatpush3.msra.mxu1 %v27796_v49  ;;  %v17089_v54 = vsel %vm225_vm0, %v20594_v8, 0  ;;  %v17092_v49 = vsel %vm225_vm0, %v20595_v11, 0  ;;  %v17176_v22 = vand.u32 4294901760, %v28034_v28  ;;  %v28055_v23 = vand.u32 4294901760, %v17095_v21 }
 0x53e   : >> { %v13066_v47 = vadd.f32 %v23018_v35, %v23005_v31  ;;  %23422 = vmatprep.mubr.f32.mxu0 %v27901_v29  ;;  %23464 = vmatprep.subr.mxu0 %v27936_v48  ;;  %v17166_v25 = vand.u32 4294901760, %v28017_v10  ;;  %v28036_v0 = vand.u32 4294901760, %v17089_v54  ;;  %v28042_v1 = vand.u32 4294901760, %v17092_v49 }
 0x53f   : >> { %v12936_v18 = vpop.f32.mrf.mxu0  ;;  %v23021_v46 = vpop.f32.mrf.mxu1  ;;  %23436 = vmatmul.mubr.f32.gmra.mxu1 %v16507_v12  ;;  %23477 = vmatprep.subr.mxu1 %v17257_v37  ;;  %v28040_v12 = vsub.f32 %v17086_v43, %v28023_v9  ;;  %v17177_v40 = vsub.f32 %v28034_v28, %v17176_v22  ;;  %v28073_v4 = vsub.f32 %v17095_v21, %v28055_v23 }
 0x540   : >> { %23455 = vmatprep.mubr.f32.mxu1 %v27835_v62  ;;  %v28053_v57 = vsub.f32 %v17089_v54, %v28036_v0  ;;  %v28061_v3 = vsub.f32 %v17092_v49, %v28042_v1 }
 0x541   : >> { %v23008_v59 = vpop.f32.mrf.mxu0  ;;  %23423 = vmatmul.mubr.f32.gmra.mxu0 %v27913_v30  ;;  %v13071_v29 = vpop.f32.mrf.mxu1  ;;  %v17178_v45 = vand.u32 4294901760, %v17177_v40 }
 0x542   : >> { %23442 = vmatprep.mubr.f32.mxu0 %v27835_v62  ;;  %v17167_v62 = vsub.f32 %v28017_v10, %v17166_v25 }
 0x543   : >> { %v12956_v24 = vpop.f32.mrf.mxu0  ;;  %v23041_v30 = vpop.f32.mrf.mxu1  ;;  %23456 = vmatmul.mubr.f32.vlgmr.msra.gmra.mxu1 %v27859_v39 }
 0x544   : >> { %v13072_v20 = vadd.f32 %v13071_v29, %v12956_v24  ;;  %23478 = vmatpush3.msra.mxu1 %v17257_v37  ;;  %23458 = vmatprep.mubr.f32.mxu1 %v27863_v7  ;;  %v17168_v50 = vand.u32 4294901760, %v17167_v62  ;;  %v17206_v37 = vand.u32 4294901760, %v28061_v3 }
 0x545   : >> { %v23028_v13 = vpop.f32.mrf.mxu0  ;;  %23443 = vmatmul.mubr.f32.vlgmr.msra.gmra.mxu0 %v27859_v39  ;;  %v13263_v63 = vpop.f32.mrf.mxu1  ;;  %23479 = vmatprep.subr.mxu1 %v17264_v58  ;;  %v17186_v39 = vand.u32 4294901760, %v28040_v12 }
 0x546   : >> { %v13161_v36 = vadd.f32 %v23028_v13, %v13054_v26  ;;  %23465 = vmatpush3.msra.mxu0 %v27936_v48  ;;  %23445 = vmatprep.mubr.f32.mxu0 %v27863_v7  ;;  %v17196_v26 = vand.u32 4294901760, %v28053_v57  ;;  %v17207_v18 = vsub.f32 %v28061_v3, %v17206_v37  ;;  %v20605_v13 = vld [vmem:[%s28673_s3 + $0x160] sm:$0xff] }
 0x547   : >> { %v13153_v15 = vpop.f32.mrf.mxu0  ;;  %v23044_v60 = vpop.f32.mrf.mxu1  ;;  %23459 = vmatmul.mubr.f32.gmra.mxu1 %v27876_v33  ;;  %23466 = vmatprep.subr.mxu0 %v27956_v14 }
 0x548   : >> { %v13272_v42 = vadd.f32 %v23041_v30, %v13161_v36  ;;  %v13154_v55 = vadd.f32 %v13153_v15, %v13048_v53  ;;  %23467 = vmatpush3.msra.mxu0 %v27956_v14  ;;  %23461 = vmatprep.mubr.f32.mxu1 %v27882_v38  ;;  %v17197_v16 = vsub.f32 %v28053_v57, %v17196_v26 }
 0x549   : >> { %v23031_v5 = vpop.f32.mrf.mxu0  ;;  %23446 = vmatmul.mubr.f32.gmra.mxu0 %v27876_v33  ;;  %v13279_v7 = vpop.f32.mrf.mxu1  ;;  %23480 = vmatpush3.msra.mxu1 %v17264_v58  ;;  %v17187_v33 = vsub.f32 %v28040_v12, %v17186_v39 }
 0x54a   : >> { %v13264_v44 = vadd.f32 %v13263_v63, %v13154_v55  ;;  %v13175_v35 = vadd.f32 %v23031_v5, %v13066_v47  ;;  %23448 = vmatprep.mubr.f32.mxu0 %v27882_v38  ;;  %23490 = vmatprep.subr.mxu0 %v27951_v34  ;;  %v20606_v38 = vld [vmem:[%s28673_s3 + $0x168] sm:$0xff]  ;;  %v17216_v47 = vand.u32 4294901760, %v28073_v4  ;;  %v17198_v58 = vand.u32 4294901760, %v17197_v16 }
 0x54b   : >> { %v13167_v43 = vpop.f32.mrf.mxu0  ;;  %v23047_v8 = vpop.f32.mrf.mxu1  ;;  %23462 = vmatmul.mubr.f32.gmra.mxu1 %v27895_v19  ;;  %23503 = vmatprep.subr.mxu1 %v27936_v48  ;;  %v17188_v54 = vand.u32 4294901760, %v17187_v33  ;;  %v28096_v56 = vand.u32 4294901760, %v20606_v38  ;;  %v28116_v5 = vand.u32 4294901760, %v20605_v13  ;;  %v20599_v33 = vld [vmem:[%s24836_s8 + $0x62] sm:$0xff]  ;;  %v20600_v16 = vld [vmem:[%s24836_s8 + $0x6a] sm:$0xff] }
 0x54c   : >> { %v13288_v53 = vadd.f32 %v23044_v60, %v13175_v35  ;;  %23481 = vmatprep.mubr.f32.mxu1 %v27995_v61  ;;  %v17217_v21 = vsub.f32 %v28073_v4, %v17216_v47 }
 0x54d   : >> { %v23034_v11 = vpop.f32.mrf.mxu0  ;;  %23449 = vmatmul.mubr.f32.gmra.mxu0 %v27895_v19  ;;  %v13295_v31 = vpop.f32.mrf.mxu1  ;;  %v28111_v36 = vsub.f32 %v20606_v38, %v28096_v56  ;;  %v28134_v38 = vsub.f32 %v20605_v13, %v28116_v5 }
 0x54e   : >> { %23468 = vmatprep.mubr.f32.mxu0 %v17168_v50  ;;  %v17218_v55 = vand.u32 4294901760, %v17217_v21 }
 0x54f   : >> { %v13181_v46 = vpop.f32.mrf.mxu0  ;;  %v23067_v49 = vpop.f32.mrf.mxu1  ;;  %23482 = vmatmul.mubr.f32.vlgmr.msra.gmra.mxu1 %v28019_v52  ;;  %v28125_v35 = vand.u32 4294901760, %v28111_v36 }
 0x550   : >> { %v13182_v19 = vadd.f32 %v13181_v46, %v13072_v20  ;;  %23504 = vmatpush3.msra.mxu1 %v27936_v48  ;;  %23484 = vmatprep.mubr.f32.mxu1 %v28023_v9  ;;  %v17208_v20 = vand.u32 4294901760, %v17207_v18 }
 0x551   : >> { %v23054_v59 = vpop.f32.mrf.mxu0  ;;  %23469 = vmatmul.mubr.f32.vlgmr.msra.gmra.mxu0 %v17178_v45  ;;  %v13483_v29 = vpop.f32.mrf.mxu1  ;;  %23505 = vmatprep.subr.mxu1 %v27956_v14 }
 0x552   : >> { %v13296_v24 = vadd.f32 %v13295_v31, %v13182_v19  ;;  %v13387_v30 = vadd.f32 %v23054_v59, %v13272_v42  ;;  %23491 = vmatpush3.msra.mxu0 %v27951_v34  ;;  %23471 = vmatprep.mubr.f32.mxu0 %v17188_v54  ;;  %v17789_v31 = vsel %vm225_vm0, %v20599_v33, 0 }
 0x553   : >> { %v13380_v63 = vpop.f32.mrf.mxu0  ;;  %v23070_v62 = vpop.f32.mrf.mxu1  ;;  %23485 = vmatmul.mubr.f32.gmra.mxu1 %v28036_v0  ;;  %23492 = vmatprep.subr.mxu0 %v27974_v41  ;;  %v28155_v46 = vand.u32 4294901760, %v17789_v31 }
 0x554   : >> { %v13490_v15 = vadd.f32 %v23067_v49, %v13387_v30  ;;  %v13381_v60 = vadd.f32 %v13380_v63, %v13264_v44  ;;  %23493 = vmatpush3.msra.mxu0 %v27974_v41  ;;  %23487 = vmatprep.mubr.f32.mxu1 %v28042_v1 }
 0x555   : >> { %v23057_v34 = vpop.f32.mrf.mxu0  ;;  %23472 = vmatmul.mubr.f32.gmra.mxu0 %v17198_v58  ;;  %v13495_v42 = vpop.f32.mrf.mxu1  ;;  %23506 = vmatpush3.msra.mxu1 %v27956_v14  ;;  %v20602_v58 = vld [vmem:[%s24836_s8 + $0x7a] sm:$0xff] }
 0x556   : >> { %v28119_v7 = vadd.f32 %v13490_v15, %v27959_v32  ;;  %v13484_v50 = vadd.f32 %v13483_v29, %v13381_v60  ;;  %v13399_v40 = vadd.f32 %v23057_v34, %v13288_v53  ;;  %23474 = vmatprep.mubr.f32.mxu0 %v17208_v20  ;;  %23516 = vmatprep.subr.mxu0 %v27965_v27 }
 0x557   : >> { %v13392_v41 = vpop.f32.mrf.mxu0  ;;  %v23073_v44 = vpop.f32.mrf.mxu1  ;;  %23488 = vmatmul.mubr.f32.gmra.mxu1 %v28055_v23  ;;  %23529 = vmatprep.subr.mxu1 %v27936_v48 }
 0x558   : >> { %v28129_v43 = vadd.f32 %v13484_v50, %v27969_v2  ;;  %v13502_v32 = vadd.f32 %v23070_v62, %v13399_v40  ;;  %23507 = vmatprep.mubr.f32.mxu1 %v17166_v25  ;;  %v17965_v25 = vsub.f32 %v28111_v36, %v28125_v35  ;;  %v20604_v62 = vld [vmem:[%s24836_s8 + $0x8a] sm:$0xff] }
 0x559   : >> { %v23060_v8 = vpop.f32.mrf.mxu0  ;;  %23475 = vmatmul.mubr.f32.gmra.mxu0 %v17218_v55  ;;  %v13507_v53 = vpop.f32.mrf.mxu1  ;;  %v17804_v40 = vsel %vm225_vm0, %v20604_v62, 0 }
 0x55a   : >> { %v28137_v11 = vadd.f32 %v13502_v32, %v27977_v17  ;;  %23494 = vmatprep.mubr.f32.mxu0 %v28017_v10  ;;  %v20601_v17 = vld [vmem:[%s24836_s8 + $0x72] sm:$0xff]  ;;  %v17966_v59 = vand.u32 4294901760, %v17965_v25 }
 0x55b   : >> { %v13404_v2 = vpop.f32.mrf.mxu0  ;;  %v23093_v45 = vpop.f32.mrf.mxu1  ;;  %23508 = vmatmul.mubr.f32.vlgmr.msra.gmra.mxu1 %v17176_v22  ;;  %v28153_v22 = vand.u32 4294901760, %v28134_v38  ;;  %v17795_v29 = vsel %vm225_vm0, %v20601_v17, 0 }
 0x55c   : >> { %v13405_v54 = vadd.f32 %v13404_v2, %v13296_v24  ;;  %23530 = vmatpush3.msra.mxu1 %v27936_v48  ;;  %23510 = vmatprep.mubr.f32.mxu1 %v17186_v39  ;;  %v17792_v48 = vsel %vm225_vm0, %v20600_v16, 0 }
 0x55d   : >> { %v23080_v18 = vpop.f32.mrf.mxu0  ;;  %23495 = vmatmul.mubr.f32.vlgmr.msra.gmra.mxu0 %v28034_v28  ;;  %v13756_v10 = vpop.f32.mrf.mxu1  ;;  %23531 = vmatprep.subr.mxu1 %v27956_v14  ;;  %v17972_v30 = vsub.f32 %v28134_v38, %v28153_v22  ;;  %v28179_v20 = vand.u32 4294901760, %v17792_v48 }
 0x55e   : >> { %v13508_v49 = vadd.f32 %v13507_v53, %v13405_v54  ;;  %v13763_v19 = vadd.f32 %v23093_v45, %v23080_v18  ;;  %23517 = vmatpush3.msra.mxu0 %v27965_v27  ;;  %23497 = vmatprep.mubr.f32.mxu0 %v28040_v12  ;;  %v20603_v27 = vld [vmem:[%s24836_s8 + $0x82] sm:$0xff] }
 0x55f   : >> { %v13625_v39 = vpop.f32.mrf.mxu0  ;;  %v23096_v28 = vpop.f32.mrf.mxu1  ;;  %23511 = vmatmul.mubr.f32.gmra.mxu1 %v17196_v26  ;;  %23518 = vmatprep.subr.mxu0 %v27993_v51  ;;  %v17973_v60 = vand.u32 4294901760, %v17972_v30  ;;  %v28194_v42 = vsub.f32 %v17792_v48, %v28179_v20 }
 0x560   : >> { %v28166_v21 = vadd.f32 %v13508_v49, %v28006_v6  ;;  %v13757_v24 = vadd.f32 %v13756_v10, %v13625_v39  ;;  %23519 = vmatpush3.msra.mxu0 %v27993_v51  ;;  %23513 = vmatprep.mubr.f32.mxu1 %v17206_v37  ;;  %v28177_v6 = vsub.f32 %v17789_v31, %v28155_v46  ;;  %v28183_v37 = vand.u32 4294901760, %v17795_v29 }
 0x561   : >> { %v23083_v12 = vpop.f32.mrf.mxu0  ;;  %23498 = vmatmul.mubr.f32.gmra.mxu0 %v28053_v57  ;;  %v13768_v26 = vpop.f32.mrf.mxu1  ;;  %23532 = vmatpush3.msra.mxu1 %v27956_v14  ;;  %v17798_v57 = vsel %vm225_vm0, %v20602_v58, 0  ;;  %v17801_v14 = vsel %vm225_vm0, %v20603_v27, 0  ;;  %v17885_v8 = vand.u32 4294901760, %v28194_v42  ;;  %v28215_v31 = vand.u32 4294901760, %v17804_v40 }
 0x562   : >> { %v13775_v51 = vadd.f32 %v23096_v28, %v23083_v12  ;;  %23500 = vmatprep.mubr.f32.mxu0 %v28061_v3  ;;  %23542 = vmatprep.subr.mxu0 %v28096_v56  ;;  %v17875_v34 = vand.u32 4294901760, %v28177_v6  ;;  %v28196_v55 = vand.u32 4294901760, %v17798_v57  ;;  %v28202_v50 = vand.u32 4294901760, %v17801_v14 }
 0x563   : >> { %v13645_v13 = vpop.f32.mrf.mxu0  ;;  %v23099_v63 = vpop.f32.mrf.mxu1  ;;  %23514 = vmatmul.mubr.f32.gmra.mxu1 %v17216_v47  ;;  %23555 = vmatprep.subr.mxu1 %v17966_v59  ;;  %v28200_v47 = vsub.f32 %v17795_v29, %v28183_v37  ;;  %v17886_v49 = vsub.f32 %v28194_v42, %v17885_v8  ;;  %v28233_v48 = vsub.f32 %v17804_v40, %v28215_v31 }
 0x564   : >> { %23533 = vmatprep.mubr.f32.mxu1 %v27995_v61  ;;  %v28213_v53 = vsub.f32 %v17798_v57, %v28196_v55  ;;  %v28221_v45 = vsub.f32 %v17801_v14, %v28202_v50 }
 0x565   : >> { %v23086_v15 = vpop.f32.mrf.mxu0  ;;  %23501 = vmatmul.mubr.f32.gmra.mxu0 %v28073_v4  ;;  %v13780_v3 = vpop.f32.mrf.mxu1  ;;  %v17887_v26 = vand.u32 4294901760, %v17886_v49 }
 0x566   : >> { %23520 = vmatprep.mubr.f32.mxu0 %v27995_v61  ;;  %v17876_v61 = vsub.f32 %v28177_v6, %v17875_v34 }
 0x567   : >> { %v13665_v41 = vpop.f32.mrf.mxu0  ;;  %v23119_v4 = vpop.f32.mrf.mxu1  ;;  %23534 = vmatmul.mubr.f32.vlgmr.msra.gmra.mxu1 %v28019_v52 }
 0x568   : >> { %v13781_v44 = vadd.f32 %v13780_v3, %v13665_v41  ;;  %23556 = vmatpush3.msra.mxu1 %v17966_v59  ;;  %23536 = vmatprep.mubr.f32.mxu1 %v28023_v9  ;;  %v17877_v10 = vand.u32 4294901760, %v17876_v61  ;;  %v17915_v59 = vand.u32 4294901760, %v28221_v45 }
 0x569   : >> { %v23106_v33 = vpop.f32.mrf.mxu0  ;;  %23521 = vmatmul.mubr.f32.vlgmr.msra.gmra.mxu0 %v28019_v52  ;;  %v13972_v32 = vpop.f32.mrf.mxu1  ;;  %23557 = vmatprep.subr.mxu1 %v17973_v60  ;;  %v17895_v52 = vand.u32 4294901760, %v28200_v47 }
 0x56a   : >> { %v13870_v2 = vadd.f32 %v23106_v33, %v13763_v19  ;;  %23543 = vmatpush3.msra.mxu0 %v28096_v56  ;;  %23523 = vmatprep.mubr.f32.mxu0 %v28023_v9  ;;  %v17905_v19 = vand.u32 4294901760, %v28213_v53  ;;  %v17916_v13 = vsub.f32 %v28221_v45, %v17915_v59  ;;  %v20613_v33 = vld [vmem:[%s28673_s3 + $0x170] sm:$0xff] }
 0x56b   : >> { %v13862_v25 = vpop.f32.mrf.mxu0  ;;  %v23122_v16 = vpop.f32.mrf.mxu1  ;;  %23537 = vmatmul.mubr.f32.gmra.mxu1 %v28036_v0  ;;  %23544 = vmatprep.subr.mxu0 %v28116_v5 }
 0x56c   : >> { %v13981_v54 = vadd.f32 %v23119_v4, %v13870_v2  ;;  %v13863_v17 = vadd.f32 %v13862_v25, %v13757_v24  ;;  %23545 = vmatpush3.msra.mxu0 %v28116_v5  ;;  %23539 = vmatprep.mubr.f32.mxu1 %v28042_v1  ;;  %v17906_v30 = vsub.f32 %v28213_v53, %v17905_v19 }
 0x56d   : >> { %v23109_v18 = vpop.f32.mrf.mxu0  ;;  %23524 = vmatmul.mubr.f32.gmra.mxu0 %v28036_v0  ;;  %v13988_v9 = vpop.f32.mrf.mxu1  ;;  %23558 = vmatpush3.msra.mxu1 %v17973_v60  ;;  %v17896_v0 = vsub.f32 %v28200_v47, %v17895_v52 }
 0x56e   : >> { %v13973_v39 = vadd.f32 %v13972_v32, %v13863_v17  ;;  %v13884_v28 = vadd.f32 %v23109_v18, %v13775_v51  ;;  %23526 = vmatprep.mubr.f32.mxu0 %v28042_v1  ;;  %23568 = vmatprep.subr.mxu0 %v28111_v36  ;;  %v20614_v1 = vld [vmem:[%s28673_s3 + $0x178] sm:$0xff]  ;;  %v17925_v51 = vand.u32 4294901760, %v28233_v48  ;;  %v17907_v60 = vand.u32 4294901760, %v17906_v30  ;;  %v20608_v30 = vld [vmem:[%s24836_s8 + $0x6b] sm:$0xff] }
 0x56f   : >> { %v13876_v29 = vpop.f32.mrf.mxu0  ;;  %v23125_v58 = vpop.f32.mrf.mxu1  ;;  %23540 = vmatmul.mubr.f32.gmra.mxu1 %v28055_v23  ;;  %23581 = vmatprep.subr.mxu1 %v28096_v56  ;;  %v17897_v57 = vand.u32 4294901760, %v17896_v0  ;;  %v28256_v62 = vand.u32 4294901760, %v20614_v1  ;;  %v28276_v18 = vand.u32 4294901760, %v20613_v33  ;;  %v20607_v0 = vld [vmem:[%s24836_s8 + $0x63] sm:$0xff] }
 0x570   : >> { %v13997_v24 = vadd.f32 %v23122_v16, %v13884_v28  ;;  %23559 = vmatprep.mubr.f32.mxu1 %v28155_v46  ;;  %v17926_v40 = vsub.f32 %v28233_v48, %v17925_v51 }
 0x571   : >> { %v23112_v27 = vpop.f32.mrf.mxu0  ;;  %23527 = vmatmul.mubr.f32.gmra.mxu0 %v28055_v23  ;;  %v14004_v12 = vpop.f32.mrf.mxu1  ;;  %v28271_v2 = vsub.f32 %v20614_v1, %v28256_v62  ;;  %v28294_v1 = vsub.f32 %v20613_v33, %v28276_v18 }
 0x572   : >> { %23546 = vmatprep.mubr.f32.mxu0 %v17877_v10  ;;  %v17927_v17 = vand.u32 4294901760, %v17926_v40 }
 0x573   : >> { %v13890_v63 = vpop.f32.mrf.mxu0  ;;  %v23145_v14 = vpop.f32.mrf.mxu1  ;;  %23560 = vmatmul.mubr.f32.vlgmr.msra.gmra.mxu1 %v28179_v20  ;;  %v28285_v28 = vand.u32 4294901760, %v28271_v2 }
 0x574   : >> { %v13891_v23 = vadd.f32 %v13890_v63, %v13781_v44  ;;  %23582 = vmatpush3.msra.mxu1 %v28096_v56  ;;  %23562 = vmatprep.mubr.f32.mxu1 %v28183_v37  ;;  %v17917_v44 = vand.u32 4294901760, %v17916_v13 }
 0x575   : >> { %v23132_v15 = vpop.f32.mrf.mxu0  ;;  %23547 = vmatmul.mubr.f32.vlgmr.msra.gmra.mxu0 %v17887_v26  ;;  %v14192_v3 = vpop.f32.mrf.mxu1  ;;  %23583 = vmatprep.subr.mxu1 %v28116_v5 }
 0x576   : >> { %v14005_v41 = vadd.f32 %v14004_v12, %v13891_v23  ;;  %v14096_v4 = vadd.f32 %v23132_v15, %v13981_v54  ;;  %23569 = vmatpush3.msra.mxu0 %v28111_v36  ;;  %23549 = vmatprep.mubr.f32.mxu0 %v17897_v57  ;;  %v18498_v12 = vsel %vm225_vm0, %v20607_v0, 0 }
 0x577   : >> { %v14089_v32 = vpop.f32.mrf.mxu0  ;;  %v23148_v61 = vpop.f32.mrf.mxu1  ;;  %23563 = vmatmul.mubr.f32.gmra.mxu1 %v28196_v55  ;;  %23570 = vmatprep.subr.mxu0 %v28134_v38  ;;  %v28315_v63 = vand.u32 4294901760, %v18498_v12 }
 0x578   : >> { %v14199_v25 = vadd.f32 %v23145_v14, %v14096_v4  ;;  %v14090_v16 = vadd.f32 %v14089_v32, %v13973_v39  ;;  %23571 = vmatpush3.msra.mxu0 %v28134_v38  ;;  %23565 = vmatprep.mubr.f32.mxu1 %v28202_v50 }
 0x579   : >> { %v23135_v36 = vpop.f32.mrf.mxu0  ;;  %23550 = vmatmul.mubr.f32.gmra.mxu0 %v17907_v60  ;;  %v14204_v54 = vpop.f32.mrf.mxu1  ;;  %23584 = vmatpush3.msra.mxu1 %v28116_v5  ;;  %v20610_v60 = vld [vmem:[%s24836_s8 + $0x7b] sm:$0xff] }
 0x57a   : >> { %v28279_v9 = vadd.f32 %v14199_v25, %v28119_v7  ;;  %v14193_v10 = vadd.f32 %v14192_v3, %v14090_v16  ;;  %v14108_v49 = vadd.f32 %v23135_v36, %v13997_v24  ;;  %23552 = vmatprep.mubr.f32.mxu0 %v17917_v44  ;;  %23594 = vmatprep.subr.mxu0 %v28125_v35 }
 0x57b   : >> { %v14101_v38 = vpop.f32.mrf.mxu0  ;;  %v23151_v39 = vpop.f32.mrf.mxu1  ;;  %23566 = vmatmul.mubr.f32.gmra.mxu1 %v28215_v31  ;;  %23607 = vmatprep.subr.mxu1 %v28096_v56 }
 0x57c   : >> { %v28289_v29 = vadd.f32 %v14193_v10, %v28129_v43  ;;  %v14211_v7 = vadd.f32 %v23148_v61, %v14108_v49  ;;  %23585 = vmatprep.mubr.f32.mxu1 %v17875_v34  ;;  %v18674_v34 = vsub.f32 %v28271_v2, %v28285_v28  ;;  %v20612_v61 = vld [vmem:[%s24836_s8 + $0x8b] sm:$0xff] }
 0x57d   : >> { %v23138_v58 = vpop.f32.mrf.mxu0  ;;  %23553 = vmatmul.mubr.f32.gmra.mxu0 %v17927_v17  ;;  %v14216_v24 = vpop.f32.mrf.mxu1  ;;  %v18513_v49 = vsel %vm225_vm0, %v20612_v61, 0 }
 0x57e   : >> { %v28297_v27 = vadd.f32 %v14211_v7, %v28137_v11  ;;  %23572 = vmatprep.mubr.f32.mxu0 %v28177_v6  ;;  %v20609_v11 = vld [vmem:[%s24836_s8 + $0x73] sm:$0xff]  ;;  %v18675_v15 = vand.u32 4294901760, %v18674_v34 }
 0x57f   : >> { %v14113_v43 = vpop.f32.mrf.mxu0  ;;  %v23171_v26 = vpop.f32.mrf.mxu1  ;;  %23586 = vmatmul.mubr.f32.vlgmr.msra.gmra.mxu1 %v17885_v8  ;;  %v28313_v8 = vand.u32 4294901760, %v28294_v1  ;;  %v18504_v3 = vsel %vm225_vm0, %v20609_v11, 0 }
 0x580   : >> { %v14114_v57 = vadd.f32 %v14113_v43, %v14005_v41  ;;  %23608 = vmatpush3.msra.mxu1 %v28096_v56  ;;  %23588 = vmatprep.mubr.f32.mxu1 %v17895_v52  ;;  %v18501_v56 = vsel %vm225_vm0, %v20608_v30, 0 }
 0x581   : >> { %v23158_v13 = vpop.f32.mrf.mxu0  ;;  %23573 = vmatmul.mubr.f32.vlgmr.msra.gmra.mxu0 %v28194_v42  ;;  %v14465_v6 = vpop.f32.mrf.mxu1  ;;  %23609 = vmatprep.subr.mxu1 %v28116_v5  ;;  %v18681_v4 = vsub.f32 %v28294_v1, %v28313_v8  ;;  %v28339_v44 = vand.u32 4294901760, %v18501_v56 }
 0x582   : >> { %v14217_v14 = vadd.f32 %v14216_v24, %v14114_v57  ;;  %v14472_v23 = vadd.f32 %v23171_v26, %v23158_v13  ;;  %23595 = vmatpush3.msra.mxu0 %v28125_v35  ;;  %23575 = vmatprep.mubr.f32.mxu0 %v28200_v47  ;;  %v20611_v35 = vld [vmem:[%s24836_s8 + $0x83] sm:$0xff] }
 0x583   : >> { %v14334_v52 = vpop.f32.mrf.mxu0  ;;  %v23174_v42 = vpop.f32.mrf.mxu1  ;;  %23589 = vmatmul.mubr.f32.gmra.mxu1 %v17905_v19  ;;  %23596 = vmatprep.subr.mxu0 %v28153_v22  ;;  %v18682_v16 = vand.u32 4294901760, %v18681_v4  ;;  %v28354_v54 = vsub.f32 %v18501_v56, %v28339_v44 }
 0x584   : >> { %v28326_v40 = vadd.f32 %v14217_v14, %v28166_v21  ;;  %v14466_v41 = vadd.f32 %v14465_v6, %v14334_v52  ;;  %23597 = vmatpush3.msra.mxu0 %v28153_v22  ;;  %23591 = vmatprep.mubr.f32.mxu1 %v17915_v59  ;;  %v28337_v21 = vsub.f32 %v18498_v12, %v28315_v63  ;;  %v28343_v59 = vand.u32 4294901760, %v18504_v3 }
 0x585   : >> { %v23161_v47 = vpop.f32.mrf.mxu0  ;;  %23576 = vmatmul.mubr.f32.gmra.mxu0 %v28213_v53  ;;  %v14477_v19 = vpop.f32.mrf.mxu1  ;;  %23610 = vmatpush3.msra.mxu1 %v28116_v5  ;;  %v18507_v53 = vsel %vm225_vm0, %v20610_v60, 0  ;;  %v18510_v5 = vsel %vm225_vm0, %v20611_v35, 0  ;;  %v18594_v58 = vand.u32 4294901760, %v28354_v54  ;;  %v28375_v12 = vand.u32 4294901760, %v18513_v49 }
 0x586   : >> { %v14484_v22 = vadd.f32 %v23174_v42, %v23161_v47  ;;  %23578 = vmatprep.mubr.f32.mxu0 %v28221_v45  ;;  %23620 = vmatprep.subr.mxu0 %v28256_v62  ;;  %v18584_v36 = vand.u32 4294901760, %v28337_v21  ;;  %v28356_v17 = vand.u32 4294901760, %v18507_v53  ;;  %v28362_v10 = vand.u32 4294901760, %v18510_v5 }
 0x587   : >> { %v14354_v33 = vpop.f32.mrf.mxu0  ;;  %v23177_v32 = vpop.f32.mrf.mxu1  ;;  %23592 = vmatmul.mubr.f32.gmra.mxu1 %v17925_v51  ;;  %23633 = vmatprep.subr.mxu1 %v18675_v15  ;;  %v28360_v51 = vsub.f32 %v18504_v3, %v28343_v59  ;;  %v18595_v14 = vsub.f32 %v28354_v54, %v18594_v58  ;;  %v28393_v56 = vsub.f32 %v18513_v49, %v28375_v12 }
 0x588   : >> { %23611 = vmatprep.mubr.f32.mxu1 %v28155_v46  ;;  %v28373_v24 = vsub.f32 %v18507_v53, %v28356_v17  ;;  %v28381_v26 = vsub.f32 %v18510_v5, %v28362_v10 }
 0x589   : >> { %v23164_v25 = vpop.f32.mrf.mxu0  ;;  %23579 = vmatmul.mubr.f32.gmra.mxu0 %v28233_v48  ;;  %v14489_v45 = vpop.f32.mrf.mxu1  ;;  %v18596_v19 = vand.u32 4294901760, %v18595_v14 }
 0x58a   : >> { %23598 = vmatprep.mubr.f32.mxu0 %v28155_v46  ;;  %v18585_v46 = vsub.f32 %v28337_v21, %v18584_v36 }
 0x58b   : >> { %v14374_v38 = vpop.f32.mrf.mxu0  ;;  %v23197_v48 = vpop.f32.mrf.mxu1  ;;  %23612 = vmatmul.mubr.f32.vlgmr.msra.gmra.mxu1 %v28179_v20 }
 0x58c   : >> { %v14490_v39 = vadd.f32 %v14489_v45, %v14374_v38  ;;  %23634 = vmatpush3.msra.mxu1 %v18675_v15  ;;  %23614 = vmatprep.mubr.f32.mxu1 %v28183_v37  ;;  %v18586_v6 = vand.u32 4294901760, %v18585_v46  ;;  %v18624_v15 = vand.u32 4294901760, %v28381_v26 }
 0x58d   : >> { %v23184_v0 = vpop.f32.mrf.mxu0  ;;  %23599 = vmatmul.mubr.f32.vlgmr.msra.gmra.mxu0 %v28179_v20  ;;  %v14681_v7 = vpop.f32.mrf.mxu1  ;;  %23635 = vmatprep.subr.mxu1 %v18682_v16  ;;  %v18604_v20 = vand.u32 4294901760, %v28360_v51 }
 0x58e   : >> { %v14579_v43 = vadd.f32 %v23184_v0, %v14472_v23  ;;  %23621 = vmatpush3.msra.mxu0 %v28256_v62  ;;  %23601 = vmatprep.mubr.f32.mxu0 %v28183_v37  ;;  %v18614_v23 = vand.u32 4294901760, %v28373_v24  ;;  %v18625_v33 = vsub.f32 %v28381_v26, %v18624_v15  ;;  %v20621_v0 = vld [vmem:[%s28673_s3 + $0x180] sm:$0xff] }
 0x58f   : >> { %v14571_v34 = vpop.f32.mrf.mxu0  ;;  %v23200_v30 = vpop.f32.mrf.mxu1  ;;  %23615 = vmatmul.mubr.f32.gmra.mxu1 %v28196_v55  ;;  %23622 = vmatprep.subr.mxu0 %v28276_v18 }
 0x590   : >> { %v14690_v57 = vadd.f32 %v23197_v48, %v14579_v43  ;;  %v14572_v11 = vadd.f32 %v14571_v34, %v14466_v41  ;;  %23623 = vmatpush3.msra.mxu0 %v28276_v18  ;;  %23617 = vmatprep.mubr.f32.mxu1 %v28202_v50  ;;  %v18615_v4 = vsub.f32 %v28373_v24, %v18614_v23 }
 0x591   : >> { %v23187_v13 = vpop.f32.mrf.mxu0  ;;  %23602 = vmatmul.mubr.f32.gmra.mxu0 %v28196_v55  ;;  %v14697_v37 = vpop.f32.mrf.mxu1  ;;  %23636 = vmatpush3.msra.mxu1 %v18682_v16  ;;  %v18605_v55 = vsub.f32 %v28360_v51, %v18604_v20 }
 0x592   : >> { %v14682_v52 = vadd.f32 %v14681_v7, %v14572_v11  ;;  %v14593_v42 = vadd.f32 %v23187_v13, %v14484_v22  ;;  %23604 = vmatprep.mubr.f32.mxu0 %v28202_v50  ;;  %23646 = vmatprep.subr.mxu0 %v28271_v2  ;;  %v20622_v50 = vld [vmem:[%s28673_s3 + $0x188] sm:$0xff]  ;;  %v18634_v22 = vand.u32 4294901760, %v28393_v56  ;;  %v18616_v16 = vand.u32 4294901760, %v18615_v4 }
 0x593   : >> { %v14585_v3 = vpop.f32.mrf.mxu0  ;;  %v23203_v60 = vpop.f32.mrf.mxu1  ;;  %23618 = vmatmul.mubr.f32.gmra.mxu1 %v28215_v31  ;;  %23659 = vmatprep.subr.mxu1 %v28256_v62  ;;  %v18606_v53 = vand.u32 4294901760, %v18605_v55  ;;  %v28416_v61 = vand.u32 4294901760, %v20622_v50  ;;  %v28436_v13 = vand.u32 4294901760, %v20621_v0  ;;  %v20615_v55 = vld [vmem:[%s24836_s8 + $0x64] sm:$0xff]  ;;  %v20616_v4 = vld [vmem:[%s24836_s8 + $0x6c] sm:$0xff] }
 0x594   : >> { %v14706_v41 = vadd.f32 %v23200_v30, %v14593_v42  ;;  %23637 = vmatprep.mubr.f32.mxu1 %v28315_v63  ;;  %v18635_v49 = vsub.f32 %v28393_v56, %v18634_v22 }
 0x595   : >> { %v23190_v35 = vpop.f32.mrf.mxu0  ;;  %23605 = vmatmul.mubr.f32.gmra.mxu0 %v28215_v31  ;;  %v14713_v47 = vpop.f32.mrf.mxu1  ;;  %v28431_v43 = vsub.f32 %v20622_v50, %v28416_v61  ;;  %v28454_v50 = vsub.f32 %v20621_v0, %v28436_v13 }
 0x596   : >> { %23624 = vmatprep.mubr.f32.mxu0 %v18586_v6  ;;  %v18636_v11 = vand.u32 4294901760, %v18635_v49 }
 0x597   : >> { %v14599_v32 = vpop.f32.mrf.mxu0  ;;  %v23223_v5 = vpop.f32.mrf.mxu1  ;;  %23638 = vmatmul.mubr.f32.vlgmr.msra.gmra.mxu1 %v28339_v44  ;;  %v28445_v42 = vand.u32 4294901760, %v28431_v43 }
 0x598   : >> { %v14600_v31 = vadd.f32 %v14599_v32, %v14490_v39  ;;  %23660 = vmatpush3.msra.mxu1 %v28256_v62  ;;  %23640 = vmatprep.mubr.f32.mxu1 %v28343_v59  ;;  %v18626_v39 = vand.u32 4294901760, %v18625_v33 }
 0x599   : >> { %v23210_v25 = vpop.f32.mrf.mxu0  ;;  %23625 = vmatmul.mubr.f32.vlgmr.msra.gmra.mxu0 %v18596_v19  ;;  %v14901_v45 = vpop.f32.mrf.mxu1  ;;  %23661 = vmatprep.subr.mxu1 %v28276_v18 }
 0x59a   : >> { %v14714_v38 = vadd.f32 %v14713_v47, %v14600_v31  ;;  %v14805_v48 = vadd.f32 %v23210_v25, %v14690_v57  ;;  %23647 = vmatpush3.msra.mxu0 %v28271_v2  ;;  %23627 = vmatprep.mubr.f32.mxu0 %v18606_v53  ;;  %v19207_v47 = vsel %vm225_vm0, %v20615_v55, 0 }
 0x59b   : >> { %v14798_v7 = vpop.f32.mrf.mxu0  ;;  %v23226_v46 = vpop.f32.mrf.mxu1  ;;  %23641 = vmatmul.mubr.f32.gmra.mxu1 %v28356_v17  ;;  %23648 = vmatprep.subr.mxu0 %v28294_v1  ;;  %v28475_v32 = vand.u32 4294901760, %v19207_v47 }
 0x59c   : >> { %v14908_v34 = vadd.f32 %v23223_v5, %v14805_v48  ;;  %v14799_v30 = vadd.f32 %v14798_v7, %v14682_v52  ;;  %23649 = vmatpush3.msra.mxu0 %v28294_v1  ;;  %23643 = vmatprep.mubr.f32.mxu1 %v28362_v10 }
 0x59d   : >> { %v23213_v2 = vpop.f32.mrf.mxu0  ;;  %23628 = vmatmul.mubr.f32.gmra.mxu0 %v18616_v16  ;;  %v14913_v57 = vpop.f32.mrf.mxu1  ;;  %23662 = vmatpush3.msra.mxu1 %v28276_v18  ;;  %v20618_v16 = vld [vmem:[%s24836_s8 + $0x7c] sm:$0xff] }
 0x59e   : >> { %v28439_v37 = vadd.f32 %v14908_v34, %v28279_v9  ;;  %v14902_v6 = vadd.f32 %v14901_v45, %v14799_v30  ;;  %v14817_v14 = vadd.f32 %v23213_v2, %v14706_v41  ;;  %23630 = vmatprep.mubr.f32.mxu0 %v18626_v39  ;;  %23672 = vmatprep.subr.mxu0 %v28285_v28 }
 0x59f   : >> { %v14810_v1 = vpop.f32.mrf.mxu0  ;;  %v23229_v52 = vpop.f32.mrf.mxu1  ;;  %23644 = vmatmul.mubr.f32.gmra.mxu1 %v28375_v12  ;;  %23685 = vmatprep.subr.mxu1 %v28256_v62 }
 0x5a0   : >> { %v28449_v3 = vadd.f32 %v14902_v6, %v28289_v29  ;;  %v14920_v9 = vadd.f32 %v23226_v46, %v14817_v14  ;;  %23663 = vmatprep.mubr.f32.mxu1 %v18584_v36  ;;  %v19383_v36 = vsub.f32 %v28431_v43, %v28445_v42  ;;  %v20620_v46 = vld [vmem:[%s24836_s8 + $0x8c] sm:$0xff] }
 0x5a1   : >> { %v23216_v60 = vpop.f32.mrf.mxu0  ;;  %23631 = vmatmul.mubr.f32.gmra.mxu0 %v18636_v11  ;;  %v14925_v41 = vpop.f32.mrf.mxu1  ;;  %v19222_v14 = vsel %vm225_vm0, %v20620_v46, 0 }
 0x5a2   : >> { %v28457_v35 = vadd.f32 %v14920_v9, %v28297_v27  ;;  %23650 = vmatprep.mubr.f32.mxu0 %v28337_v21  ;;  %v20617_v27 = vld [vmem:[%s24836_s8 + $0x74] sm:$0xff]  ;;  %v19384_v25 = vand.u32 4294901760, %v19383_v36 }
 0x5a3   : >> { %v14822_v29 = vpop.f32.mrf.mxu0  ;;  %v23249_v19 = vpop.f32.mrf.mxu1  ;;  %23664 = vmatmul.mubr.f32.vlgmr.msra.gmra.mxu1 %v18594_v58  ;;  %v28473_v58 = vand.u32 4294901760, %v28454_v50  ;;  %v19213_v45 = vsel %vm225_vm0, %v20617_v27, 0 }
 0x5a4   : >> { %v14823_v53 = vadd.f32 %v14822_v29, %v14714_v38  ;;  %23686 = vmatpush3.msra.mxu1 %v28256_v62  ;;  %23666 = vmatprep.mubr.f32.mxu1 %v18604_v20  ;;  %v19210_v62 = vsel %vm225_vm0, %v20616_v4, 0 }
 0x5a5   : >> { %v23236_v33 = vpop.f32.mrf.mxu0  ;;  %23651 = vmatmul.mubr.f32.vlgmr.msra.gmra.mxu0 %v28354_v54  ;;  %v15174_v21 = vpop.f32.mrf.mxu1  ;;  %23687 = vmatprep.subr.mxu1 %v28276_v18  ;;  %v19390_v48 = vsub.f32 %v28454_v50, %v28473_v58  ;;  %v28499_v39 = vand.u32 4294901760, %v19210_v62 }
 0x5a6   : >> { %v14926_v5 = vadd.f32 %v14925_v41, %v14823_v53  ;;  %v15181_v31 = vadd.f32 %v23249_v19, %v23236_v33  ;;  %23673 = vmatpush3.msra.mxu0 %v28285_v28  ;;  %23653 = vmatprep.mubr.f32.mxu0 %v28360_v51  ;;  %v20619_v28 = vld [vmem:[%s24836_s8 + $0x84] sm:$0xff]  ;;  %s19933_s8 = smul.u32 7, %s23828_s23  ;;  %s2191_s23 = sadd.s32 1, %s23828_s23  }
 0x5a7   : >> { %v15043_v20 = vpop.f32.mrf.mxu0  ;;  %v23252_v54 = vpop.f32.mrf.mxu1  ;;  %23667 = vmatmul.mubr.f32.gmra.mxu1 %v18614_v23  ;;  %23674 = vmatprep.subr.mxu0 %v28313_v8  ;;  %v19391_v30 = vand.u32 4294901760, %v19390_v48  ;;  %v28514_v57 = vsub.f32 %v19210_v62, %v28499_v39  ;;  %p2188_p5 = scmp.ge.s32.totalorder %s2191_s23, 7  }
 0x5a8   : >> { %v28486_v49 = vadd.f32 %v14926_v5, %v28326_v40  ;;  %v15175_v38 = vadd.f32 %v15174_v21, %v15043_v20  ;;  %23675 = vmatpush3.msra.mxu0 %v28313_v8  ;;  %23669 = vmatprep.mubr.f32.mxu1 %v18624_v15  ;;  %v28497_v40 = vsub.f32 %v19207_v47, %v28475_v32  ;;  %v28503_v15 = vand.u32 4294901760, %v19213_v45  ;;  %s19934_s19 = scalar_lea.vmem %s23955_s7, %s19933_s8 }
 0x5a9   : >> { %v23239_v51 = vpop.f32.mrf.mxu0  ;;  %23654 = vmatmul.mubr.f32.gmra.mxu0 %v28373_v24  ;;  %v15186_v23 = vpop.f32.mrf.mxu1  ;;  %23688 = vmatpush3.msra.mxu1 %v28276_v18  ;;  %v19216_v24 = vsel %vm225_vm0, %v20618_v16, 0  ;;  %v19219_v18 = vsel %vm225_vm0, %v20619_v28, 0  ;;  %v19303_v60 = vand.u32 4294901760, %v28514_v57  ;;  %v28535_v47 = vand.u32 4294901760, %v19222_v14 }
 0x5aa   : >> { %v15193_v8 = vadd.f32 %v23252_v54, %v23239_v51  ;;  %23656 = vmatprep.mubr.f32.mxu0 %v28381_v26  ;;  %23698 = vmatprep.subr.mxu0 %v28416_v61  ;;  %v19293_v2 = vand.u32 4294901760, %v28497_v40  ;;  %v28516_v11 = vand.u32 4294901760, %v19216_v24  ;;  %v28522_v6 = vand.u32 4294901760, %v19219_v18 }
 0x5ab   : >> { %v15063_v0 = vpop.f32.mrf.mxu0  ;;  %v23255_v7 = vpop.f32.mrf.mxu1  ;;  %23670 = vmatmul.mubr.f32.gmra.mxu1 %v18634_v22  ;;  %23711 = vmatprep.subr.mxu1 %v19384_v25  ;;  %v28520_v22 = vsub.f32 %v19213_v45, %v28503_v15  ;;  %v19304_v5 = vsub.f32 %v28514_v57, %v19303_v60  ;;  %v28553_v62 = vsub.f32 %v19222_v14, %v28535_v47 }
 0x5ac   : >> { %23689 = vmatprep.mubr.f32.mxu1 %v28315_v63  ;;  %v28533_v41 = vsub.f32 %v19216_v24, %v28516_v11  ;;  %v28541_v19 = vsub.f32 %v19219_v18, %v28522_v6 }
 0x5ad   : >> { %v23242_v34 = vpop.f32.mrf.mxu0  ;;  %23657 = vmatmul.mubr.f32.gmra.mxu0 %v28393_v56  ;;  %v15198_v26 = vpop.f32.mrf.mxu1  ;;  %v19305_v51 = vand.u32 4294901760, %v19304_v5  ;;  %v19343_v48 = vand.u32 4294901760, %v28553_v62 }
 0x5ae   : >> { %23676 = vmatprep.mubr.f32.mxu0 %v28315_v63  ;;  %v19294_v63 = vsub.f32 %v28497_v40, %v19293_v2 }
 0x5af   : >> { %v15083_v1 = vpop.f32.mrf.mxu0  ;;  %v23275_v56 = vpop.f32.mrf.mxu1  ;;  %23690 = vmatmul.mubr.f32.vlgmr.msra.gmra.mxu1 %v28339_v44 }
 0x5b0   : >> { %v15199_v52 = vadd.f32 %v15198_v26, %v15083_v1  ;;  %23712 = vmatpush3.msra.mxu1 %v19384_v25  ;;  %23692 = vmatprep.mubr.f32.mxu1 %v28343_v59  ;;  %v19295_v21 = vand.u32 4294901760, %v19294_v63  ;;  %v19333_v25 = vand.u32 4294901760, %v28541_v19  ;;  %v19344_v26 = vsub.f32 %v28553_v62, %v19343_v48 }
 0x5b1   : >> { %v23262_v55 = vpop.f32.mrf.mxu0  ;;  %23677 = vmatmul.mubr.f32.vlgmr.msra.gmra.mxu0 %v28339_v44  ;;  %v15390_v9 = vpop.f32.mrf.mxu1  ;;  %23713 = vmatprep.subr.mxu1 %v19391_v30  ;;  %v19313_v44 = vand.u32 4294901760, %v28520_v22 }
 0x5b2   : >> { %v15288_v29 = vadd.f32 %v23262_v55, %v15181_v31  ;;  %23699 = vmatpush3.msra.mxu0 %v28416_v61  ;;  %23679 = vmatprep.mubr.f32.mxu0 %v28343_v59  ;;  %v19323_v31 = vand.u32 4294901760, %v28533_v41  ;;  %v19334_v24 = vsub.f32 %v28541_v19, %v19333_v25 }
 0x5b3   : >> { %v15280_v36 = vpop.f32.mrf.mxu0  ;;  %v23278_v4 = vpop.f32.mrf.mxu1  ;;  %23693 = vmatmul.mubr.f32.gmra.mxu1 %v28356_v17  ;;  %23700 = vmatprep.subr.mxu0 %v28436_v13 }
 0x5b4   : >> { %v15399_v53 = vadd.f32 %v23275_v56, %v15288_v29  ;;  %v15281_v27 = vadd.f32 %v15280_v36, %v15175_v38  ;;  %23701 = vmatpush3.msra.mxu0 %v28436_v13  ;;  %23695 = vmatprep.mubr.f32.mxu1 %v28362_v10  ;;  %v19324_v23 = vsub.f32 %v28533_v41, %v19323_v31  ;;  %v19335_v1 = vand.u32 4294901760, %v19334_v24 }
 0x5b5   : >> { %v23265_v33 = vpop.f32.mrf.mxu0  ;;  %23680 = vmatmul.mubr.f32.gmra.mxu0 %v28356_v17  ;;  %v15406_v59 = vpop.f32.mrf.mxu1  ;;  %23714 = vmatpush3.msra.mxu1 %v19391_v30  ;;  %v19314_v17 = vsub.f32 %v28520_v22, %v19313_v44  ;;  %v19345_v36 = vand.u32 4294901760, %v19344_v26 }
 0x5b6   : >> { %v15391_v20 = vadd.f32 %v15390_v9, %v15281_v27  ;;  %v15302_v54 = vadd.f32 %v23265_v33, %v15193_v8  ;;  %23682 = vmatprep.mubr.f32.mxu0 %v28362_v10  ;;  %23724 = vmatprep.subr.mxu0 %v28431_v43  ;;  %v19325_v34 = vand.u32 4294901760, %v19324_v23 }
 0x5b7   : >> { %v15294_v45 = vpop.f32.mrf.mxu0  ;;  %v23281_v16 = vpop.f32.mrf.mxu1  ;;  %23696 = vmatmul.mubr.f32.gmra.mxu1 %v28375_v12  ;;  %23737 = vmatprep.subr.mxu1 %v28416_v61  ;;  %v19315_v8 = vand.u32 4294901760, %v19314_v17 }
 0x5b8   : >> { %v15415_v38 = vadd.f32 %v23278_v4, %v15302_v54  ;;  %23715 = vmatprep.mubr.f32.mxu1 %v28475_v32 }
 0x5b9   : >> { %v23268_v28 = vpop.f32.mrf.mxu0  ;;  %23683 = vmatmul.mubr.f32.gmra.mxu0 %v28375_v12  ;;  %v15422_v10 = vpop.f32.mrf.mxu1 }
 0x5ba   : >> { %23702 = vmatprep.mubr.f32.mxu0 %v19295_v21 }
 0x5bb   : >> { %v15308_v0 = vpop.f32.mrf.mxu0  ;;  %v23301_v7 = vpop.f32.mrf.mxu1  ;;  %23716 = vmatmul.mubr.f32.vlgmr.msra.gmra.mxu1 %v28499_v39 }
 0x5bc   : >> { %v15309_v18 = vadd.f32 %v15308_v0, %v15199_v52  ;;  %23738 = vmatpush3.msra.mxu1 %v28416_v61  ;;  %23718 = vmatprep.mubr.f32.mxu1 %v28503_v15 }
 0x5bd   : >> { %v23288_v12 = vpop.f32.mrf.mxu0  ;;  %23703 = vmatmul.mubr.f32.vlgmr.msra.gmra.mxu0 %v19305_v51  ;;  %v15610_v46 = vpop.f32.mrf.mxu1  ;;  %23739 = vmatprep.subr.mxu1 %v28436_v13 }
 0x5be   : >> { %v15423_v30 = vadd.f32 %v15422_v10, %v15309_v18  ;;  %v15514_v14 = vadd.f32 %v23288_v12, %v15399_v53  ;;  %23725 = vmatpush3.msra.mxu0 %v28431_v43  ;;  %23705 = vmatprep.mubr.f32.mxu0 %v19315_v8 }
 0x5bf   : >> { %v15507_v56 = vpop.f32.mrf.mxu0  ;;  %v23304_v52 = vpop.f32.mrf.mxu1  ;;  %23719 = vmatmul.mubr.f32.gmra.mxu1 %v28516_v11  ;;  %23726 = vmatprep.subr.mxu0 %v28454_v50 }
 0x5c0   : >> { %v15617_v55 = vadd.f32 %v23301_v7, %v15514_v14  ;;  %v15508_v9 = vadd.f32 %v15507_v56, %v15391_v20  ;;  %23727 = vmatpush3.msra.mxu0 %v28454_v50  ;;  %23721 = vmatprep.mubr.f32.mxu1 %v28522_v6 }
 0x5c1   : >> { %v23291_v63 = vpop.f32.mrf.mxu0  ;;  %23706 = vmatmul.mubr.f32.gmra.mxu0 %v19325_v34  ;;  %v15622_v29 = vpop.f32.mrf.mxu1  ;;  %23740 = vmatpush3.msra.mxu1 %v28436_v13 }
 0x5c2   : >> { %v28586_v43 = vadd.f32 %v15617_v55, %v28439_v37  ;;  %v15611_v4 = vadd.f32 %v15610_v46, %v15508_v9  ;;  %v15526_v53 = vadd.f32 %v23291_v63, %v15415_v38  ;;  %23708 = vmatprep.mubr.f32.mxu0 %v19335_v1  ;;  %23750 = vmatprep.subr.mxu0 %v28445_v42 }
 0x5c3   : >> { %v15519_v27 = vpop.f32.mrf.mxu0  ;;  %v23307_v33 = vpop.f32.mrf.mxu1  ;;  %23722 = vmatmul.mubr.f32.gmra.mxu1 %v28535_v47  ;;  %23763 = vmatprep.subr.mxu1 %v28416_v61 }
 0x5c4   : >> { %v28592_v50 = vadd.f32 %v15611_v4, %v28449_v3  ;;  %v15629_v59 = vadd.f32 %v23304_v52, %v15526_v53  ;;  %23741 = vmatprep.mubr.f32.mxu1 %v19293_v2 }
 0x5c5   : >> { %v23294_v37 = vpop.f32.mrf.mxu0  ;;  %23709 = vmatmul.mubr.f32.gmra.mxu0 %v19345_v36  ;;  %v15634_v21 = vpop.f32.mrf.mxu1 }
 0x5c6   : >> { %v28597_v5 = vadd.f32 %v15629_v59, %v28457_v35  ;;  %23728 = vmatprep.mubr.f32.mxu0 %v28497_v40 }
 0x5c7   : >> { %v15531_v20 = vpop.f32.mrf.mxu0  ;;  %v23327_v54 = vpop.f32.mrf.mxu1  ;;  %23742 = vmatmul.mubr.f32.vlgmr.msra.gmra.mxu1 %v19303_v60 }
 0x5c8   : >> { %v15532_v17 = vadd.f32 %v15531_v20, %v15423_v30  ;;  %23764 = vmatpush3.msra.mxu1 %v28416_v61  ;;  %23744 = vmatprep.mubr.f32.mxu1 %v19313_v44 }
 0x5c9   : >> { %v23314_v3 = vpop.f32.mrf.mxu0  ;;  %23729 = vmatmul.mubr.f32.vlgmr.msra.gmra.mxu0 %v28514_v57  ;;  %v15883_v2 = vpop.f32.mrf.mxu1  ;;  %23765 = vmatprep.subr.mxu1 %v28436_v13 }
 0x5ca   : >> { %v15635_v35 = vadd.f32 %v15634_v21, %v15532_v17  ;;  %v15890_v45 = vadd.f32 %v23327_v54, %v23314_v3  ;;  %23751 = vmatpush3.msra.mxu0 %v28445_v42  ;;  %23731 = vmatprep.mubr.f32.mxu0 %v28520_v22 }
 0x5cb   : >> { %v15752_v40 = vpop.f32.mrf.mxu0  ;;  %v23330_v60 = vpop.f32.mrf.mxu1  ;;  %23745 = vmatmul.mubr.f32.gmra.mxu1 %v19323_v31  ;;  %23752 = vmatprep.subr.mxu0 %v28473_v58 }
 0x5cc   : >> { %v28613_v61 = vadd.f32 %v15635_v35, %v28486_v49  ;;  %v15884_v57 = vadd.f32 %v15883_v2, %v15752_v40  ;;  %23753 = vmatpush3.msra.mxu0 %v28473_v58  ;;  %23747 = vmatprep.mubr.f32.mxu1 %v19333_v25 }
 0x5cd   : >> { %v23317_v44 = vpop.f32.mrf.mxu0  ;;  %23732 = vmatmul.mubr.f32.gmra.mxu0 %v28533_v41  ;;  %v15895_v42 = vpop.f32.mrf.mxu1  ;;  %23766 = vmatpush3.msra.mxu1 %v28436_v13 }
 0x5ce   : >> { %v15902_v22 = vadd.f32 %v23330_v60, %v23317_v44  ;;  %23734 = vmatprep.mubr.f32.mxu0 %v28541_v19 }
 0x5cf   : >> { %v15772_v31 = vpop.f32.mrf.mxu0  ;;  %v23333_v16 = vpop.f32.mrf.mxu1  ;;  %23748 = vmatmul.mubr.f32.gmra.mxu1 %v19343_v48 }
 0x5d0   : >> { %23767 = vmatprep.mubr.f32.mxu1 %v28475_v32 }
 0x5d1   : >> { %v23320_v58 = vpop.f32.mrf.mxu0  ;;  %23735 = vmatmul.mubr.f32.gmra.mxu0 %v28553_v62  ;;  %v15907_v49 = vpop.f32.mrf.mxu1 }
 0x5d2   : >> { %23754 = vmatprep.mubr.f32.mxu0 %v28475_v32 }
 0x5d3   : >> { %v15792_v41 = vpop.f32.mrf.mxu0  ;;  %v23353_v25 = vpop.f32.mrf.mxu1  ;;  %23768 = vmatmul.mubr.f32.vlgmr.msra.gmra.mxu1 %v28499_v39 }
 0x5d4   : >> { %v15908_v13 = vadd.f32 %v15907_v49, %v15792_v41  ;;  %23770 = vmatprep.mubr.f32.mxu1 %v28503_v15 }
 0x5d5   : >> { %v23340_v19 = vpop.f32.mrf.mxu0  ;;  %23755 = vmatmul.mubr.f32.vlgmr.msra.gmra.mxu0 %v28499_v39  ;;  %v16099_v38 = vpop.f32.mrf.mxu1 }
 0x5d6   : >> { %v15997_v28 = vadd.f32 %v23340_v19, %v15890_v45  ;;  %23757 = vmatprep.mubr.f32.mxu0 %v28503_v15 }
 0x5d7   : >> { %v15989_v10 = vpop.f32.mrf.mxu0  ;;  %v23356_v51 = vpop.f32.mrf.mxu1  ;;  %23771 = vmatmul.mubr.f32.gmra.mxu1 %v28516_v11 }
 0x5d8   : >> { %v16108_v62 = vadd.f32 %v23353_v25, %v15997_v28  ;;  %v15990_v32 = vadd.f32 %v15989_v10, %v15884_v57  ;;  %23773 = vmatprep.mubr.f32.mxu1 %v28522_v6 }
 0x5d9   : >> { %v23343_v23 = vpop.f32.mrf.mxu0  ;;  %23758 = vmatmul.mubr.f32.gmra.mxu0 %v28516_v11  ;;  %v16115_v48 = vpop.f32.mrf.mxu1 }
 0x5da   : >> { %v16100_v8 = vadd.f32 %v16099_v38, %v15990_v32  ;;  %v16011_v24 = vadd.f32 %v23343_v23, %v15902_v22  ;;  %23760 = vmatprep.mubr.f32.mxu0 %v28522_v6 }
 0x5db   : >> { %v16003_v39 = vpop.f32.mrf.mxu0  ;;  %v23359_v0 = vpop.f32.mrf.mxu1  ;;  %23774 = vmatmul.mubr.f32.gmra.mxu1 %v28535_v47 }
 0x5dc   : >> { %v16124_v15 = vadd.f32 %v23356_v51, %v16011_v24 }
 0x5dd   : >> { %v23346_v7 = vpop.f32.mrf.mxu0  ;;  %23761 = vmatmul.mubr.f32.gmra.mxu0 %v28535_v47  ;;  %v16131_v18 = vpop.f32.mrf.mxu1 }
 0x5df   : >> { %v16017_v12 = vpop.f32.mrf.mxu0  ;;  %v23379_v46 = vpop.f32.mrf.mxu1 }
 0x5e0   : >> { %v16018_v34 = vadd.f32 %v16017_v12, %v15908_v13 }
 0x5e1   : >> { %v23366_v26 = vpop.f32.mrf.mxu0  ;;  %v16319_v30 = vpop.f32.mrf.mxu1 }
 0x5e2   : >> { %v16132_v11 = vadd.f32 %v16131_v18, %v16018_v34  ;;  %v16223_v14 = vadd.f32 %v23366_v26, %v16108_v62 }
 0x5e3   : >> { %v16216_v1 = vpop.f32.mrf.mxu0  ;;  %v23382_v56 = vpop.f32.mrf.mxu1 }
 0x5e4   : >> { %v16326_v52 = vadd.f32 %v23379_v46, %v16223_v14  ;;  %v16217_v6 = vadd.f32 %v16216_v1, %v16100_v8 }
 0x5e5   : >> { %v23369_v55 = vpop.f32.mrf.mxu0  ;;  %v16331_v9 = vpop.f32.mrf.mxu1 }
 0x5e6   : >> { %v16354_v63 = vadd.f32 %v16326_v52, %v28586_v43  ;;  %v16320_v29 = vadd.f32 %v16319_v30, %v16217_v6  ;;  %v16235_v36 = vadd.f32 %v23369_v55, %v16124_v15 }
 0x5e7   : >> { %v16228_v4 = vpop.f32.mrf.mxu0  ;;  %v23385_v47 = vpop.f32.mrf.mxu1 }
 0x5e8   : >> { %v16353_v53 = vadd.f32 %v16320_v29, %v28592_v50  ;;  %v16338_v27 = vadd.f32 %v23382_v56, %v16235_v36 }
 0x5e9   : >> { %v23372_v33 = vpop.f32.mrf.mxu0  ;;  %v16343_v59 = vpop.f32.mrf.mxu1 }
 0x5ea   : >> { %v16356_v37 = vadd.f32 %v16338_v27, %v28597_v5 }
 0x5eb   : >> { %v16240_v21 = vpop.f32.mrf.mxu0  ;;  %v23405_v20 = vpop.f32.mrf.mxu1 }
 0x5ec   : >> { %v16241_v54 = vadd.f32 %v16240_v21, %v16132_v11 }
 0x5ed   : >> { %v23392_v17 = vpop.f32.mrf.mxu0  ;;  %v16592_v3 = vpop.f32.mrf.mxu1 }
 0x5ee   : >> { %v16344_v2 = vadd.f32 %v16343_v59, %v16241_v54  ;;  %v16599_v35 = vadd.f32 %v23405_v20, %v23392_v17 }
 0x5ef   : >> { %v16461_v45 = vpop.f32.mrf.mxu0  ;;  %v23408_v43 = vpop.f32.mrf.mxu1 }
 0x5f0   : >> { %v16357_v40 = vadd.f32 %v16344_v2, %v28613_v61  ;;  %v16593_v60 = vadd.f32 %v16592_v3, %v16461_v45 }
 0x5f1   : >> { %v23395_v57 = vpop.f32.mrf.mxu0  ;;  %v16604_v44 = vpop.f32.mrf.mxu1 }
 0x5f2   : >> { %v16611_v50 = vadd.f32 %v23408_v43, %v23395_v57 }
 0x5f3   : >> { %v16481_v42 = vpop.f32.mrf.mxu0  ;;  %v23411_v22 = vpop.f32.mrf.mxu1 }
 0x5f5   : >> { %v23398_v31 = vpop.f32.mrf.mxu0  ;;  %v16616_v16 = vpop.f32.mrf.mxu1 }
 0x5f7   : >> { %v16501_v5 = vpop.f32.mrf.mxu0  ;;  %v23431_v58 = vpop.f32.mrf.mxu1 }
 0x5f8   : >> { %v16617_v49 = vadd.f32 %v16616_v16, %v16501_v5 }
 0x5f9   : >> { %v23418_v41 = vpop.f32.mrf.mxu0  ;;  %v16808_v25 = vpop.f32.mrf.mxu1 }
 0x5fa   : >> { %v16706_v13 = vadd.f32 %v23418_v41, %v16599_v35 }
 0x5fb   : >> { %v16698_v19 = vpop.f32.mrf.mxu0  ;;  %v23434_v38 = vpop.f32.mrf.mxu1 }
 0x5fc   : >> { %v16817_v28 = vadd.f32 %v23431_v58, %v16706_v13  ;;  %v16699_v10 = vadd.f32 %v16698_v19, %v16593_v60 }
 0x5fd   : >> { %v23421_v51 = vpop.f32.mrf.mxu0  ;;  %v16824_v61 = vpop.f32.mrf.mxu1 }
 0x5fe   : >> { %v16809_v62 = vadd.f32 %v16808_v25, %v16699_v10  ;;  %v16720_v32 = vadd.f32 %v23421_v51, %v16611_v50 }
 0x5ff   : >> { %v16712_v23 = vpop.f32.mrf.mxu0  ;;  %v23437_v48 = vpop.f32.mrf.mxu1 }
 0x600   : >> { %v16833_v8 = vadd.f32 %v23434_v38, %v16720_v32 }
 0x601   : >> { %v23424_v24 = vpop.f32.mrf.mxu0  ;;  %v16840_v39 = vpop.f32.mrf.mxu1 }
 0x603   : >> { %v16726_v0 = vpop.f32.mrf.mxu0  ;;  %v23457_v15 = vpop.f32.mrf.mxu1 }
 0x604   : >> { %v16727_v7 = vadd.f32 %v16726_v0, %v16617_v49 }
 0x605   : >> { %v23444_v18 = vpop.f32.mrf.mxu0  ;;  %v17028_v12 = vpop.f32.mrf.mxu1 }
 0x606   : >> { %v16841_v46 = vadd.f32 %v16840_v39, %v16727_v7  ;;  %v16932_v34 = vadd.f32 %v23444_v18, %v16817_v28 }
 0x607   : >> { %v16925_v26 = vpop.f32.mrf.mxu0  ;;  %v23460_v30 = vpop.f32.mrf.mxu1 }
 0x608   : >> { %v17035_v11 = vadd.f32 %v23457_v15, %v16932_v34  ;;  %v16926_v14 = vadd.f32 %v16925_v26, %v16809_v62 }
 0x609   : >> { %v23447_v1 = vpop.f32.mrf.mxu0  ;;  %v17040_v56 = vpop.f32.mrf.mxu1 }
 0x60a   : >> { %v17063_v52 = vadd.f32 %v17035_v11, %v16354_v63  ;;  %v17029_v6 = vadd.f32 %v17028_v12, %v16926_v14  ;;  %v16944_v55 = vadd.f32 %v23447_v1, %v16833_v8 }
 0x60b   : >> { %v16937_v9 = vpop.f32.mrf.mxu0  ;;  %v23463_v29 = vpop.f32.mrf.mxu1 }
 0x60c   : >> { %v17062_v36 = vadd.f32 %v17029_v6, %v16353_v53  ;;  %v17047_v4 = vadd.f32 %v23460_v30, %v16944_v55 }
 0x60d   : >> { %v23450_v47 = vpop.f32.mrf.mxu0  ;;  %v17052_v27 = vpop.f32.mrf.mxu1 }
 0x60e   : >> { %v17065_v33 = vadd.f32 %v17047_v4, %v16356_v37 }
 0x60f   : >> { %v16949_v59 = vpop.f32.mrf.mxu0  ;;  %v23483_v21 = vpop.f32.mrf.mxu1 }
 0x610   : >> { %v16950_v20 = vadd.f32 %v16949_v59, %v16841_v46 }
 0x611   : >> { %v23470_v54 = vpop.f32.mrf.mxu0  ;;  %v17301_v17 = vpop.f32.mrf.mxu1 }
 0x612   : >> { %v17053_v3 = vadd.f32 %v17052_v27, %v16950_v20  ;;  %v17308_v2 = vadd.f32 %v23483_v21, %v23470_v54 }
 0x613   : >> { %v17170_v35 = vpop.f32.mrf.mxu0  ;;  %v23486_v45 = vpop.f32.mrf.mxu1 }
 0x614   : >> { %v17066_v43 = vadd.f32 %v17053_v3, %v16357_v40  ;;  %v17302_v63 = vadd.f32 %v17301_v17, %v17170_v35 }
 0x615   : >> { %v23473_v60 = vpop.f32.mrf.mxu0  ;;  %v17313_v57 = vpop.f32.mrf.mxu1 }
 0x616   : >> { %v17320_v44 = vadd.f32 %v23486_v45, %v23473_v60 }
 0x617   : >> { %v17190_v50 = vpop.f32.mrf.mxu0  ;;  %v23489_v53 = vpop.f32.mrf.mxu1 }
 0x619   : >> { %v23476_v42 = vpop.f32.mrf.mxu0  ;;  %v17325_v22 = vpop.f32.mrf.mxu1 }
 0x61b   : >> { %v17210_v31 = vpop.f32.mrf.mxu0  ;;  %v23509_v37 = vpop.f32.mrf.mxu1 }
 0x61c   : >> { %v17326_v16 = vadd.f32 %v17325_v22, %v17210_v31 }
 0x61d   : >> { %v23496_v5 = vpop.f32.mrf.mxu0  ;;  %v17517_v58 = vpop.f32.mrf.mxu1 }
 0x61e   : >> { %v17415_v49 = vadd.f32 %v23496_v5, %v17308_v2 }
 0x61f   : >> { %v17407_v41 = vpop.f32.mrf.mxu0  ;;  %v23512_v25 = vpop.f32.mrf.mxu1 }
 0x620   : >> { %v17526_v13 = vadd.f32 %v23509_v37, %v17415_v49  ;;  %v17408_v19 = vadd.f32 %v17407_v41, %v17302_v63 }
 0x621   : >> { %v23499_v38 = vpop.f32.mrf.mxu0  ;;  %v17533_v40 = vpop.f32.mrf.mxu1 }
 0x622   : >> { %v17518_v28 = vadd.f32 %v17517_v58, %v17408_v19  ;;  %v17429_v10 = vadd.f32 %v23499_v38, %v17320_v44 }
 0x623   : >> { %v17421_v51 = vpop.f32.mrf.mxu0  ;;  %v23515_v61 = vpop.f32.mrf.mxu1 }
 0x624   : >> { %v17542_v62 = vadd.f32 %v23512_v25, %v17429_v10 }
 0x625   : >> { %v23502_v32 = vpop.f32.mrf.mxu0  ;;  %v17549_v23 = vpop.f32.mrf.mxu1 }
 0x627   : >> { %v17435_v48 = vpop.f32.mrf.mxu0  ;;  %v23535_v8 = vpop.f32.mrf.mxu1 }
 0x628   : >> { %v17436_v24 = vadd.f32 %v17435_v48, %v17326_v16 }
 0x629   : >> { %v23522_v39 = vpop.f32.mrf.mxu0  ;;  %v17737_v0 = vpop.f32.mrf.mxu1 }
 0x62a   : >> { %v17550_v15 = vadd.f32 %v17549_v23, %v17436_v24  ;;  %v17641_v7 = vadd.f32 %v23522_v39, %v17526_v13 }
 0x62b   : >> { %v17634_v18 = vpop.f32.mrf.mxu0  ;;  %v23538_v12 = vpop.f32.mrf.mxu1 }
 0x62c   : >> { %v17744_v46 = vadd.f32 %v23535_v8, %v17641_v7  ;;  %v17635_v34 = vadd.f32 %v17634_v18, %v17518_v28 }
 0x62d   : >> { %v23525_v26 = vpop.f32.mrf.mxu0  ;;  %v17749_v30 = vpop.f32.mrf.mxu1 }
 0x62e   : >> { %v17772_v11 = vadd.f32 %v17744_v46, %v17063_v52  ;;  %v17738_v14 = vadd.f32 %v17737_v0, %v17635_v34  ;;  %v17653_v1 = vadd.f32 %v23525_v26, %v17542_v62 }
 0x62f   : >> { %v17646_v56 = vpop.f32.mrf.mxu0  ;;  %v23541_v6 = vpop.f32.mrf.mxu1 }
 0x630   : >> { %v17771_v55 = vadd.f32 %v17738_v14, %v17062_v36  ;;  %v17756_v9 = vadd.f32 %v23538_v12, %v17653_v1 }
 0x631   : >> { %v23528_v29 = vpop.f32.mrf.mxu0  ;;  %v17761_v4 = vpop.f32.mrf.mxu1 }
 0x632   : >> { %v17774_v47 = vadd.f32 %v17756_v9, %v17065_v33 }
 0x633   : >> { %v17658_v27 = vpop.f32.mrf.mxu0  ;;  %v23561_v59 = vpop.f32.mrf.mxu1 }
 0x634   : >> { %v17659_v21 = vadd.f32 %v17658_v27, %v17550_v15 }
 0x635   : >> { %v23548_v20 = vpop.f32.mrf.mxu0  ;;  %v18010_v54 = vpop.f32.mrf.mxu1 }
 0x636   : >> { %v17762_v17 = vadd.f32 %v17761_v4, %v17659_v21  ;;  %v18017_v3 = vadd.f32 %v23561_v59, %v23548_v20 }
 0x637   : >> { %v17879_v2 = vpop.f32.mrf.mxu0  ;;  %v23564_v35 = vpop.f32.mrf.mxu1 }
 0x638   : >> { %v17775_v45 = vadd.f32 %v17762_v17, %v17066_v43  ;;  %v18011_v52 = vadd.f32 %v18010_v54, %v17879_v2 }
 0x639   : >> { %v23551_v63 = vpop.f32.mrf.mxu0  ;;  %v18022_v60 = vpop.f32.mrf.mxu1 }
 0x63a   : >> { %v18029_v57 = vadd.f32 %v23564_v35, %v23551_v63 }
 0x63b   : >> { %v17899_v44 = vpop.f32.mrf.mxu0  ;;  %v23567_v36 = vpop.f32.mrf.mxu1 }
 0x63d   : >> { %v23554_v50 = vpop.f32.mrf.mxu0  ;;  %v18034_v53 = vpop.f32.mrf.mxu1 }
 0x63f   : >> { %v17919_v42 = vpop.f32.mrf.mxu0  ;;  %v23587_v33 = vpop.f32.mrf.mxu1 }
 0x640   : >> { %v18035_v22 = vadd.f32 %v18034_v53, %v17919_v42 }
 0x641   : >> { %v23574_v31 = vpop.f32.mrf.mxu0  ;;  %v18226_v37 = vpop.f32.mrf.mxu1 }
 0x642   : >> { %v18124_v16 = vadd.f32 %v23574_v31, %v18017_v3 }
 0x643   : >> { %v18116_v5 = vpop.f32.mrf.mxu0  ;;  %v23590_v58 = vpop.f32.mrf.mxu1 }
 0x644   : >> { %v18235_v49 = vadd.f32 %v23587_v33, %v18124_v16  ;;  %v18117_v41 = vadd.f32 %v18116_v5, %v18011_v52 }
 0x645   : >> { %v23577_v25 = vpop.f32.mrf.mxu0  ;;  %v18242_v43 = vpop.f32.mrf.mxu1 }
 0x646   : >> { %v18227_v13 = vadd.f32 %v18226_v37, %v18117_v41  ;;  %v18138_v19 = vadd.f32 %v23577_v25, %v18029_v57 }
 0x647   : >> { %v18130_v38 = vpop.f32.mrf.mxu0  ;;  %v23593_v40 = vpop.f32.mrf.mxu1 }
 0x648   : >> { %v18251_v28 = vadd.f32 %v23590_v58, %v18138_v19 }
 0x649   : >> { %v23580_v10 = vpop.f32.mrf.mxu0  ;;  %v18258_v51 = vpop.f32.mrf.mxu1 }
 0x64b   : >> { %v18144_v61 = vpop.f32.mrf.mxu0  ;;  %v23613_v62 = vpop.f32.mrf.mxu1 }
 0x64c   : >> { %v18145_v32 = vadd.f32 %v18144_v61, %v18035_v22 }
 0x64d   : >> { %v23600_v23 = vpop.f32.mrf.mxu0  ;;  %v18446_v48 = vpop.f32.mrf.mxu1 }
 0x64e   : >> { %v18259_v8 = vadd.f32 %v18258_v51, %v18145_v32  ;;  %v18350_v24 = vadd.f32 %v23600_v23, %v18235_v49 }
 0x64f   : >> { %v18343_v39 = vpop.f32.mrf.mxu0  ;;  %v23616_v0 = vpop.f32.mrf.mxu1 }
 0x650   : >> { %v18453_v15 = vadd.f32 %v23613_v62, %v18350_v24  ;;  %v18344_v7 = vadd.f32 %v18343_v39, %v18227_v13 }
 0x651   : >> { %v23603_v18 = vpop.f32.mrf.mxu0  ;;  %v18458_v12 = vpop.f32.mrf.mxu1 }
 0x652   : >> { %v28640_v46 = vadd.f32 %v18453_v15, %v17772_v11  ;;  %v18447_v34 = vadd.f32 %v18446_v48, %v18344_v7  ;;  %v18362_v26 = vadd.f32 %v23603_v18, %v18251_v28 }
 0x653   : >> { %v18355_v30 = vpop.f32.mrf.mxu0  ;;  %v23619_v14 = vpop.f32.mrf.mxu1 }
 0x654   : >> { %v28642_v1 = vadd.f32 %v18447_v34, %v17771_v55  ;;  %v18465_v56 = vadd.f32 %v23616_v0, %v18362_v26 }
 0x655   : >> { %v23606_v6 = vpop.f32.mrf.mxu0  ;;  %v18470_v9 = vpop.f32.mrf.mxu1 }
 0x656   : >> { %v28644_v29 = vadd.f32 %v18465_v56, %v17774_v47 }
 0x657   : >> { %v18367_v4 = vpop.f32.mrf.mxu0  ;;  %v23639_v27 = vpop.f32.mrf.mxu1 }
 0x658   : >> { %v18368_v59 = vadd.f32 %v18367_v4, %v18259_v8 }
 0x659   : >> { %v23626_v21 = vpop.f32.mrf.mxu0  ;;  %v18719_v20 = vpop.f32.mrf.mxu1 }
 0x65a   : >> { %v18471_v54 = vadd.f32 %v18470_v9, %v18368_v59  ;;  %v18726_v14 = vadd.f32 %v23639_v27, %v23626_v21 }
 0x65b   : >> { %v18588_v17 = vpop.f32.mrf.mxu0  ;;  %v23642_v11 = vpop.f32.mrf.mxu1 }
 0x65c   : >> { %v28646_v3 = vadd.f32 %v18471_v54, %v17775_v45  ;;  %v18720_v7 = vadd.f32 %v18719_v20, %v18588_v17 }
 0x65d   : >> { %v23629_v2 = vpop.f32.mrf.mxu0  ;;  %v18731_v35 = vpop.f32.mrf.mxu1 }
 0x65e   : >> { %v18738_v56 = vadd.f32 %v23642_v11, %v23629_v2 }
 0x65f   : >> { %v18608_v52 = vpop.f32.mrf.mxu0  ;;  %v23645_v55 = vpop.f32.mrf.mxu1 }
 0x661   : >> { %v23632_v63 = vpop.f32.mrf.mxu0  ;;  %v18743_v60 = vpop.f32.mrf.mxu1 }
 0x663   : >> { %v18628_v57 = vpop.f32.mrf.mxu0  ;;  %v23665_v44 = vpop.f32.mrf.mxu1 }
 0x665   : >> { %v23652_v47 = vpop.f32.mrf.mxu0  ;;  %v18935_v36 = vpop.f32.mrf.mxu1 }
 0x666   : >> { %v18833_v4 = vadd.f32 %v23652_v47, %v18726_v14  ;;  %v28812_v14 = vld [vmem:[#allocation6_spill] sm:$0xff] }
 0x667   : >> { %v18825_v50 = vpop.f32.mrf.mxu0  ;;  %v23668_v53 = vpop.f32.mrf.mxu1 }
 0x668   : >> { %v18826_v34 = vadd.f32 %v18825_v50, %v18720_v7  ;;  %v18944_v17 = vadd.f32 %v23665_v44, %v18833_v4 }
 0x669   : >> { %v23655_v42 = vpop.f32.mrf.mxu0  ;;  %v18951_v33 = vpop.f32.mrf.mxu1 }
 0x66a   : >> { %v18936_v59 = vadd.f32 %v18935_v36, %v18826_v34  ;;  %v18847_v54 = vadd.f32 %v23655_v42, %v18738_v56 }
 0x66b   : >> { %v18839_v22 = vpop.f32.mrf.mxu0  ;;  %v23671_v31 = vpop.f32.mrf.mxu1 }
 0x66c   : >> { %v18744_v22 = vadd.f32 %v18743_v60, %v18628_v57 }
 0x66d   : >> { %v23658_v37 = vpop.f32.mrf.mxu0  ;;  %v18967_v16 = vpop.f32.mrf.mxu1 }
 0x66e   : >> { %v18960_v37 = vadd.f32 %v23668_v53, %v18847_v54 }
 0x66f   : >> { %v18853_v45 = vpop.f32.mrf.mxu0  ;;  %v28648_v5 = vpop.f32.mrf.mxu1 }
 0x671   : >> { %v23678_v58 = vpop.f32.mrf.mxu0  ;;  %v19155_v49 = vpop.f32.mrf.mxu1 }
 0x672   : >> { %v19059_v2 = vadd.f32 %v23678_v58, %v18944_v17 }
 0x673   : >> { %v19052_v41 = vpop.f32.mrf.mxu0  ;;  %v23694_v25 = vpop.f32.mrf.mxu1 }
 0x674   : >> { %v19053_v55 = vadd.f32 %v19052_v41, %v18936_v59  ;;  %v19162_v44 = vadd.f32 %v28648_v5, %v19059_v2 }
 0x675   : >> { %v23681_v43 = vpop.f32.mrf.mxu0  ;;  %v19167_v13 = vpop.f32.mrf.mxu1 }
 0x676   : >> { %v19156_v47 = vadd.f32 %v19155_v49, %v19053_v55  ;;  %v19071_v36 = vadd.f32 %v23681_v43, %v18960_v37 }
 0x677   : >> { %v19064_v19 = vpop.f32.mrf.mxu0  ;;  %v23697_v38 = vpop.f32.mrf.mxu1 }
 0x678   : >> { %v18854_v19 = vadd.f32 %v18853_v45, %v18744_v22  ;;  %v19189_v53 = vadd.f32 %v19156_v47, %v28642_v1 }
 0x679   : >> { %v23684_v40 = vpop.f32.mrf.mxu0  ;;  %v28650_v28 = vpop.f32.mrf.mxu1 }
 0x67b   : >> { %v19076_v10 = vpop.f32.mrf.mxu0  ;;  %v23717_v51 = vpop.f32.mrf.mxu1 }
 0x67d   : >> { %v23704_v61 = vpop.f32.mrf.mxu0  ;;  %v19428_v62 = vpop.f32.mrf.mxu1 }
 0x67e   : >> { %v19435_v31 = vadd.f32 %v23717_v51, %v23704_v61  ;;  %v19174_v51 = vadd.f32 %v23694_v25, %v19071_v36 }
 0x67f   : >> { %v19297_v32 = vpop.f32.mrf.mxu0  ;;  %v23720_v23 = vpop.f32.mrf.mxu1 }
 0x680   : >> { %v19429_v20 = vadd.f32 %v19428_v62, %v19297_v32 }
 0x681   : >> { %v23707_v48 = vpop.f32.mrf.mxu0  ;;  %v19440_v8 = vpop.f32.mrf.mxu1 }
 0x682   : >> { %v19447_v27 = vadd.f32 %v23720_v23, %v23707_v48 }
 0x683   : >> { %v19317_v24 = vpop.f32.mrf.mxu0  ;;  %v23723_v39 = vpop.f32.mrf.mxu1 }
 0x684   : >> { %v18968_v24 = vadd.f32 %v18967_v16, %v18854_v19  ;;  %v19190_v16 = vadd.f32 %v19162_v44, %v28640_v46 }
 0x685   : >> { %v23710_v0 = vpop.f32.mrf.mxu0  ;;  %v19452_v15 = vpop.f32.mrf.mxu1 }
 0x686   : >> { %v19077_v43 = vadd.f32 %v19076_v10, %v18968_v24 }
 0x687   : >> { %v19337_v18 = vpop.f32.mrf.mxu0  ;;  %v23743_v12 = vpop.f32.mrf.mxu1 }
 0x688   : >> { %v19453_v62 = vadd.f32 %v19452_v15, %v19337_v18 }
 0x689   : >> { %v23730_v26 = vpop.f32.mrf.mxu0  ;;  %v19644_v30 = vpop.f32.mrf.mxu1 }
 0x68a   : >> { %v19542_v21 = vadd.f32 %v23730_v26, %v19435_v31  ;;  %v19180_v26 = vadd.f32 %v28650_v28, %v19077_v43 }
 0x68b   : >> { %v19534_v6 = vpop.f32.mrf.mxu0  ;;  %v23746_v9 = vpop.f32.mrf.mxu1 }
 0x68c   : >> { %v19535_v11 = vadd.f32 %v19534_v6, %v19429_v20  ;;  %v19653_v60 = vadd.f32 %v23743_v12, %v19542_v21  ;;  %v19192_v12 = vadd.f32 %v19174_v51, %v28644_v29  ;;  %v19193_v29 = vadd.f32 %v19180_v26, %v28646_v3 }
 0x68d   : >> { %v23733_v35 = vpop.f32.mrf.mxu0  ;;  %v19660_v52 = vpop.f32.mrf.mxu1 }
 0x68e   : >> { %v19556_v40 = vadd.f32 %v23733_v35, %v19447_v27  ;;  %v19645_v57 = vadd.f32 %v19644_v30, %v19535_v11 }
 0x68f   : >> { %v19548_v63 = vpop.f32.mrf.mxu0  ;;  %v23749_v33 = vpop.f32.mrf.mxu1 }
 0x690   : >> { %v19669_v32 = vadd.f32 %v23746_v9, %v19556_v40 }
 0x691   : >> { %v23736_v50 = vpop.f32.mrf.mxu0  ;;  %v19676_v13 = vpop.f32.mrf.mxu1 }
 0x693   : >> { %v19562_v42 = vpop.f32.mrf.mxu0  ;;  %v23769_v38 = vpop.f32.mrf.mxu1 }
 0x694   : >> { %v19563_v39 = vadd.f32 %v19562_v42, %v19453_v62 }
 0x695   : >> { %v23756_v41 = vpop.f32.mrf.mxu0  ;;  %v19864_v8 = vpop.f32.mrf.mxu1 }
 0x696   : >> { %v19768_v58 = vadd.f32 %v23756_v41, %v19653_v60  ;;  %v19677_v30 = vadd.f32 %v19676_v13, %v19563_v39 }
 0x697   : >> { %v19761_v45 = vpop.f32.mrf.mxu0  ;;  %v23772_v61 = vpop.f32.mrf.mxu1 }
 0x698   : >> { %v19762_v49 = vadd.f32 %v19761_v45, %v19645_v57  ;;  %v19871_v34 = vadd.f32 %v23769_v38, %v19768_v58 }
 0x699   : >> { %v23759_v23 = vpop.f32.mrf.mxu0  ;;  %v19876_v48 = vpop.f32.mrf.mxu1 }
 0x69a   : >> { %v19865_v0 = vadd.f32 %v19864_v8, %v19762_v49  ;;  %v19780_v7 = vadd.f32 %v23759_v23, %v19669_v32  ;;  %v19899_v9 = vadd.f32 %v19871_v34, %v19190_v16 }
 0x69b   : >> { %v19773_v5 = vpop.f32.mrf.mxu0  ;;  %v23775_v18 = vpop.f32.mrf.mxu1 }
 0x69c   : >> { %v19898_v1 = vadd.f32 %v19865_v0, %v19189_v53  ;;  %v19883_v25 = vadd.f32 %v23772_v61, %v19780_v7  ;;  %v19911_v28 = vadd.f32 %v28812_v14, %v19899_v9 }
 0x69d   : >> { %v23762_v15 = vpop.f32.mrf.mxu0  ;;  %v19888_v46 = vpop.f32.mrf.mxu1 }
 0x69e   : >> { %v19910_v10 = vadd.f32 %v28812_v14, %v19898_v1  ;;  %v19901_v56 = vadd.f32 %v19883_v25, %v19192_v12  ;;  %v19917_v22 = vmax.f32 %v19911_v28, 0.0 }
 0x69f   : >> { %v19785_v6 = vpop.f32.mrf.mxu0 }
 0x6a0   : >> { %v19913_v4 = vadd.f32 %v28812_v14, %v19901_v56  ;;  %v19786_v59 = vadd.f32 %v19785_v6, %v19677_v30  ;;  %v19916_v54 = vmax.f32 %v19910_v10, 0.0 }
 0x6a2   : >> { %v19919_v35 = vmax.f32 %v19913_v4, 0.0  ;;  %v19889_v52 = vadd.f32 %v19888_v46, %v19786_v59 }
 0x6a4   : >> { %v19922_v55 = vmax.f32 %v19916_v54, %v19919_v35  ;;  %v19902_v63 = vadd.f32 %v19889_v52, %v19193_v29 }
 0x6a6   : >> { %19926 = vst.msk [vmem:[#allocation4] sm:$0xff] %vm19925_vm2, %v19922_v55  ;;  %v19914_v33 = vadd.f32 %v28812_v14, %v19902_v63 }
 0x6a8   : >> { %v19920_v31 = vmax.f32 %v19914_v33, 0.0 }
 0x6aa   : >> { %v19923_v20 = vmax.f32 %v19917_v22, %v19920_v31 }
 0x6ac   : >> { %19927 = vst.msk [vmem:[#allocation4 + $0x8] sm:$0xff] %vm19925_vm2, %v19923_v20 }
 0x6b2   : > { %2190 = sbr.rel (!%p2188_p5) target bundleno = 586 (0x24a), region = 199 }
 0x6b3   : >> { %v19929_v17 = vld [vmem:[#allocation4] ss:$2 sm:$0x7f]  ;;  %v19931_v3 = vld [vmem:[#allocation4 + $0x1] ss:$2 sm:$0x7f] }
 0x6b4   : >> { %v19932_v37 = vmax.f32 %v19929_v17, %v19931_v3 }
 0x6b6   : >> { %19936 = vst.msk [vmem:[%s19934_s19] sm:$0x7f] %vm19935_vm3, %v19932_v37 }
 0x6b7 PF: > { %s15_s18 = sadd.s32 1, %s23820_s18  }
 0x6b8   : > { %p12_p6 = scmp.ge.s32.totalorder %s15_s18, 4  }
 0x6ba   :  { %14 = sbr.rel (!%p12_p6) target bundleno = 1 (0x1), region = 210 }

</bundles_post_ra>
